<compile_context>
chip_gen: v6e
topology: v6e:2x2x1
jax: 0.10.0
libtpu: 0.0.40
codegen_flags: <defaults>
</compile_context>

<pallas_src>
import numpy as np
import jax
import jax.numpy as jnp
from jax.experimental import pallas as pl
from jax.experimental.pallas import tpu as pltpu

HID = 500      # logical hidden width of both inner Linear layers
HID_P = 512    # padded hidden width (lane/sublane aligned)
IMG = 32       # output spatial size

# Resolved lazily: whether pl.Buffered(1) on the constant weight specs is accepted.
_SINGLE_BUFFER_WEIGHTS = None


# ---------------------------------------------------------------------------
# Pallas kernel: one batch-block (nb samples) per grid step
# ---------------------------------------------------------------------------
def _decoder_kernel(x_ref, w1_ref, b1_ref, w2_ref, b2_ref, w3_ref, b3_ref, o_ref):
    # MXU matmuls with bf16 operands / f32 accumulation; elementwise math in f32.
    x = x_ref[...].astype(jnp.bfloat16)                               # (nb, L)
    h1 = jnp.dot(x, w1_ref[...], preferred_element_type=jnp.float32) + b1_ref[...]
    h1 = jnp.maximum(h1, 0.0)                                         # (nb, 512) f32
    h2 = jnp.dot(h1.astype(jnp.bfloat16), w2_ref[...],
                 preferred_element_type=jnp.float32) + b2_ref[...]
    h2 = jnp.maximum(h2, 0.0)                                         # (nb, 512) f32
    o_ref[...] = (jnp.dot(h2.astype(jnp.bfloat16), w3_ref[...],
                          preferred_element_type=jnp.float32)
                  + b3_ref[...])                                      # (nb, C*32*32) f32


# ---------------------------------------------------------------------------
# helpers
# ---------------------------------------------------------------------------
def _round_up(x, m):
    return ((x + m - 1) // m) * m


def _build_call(nb, L, OUT, b_pad, kshapes, single_buffer_weights, vmem_limit, cost):
    (w1s, b1s, w2s, b2s, w3s, b3s) = kshapes

    def const_spec(shape):
        # weights/biases never change across the grid (constant index_map)
        if single_buffer_weights:
            return pl.BlockSpec(shape, lambda i: (0, 0), pipeline_mode=pl.Buffered(1))
        return pl.BlockSpec(shape, lambda i: (0, 0))

    return pl.pallas_call(
        _decoder_kernel,
        grid=(b_pad // nb,),
        in_specs=[
            pl.BlockSpec((nb, L), lambda i: (i, 0)),   # latent block
            const_spec(w1s), const_spec(b1s),          # (L, 512) bf16, (1, 512) f32
            const_spec(w2s), const_spec(b2s),          # (512, 512) bf16, (1, 512) f32
            const_spec(w3s), const_spec(b3s),          # (512, OUT) bf16, (1, OUT) f32
        ],
        out_specs=pl.BlockSpec((nb, OUT), lambda i: (i, 0)),
        out_shape=jax.ShapeDtypeStruct((b_pad, OUT), jnp.float32),
        compiler_params=pltpu.CompilerParams(
            dimension_semantics=("parallel",),
            vmem_limit_bytes=vmem_limit,
        ),
        cost_estimate=cost,
    )


# ---------------------------------------------------------------------------
# wrapper
# ---------------------------------------------------------------------------
def state_decoder_forward(latent_state, kparams, num_channels=3):
    """latent_state: (..., latent_dim) -> decoded_state: (..., num_channels, 32, 32)."""
    global _SINGLE_BUFFER_WEIGHTS
    w1T, b1, w2T, b2, w3T, b3 = kparams
    L = w1T.shape[0]
    OUT = w3T.shape[1]
    assert latent_state.shape[-1] == L
    assert OUT == num_channels * IMG * IMG

    lead = latent_state.shape[:-1]
    x = latent_state.reshape(-1, L).astype(jnp.float32)
    b_flat = x.shape[0]
    if b_flat == 0:
        return jnp.zeros(lead + (num_channels, IMG, IMG), jnp.float32)

    # Batch block: multiple of 8 sublanes, >=2 grid steps when possible (so v7x's
    # two TensorCores both get work), capped at 256 rows per MXU pass.
    half = _round_up(max((b_flat + 1) // 2, 1), 8)
    nb = max(8, min(256, half))
    b_pad = _round_up(b_flat, nb)
    if b_pad != b_flat:
        x = jnp.pad(x, ((0, b_pad - b_flat), (0, 0)))

    weight_bytes = sum(int(np.prod(a.shape)) * a.dtype.itemsize for a in (w1T, w2T, w3T))
    bias_bytes = sum(int(np.prod(a.shape)) * a.dtype.itemsize for a in (b1, b2, b3))

    # VMEM budget: double-buffered I/O blocks + (at most double-buffered) weights
    # + f32/bf16 intermediates, with ~1.5x headroom; never above 48 MiB (v7x safe).
    io_bytes = 2 * nb * L * 4 + 2 * nb * OUT * 4
    inter_bytes = 6 * nb * HID_P * 4
    footprint = 2 * weight_bytes + 2 * bias_bytes + io_bytes + inter_bytes
    vmem_limit = int(min(max(footprint * 3 // 2 + (4 << 20), 16 << 20), 48 << 20))

    cost = pl.CostEstimate(
        flops=2 * b_pad * (L * HID_P + HID_P * HID_P + HID_P * OUT),
        transcendentals=0,
        bytes_accessed=b_pad * L * 4 + b_pad * OUT * 4 + weight_bytes + bias_bytes,
    )

    kshapes = tuple(p.shape for p in kparams)
    options = ((True, False) if _SINGLE_BUFFER_WEIGHTS is None
               else (_SINGLE_BUFFER_WEIGHTS,))
    y = None
    last_exc = None
    for sb in options:
        try:
            call = _build_call(nb, L, OUT, b_pad, kshapes, sb, vmem_limit, cost)
            y = call(x, w1T, b1, w2T, b2, w3T, b3)
            _SINGLE_BUFFER_WEIGHTS = sb
            break
        except Exception as e:  # fall back to default double-buffered weights
            last_exc = e
    if y is None:
        raise last_exc

    y = y[:b_flat]
    return y.reshape(lead + (num_channels, IMG, IMG))


# ---------------------------------------------------------------------------
# PyTorch-like deterministic init (torch-layout params) + kernel-layout packing
# ---------------------------------------------------------------------------
def pack_params(torch_like):
    """torch-layout f32 params -> (transposed, HID->512 zero-padded, bf16 weights)."""
    w1, b1, w2, b2, w3, b3 = [jnp.asarray(p, jnp.float32) for p in torch_like]
    OUT = w3.shape[0]
    pad = HID_P - HID
    w1T = jnp.pad(w1.T, ((0, 0), (0, pad))).astype(jnp.bfloat16)      # (L, 512)
    b1p = jnp.pad(b1, (0, pad)).reshape(1, HID_P)                      # (1, 512) f32
    w2T = jnp.pad(w2.T, ((0, pad), (0, pad))).astype(jnp.bfloat16)     # (512, 512)
    b2p = jnp.pad(b2, (0, pad)).reshape(1, HID_P)                      # (1, 512) f32
    w3T = jnp.pad(w3.T, ((0, pad), (0, 0))).astype(jnp.bfloat16)       # (512, OUT)
    b3p = b3.reshape(1, OUT)                                           # (1, OUT) f32
    return (w1T, b1p, w2T, b2p, w3T, b3p)


def init_params(key, latent_dim, num_channels=3):
    OUT = num_channels * IMG * IMG
    ks = jax.random.split(key, 6)

    def u(k, shape, fan_in):
        b = 1.0 / np.sqrt(fan_in)
        return jax.random.uniform(k, shape, jnp.float32, -b, b)

    w1 = u(ks[0], (HID, latent_dim), latent_dim)
    b1 = u(ks[1], (HID,), latent_dim)
    w2 = u(ks[2], (HID, HID), HID)
    b2 = u(ks[3], (HID,), HID)
    w3 = u(ks[4], (OUT, HID), HID)
    b3 = u(ks[5], (OUT,), HID)
    torch_like = (w1, b1, w2, b2, w3, b3)
    return torch_like, pack_params(torch_like)


# ---------------------------------------------------------------------------
# numpy reference of the PyTorch forward (for correctness check)
# ---------------------------------------------------------------------------
def reference_forward(latent_state, torch_like, num_channels=3):
    w1, b1, w2, b2, w3, b3 = [np.asarray(p, np.float64) for p in torch_like]
    lead = latent_state.shape[:-1]
    x = np.asarray(latent_state, np.float64).reshape(-1, latent_state.shape[-1])
    h1 = np.maximum(x @ w1.T + b1, 0.0)
    h2 = np.maximum(h1 @ w2.T + b2, 0.0)
    y = h2 @ w3.T + b3
    return y.reshape(lead + (num_channels, IMG, IMG))


if __name__ == "__main__":
    latent_dim = 16
    num_channels = 3
    key = jax.random.PRNGKey(0)
    k_x, k_p = jax.random.split(key)

    # small deterministic input: (..., latent_dim) with leading dims (2, 8)
    latent = jax.random.normal(k_x, (2, 8, latent_dim), jnp.float32)

    torch_like, kparams = init_params(k_p, latent_dim, num_channels)

    out = state_decoder_forward(latent, kparams, num_channels)
    out = jax.block_until_ready(out)

    ref = reference_forward(np.asarray(latent), torch_like, num_channels)
    assert out.shape == (2, 8, num_channels, IMG, IMG), out.shape
    err = float(np.max(np.abs(np.asarray(out, np.float64) - ref)))
    # bf16 matmul operands with f32 accumulation -> tolerance loosened vs. pure f32
    assert err < 5e-2, f"max abs error {err}"
    print("KERNEL_OK")
</pallas_src>

<mosaic_0001>
module attributes {stable_mosaic.version = 11 : i64} {
  func.func @_decoder_kernel(%arg0: i32, %arg1: memref<8x16xf32, #tpu.memory_space<vmem>>, %arg2: memref<16x512xbf16, #tpu.memory_space<vmem>>, %arg3: memref<1x512xf32, #tpu.memory_space<vmem>>, %arg4: memref<512x512xbf16, #tpu.memory_space<vmem>>, %arg5: memref<1x512xf32, #tpu.memory_space<vmem>>, %arg6: memref<512x3072xbf16, #tpu.memory_space<vmem>>, %arg7: memref<1x3072xf32, #tpu.memory_space<vmem>>, %arg8: memref<8x3072xf32, #tpu.memory_space<vmem>>) attributes {dimension_semantics = [#tpu.dimension_semantics<parallel>], iteration_bounds = array<i64: 2>, scalar_prefetch = 0 : i64, scratch_operands = 0 : i64, tpu.core_type = #tpu.core_type<tc>, window_params = [{transform_indices = @transform_0, window_bounds = array<i64: 8, 16>}, {pipeline_mode = #tpu.pipeline_mode<synchronous>, transform_indices = @transform_1, window_bounds = array<i64: 16, 512>}, {pipeline_mode = #tpu.pipeline_mode<synchronous>, transform_indices = @transform_2, window_bounds = array<i64: 1, 512>}, {pipeline_mode = #tpu.pipeline_mode<synchronous>, transform_indices = @transform_3, window_bounds = array<i64: 512, 512>}, {pipeline_mode = #tpu.pipeline_mode<synchronous>, transform_indices = @transform_4, window_bounds = array<i64: 1, 512>}, {pipeline_mode = #tpu.pipeline_mode<synchronous>, transform_indices = @transform_5, window_bounds = array<i64: 512, 3072>}, {pipeline_mode = #tpu.pipeline_mode<synchronous>, transform_indices = @transform_6, window_bounds = array<i64: 1, 3072>}, {transform_indices = @transform_7, window_bounds = array<i64: 8, 3072>}]} {
    %c0 = arith.constant 0 : index
    %c0_0 = arith.constant 0 : index
    %0 = vector.load %arg1[%c0, %c0_0] : memref<8x16xf32, #tpu.memory_space<vmem>>, vector<8x16xf32>
    %1 = arith.truncf %0 : vector<8x16xf32> to vector<8x16xbf16>
    %c0_1 = arith.constant 0 : index
    %c0_2 = arith.constant 0 : index
    %2 = vector.load %arg2[%c0_1, %c0_2] : memref<16x512xbf16, #tpu.memory_space<vmem>>, vector<16x512xbf16>
    %cst = arith.constant dense<0.000000e+00> : vector<8x512xf32>
    %3 = tpu.matmul %1, %2, %cst {dimension_numbers = #tpu.dot_dimension_numbers<[1], [0], [0], [1], [0, 0, 1, 1], [], []>} : vector<8x16xbf16>, vector<16x512xbf16>, vector<8x512xf32> -> vector<8x512xf32>
    %c0_3 = arith.constant 0 : index
    %c0_4 = arith.constant 0 : index
    %4 = vector.load %arg3[%c0_3, %c0_4] : memref<1x512xf32, #tpu.memory_space<vmem>>, vector<1x512xf32>
    %5 = vector.broadcast %4 : vector<1x512xf32> to vector<8x512xf32>
    %6 = arith.addf %3, %5 : vector<8x512xf32>
    %cst_5 = arith.constant 0.000000e+00 : f32
    %7 = vector.broadcast %cst_5 : f32 to vector<8x512xf32>
    %8 = arith.maximumf %6, %7 : vector<8x512xf32>
    %9 = arith.truncf %8 : vector<8x512xf32> to vector<8x512xbf16>
    %c0_6 = arith.constant 0 : index
    %c0_7 = arith.constant 0 : index
    %10 = vector.load %arg4[%c0_6, %c0_7] : memref<512x512xbf16, #tpu.memory_space<vmem>>, vector<512x512xbf16>
    %cst_8 = arith.constant dense<0.000000e+00> : vector<8x512xf32>
    %11 = tpu.matmul %9, %10, %cst_8 {dimension_numbers = #tpu.dot_dimension_numbers<[1], [0], [0], [1], [0, 0, 1, 1], [], []>} : vector<8x512xbf16>, vector<512x512xbf16>, vector<8x512xf32> -> vector<8x512xf32>
    %c0_9 = arith.constant 0 : index
    %c0_10 = arith.constant 0 : index
    %12 = vector.load %arg5[%c0_9, %c0_10] : memref<1x512xf32, #tpu.memory_space<vmem>>, vector<1x512xf32>
    %13 = vector.broadcast %12 : vector<1x512xf32> to vector<8x512xf32>
    %14 = arith.addf %11, %13 : vector<8x512xf32>
    %cst_11 = arith.constant 0.000000e+00 : f32
    %15 = vector.broadcast %cst_11 : f32 to vector<8x512xf32>
    %16 = arith.maximumf %14, %15 : vector<8x512xf32>
    %17 = arith.truncf %16 : vector<8x512xf32> to vector<8x512xbf16>
    %c0_12 = arith.constant 0 : index
    %c0_13 = arith.constant 0 : index
    %18 = vector.load %arg6[%c0_12, %c0_13] : memref<512x3072xbf16, #tpu.memory_space<vmem>>, vector<512x3072xbf16>
    %cst_14 = arith.constant dense<0.000000e+00> : vector<8x3072xf32>
    %19 = tpu.matmul %17, %18, %cst_14 {dimension_numbers = #tpu.dot_dimension_numbers<[1], [0], [0], [1], [0, 0, 1, 1], [], []>} : vector<8x512xbf16>, vector<512x3072xbf16>, vector<8x3072xf32> -> vector<8x3072xf32>
    %c0_15 = arith.constant 0 : index
    %c0_16 = arith.constant 0 : index
    %20 = vector.load %arg7[%c0_15, %c0_16] : memref<1x3072xf32, #tpu.memory_space<vmem>>, vector<1x3072xf32>
    %21 = vector.broadcast %20 : vector<1x3072xf32> to vector<8x3072xf32>
    %22 = arith.addf %19, %21 : vector<8x3072xf32>
    %c0_17 = arith.constant 0 : index
    %c0_18 = arith.constant 0 : index
    %23 = vector.load %arg8[%c0_17, %c0_18] : memref<8x3072xf32, #tpu.memory_space<vmem>>, vector<8x3072xf32>
    tpu.vector_store %arg8[%c0_17, %c0_18], %22 {strides = array<i32>} : memref<8x3072xf32, #tpu.memory_space<vmem>>, vector<8x3072xf32>,
    return
  }
  func.func @transform_0(%arg0: i32) -> (i32, i32) {
    %c0_i32 = arith.constant 0 : i32
    %c0_i32_0 = arith.constant 0 : i32
    return %arg0, %c0_i32 : i32, i32
  }
  func.func @transform_1(%arg0: i32) -> (i32, i32) {
    %c0_i32 = arith.constant 0 : i32
    %c0_i32_0 = arith.constant 0 : i32
    %c0_i32_1 = arith.constant 0 : i32
    return %c0_i32, %c0_i32_0 : i32, i32
  }
  func.func @transform_2(%arg0: i32) -> (i32, i32) {
    %c0_i32 = arith.constant 0 : i32
    %c0_i32_0 = arith.constant 0 : i32
    %c0_i32_1 = arith.constant 0 : i32
    return %c0_i32, %c0_i32_0 : i32, i32
  }
  func.func @transform_3(%arg0: i32) -> (i32, i32) {
    %c0_i32 = arith.constant 0 : i32
    %c0_i32_0 = arith.constant 0 : i32
    %c0_i32_1 = arith.constant 0 : i32
    return %c0_i32, %c0_i32_0 : i32, i32
  }
  func.func @transform_4(%arg0: i32) -> (i32, i32) {
    %c0_i32 = arith.constant 0 : i32
    %c0_i32_0 = arith.constant 0 : i32
    %c0_i32_1 = arith.constant 0 : i32
    return %c0_i32, %c0_i32_0 : i32, i32
  }
  func.func @transform_5(%arg0: i32) -> (i32, i32) {
    %c0_i32 = arith.constant 0 : i32
    %c0_i32_0 = arith.constant 0 : i32
    %c0_i32_1 = arith.constant 0 : i32
    return %c0_i32, %c0_i32_0 : i32, i32
  }
  func.func @transform_6(%arg0: i32) -> (i32, i32) {
    %c0_i32 = arith.constant 0 : i32
    %c0_i32_0 = arith.constant 0 : i32
    %c0_i32_1 = arith.constant 0 : i32
    return %c0_i32, %c0_i32_0 : i32, i32
  }
  func.func @transform_7(%arg0: i32) -> (i32, i32) {
    %c0_i32 = arith.constant 0 : i32
    %c0_i32_0 = arith.constant 0 : i32
    return %arg0, %c0_i32 : i32, i32
  }
}

module attributes {stable_mosaic.version = 11 : i64} {
  func.func @_decoder_kernel(%arg0: i32, %arg1: memref<8x16xf32, #tpu.memory_space<vmem>>, %arg2: memref<16x512xbf16, #tpu.memory_space<vmem>>, %arg3: memref<1x512xf32, #tpu.memory_space<vmem>>, %arg4: memref<512x512xbf16, #tpu.memory_space<vmem>>, %arg5: memref<1x512xf32, #tpu.memory_space<vmem>>, %arg6: memref<512x3072xbf16, #tpu.memory_space<vmem>>, %arg7: memref<1x3072xf32, #tpu.memory_space<vmem>>, %arg8: memref<8x3072xf32, #tpu.memory_space<vmem>>) attributes {dimension_semantics = [#tpu.dimension_semantics<parallel>], iteration_bounds = array<i64: 2>, scalar_prefetch = 0 : i64, scratch_operands = 0 : i64, tpu.core_type = #tpu.core_type<tc>, window_params = [{transform_indices = @transform_0, window_bounds = array<i64: 8, 16>}, {pipeline_mode = #tpu.pipeline_mode<synchronous>, transform_indices = @transform_1, window_bounds = array<i64: 16, 512>}, {pipeline_mode = #tpu.pipeline_mode<synchronous>, transform_indices = @transform_2, window_bounds = array<i64: 1, 512>}, {pipeline_mode = #tpu.pipeline_mode<synchronous>, transform_indices = @transform_3, window_bounds = array<i64: 512, 512>}, {pipeline_mode = #tpu.pipeline_mode<synchronous>, transform_indices = @transform_4, window_bounds = array<i64: 1, 512>}, {pipeline_mode = #tpu.pipeline_mode<synchronous>, transform_indices = @transform_5, window_bounds = array<i64: 512, 3072>}, {pipeline_mode = #tpu.pipeline_mode<synchronous>, transform_indices = @transform_6, window_bounds = array<i64: 1, 3072>}, {transform_indices = @transform_7, window_bounds = array<i64: 8, 3072>}]} {
    %c0 = arith.constant 0 : index
    %c0_0 = arith.constant 0 : index
    %0 = vector.load %arg1[%c0, %c0_0] : memref<8x16xf32, #tpu.memory_space<vmem>>, vector<8x16xf32>
    %1 = arith.truncf %0 : vector<8x16xf32> to vector<8x16xbf16>
    %c0_1 = arith.constant 0 : index
    %c0_2 = arith.constant 0 : index
    %2 = vector.load %arg2[%c0_1, %c0_2] : memref<16x512xbf16, #tpu.memory_space<vmem>>, vector<16x512xbf16>
    %cst = arith.constant dense<0.000000e+00> : vector<8x512xf32>
    %3 = tpu.matmul %1, %2, %cst {dimension_numbers = #tpu.dot_dimension_numbers<[1], [0], [0], [1], [0, 0, 1, 1], [], []>} : vector<8x16xbf16>, vector<16x512xbf16>, vector<8x512xf32> -> vector<8x512xf32>
    %c0_3 = arith.constant 0 : index
    %c0_4 = arith.constant 0 : index
    %4 = vector.load %arg3[%c0_3, %c0_4] : memref<1x512xf32, #tpu.memory_space<vmem>>, vector<1x512xf32>
    %5 = vector.broadcast %4 : vector<1x512xf32> to vector<8x512xf32>
    %6 = arith.addf %3, %5 : vector<8x512xf32>
    %cst_5 = arith.constant 0.000000e+00 : f32
    %7 = vector.broadcast %cst_5 : f32 to vector<8x512xf32>
    %8 = arith.maximumf %6, %7 : vector<8x512xf32>
    %9 = arith.truncf %8 : vector<8x512xf32> to vector<8x512xbf16>
    %c0_6 = arith.constant 0 : index
    %c0_7 = arith.constant 0 : index
    %10 = vector.load %arg4[%c0_6, %c0_7] : memref<512x512xbf16, #tpu.memory_space<vmem>>, vector<512x512xbf16>
    %cst_8 = arith.constant dense<0.000000e+00> : vector<8x512xf32>
    %11 = tpu.matmul %9, %10, %cst_8 {dimension_numbers = #tpu.dot_dimension_numbers<[1], [0], [0], [1], [0, 0, 1, 1], [], []>} : vector<8x512xbf16>, vector<512x512xbf16>, vector<8x512xf32> -> vector<8x512xf32>
    %c0_9 = arith.constant 0 : index
    %c0_10 = arith.constant 0 : index
    %12 = vector.load %arg5[%c0_9, %c0_10] : memref<1x512xf32, #tpu.memory_space<vmem>>, vector<1x512xf32>
    %13 = vector.broadcast %12 : vector<1x512xf32> to vector<8x512xf32>
    %14 = arith.addf %11, %13 : vector<8x512xf32>
    %cst_11 = arith.constant 0.000000e+00 : f32
    %15 = vector.broadcast %cst_11 : f32 to vector<8x512xf32>
    %16 = arith.maximumf %14, %15 : vector<8x512xf32>
    %17 = arith.truncf %16 : vector<8x512xf32> to vector<8x512xbf16>
    %c0_12 = arith.constant 0 : index
    %c0_13 = arith.constant 0 : index
    %18 = vector.load %arg6[%c0_12, %c0_13] : memref<512x3072xbf16, #tpu.memory_space<vmem>>, vector<512x3072xbf16>
    %cst_14 = arith.constant dense<0.000000e+00> : vector<8x3072xf32>
    %19 = tpu.matmul %17, %18, %cst_14 {dimension_numbers = #tpu.dot_dimension_numbers<[1], [0], [0], [1], [0, 0, 1, 1], [], []>} : vector<8x512xbf16>, vector<512x3072xbf16>, vector<8x3072xf32> -> vector<8x3072xf32>
    %c0_15 = arith.constant 0 : index
    %c0_16 = arith.constant 0 : index
    %20 = vector.load %arg7[%c0_15, %c0_16] : memref<1x3072xf32, #tpu.memory_space<vmem>>, vector<1x3072xf32>
    %21 = vector.broadcast %20 : vector<1x3072xf32> to vector<8x3072xf32>
    %22 = arith.addf %19, %21 : vector<8x3072xf32>
    %c0_17 = arith.constant 0 : index
    %c0_18 = arith.constant 0 : index
    %23 = vector.load %arg8[%c0_17, %c0_18] : memref<8x3072xf32, #tpu.memory_space<vmem>>, vector<8x3072xf32>
    tpu.vector_store %arg8[%c0_17, %c0_18], %22 {strides = array<i32>} : memref<8x3072xf32, #tpu.memory_space<vmem>>, vector<8x3072xf32>,
    return
  }
  func.func @transform_0(%arg0: i32) -> (i32, i32) {
    %c0_i32 = arith.constant 0 : i32
    %c0_i32_0 = arith.constant 0 : i32
    return %arg0, %c0_i32 : i32, i32
  }
  func.func @transform_1(%arg0: i32) -> (i32, i32) {
    %c0_i32 = arith.constant 0 : i32
    %c0_i32_0 = arith.constant 0 : i32
    %c0_i32_1 = arith.constant 0 : i32
    return %c0_i32, %c0_i32_0 : i32, i32
  }
  func.func @transform_2(%arg0: i32) -> (i32, i32) {
    %c0_i32 = arith.constant 0 : i32
    %c0_i32_0 = arith.constant 0 : i32
    %c0_i32_1 = arith.constant 0 : i32
    return %c0_i32, %c0_i32_0 : i32, i32
  }
  func.func @transform_3(%arg0: i32) -> (i32, i32) {
    %c0_i32 = arith.constant 0 : i32
    %c0_i32_0 = arith.constant 0 : i32
    %c0_i32_1 = arith.constant 0 : i32
    return %c0_i32, %c0_i32_0 : i32, i32
  }
  func.func @transform_4(%arg0: i32) -> (i32, i32) {
    %c0_i32 = arith.constant 0 : i32
    %c0_i32_0 = arith.constant 0 : i32
    %c0_i32_1 = arith.constant 0 : i32
    return %c0_i32, %c0_i32_0 : i32, i32
  }
  func.func @transform_5(%arg0: i32) -> (i32, i32) {
    %c0_i32 = arith.constant 0 : i32
    %c0_i32_0 = arith.constant 0 : i32
    %c0_i32_1 = arith.constant 0 : i32
    return %c0_i32, %c0_i32_0 : i32, i32
  }
  func.func @transform_6(%arg0: i32) -> (i32, i32) {
    %c0_i32 = arith.constant 0 : i32
    %c0_i32_0 = arith.constant 0 : i32
    %c0_i32_1 = arith.constant 0 : i32
    return %c0_i32, %c0_i32_0 : i32, i32
  }
  func.func @transform_7(%arg0: i32) -> (i32, i32) {
    %c0_i32 = arith.constant 0 : i32
    %c0_i32_0 = arith.constant 0 : i32
    return %arg0, %c0_i32 : i32, i32
  }
}

</mosaic_0001>

<bundles_post_ra>
// kernel: tpu_custom_call.1
= control target key start
LH: loop header
LB: loop body
LE: loop exit
PB: predicated region body
PF: predicated region fallthrough
CT: control target
= control target key end

     0   :  { %s9400_s0 = inlined_call_operand.hbm [shape: f32[16,16], index: 0, kind: input, shape index: {}]   ;;  %s9401_s1 = inlined_call_operand.hbm [shape: bf16[16,512], index: 1, kind: input, shape index: {}]   ;;  %s9402_s2 = inlined_call_operand.hbm [shape: f32[1,512], index: 2, kind: input, shape index: {}]   ;;  %s9403_s3 = inlined_call_operand.hbm [shape: bf16[512,512], index: 3, kind: input, shape index: {}]   ;;  %s9404_s4 = inlined_call_operand.hbm [shape: f32[1,512], index: 4, kind: input, shape index: {}]   ;;  %s9405_s5 = inlined_call_operand.hbm [shape: bf16[512,3072], index: 5, kind: input, shape index: {}]   ;;  %s9406_s6 = inlined_call_operand.hbm [shape: f32[1,3072], index: 6, kind: input, shape index: {}]   ;;  %s9407_s7 = inlined_call_operand.hbm [shape: f32[16,3072], index: 7, kind: output, shape index: {}]  }
   0x1   :  { %9412 = sst [smem:[#allocation20_spill]] %s9401_s1 }
   0x2   :  { %9413 = sst [smem:[#allocation21_spill]] %s9402_s2 }
   0x3   :  { %12 = vsyncpa [#allocation3], 0 }
   0x4   :  { %14 = vsyncpa [#allocation3 + $0x1], 0 }
   0x5   :  { %15 = vsyncpa [#allocation6], 0 }
   0x6   :  { %16 = vsyncpa [#allocation9], 0 }
   0x7   :  { %17 = vsyncpa [#allocation12], 0 }
   0x8   :  { %18 = vsyncpa [#allocation4], 0 }
   0x9   :  { %20 = vsyncpa [#allocation4 + $0x1], 0  ;;  %s8917_s24 = smov 0   ;;  %s8919_s25 = smov 0  }
   0xa   :  { %s8921_s26 = smov 0   ;;  %s8923_s27 = smov 0  }
   0xb LB: > { %s8864_s28 = smov [#allocation5]   ;;  %s8938_s30 = sadd.s32 4294967295, %s8862_s27   ;;  %s8862_s27 = sphi %s8923_s27, %s9439_s27   ;;  %s8858_s26 = sphi %s8921_s26, %s9438_s26   ;;  %s8854_s25 = sphi %s8919_s25, %s9437_s25   ;;  %s8850_s24 = sphi %s8917_s24, %s9436_s24  }
   0xc   : > { %s221_s29 = sshll.u32 %s8864_s28, 4  ;;  %p7365_p0 = scmp.ge.s32.totalorder %s8862_s27, 1  ;;  %s222_s29 = int_to_ptr.vmem [resolvable:$true] %s221_s29 }
   0xd   : > { %p9408_p1 = scmp.eq.s32.totalorder %s8938_s30, 0  ;;  %p209_p2 = scmp.lt.s32.totalorder %s8862_s27, 3 }
   0xe   : > { %s8865_s9 = smov [#allocation8]   ;;  %s8866_s12 = smov [#allocation11]  }
   0xf   : > { %p8943_p3 = pnand %p7365_p0, %p209_p2  ;;  %s245_s10 = sshll.u32 %s8865_s9, 4  ;;  %s8956_s10 = int_to_ptr.vmem [resolvable:$true] %s245_s10 }
  0x10   : > { %s269_s13 = sshll.u32 %s8866_s12, 4  ;;  %s8613_s15 = scalar_lea.vmem %s222_s29, 512  ;;  %s8958_s13 = int_to_ptr.vmem [resolvable:$true] %s269_s13 }
  0x11   : > { %s9414_s8 = scalar_select %p8943_p3, 1, 0 }
  0x12   : > { %p8318_p5 = pneg %p8943_p3  ;;  %p8614_p8 = scmp.ne.s32.totalorder %s222_s29, %s8613_s15 }
  0x13   : > { %p8621_p11 = scmp.lt.s32.totalorder %s222_s29, %s222_s29  ;;  %p8622_p12 = scmp.lt.s32.totalorder %s8613_s15, %s8613_s15 }
  0x14   : > { %p8952_p6 = pnand %p8318_p5, %p9408_p1 }
  0x15   : > { %p8623_p13 = por %p8622_p12, %p8621_p11 }
  0x16   : > { %p8962_p7 = pneg %p8952_p6 }
  0x18   : > { %p8616_p9 = pnand %p8614_p8, %p8962_p7 }
  0x1a   : > { %p8617_p10 = pneg %p8616_p9 }
  0x1c   : > { %p8624_p0 = pnand %p8623_p13, %p8617_p10 }
  0x1e   : > { %8627 = shalt.err (!%p8624_p0)
}
  0x1f   : > { %s8867_s16 = smov 256   ;;  %s8868_s17 = smov 16  }
  0x20   : > { %s9417_s1 = sld [smem:[#allocation20_spill]]  ;;  %s8639_s20 = scalar_lea.vmem %s8956_s10, 16384 }
  0x21   : > { %p8640_p2 = scmp.ne.s32.totalorder %s8956_s10, %s8639_s20  ;;  %p8647_p9 = scmp.lt.s32.totalorder %s8956_s10, %s8956_s10 }
  0x22   : > { %p8648_p10 = scmp.lt.s32.totalorder %s8639_s20, %s8639_s20 }
  0x23   : > { %p8642_p5 = pnand %p8640_p2, %p8962_p7 }
  0x24   : > { %p8649_p11 = por %p8648_p10, %p8647_p9 }
  0x25   : > { %p8643_p8 = pneg %p8642_p5 }
  0x26   : > { %8321 = dma.hbm_to_vmem [thread:$0]  (!%p8952_p6), %s9417_s1, 512, %s222_s29, [#allocation6], %s8867_s16, %s8867_s16, %s8868_s17  }
  0x27   : > { %p8650_p12 = pnand %p8649_p11, %p8643_p8 }
  0x29   : > { %8653 = shalt.err (!%p8650_p12)
}
  0x2a   : > { %8327 = dma.hbm_to_vmem [thread:$0]  (!%p8952_p6), %s9403_s3, 16384, %s8956_s10, [#allocation9], %s8867_s16, %s8867_s16, %s8868_s17  }
  0x2b   : > { %s8665_s23 = scalar_lea.vmem %s8958_s13, 98304  ;;  %p8673_p5 = scmp.lt.s32.totalorder %s8958_s13, %s8958_s13 }
  0x2c   : > { %p8666_p13 = scmp.ne.s32.totalorder %s8958_s13, %s8665_s23  ;;  %p8674_p8 = scmp.lt.s32.totalorder %s8665_s23, %s8665_s23 }
  0x2e   : > { %p8668_p0 = pnand %p8666_p13, %p8962_p7  ;;  %p8675_p9 = por %p8674_p8, %p8673_p5 }
  0x30   : > { %p8669_p2 = pneg %p8668_p0 }
  0x32   : > { %p8676_p10 = pnand %p8675_p9, %p8669_p2 }
  0x34   : > { %8679 = shalt.err (!%p8676_p10)
}
  0x35   : > { %s8869_s28 = smov 1536   ;;  %s8870_s29 = smov 96  }
  0x36   : > { %8333 = dma.hbm_to_vmem [thread:$0]  (!%p8952_p6), %s9405_s5, 98304, %s8958_s13, [#allocation12], %s8869_s28, %s8869_s28, %s8870_s29  }
  0x37   : > { %s8871_s10 = smov [#allocation7]   ;;  %s8872_s16 = smov [#allocation10]  }
  0x38   : > { %s235_s15 = sshll.u32 %s8871_s10, 4  ;;  %s259_s17 = sshll.u32 %s8872_s16, 4  ;;  %s236_s15 = int_to_ptr.vmem [resolvable:$true] %s235_s15  ;;  %s260_s17 = int_to_ptr.vmem [resolvable:$true] %s259_s17 }
  0x39   : > { %s8691_s18 = scalar_lea.vmem %s236_s15, 64  ;;  %p8699_p0 = scmp.lt.s32.totalorder %s236_s15, %s236_s15 }
  0x3a   : > { %p8692_p11 = scmp.ne.s32.totalorder %s236_s15, %s8691_s18  ;;  %p8700_p2 = scmp.lt.s32.totalorder %s8691_s18, %s8691_s18 }
  0x3c   : > { %p8694_p12 = pnand %p8692_p11, %p8962_p7  ;;  %p8701_p5 = por %p8700_p2, %p8699_p0 }
  0x3e   : > { %p8695_p13 = pneg %p8694_p12 }
  0x40   : > { %p8702_p8 = pnand %p8701_p5, %p8695_p13 }
  0x42   : > { %8705 = shalt.err (!%p8702_p8)
}
  0x43   : > { %s9418_s2 = sld [smem:[#allocation21_spill]]  ;;  %s8717_s13 = scalar_lea.vmem %s260_s17, 64 }
  0x44   : > { %p8718_p9 = scmp.ne.s32.totalorder %s260_s17, %s8717_s13  ;;  %p8725_p11 = scmp.lt.s32.totalorder %s260_s17, %s260_s17 }
  0x45   : > { %p8726_p12 = scmp.lt.s32.totalorder %s8717_s13, %s8717_s13 }
  0x46   : > { %p8720_p10 = pnand %p8718_p9, %p8962_p7 }
  0x47   : > { %p8727_p1 = por %p8726_p12, %p8725_p11 }
  0x48   : > { %p8721_p4 = pneg %p8720_p10 }
  0x49   : > { %8324 = dma.hbm_to_vmem [thread:$0]  (!%p8952_p6), %s9418_s2, 64, %s236_s15, [#allocation6]  }
  0x4a   : > { %p8728_p3 = pnand %p8727_p1, %p8721_p4 }
  0x4c   : > { %8731 = shalt.err (!%p8728_p3)
}
  0x4d   : > { %8330 = dma.hbm_to_vmem [thread:$0]  (!%p8952_p6), %s9404_s4, 64, %s260_s17, [#allocation9]  }
  0x4e   : > { %s8873_s23 = smov [#allocation13]  }
  0x4f   : > { %s283_s28 = sshll.u32 %s8873_s23, 4  ;;  %s284_s28 = int_to_ptr.vmem [resolvable:$true] %s283_s28 }
  0x50   : > { %s8743_s29 = scalar_lea.vmem %s284_s28, 384  ;;  %p8751_p5 = scmp.lt.s32.totalorder %s284_s28, %s284_s28 }
  0x51   : > { %p8744_p13 = scmp.ne.s32.totalorder %s284_s28, %s8743_s29  ;;  %p8752_p8 = scmp.lt.s32.totalorder %s8743_s29, %s8743_s29 }
  0x53   : > { %p8746_p0 = pnand %p8744_p13, %p8962_p7  ;;  %p8753_p9 = por %p8752_p8, %p8751_p5 }
  0x55   : > { %p8747_p2 = pneg %p8746_p0 }
  0x57   : > { %p8754_p1 = pnand %p8753_p9, %p8747_p2 }
  0x59   : > { %8757 = shalt.err (!%p8754_p1)
}
  0x5a   : > { %8336 = dma.hbm_to_vmem [thread:$0]  (!%p8952_p6), %s9406_s6, 384, %s284_s28, [#allocation12]  }
  0x5b   : > { %s7364_s14 = sadd.s32 4294967294, %s8862_s27   ;;  %s9020_s11 = sadd.s32 1, %s8862_s27  }
  0x5c   : > { %s30_s10 = ssub.s32 %s8862_s27, %s9020_s11  ;;  %s33_s15 = sadd.s32 1, %s8858_s26 }
  0x5d   : > { %p31_p3 = scmp.eq.s32.totalorder %s30_s10, 0  ;;  %p40_p4 = scmp.ne.s32.totalorder %s8858_s26, %s8854_s25 }
  0x5e   : > { %p41_p7 = scmp.eq.s32.totalorder %s8862_s27, 0  ;;  %p46_p10 = scmp.ne.s32.totalorder %s8854_s25, %s8850_s24 }
  0x5f   : > { %s9031_s16 = scalar_select %p31_p3, %s8858_s26, %s33_s15  }
  0x60   : > { %p9033_p11 = por %p41_p7, %p40_p4  ;;  %p9420_p12 = scmp.eq.s32.totalorder %s8938_s30, 0 }
  0x61   : > { %p196_p13 = scmp.eq.s32.totalorder %s8938_s30, 1  ;;  %p202_p0 = scmp.eq.s32.totalorder %s7364_s14, 1 }
  0x62   : > { %p9039_p6 = por %p9420_p12, %p46_p10  ;;  %p8351_p2 = scmp.lt.s32.totalorder %s8862_s27, 2 }
  0x63   : > { %s294_s19 = sand.u32 1, %s8858_s26   ;;  %p9046_p5 = por %p196_p13, %p40_p4 }
  0x64   : > { %s9421_s18 = scalar_select %p9039_p6, 1, 0 }
  0x65   : > { %s9422_s20 = scalar_select %p9046_p5, 1, 0 }
  0x66   : > { %p9050_p8 = por %p202_p0, %p46_p10  ;;  %s7373_s21 = sshll.u32 %s294_s19, 3 }
  0x67   : > { %s7374_s22 = sshll.u32 %s8862_s27, 7  ;;  %s298_s9 = scalar_lea.vmem [#allocation2], %s7373_s21 }
  0x68   : > { %s9423_s13 = scalar_select %p9050_p8, 1, 0 }
  0x69   : > { %s9058_s29 = scalar_lea.hbm %s9400_s0, %s7374_s22  ;;  %s305_s12 = sshll.u32 %s298_s9, 4  ;;  %s306_s12 = int_to_ptr.vmem [resolvable:$true] %s305_s12 }
  0x6a   : > { %p9062_p9 = pnand %p8351_p2, %p9033_p11  ;;  %s295_s10 = scalar_lea.sflag [#allocation3], %s294_s19 }
  0x6b   : > { %s8758_s15 = scalar_lea.hbm %s9058_s29, 128  ;;  %s8763_s28 = scalar_lea.hbm %s9400_s0, 256 }
  0x6c   : > { %p8759_p1 = scmp.ne.s32.totalorder %s9058_s29, %s8758_s15  ;;  %p8760_p3 = pneg %p9062_p9 }
  0x6d   : > { %p8764_p10 = scmp.lt.s32.totalorder %s9058_s29, %s9400_s0  ;;  %p8765_p11 = scmp.lt.s32.totalorder %s8763_s28, %s8758_s15 }
  0x6e   : > { %p8761_p4 = pnand %p8760_p3, %p8759_p1 }
  0x6f   : > { %p8766_p12 = por %p8765_p11, %p8764_p10 }
  0x70   : > { %p8762_p7 = pneg %p8761_p4 }
  0x72   : > { %p8767_p13 = pnand %p8766_p12, %p8762_p7 }
  0x74   : > { %8770 = shalt.err (!%p8767_p13)
}
  0x75   : > { %s8771_s17 = scalar_lea.vmem %s306_s12, 128  ;;  %s8874_s19 = smov [#allocation2]  }
  0x76   : > { %p8772_p0 = scmp.ne.s32.totalorder %s306_s12, %s8771_s17  ;;  %s8776_s1 = sshll.u32 %s8874_s19, 4  ;;  %s8777_s1 = int_to_ptr.vmem [resolvable:$false] %s8776_s1 }
  0x77   : > { %s8778_s2 = scalar_lea.vmem %s8777_s1, 256  ;;  %p8779_p1 = scmp.lt.s32.totalorder %s306_s12, %s8777_s1 }
  0x78   : > { %p8774_p2 = pnand %p8772_p0, %p8760_p3  ;;  %p8780_p4 = scmp.lt.s32.totalorder %s8778_s2, %s8771_s17 }
  0x7a   : > { %p8775_p8 = pneg %p8774_p2  ;;  %p8781_p5 = por %p8780_p4, %p8779_p1 }
  0x7c   : > { %p8782_p6 = pnand %p8781_p5, %p8775_p8 }
  0x7e   : > { %8785 = shalt.err (!%p8782_p6)
}
  0x7f   : > { %8340 = dma.hbm_to_vmem [thread:$0]  (!%p9062_p9), %s9058_s29, 128, %s306_s12, %s295_s10  }
  0x80   : > { %p9425_p7 = scmp.ne.s32.totalorder %s9414_s8, 0 }
  0x81   : > { %s9083_s15 = sand.u32 (!%p9425_p7), 1, %s8854_s25   ;;  %p9426_p3 = scmp.ne.s32.totalorder (!%p9425_p7), %s9421_s18, 0 }
  0x82   : > { %314 = sbr.rel (%p9425_p7) target bundleno = 1537 (0x601), region = 48  ;;  %s7376_s22 = sshll.u32 (!%p9425_p7), %s9083_s15, 3 }
  0x83   : > { %s317_s23 = scalar_lea.sflag (!%p9425_p7), [#allocation3], %s9083_s15  ;;  %s320_s1 = scalar_lea.vmem (!%p9425_p7), [#allocation2], %s7376_s22 }
  0x87   : > { %8829 = dma.done.wait (%p9426_p3), %s317_s23, 128  }
  0x88   : > { %8831 = vsyncadd (%p9426_p3), %s317_s23, 4294967168  ;;  %p9427_p6 = scmp.eq.s32.totalorder %s8938_s30, 0 }
  0x8a   : > { %8833 = dma.done.wait (%p9427_p6), [#allocation6], 576   ;;  %p9428_p5 = pmov %p9427_p6 }
  0x8c   : > { %8835 = vsyncadd (%p9428_p5), [#allocation6], 4294966720  ;;  %p9429_p8 = pmov %p9428_p5 }
  0x8d   : > { %p9430_p9 = pmov %p9428_p5 }
  0x8e   : > { %8837 = dma.done.wait (%p9429_p8), [#allocation9], 16448  }
  0x8f   : > { %8839 = vsyncadd (%p9430_p9), [#allocation9], 4294950848  ;;  %p9431_p10 = pmov %p9428_p5 }
  0x90   : > { %p9432_p11 = pmov %p9428_p5 }
  0x91   : > { %8841 = dma.done.wait (%p9431_p10), [#allocation12], 98688  }
  0x92   : > { %8843 = vsyncadd (%p9432_p11), [#allocation12], 4294868608  ;;  %v8875_v0 = vmov 0   ;;  %v8402_v1 = vld [vmem:[#allocation5 + $0x4] ss:$16 sps:$4 sm:$0xff]   ;;  %vm424_vm0 = vcmask 130048  }
  0x93   : > { %460 = vmatprep.mubr.bf16.mxu0 %v8875_v0  ;;  %501 = vmatprep.mubr.bf16.mxu1 %v8875_v0  ;;  %v8404_v2 = vld [vmem:[#allocation5 + $0xc] ss:$16 sps:$4 sm:$0xff]   ;;  %v8406_v3 = vld [vmem:[#allocation5] ss:$16 sps:$4 sm:$0xff]   ;;  %v8407_v4 = vld [vmem:[#allocation5 + $0x8] ss:$16 sps:$4 sm:$0xff]  }
  0x94   : > { %442 = vmatprep.subr.bf16.mxu0 %v8402_v1  ;;  %v376_v5 = vld [vmem:[%s320_s1] sm:$0xff]  ;;  %483 = vmatprep.subr.bf16.mxu1 %v8404_v2  ;;  %s8288_s2 = smul.u32 192, %s9083_s15  ;;  %p9433_p13 = scmp.ne.s32.totalorder %s9422_s20, 0 }
  0x95   : > { %v377_v6 = vpack.c.bf16 %v376_v5, %v376_v5  ;;  %v8408_v7 = vld [vmem:[#allocation8 + $0xe0] ss:$16 sps:$4 sm:$0xff]   ;;  %443 = vmatpush1.bf16.msra.mxu0 %v8406_v3  ;;  %484 = vmatpush1.bf16.msra.mxu1 %v8407_v4  ;;  %v8410_v8 = vld [vmem:[#allocation8 + $0xe4] ss:$16 sps:$4 sm:$0xff]   ;;  %s8289_s18 = smul.u32 3072, %s8938_s30  ;;  %s7223_s30 = scalar_lea.sflag [#allocation4], %s9083_s15 }
  0x96   : > { %v8411_v9 = vld [vmem:[#allocation8 + $0x2e0] ss:$16 sps:$4 sm:$0xff]   ;;  %v8413_v10 = vld [vmem:[#allocation8 + $0x2e4] ss:$16 sps:$4 sm:$0xff]   ;;  %1308 = vmatprep.subr.bf16.mxu0 %v8410_v8  ;;  %v8509_v8 = vld [vmem:[#allocation8 + $0x2ec] ss:$16 sps:$4 sm:$0xff]  }
  0x97   : > { %v8416_v11 = vld [vmem:[#allocation8 + $0xc4] ss:$16 sps:$4 sm:$0xff]   ;;  %v8414_v12 = vld [vmem:[#allocation8 + $0xc0] ss:$16 sps:$4 sm:$0xff]   ;;  %1349 = vmatprep.subr.bf16.mxu1 %v8413_v10  ;;  %s9207_s8 = scalar_lea.vmem [#allocation14], %s8288_s2  ;;  %s9356_s10 = scalar_lea.hbm %s9407_s7, %s8289_s18 }
  0x98   : > { %7387 = vmatmul.mubr.msk.bf16.vlgmr.msra.gmra.mxu0 %vm424_vm0, %v377_v6  ;;  %7388 = vmatmul.mubr.msk.bf16.vlgmr.msra.gmra.mxu1 %vm424_vm0, %v377_v6  ;;  %v8419_v13 = vld [vmem:[#allocation8 + $0x2c4] ss:$16 sps:$4 sm:$0xff]   ;;  %v8417_v14 = vld [vmem:[#allocation8 + $0x2c0] ss:$16 sps:$4 sm:$0xff]   ;;  %s7237_s29 = sshll.u32 %s9207_s8, 4  ;;  %s8876_s21 = smov [#allocation14]   ;;  %s9358_s29 = int_to_ptr.vmem [resolvable:$true] %s7237_s29 }
  0x99   : > { %1309 = vmatpush1.bf16.msra.mxu0 %v8408_v7  ;;  %1350 = vmatpush1.bf16.msra.mxu1 %v8411_v9  ;;  %v8422_v15 = vld [vmem:[#allocation8 + $0xa4] ss:$16 sps:$4 sm:$0xff]   ;;  %v8420_v17 = vld [vmem:[#allocation8 + $0xa0] ss:$16 sps:$4 sm:$0xff]   ;;  %v8506_v7 = vld [vmem:[#allocation8 + $0xec] ss:$16 sps:$4 sm:$0xff]   ;;  %v384_v9 = vlaneseq }
  0x9a   : > { %1310 = vmatprep.subr.bf16.mxu0 %v8416_v11  ;;  %1351 = vmatprep.subr.bf16.mxu1 %v8419_v13  ;;  %v8425_v16 = vld [vmem:[#allocation8 + $0x2a4] ss:$16 sps:$4 sm:$0xff]   ;;  %v8423_v18 = vld [vmem:[#allocation8 + $0x2a0] ss:$16 sps:$4 sm:$0xff]   ;;  %v382_v13 = vld [vmem:[#allocation7] sm:$0xf] }
  0x9b   : > { %v8428_v19 = vld [vmem:[#allocation8 + $0x84] ss:$16 sps:$4 sm:$0xff]   ;;  %v8426_v21 = vld [vmem:[#allocation8 + $0x80] ss:$16 sps:$4 sm:$0xff]   ;;  %v9103_v10 = vshrl.u32 %v384_v9, 7  ;;  %s8786_s28 = scalar_lea.vmem %s9358_s29, 3072 }
  0x9c   : > { %v8431_v20 = vld [vmem:[#allocation8 + $0x284] ss:$16 sps:$4 sm:$0xff]   ;;  %v8429_v22 = vld [vmem:[#allocation8 + $0x280] ss:$16 sps:$4 sm:$0xff]   ;;  %v8555_v9 = vld [vmem:[#allocation8 + $0x3e8] ss:$16 sps:$4 sm:$0xff]   ;;  %p8787_p12 = scmp.ne.s32.totalorder %s9358_s29, %s8786_s28 }
  0x9d   : > { %1311 = vmatpush1.bf16.msra.mxu0 %v8414_v12  ;;  %1352 = vmatpush1.bf16.msra.mxu1 %v8417_v14  ;;  %v8434_v23 = vld [vmem:[#allocation8 + $0x64] ss:$16 sps:$4 sm:$0xff]   ;;  %v8432_v25 = vld [vmem:[#allocation8 + $0x60] ss:$16 sps:$4 sm:$0xff]   ;;  %v9106_v11 = vsub.s32 0, %v9103_v10  ;;  %v9109_v12 = vsub.s32 2, %v9103_v10 }
  0x9e   : > { %1312 = vmatprep.subr.bf16.mxu0 %v8422_v15  ;;  %1353 = vmatprep.subr.bf16.mxu1 %v8425_v16  ;;  %v8437_v24 = vld [vmem:[#allocation8 + $0x264] ss:$16 sps:$4 sm:$0xff]   ;;  %v8435_v26 = vld [vmem:[#allocation8 + $0x260] ss:$16 sps:$4 sm:$0xff]   ;;  %v9112_v14 = vsub.s32 1, %v9103_v10  ;;  %v9115_v15 = vsub.s32 3, %v9103_v10  ;;  %p8788_p0 = pnand %p8787_p12, %p9433_p13 }
  0x9f   : > { %v8440_v27 = vld [vmem:[#allocation8 + $0x44] ss:$16 sps:$4 sm:$0xff]   ;;  %v8438_v29 = vld [vmem:[#allocation8 + $0x40] ss:$16 sps:$4 sm:$0xff]   ;;  %v387_v16 = vrot.slane %v382_v13, %v9106_v11  ;;  %s8790_s9 = sshll.u32 %s8876_s21, 4  ;;  %s8791_s9 = int_to_ptr.vmem [resolvable:$false] %s8790_s9 }
  0xa0   : > { %v8443_v28 = vld [vmem:[#allocation8 + $0x244] ss:$16 sps:$4 sm:$0xff]   ;;  %v8441_v30 = vld [vmem:[#allocation8 + $0x240] ss:$16 sps:$4 sm:$0xff]   ;;  %p8789_p2 = pneg %p8788_p0  ;;  %s8792_s17 = scalar_lea.vmem %s8791_s9, 6144 }
  0xa1   : > { %1313 = vmatpush1.bf16.msra.mxu0 %v8420_v17  ;;  %1354 = vmatpush1.bf16.msra.mxu1 %v8423_v18  ;;  %v8446_v31 = vld [vmem:[#allocation8 + $0x24] ss:$16 sps:$4 sm:$0xff]   ;;  %v8444_v33 = vld [vmem:[#allocation8 + $0x20] ss:$16 sps:$4 sm:$0xff]   ;;  %v395_v17 = vrot.slane %v382_v13, %v9109_v12  ;;  %v391_v18 = vrot.slane %v382_v13, %v9112_v14  ;;  %p8793_p1 = scmp.lt.s32.totalorder %s9358_s29, %s8791_s9  ;;  %p8794_p4 = scmp.lt.s32.totalorder %s8792_s17, %s8786_s28 }
  0xa2   : > { %1314 = vmatprep.subr.bf16.mxu0 %v8428_v19  ;;  %1355 = vmatprep.subr.bf16.mxu1 %v8431_v20  ;;  %v8449_v32 = vld [vmem:[#allocation8 + $0x224] ss:$16 sps:$4 sm:$0xff]   ;;  %v8447_v34 = vld [vmem:[#allocation8 + $0x220] ss:$16 sps:$4 sm:$0xff]   ;;  %v399_v19 = vrot.slane %v382_v13, %v9115_v15  ;;  %v8560_v13 = vld [vmem:[#allocation8 + $0x1cc] ss:$16 sps:$4 sm:$0xff]  }
  0xa3   : > { %v8452_v35 = vld [vmem:[#allocation8 + $0x4] ss:$16 sps:$4 sm:$0xff]   ;;  %v8450_v37 = vld [vmem:[#allocation8] ss:$16 sps:$4 sm:$0xff]   ;;  %p8795_p7 = por %p8794_p4, %p8793_p1 }
  0xa4   : > { %v8455_v36 = vld [vmem:[#allocation8 + $0x204] ss:$16 sps:$4 sm:$0xff]   ;;  %v8453_v38 = vld [vmem:[#allocation8 + $0x200] ss:$16 sps:$4 sm:$0xff]  }
  0xa5   : > { %1315 = vmatpush1.bf16.msra.mxu0 %v8426_v21  ;;  %1356 = vmatpush1.bf16.msra.mxu1 %v8429_v22  ;;  %v8458_v39 = vld [vmem:[#allocation8 + $0x1e4] ss:$16 sps:$4 sm:$0xff]   ;;  %v8456_v41 = vld [vmem:[#allocation8 + $0x1e0] ss:$16 sps:$4 sm:$0xff]   ;;  %p8796_p3 = pnand %p8795_p7, %p8789_p2 }
  0xa6   : > { %1316 = vmatprep.subr.bf16.mxu0 %v8434_v23  ;;  %1357 = vmatprep.subr.bf16.mxu1 %v8437_v24  ;;  %v8461_v40 = vld [vmem:[#allocation8 + $0x3e4] ss:$16 sps:$4 sm:$0xff]   ;;  %v8459_v42 = vld [vmem:[#allocation8 + $0x3e0] ss:$16 sps:$4 sm:$0xff]  }
  0xa7   : > { %v8464_v43 = vld [vmem:[#allocation8 + $0x1c4] ss:$16 sps:$4 sm:$0xff]   ;;  %v8462_v44 = vld [vmem:[#allocation8 + $0x1c0] ss:$16 sps:$4 sm:$0xff]  }
  0xa8   : > { %v8467_v45 = vld [vmem:[#allocation8 + $0x3c4] ss:$16 sps:$4 sm:$0xff]   ;;  %v8465_v46 = vld [vmem:[#allocation8 + $0x3c0] ss:$16 sps:$4 sm:$0xff]  }
  0xa9   : > { %1317 = vmatpush1.bf16.msra.mxu0 %v8432_v25  ;;  %1358 = vmatpush1.bf16.msra.mxu1 %v8435_v26  ;;  %v8470_v47 = vld [vmem:[#allocation8 + $0x1a4] ss:$16 sps:$4 sm:$0xff]   ;;  %v8468_v49 = vld [vmem:[#allocation8 + $0x1a0] ss:$16 sps:$4 sm:$0xff]  }
  0xaa   : > { %1318 = vmatprep.subr.bf16.mxu0 %v8440_v27  ;;  %1359 = vmatprep.subr.bf16.mxu1 %v8443_v28  ;;  %v8473_v48 = vld [vmem:[#allocation8 + $0x3a4] ss:$16 sps:$4 sm:$0xff]   ;;  %v8471_v50 = vld [vmem:[#allocation8 + $0x3a0] ss:$16 sps:$4 sm:$0xff]  }
  0xab   : > { %v8476_v51 = vld [vmem:[#allocation8 + $0x184] ss:$16 sps:$4 sm:$0xff]   ;;  %v8474_v53 = vld [vmem:[#allocation8 + $0x180] ss:$16 sps:$4 sm:$0xff]  }
  0xac   : > { %v8479_v52 = vld [vmem:[#allocation8 + $0x384] ss:$16 sps:$4 sm:$0xff]   ;;  %v8477_v54 = vld [vmem:[#allocation8 + $0x380] ss:$16 sps:$4 sm:$0xff]  }
  0xad   : > { %1319 = vmatpush1.bf16.msra.mxu0 %v8438_v29  ;;  %1360 = vmatpush1.bf16.msra.mxu1 %v8441_v30  ;;  %v8482_v55 = vld [vmem:[#allocation8 + $0x164] ss:$16 sps:$4 sm:$0xff]   ;;  %v8480_v57 = vld [vmem:[#allocation8 + $0x160] ss:$16 sps:$4 sm:$0xff]  }
  0xae   : > { %1320 = vmatprep.subr.bf16.mxu0 %v8446_v31  ;;  %1361 = vmatprep.subr.bf16.mxu1 %v8449_v32  ;;  %v8485_v56 = vld [vmem:[#allocation8 + $0x364] ss:$16 sps:$4 sm:$0xff]   ;;  %v8483_v58 = vld [vmem:[#allocation8 + $0x360] ss:$16 sps:$4 sm:$0xff]  }
  0xaf   : > { %v8488_v59 = vld [vmem:[#allocation8 + $0x144] ss:$16 sps:$4 sm:$0xff]   ;;  %v8486_v61 = vld [vmem:[#allocation8 + $0x140] ss:$16 sps:$4 sm:$0xff]  }
  0xb0   : > { %v8491_v60 = vld [vmem:[#allocation8 + $0x344] ss:$16 sps:$4 sm:$0xff]   ;;  %v8489_v62 = vld [vmem:[#allocation8 + $0x340] ss:$16 sps:$4 sm:$0xff]  }
  0xb1   : > { %1321 = vmatpush1.bf16.msra.mxu0 %v8444_v33  ;;  %1362 = vmatpush1.bf16.msra.mxu1 %v8447_v34  ;;  %v8494_v63 = vld [vmem:[#allocation8 + $0x124] ss:$16 sps:$4 sm:$0xff]   ;;  %v8492_v1 = vld [vmem:[#allocation8 + $0x120] ss:$16 sps:$4 sm:$0xff]  }
  0xb2   : > { %1322 = vmatprep.subr.bf16.mxu0 %v8452_v35  ;;  %1363 = vmatprep.subr.bf16.mxu1 %v8455_v36  ;;  %v8497_v0 = vld [vmem:[#allocation8 + $0x324] ss:$16 sps:$4 sm:$0xff]   ;;  %v8495_v2 = vld [vmem:[#allocation8 + $0x320] ss:$16 sps:$4 sm:$0xff]  }
  0xb3   : > { %v8500_v3 = vld [vmem:[#allocation8 + $0x104] ss:$16 sps:$4 sm:$0xff]   ;;  %v8498_v5 = vld [vmem:[#allocation8 + $0x100] ss:$16 sps:$4 sm:$0xff]  }
  0xb4   : > { %v8503_v4 = vld [vmem:[#allocation8 + $0x304] ss:$16 sps:$4 sm:$0xff]   ;;  %v8501_v6 = vld [vmem:[#allocation8 + $0x300] ss:$16 sps:$4 sm:$0xff]  }
  0xb5   : > { %1323 = vmatpush1.bf16.msra.mxu0 %v8450_v37  ;;  %1364 = vmatpush1.bf16.msra.mxu1 %v8453_v38 }
  0xb6   : > { %1324 = vmatprep.subr.bf16.mxu0 %v8458_v39  ;;  %1365 = vmatprep.subr.bf16.mxu1 %v8461_v40  ;;  %v8504_v39 = vld [vmem:[#allocation8 + $0xe8] ss:$16 sps:$4 sm:$0xff]  }
  0xb7   : > { %v8507_v40 = vld [vmem:[#allocation8 + $0x2e8] ss:$16 sps:$4 sm:$0xff]  }
  0xb9   : > { %1325 = vmatpush2.bf16.msra.mxu0 %v8456_v41  ;;  %1366 = vmatpush2.bf16.msra.mxu1 %v8459_v42  ;;  %v8512_v42 = vld [vmem:[#allocation8 + $0xcc] ss:$16 sps:$4 sm:$0xff]  }
  0xba   : > { %1326 = vmatprep.subr.bf16.mxu0 %v8464_v43  ;;  %1367 = vmatprep.subr.bf16.mxu1 %v8467_v45  ;;  %v8515_v43 = vld [vmem:[#allocation8 + $0x2cc] ss:$16 sps:$4 sm:$0xff]   ;;  %v8513_v45 = vld [vmem:[#allocation8 + $0x2c8] ss:$16 sps:$4 sm:$0xff]  }
  0xbd   : > { %1327 = vmatpush2.bf16.msra.mxu0 %v8462_v44  ;;  %1368 = vmatpush2.bf16.msra.mxu1 %v8465_v46  ;;  %v8510_v44 = vld [vmem:[#allocation8 + $0xc8] ss:$16 sps:$4 sm:$0xff]   ;;  %v8518_v46 = vld [vmem:[#allocation8 + $0xac] ss:$16 sps:$4 sm:$0xff]  }
  0xbe   : > { %1328 = vmatprep.subr.bf16.mxu0 %v8470_v47  ;;  %1369 = vmatprep.subr.bf16.mxu1 %v8473_v48  ;;  %v8521_v47 = vld [vmem:[#allocation8 + $0x2ac] ss:$16 sps:$4 sm:$0xff]   ;;  %v8516_v48 = vld [vmem:[#allocation8 + $0xa8] ss:$16 sps:$4 sm:$0xff]  }
  0xc1   : > { %1329 = vmatpush2.bf16.msra.mxu0 %v8468_v49  ;;  %1370 = vmatpush2.bf16.msra.mxu1 %v8471_v50  ;;  %v8519_v49 = vld [vmem:[#allocation8 + $0x2a8] ss:$16 sps:$4 sm:$0xff]   ;;  %v8524_v50 = vld [vmem:[#allocation8 + $0x8c] ss:$16 sps:$4 sm:$0xff]  }
  0xc2   : > { %1330 = vmatprep.subr.bf16.mxu0 %v8476_v51  ;;  %1371 = vmatprep.subr.bf16.mxu1 %v8479_v52  ;;  %v8527_v51 = vld [vmem:[#allocation8 + $0x28c] ss:$16 sps:$4 sm:$0xff]   ;;  %v8522_v52 = vld [vmem:[#allocation8 + $0x88] ss:$16 sps:$4 sm:$0xff]  }
  0xc5   : > { %1331 = vmatpush2.bf16.msra.mxu0 %v8474_v53  ;;  %1372 = vmatpush2.bf16.msra.mxu1 %v8477_v54  ;;  %v8525_v53 = vld [vmem:[#allocation8 + $0x288] ss:$16 sps:$4 sm:$0xff]   ;;  %v8530_v54 = vld [vmem:[#allocation8 + $0x6c] ss:$16 sps:$4 sm:$0xff]  }
  0xc6   : > { %1332 = vmatprep.subr.bf16.mxu0 %v8482_v55  ;;  %1373 = vmatprep.subr.bf16.mxu1 %v8485_v56  ;;  %v8533_v55 = vld [vmem:[#allocation8 + $0x26c] ss:$16 sps:$4 sm:$0xff]   ;;  %v8528_v56 = vld [vmem:[#allocation8 + $0x68] ss:$16 sps:$4 sm:$0xff]  }
  0xc9   : > { %1333 = vmatpush2.bf16.msra.mxu0 %v8480_v57  ;;  %1374 = vmatpush2.bf16.msra.mxu1 %v8483_v58  ;;  %v8531_v57 = vld [vmem:[#allocation8 + $0x268] ss:$16 sps:$4 sm:$0xff]   ;;  %v8536_v58 = vld [vmem:[#allocation8 + $0x4c] ss:$16 sps:$4 sm:$0xff]  }
  0xca   : > { %1334 = vmatprep.subr.bf16.mxu0 %v8488_v59  ;;  %1375 = vmatprep.subr.bf16.mxu1 %v8491_v60  ;;  %v8539_v59 = vld [vmem:[#allocation8 + $0x24c] ss:$16 sps:$4 sm:$0xff]   ;;  %v8534_v60 = vld [vmem:[#allocation8 + $0x48] ss:$16 sps:$4 sm:$0xff]  }
  0xcd   : > { %1335 = vmatpush2.bf16.msra.mxu0 %v8486_v61  ;;  %1376 = vmatpush2.bf16.msra.mxu1 %v8489_v62  ;;  %v8537_v61 = vld [vmem:[#allocation8 + $0x248] ss:$16 sps:$4 sm:$0xff]   ;;  %v8542_v62 = vld [vmem:[#allocation8 + $0x2c] ss:$16 sps:$4 sm:$0xff]  }
  0xce   : > { %1336 = vmatprep.subr.bf16.mxu0 %v8494_v63  ;;  %1377 = vmatprep.subr.bf16.mxu1 %v8497_v0  ;;  %v8545_v63 = vld [vmem:[#allocation8 + $0x22c] ss:$16 sps:$4 sm:$0xff]   ;;  %v8540_v0 = vld [vmem:[#allocation8 + $0x28] ss:$16 sps:$4 sm:$0xff]  }
  0xd1   : > { %1337 = vmatpush2.bf16.msra.mxu0 %v8492_v1  ;;  %1378 = vmatpush2.bf16.msra.mxu1 %v8495_v2  ;;  %v8543_v1 = vld [vmem:[#allocation8 + $0x228] ss:$16 sps:$4 sm:$0xff]   ;;  %v8548_v2 = vld [vmem:[#allocation8 + $0xc] ss:$16 sps:$4 sm:$0xff]  }
  0xd2   : > { %1338 = vmatprep.subr.bf16.mxu0 %v8500_v3  ;;  %1379 = vmatprep.subr.bf16.mxu1 %v8503_v4  ;;  %v8551_v3 = vld [vmem:[#allocation8 + $0x20c] ss:$16 sps:$4 sm:$0xff]   ;;  %v8546_v4 = vld [vmem:[#allocation8 + $0x8] ss:$16 sps:$4 sm:$0xff]  }
  0xd5   : > { %1339 = vmatpush2.bf16.msra.mxu0 %v8498_v5  ;;  %1380 = vmatpush2.bf16.msra.mxu1 %v8501_v6  ;;  %v8549_v5 = vld [vmem:[#allocation8 + $0x208] ss:$16 sps:$4 sm:$0xff]   ;;  %v8554_v6 = vld [vmem:[#allocation8 + $0x1ec] ss:$16 sps:$4 sm:$0xff]  }
  0xd6   : > { %1390 = vmatprep.subr.bf16.mxu0 %v8506_v7  ;;  %1431 = vmatprep.subr.bf16.mxu1 %v8509_v8  ;;  %v8557_v7 = vld [vmem:[#allocation8 + $0x3ec] ss:$16 sps:$4 sm:$0xff]   ;;  %v8552_v8 = vld [vmem:[#allocation8 + $0x1e8] ss:$16 sps:$4 sm:$0xff]  }
 0x158   : > { %v462_v20 = vpop.f32.mrf.mxu0  ;;  %v503_v21 = vpop.f32.mrf.mxu1 }
 0x159   : > { %v463_v22 = vadd.f32 %v462_v20, %v387_v16  ;;  %v504_v23 = vadd.f32 %v503_v21, %v395_v17  ;;  %v8563_v16 = vld [vmem:[#allocation8 + $0x3cc] ss:$16 sps:$4 sm:$0xff]   ;;  %v8558_v17 = vld [vmem:[#allocation8 + $0x1c8] ss:$16 sps:$4 sm:$0xff]  }
 0x15a   : > { %v464_v24 = vpop.f32.mrf.mxu0  ;;  %v505_v25 = vpop.f32.mrf.mxu1  ;;  %v8569_v20 = vld [vmem:[#allocation8 + $0x3ac] ss:$16 sps:$4 sm:$0xff]   ;;  %v8564_v21 = vld [vmem:[#allocation8 + $0x1a8] ss:$16 sps:$4 sm:$0xff]  }
 0x15b   : > { %v512_v26 = vmax.f32 %v504_v23, 0.0  ;;  %v465_v27 = vadd.f32 %v464_v24, %v391_v18  ;;  %v506_v28 = vadd.f32 %v505_v25, %v399_v19  ;;  %v510_v29 = vmax.f32 %v463_v22, 0.0  ;;  %v8561_v18 = vld [vmem:[#allocation8 + $0x3c8] ss:$16 sps:$4 sm:$0xff]   ;;  %v8566_v19 = vld [vmem:[#allocation8 + $0x1ac] ss:$16 sps:$4 sm:$0xff]  }
 0x15c   : > { %v466_v30 = vpop.f32.mrf.mxu0  ;;  %v507_v31 = vpop.f32.mrf.mxu1  ;;  %v8567_v22 = vld [vmem:[#allocation8 + $0x3a8] ss:$16 sps:$4 sm:$0xff]   ;;  %v8572_v23 = vld [vmem:[#allocation8 + $0x18c] ss:$16 sps:$4 sm:$0xff]  }
 0x15d   : > { %v511_v32 = vmax.f32 %v465_v27, 0.0  ;;  %v513_v33 = vmax.f32 %v506_v28, 0.0  ;;  %v9121_v34 = vpack.c.bf16 %v512_v26, %v512_v26  ;;  %v9123_v41 = vpack.c.bf16 %v510_v29, %v510_v29  ;;  %v8575_v24 = vld [vmem:[#allocation8 + $0x38c] ss:$16 sps:$4 sm:$0xff]   ;;  %v8570_v25 = vld [vmem:[#allocation8 + $0x188] ss:$16 sps:$4 sm:$0xff]  }
 0x15e   : > { %v467_v35 = vpop.f32.mrf.mxu0  ;;  %v508_v36 = vpop.f32.mrf.mxu1  ;;  %v8573_v26 = vld [vmem:[#allocation8 + $0x388] ss:$16 sps:$4 sm:$0xff]   ;;  %v8578_v27 = vld [vmem:[#allocation8 + $0x16c] ss:$16 sps:$4 sm:$0xff]  }
 0x15f   : > { %v515_v37 = vpack.c.bf16 %v511_v32, %v511_v32  ;;  %v517_v38 = vpack.c.bf16 %v513_v33, %v513_v33  ;;  %v8581_v28 = vld [vmem:[#allocation8 + $0x36c] ss:$16 sps:$4 sm:$0xff]   ;;  %v8576_v29 = vld [vmem:[#allocation8 + $0x168] ss:$16 sps:$4 sm:$0xff]  }
 0x160   : > { %v8579_v30 = vld [vmem:[#allocation8 + $0x368] ss:$16 sps:$4 sm:$0xff]   ;;  %v8584_v31 = vld [vmem:[#allocation8 + $0x14c] ss:$16 sps:$4 sm:$0xff]  }
 0x161   : > { %1340 = vmatprep.mubr.bf16.mxu0 %v515_v37  ;;  %1381 = vmatprep.mubr.bf16.mxu1 %v517_v38  ;;  %v8587_v32 = vld [vmem:[#allocation8 + $0x34c] ss:$16 sps:$4 sm:$0xff]   ;;  %v8582_v33 = vld [vmem:[#allocation8 + $0x148] ss:$16 sps:$4 sm:$0xff]  }
 0x162   : > { %1341 = vmatmul.mubr.bf16.vlgmr.msra.gmra.mxu0 %v9123_v41  ;;  %1382 = vmatmul.mubr.bf16.vlgmr.msra.gmra.mxu1 %v9121_v34  ;;  %v8585_v35 = vld [vmem:[#allocation8 + $0x348] ss:$16 sps:$4 sm:$0xff]   ;;  %v8590_v36 = vld [vmem:[#allocation8 + $0x12c] ss:$16 sps:$4 sm:$0xff]  }
 0x163   : > { %1391 = vmatpush1.bf16.msra.mxu0 %v8504_v39  ;;  %1432 = vmatpush1.bf16.msra.mxu1 %v8507_v40  ;;  %v8591_v39 = vld [vmem:[#allocation8 + $0x328] ss:$16 sps:$4 sm:$0xff]   ;;  %v8596_v40 = vld [vmem:[#allocation8 + $0x10c] ss:$16 sps:$4 sm:$0xff]  }
 0x164   : > { %1422 = vmatprep.mubr.bf16.mxu0 %v515_v37  ;;  %1463 = vmatprep.mubr.bf16.mxu1 %v517_v38  ;;  %v8593_v37 = vld [vmem:[#allocation8 + $0x32c] ss:$16 sps:$4 sm:$0xff]   ;;  %v8588_v38 = vld [vmem:[#allocation8 + $0x128] ss:$16 sps:$4 sm:$0xff]  }
 0x165   : > { %1392 = vmatprep.subr.bf16.mxu0 %v8512_v42  ;;  %1433 = vmatprep.subr.bf16.mxu1 %v8515_v43  ;;  %v8599_v42 = vld [vmem:[#allocation8 + $0x30c] ss:$16 sps:$4 sm:$0xff]   ;;  %v1648_v43 = vld [vmem:[#allocation11 + $0x540] sm:$0xff] }
 0x167   : > { %1393 = vmatpush1.bf16.msra.mxu0 %v8510_v44  ;;  %1434 = vmatpush1.bf16.msra.mxu1 %v8513_v45  ;;  %v1660_v44 = vld [vmem:[#allocation11 + $0x5a0] sm:$0xff] }
 0x168   : > { %1394 = vmatprep.subr.bf16.mxu0 %v8518_v46  ;;  %1435 = vmatprep.subr.bf16.mxu1 %v8521_v47  ;;  %v8594_v45 = vld [vmem:[#allocation8 + $0x108] ss:$16 sps:$4 sm:$0xff]   ;;  %v7686_v47 = vcombine.high %v1648_v43, %v1660_v44 }
 0x169   : > { %v8597_v46 = vld [vmem:[#allocation8 + $0x308] ss:$16 sps:$4 sm:$0xff]  }
 0x16b   : > { %1395 = vmatpush1.bf16.msra.mxu0 %v8516_v48  ;;  %1436 = vmatpush1.bf16.msra.mxu1 %v8519_v49  ;;  %v1624_v48 = vld [vmem:[#allocation11 + $0x480] sm:$0xff] }
 0x16c   : > { %1396 = vmatprep.subr.bf16.mxu0 %v8524_v50  ;;  %1437 = vmatprep.subr.bf16.mxu1 %v8527_v51  ;;  %v1636_v49 = vld [vmem:[#allocation11 + $0x4e0] sm:$0xff]  ;;  %v7685_v50 = vcombine.low %v1648_v43, %v1660_v44 }
 0x16d   : > { %v7662_v51 = vcombine.high %v1624_v48, %v1636_v49  ;;  %v1816_v44 = vld [vmem:[#allocation11 + $0xa80] sm:$0xff] }
 0x16f   : > { %1397 = vmatpush1.bf16.msra.mxu0 %v8522_v52  ;;  %1438 = vmatpush1.bf16.msra.mxu1 %v8525_v53  ;;  %v1600_v52 = vld [vmem:[#allocation11 + $0x3c0] sm:$0xff] }
 0x170   : > { %1398 = vmatprep.subr.bf16.mxu0 %v8530_v54  ;;  %1439 = vmatprep.subr.bf16.mxu1 %v8533_v55  ;;  %v1612_v53 = vld [vmem:[#allocation11 + $0x420] sm:$0xff]  ;;  %v7661_v54 = vcombine.low %v1624_v48, %v1636_v49 }
 0x171   : > { %v7638_v55 = vcombine.high %v1600_v52, %v1612_v53 }
 0x173   : > { %1399 = vmatpush1.bf16.msra.mxu0 %v8528_v56  ;;  %1440 = vmatpush1.bf16.msra.mxu1 %v8531_v57  ;;  %v1576_v56 = vld [vmem:[#allocation11 + $0x300] sm:$0xff] }
 0x174   : > { %1400 = vmatprep.subr.bf16.mxu0 %v8536_v58  ;;  %1441 = vmatprep.subr.bf16.mxu1 %v8539_v59  ;;  %v1588_v57 = vld [vmem:[#allocation11 + $0x360] sm:$0xff]  ;;  %v7637_v58 = vcombine.low %v1600_v52, %v1612_v53 }
 0x175   : > { %v7614_v59 = vcombine.high %v1576_v56, %v1588_v57  ;;  %v1792_v52 = vld [vmem:[#allocation11 + $0x9c0] sm:$0xff] }
 0x176   : > { %v1804_v53 = vld [vmem:[#allocation11 + $0xa20] sm:$0xff] }
 0x177   : > { %1401 = vmatpush1.bf16.msra.mxu0 %v8534_v60  ;;  %1442 = vmatpush1.bf16.msra.mxu1 %v8537_v61  ;;  %v1552_v60 = vld [vmem:[#allocation11 + $0x240] sm:$0xff] }
 0x178   : > { %1402 = vmatprep.subr.bf16.mxu0 %v8542_v62  ;;  %1443 = vmatprep.subr.bf16.mxu1 %v8545_v63  ;;  %v1564_v61 = vld [vmem:[#allocation11 + $0x2a0] sm:$0xff] }
 0x179   : > { %v2032_v62 = vld [vmem:[#allocation11 + $0x1140] sm:$0xff] }
 0x17a   : > { %v2044_v63 = vld [vmem:[#allocation11 + $0x11a0] sm:$0xff] }
 0x17b   : > { %1403 = vmatpush1.bf16.msra.mxu0 %v8540_v0  ;;  %1444 = vmatpush1.bf16.msra.mxu1 %v8543_v1  ;;  %v7613_v0 = vcombine.low %v1576_v56, %v1588_v57  ;;  %v8069_v1 = vcombine.low %v2032_v62, %v2044_v63 }
 0x17c   : > { %1404 = vmatprep.subr.bf16.mxu0 %v8548_v2  ;;  %1445 = vmatprep.subr.bf16.mxu1 %v8551_v3  ;;  %v9129_v2 = vld [vmem:[#allocation11 + $0x548] sm:$0xff]  ;;  %v7590_v3 = vcombine.high %v1552_v60, %v1564_v61 }
 0x17f   : > { %1405 = vmatpush1.bf16.msra.mxu0 %v8546_v4  ;;  %1446 = vmatpush1.bf16.msra.mxu1 %v8549_v5  ;;  %v1528_v4 = vld [vmem:[#allocation11 + $0x180] sm:$0xff] }
 0x180   : > { %1406 = vmatprep.subr.bf16.mxu0 %v8554_v6  ;;  %1447 = vmatprep.subr.bf16.mxu1 %v8557_v7  ;;  %v1540_v5 = vld [vmem:[#allocation11 + $0x1e0] sm:$0xff] }
 0x181   : > { %v2008_v7 = vld [vmem:[#allocation11 + $0x1080] sm:$0xff] }
 0x183   : > { %1407 = vmatpush2.bf16.msra.mxu0 %v8552_v8  ;;  %1448 = vmatpush2.bf16.msra.mxu1 %v8555_v9  ;;  %v2020_v8 = vld [vmem:[#allocation11 + $0x10e0] sm:$0xff]  ;;  %v7589_v9 = vcombine.low %v1552_v60, %v1564_v61 }
 0x184   : > { %1408 = vmatprep.subr.bf16.mxu0 %v8560_v13  ;;  %1449 = vmatprep.subr.bf16.mxu1 %v8563_v16  ;;  %v8045_v13 = vcombine.low %v2008_v7, %v2020_v8  ;;  %v8046_v16 = vcombine.high %v2008_v7, %v2020_v8  ;;  %v1768_v60 = vld [vmem:[#allocation11 + $0x900] sm:$0xff] }
 0x185   : > { %v1780_v61 = vld [vmem:[#allocation11 + $0x960] sm:$0xff] }
 0x186   : > { %v2224_v7 = vld [vmem:[#allocation11 + $0x1740] sm:$0xff] }
 0x187   : > { %1409 = vmatpush2.bf16.msra.mxu0 %v8558_v17  ;;  %1450 = vmatpush2.bf16.msra.mxu1 %v8561_v18  ;;  %v7566_v17 = vcombine.high %v1528_v4, %v1540_v5  ;;  %v1504_v18 = vld [vmem:[#allocation11 + $0xc0] sm:$0xff] }
 0x188   : > { %1410 = vmatprep.subr.bf16.mxu0 %v8566_v19  ;;  %1451 = vmatprep.subr.bf16.mxu1 %v8569_v20  ;;  %v1516_v19 = vld [vmem:[#allocation11 + $0x120] sm:$0xff] }
 0x189   : > { %v1984_v20 = vld [vmem:[#allocation11 + $0xfc0] sm:$0xff] }
 0x18a   : > { %v2236_v8 = vld [vmem:[#allocation11 + $0x17a0] sm:$0xff] }
 0x18b   : > { %1411 = vmatpush2.bf16.msra.mxu0 %v8564_v21  ;;  %1452 = vmatpush2.bf16.msra.mxu1 %v8567_v22  ;;  %v1996_v21 = vld [vmem:[#allocation11 + $0x1020] sm:$0xff]  ;;  %v7565_v22 = vcombine.low %v1528_v4, %v1540_v5 }
 0x18c   : > { %1412 = vmatprep.subr.bf16.mxu0 %v8572_v23  ;;  %1453 = vmatprep.subr.bf16.mxu1 %v8575_v24  ;;  %v8021_v23 = vcombine.low %v1984_v20, %v1996_v21  ;;  %v8022_v24 = vcombine.high %v1984_v20, %v1996_v21  ;;  %v1744_v4 = vld [vmem:[#allocation11 + $0x840] sm:$0xff] }
 0x18d   : > { %v1756_v5 = vld [vmem:[#allocation11 + $0x8a0] sm:$0xff] }
 0x18e   : > { %v2200_v20 = vld [vmem:[#allocation11 + $0x1680] sm:$0xff] }
 0x18f   : > { %1413 = vmatpush2.bf16.msra.mxu0 %v8570_v25  ;;  %1454 = vmatpush2.bf16.msra.mxu1 %v8573_v26  ;;  %v7542_v25 = vcombine.high %v1504_v18, %v1516_v19  ;;  %v1480_v26 = vld [vmem:[#allocation11] sm:$0xff] }
 0x190   : > { %1414 = vmatprep.subr.bf16.mxu0 %v8578_v27  ;;  %1455 = vmatprep.subr.bf16.mxu1 %v8581_v28  ;;  %v1492_v27 = vld [vmem:[#allocation11 + $0x60] sm:$0xff] }
 0x191   : > { %v1960_v28 = vld [vmem:[#allocation11 + $0xf00] sm:$0xff] }
 0x192   : > { %v2212_v21 = vld [vmem:[#allocation11 + $0x16e0] sm:$0xff] }
 0x193   : > { %1415 = vmatpush2.bf16.msra.mxu0 %v8576_v29  ;;  %1456 = vmatpush2.bf16.msra.mxu1 %v8579_v30  ;;  %v1972_v29 = vld [vmem:[#allocation11 + $0xf60] sm:$0xff]  ;;  %v7541_v30 = vcombine.low %v1504_v18, %v1516_v19 }
 0x194   : > { %1416 = vmatprep.subr.bf16.mxu0 %v8584_v31  ;;  %1457 = vmatprep.subr.bf16.mxu1 %v8587_v32  ;;  %v7997_v31 = vcombine.low %v1960_v28, %v1972_v29  ;;  %v7998_v32 = vcombine.high %v1960_v28, %v1972_v29  ;;  %v1720_v18 = vld [vmem:[#allocation11 + $0x780] sm:$0xff] }
 0x195   : > { %v1732_v19 = vld [vmem:[#allocation11 + $0x7e0] sm:$0xff] }
 0x196   : > { %v2176_v28 = vld [vmem:[#allocation11 + $0x15c0] sm:$0xff] }
 0x197   : > { %1417 = vmatpush2.bf16.msra.mxu0 %v8582_v33  ;;  %1458 = vmatpush2.bf16.msra.mxu1 %v8585_v35  ;;  %v7518_v33 = vcombine.high %v1480_v26, %v1492_v27  ;;  %v1840_v35 = vld [vmem:[#allocation11 + $0xb40] sm:$0xff] }
 0x198   : > { %1418 = vmatprep.subr.bf16.mxu0 %v8590_v36  ;;  %1459 = vmatprep.subr.bf16.mxu1 %v8593_v37  ;;  %v1852_v36 = vld [vmem:[#allocation11 + $0xba0] sm:$0xff] }
 0x199   : > { %v1936_v37 = vld [vmem:[#allocation11 + $0xe40] sm:$0xff]  ;;  %v7878_v43 = vcombine.high %v1840_v35, %v1852_v36  ;;  %v7877_v48 = vcombine.low %v1840_v35, %v1852_v36 }
 0x19a   : > { %v2188_v29 = vld [vmem:[#allocation11 + $0x1620] sm:$0xff] }
 0x19b   : > { %1419 = vmatpush2.bf16.msra.mxu0 %v8588_v38  ;;  %1460 = vmatpush2.bf16.msra.mxu1 %v8591_v39  ;;  %v1948_v38 = vld [vmem:[#allocation11 + $0xea0] sm:$0xff]  ;;  %v7517_v39 = vcombine.low %v1480_v26, %v1492_v27 }
 0x19c   : > { %1420 = vmatprep.subr.bf16.mxu0 %v8596_v40  ;;  %1461 = vmatprep.subr.bf16.mxu1 %v8599_v42  ;;  %v7973_v40 = vcombine.low %v1936_v37, %v1948_v38  ;;  %v7974_v42 = vcombine.high %v1936_v37, %v1948_v38  ;;  %v1696_v26 = vld [vmem:[#allocation11 + $0x6c0] sm:$0xff] }
 0x19d   : > { %v1708_v27 = vld [vmem:[#allocation11 + $0x720] sm:$0xff] }
 0x19e   : > { %v1672_v35 = vld [vmem:[#allocation11 + $0x600] sm:$0xff] }
 0x19f   : > { %1421 = vmatpush2.bf16.msra.mxu0 %v8594_v45  ;;  %1462 = vmatpush2.bf16.msra.mxu1 %v8597_v46  ;;  %v1828_v45 = vld [vmem:[#allocation11 + $0xae0] sm:$0xff] }
 0x1a0   : > { %6214 = vmatprep.subr.bf16.mxu0 %v7686_v47  ;;  %v1912_v46 = vld [vmem:[#allocation11 + $0xd80] sm:$0xff]  ;;  %v7853_v56 = vcombine.low %v1816_v44, %v1828_v45 }
 0x1a1   : > { %v1924_v47 = vld [vmem:[#allocation11 + $0xde0] sm:$0xff] }
 0x1a2   : > { %1423 = vmatmul.mubr.bf16.vlgmr.msra.gmra.mxu0 %v9123_v41  ;;  %1464 = vmatmul.mubr.bf16.vlgmr.msra.gmra.mxu1 %v9121_v34  ;;  %v8070_v41 = vcombine.high %v2032_v62, %v2044_v63  ;;  %v9131_v34 = vld [vmem:[#allocation11 + $0x5a8] sm:$0xff]  ;;  %v7949_v49 = vcombine.low %v1912_v46, %v1924_v47  ;;  %v1864_v62 = vld [vmem:[#allocation11 + $0xc00] sm:$0xff] }
 0x1a3   : > { %6215 = vmatpush1.bf16.msra.mxu0 %v7685_v50  ;;  %v7687_v6 = vcombine.low %v9129_v2, %v9131_v34  ;;  %v7950_v50 = vcombine.high %v1912_v46, %v1924_v47  ;;  %v1876_v63 = vld [vmem:[#allocation11 + $0xc60] sm:$0xff] }
 0x1a4   : > { %6216 = vmatprep.subr.bf16.mxu0 %v7662_v51  ;;  %6255 = vmatprep.subr.bf16.mxu1 %v8070_v41  ;;  %v7854_v51 = vcombine.high %v1816_v44, %v1828_v45  ;;  %v7902_v41 = vcombine.high %v1864_v62, %v1876_v63  ;;  %v1684_v36 = vld [vmem:[#allocation11 + $0x660] sm:$0xff] }
 0x1a5   : > { %6256 = vmatpush1.bf16.msra.mxu1 %v8069_v1  ;;  %v7901_v1 = vcombine.low %v1864_v62, %v1876_v63  ;;  %v2152_v37 = vld [vmem:[#allocation11 + $0x1500] sm:$0xff]  ;;  %v7709_v46 = vcombine.low %v1672_v35, %v1684_v36  ;;  %v9137_v62 = vld [vmem:[#allocation11 + $0x1148] sm:$0xff] }
 0x1a6   : > { %6257 = vmatprep.subr.bf16.mxu1 %v8046_v16  ;;  %v8262_v16 = vcombine.high %v2224_v7, %v2236_v8  ;;  %v2164_v38 = vld [vmem:[#allocation11 + $0x1560] sm:$0xff]  ;;  %v9139_v63 = vld [vmem:[#allocation11 + $0x11a8] sm:$0xff] }
 0x1a7   : > { %6217 = vmatpush1.bf16.msra.mxu0 %v7661_v54  ;;  %v1888_v54 = vld [vmem:[#allocation11 + $0xcc0] sm:$0xff] }
 0x1a8   : > { %6218 = vmatprep.subr.bf16.mxu0 %v7638_v55  ;;  %v1900_v55 = vld [vmem:[#allocation11 + $0xd20] sm:$0xff] }
 0x1a9   : > { %6258 = vmatpush1.bf16.msra.mxu1 %v8045_v13  ;;  %v7925_v57 = vcombine.low %v1888_v54, %v1900_v55  ;;  %v8261_v13 = vcombine.low %v2224_v7, %v2236_v8  ;;  %v2128_v44 = vld [vmem:[#allocation11 + $0x1440] sm:$0xff] }
 0x1aa   : > { %6259 = vmatprep.subr.bf16.mxu1 %v8022_v24  ;;  %v8238_v24 = vcombine.high %v2200_v20, %v2212_v21  ;;  %v2140_v45 = vld [vmem:[#allocation11 + $0x14a0] sm:$0xff] }
 0x1ab   : > { %6219 = vmatpush1.bf16.msra.mxu0 %v7637_v58  ;;  %v7926_v58 = vcombine.high %v1888_v54, %v1900_v55  ;;  %v8165_v47 = vcombine.low %v2128_v44, %v2140_v45  ;;  %v2080_v54 = vld [vmem:[#allocation11 + $0x12c0] sm:$0xff] }
 0x1ac   : > { %6220 = vmatprep.subr.bf16.mxu0 %v7614_v59  ;;  %v7830_v59 = vcombine.high %v1792_v52, %v1804_v53  ;;  %v2092_v55 = vld [vmem:[#allocation11 + $0x1320] sm:$0xff] }
 0x1ad   : > { %6260 = vmatpush1.bf16.msra.mxu1 %v8021_v23  ;;  %v8237_v23 = vcombine.low %v2200_v20, %v2212_v21 }
 0x1ae   : > { %6261 = vmatprep.subr.bf16.mxu1 %v7998_v32  ;;  %v8214_v32 = vcombine.high %v2176_v28, %v2188_v29 }
 0x1af   : > { %6221 = vmatpush1.bf16.msra.mxu0 %v7613_v0  ;;  %v7829_v0 = vcombine.low %v1792_v52, %v1804_v53 }
 0x1b0   : > { %6222 = vmatprep.subr.bf16.mxu0 %v7590_v3  ;;  %v7806_v3 = vcombine.high %v1768_v60, %v1780_v61 }
 0x1b1   : > { %6262 = vmatpush1.bf16.msra.mxu1 %v7997_v31  ;;  %v8213_v31 = vcombine.low %v2176_v28, %v2188_v29 }
 0x1b2   : > { %6263 = vmatprep.subr.bf16.mxu1 %v7974_v42  ;;  %v8190_v42 = vcombine.high %v2152_v37, %v2164_v38 }
 0x1b3   : > { %6223 = vmatpush1.bf16.msra.mxu0 %v7589_v9  ;;  %v7805_v9 = vcombine.low %v1768_v60, %v1780_v61 }
 0x1b4   : > { %6224 = vmatprep.subr.bf16.mxu0 %v7566_v17  ;;  %v7782_v17 = vcombine.high %v1744_v4, %v1756_v5 }
 0x1b5   : > { %6264 = vmatpush1.bf16.msra.mxu1 %v7973_v40  ;;  %v8189_v40 = vcombine.low %v2152_v37, %v2164_v38 }
 0x1b6   : > { %6265 = vmatprep.subr.bf16.mxu1 %v7950_v50  ;;  %v2104_v50 = vld [vmem:[#allocation11 + $0x1380] sm:$0xff] }
 0x1b7   : > { %6225 = vmatpush1.bf16.msra.mxu0 %v7565_v22  ;;  %v7781_v22 = vcombine.low %v1744_v4, %v1756_v5 }
 0x1b8   : > { %6226 = vmatprep.subr.bf16.mxu0 %v7542_v25  ;;  %v7758_v25 = vcombine.high %v1720_v18, %v1732_v19 }
 0x1b9   : > { %6266 = vmatpush1.bf16.msra.mxu1 %v7949_v49  ;;  %v7688_v49 = vcombine.high %v9129_v2, %v9131_v34  ;;  %v1541_v2 = vld [vmem:[#allocation11 + $0x1e8] sm:$0xff] }
 0x1ba   : > { %6267 = vmatprep.subr.bf16.mxu1 %v7926_v58  ;;  %v2056_v58 = vld [vmem:[#allocation11 + $0x1200] sm:$0xff] }
 0x1bb   : > { %6227 = vmatpush1.bf16.msra.mxu0 %v7541_v30  ;;  %v7757_v30 = vcombine.low %v1720_v18, %v1732_v19 }
 0x1bc   : > { %6228 = vmatprep.subr.bf16.mxu0 %v7518_v33  ;;  %v7734_v33 = vcombine.high %v1696_v26, %v1708_v27 }
 0x1bd   : > { %6268 = vmatpush1.bf16.msra.mxu1 %v7925_v57  ;;  %v8117_v57 = vcombine.low %v2080_v54, %v2092_v55 }
 0x1be   : > { %6269 = vmatprep.subr.bf16.mxu1 %v7902_v41  ;;  %v9145_v41 = vld [vmem:[#allocation10] sm:$0xf] }
 0x1bf   : > { %6229 = vmatpush1.bf16.msra.mxu0 %v7517_v39  ;;  %v7733_v39 = vcombine.low %v1696_v26, %v1708_v27  ;;  %v655_v4 = vrot.slane %v9145_v41, %v9112_v14  ;;  %v1637_v26 = vld [vmem:[#allocation11 + $0x4e8] sm:$0xff] }
 0x1c0   : > { %6230 = vmatprep.subr.bf16.mxu0 %v7878_v43  ;;  %v7710_v43 = vcombine.high %v1672_v35, %v1684_v36  ;;  %v1577_v35 = vld [vmem:[#allocation11 + $0x308] sm:$0xff] }
 0x1c1   : > { %6270 = vmatpush1.bf16.msra.mxu1 %v7901_v1  ;;  %v8071_v1 = vcombine.low %v9137_v62, %v9139_v63  ;;  %v1589_v36 = vld [vmem:[#allocation11 + $0x368] sm:$0xff] }
 0x1c2   : > { %6271 = vmatprep.subr.bf16.mxu1 %v8262_v16  ;;  %v7616_v38 = vcombine.high %v1577_v35, %v1589_v36 }
 0x1c3   : > { %6231 = vmatpush2.bf16.msra.mxu0 %v7877_v48  ;;  %v8166_v48 = vcombine.high %v2128_v44, %v2140_v45  ;;  %v1529_v44 = vld [vmem:[#allocation11 + $0x188] sm:$0xff] }
 0x1c4   : > { %6232 = vmatprep.subr.bf16.mxu0 %v7854_v51  ;;  %v2116_v51 = vld [vmem:[#allocation11 + $0x13e0] sm:$0xff]  ;;  %v1505_v45 = vld [vmem:[#allocation11 + $0xc8] sm:$0xff] }
 0x1c5   : > { %6272 = vmatpush2.bf16.msra.mxu1 %v8261_v13  ;;  %v8141_v52 = vcombine.low %v2104_v50, %v2116_v51  ;;  %v8142_v53 = vcombine.high %v2104_v50, %v2116_v51  ;;  %v1493_v50 = vld [vmem:[#allocation11 + $0x68] sm:$0xff] }
 0x1c6   : > { %6273 = vmatprep.subr.bf16.mxu1 %v8238_v24 }
 0x1c7   : > { %6233 = vmatpush2.bf16.msra.mxu0 %v7853_v56  ;;  %v8118_v56 = vcombine.high %v2080_v54, %v2092_v55  ;;  %v1853_v54 = vld [vmem:[#allocation11 + $0xba8] sm:$0xff] }
 0x1c8   : > { %6234 = vmatprep.subr.bf16.mxu0 %v7830_v59  ;;  %v2068_v59 = vld [vmem:[#allocation11 + $0x1260] sm:$0xff] }
 0x1c9   : > { %6274 = vmatpush2.bf16.msra.mxu1 %v8237_v23  ;;  %v8094_v60 = vcombine.high %v2056_v58, %v2068_v59  ;;  %v8093_v61 = vcombine.low %v2056_v58, %v2068_v59  ;;  %v1829_v58 = vld [vmem:[#allocation11 + $0xae8] sm:$0xff] }
 0x1ca   : > { %6275 = vmatprep.subr.bf16.mxu1 %v8214_v32 }
 0x1cb   : > { %6235 = vmatpush2.bf16.msra.mxu0 %v7829_v0  ;;  %v8072_v0 = vcombine.high %v9137_v62, %v9139_v63 }
 0x1cc   : > { %6236 = vmatprep.subr.bf16.mxu0 %v7806_v3  ;;  %v651_v3 = vrot.slane %v9145_v41, %v9106_v11 }
 0x1cd   : > { %6276 = vmatpush2.bf16.msra.mxu1 %v8213_v31  ;;  %v1613_v31 = vld [vmem:[#allocation11 + $0x428] sm:$0xff] }
 0x1ce   : > { %6277 = vmatprep.subr.bf16.mxu1 %v8190_v42  ;;  %v7615_v42 = vcombine.low %v1577_v35, %v1589_v36 }
 0x1cf   : > { %6237 = vmatpush2.bf16.msra.mxu0 %v7805_v9 }
 0x1d0   : > { %6238 = vmatprep.subr.bf16.mxu0 %v7782_v17 }
 0x1d1   : > { %6278 = vmatpush2.bf16.msra.mxu1 %v8189_v40  ;;  %v1565_v40 = vld [vmem:[#allocation11 + $0x2a8] sm:$0xff] }
 0x1d2   : > { %6279 = vmatprep.subr.bf16.mxu1 %v8166_v48 }
 0x1d3   : > { %6239 = vmatpush2.bf16.msra.mxu0 %v7781_v22 }
 0x1d4   : > { %6240 = vmatprep.subr.bf16.mxu0 %v7758_v25  ;;  %v1625_v25 = vld [vmem:[#allocation11 + $0x488] sm:$0xff] }
 0x1d5   : > { %6280 = vmatpush2.bf16.msra.mxu1 %v8165_v47  ;;  %v7664_v29 = vcombine.high %v1625_v25, %v1637_v26  ;;  %v7663_v32 = vcombine.low %v1625_v25, %v1637_v26  ;;  %v7567_v47 = vcombine.low %v1529_v44, %v1541_v2  ;;  %v659_v25 = vrot.slane %v9145_v41, %v9109_v12 }
 0x1d6   : > { %6281 = vmatprep.subr.bf16.mxu1 %v8142_v53  ;;  %v1841_v53 = vld [vmem:[#allocation11 + $0xb48] sm:$0xff] }
 0x1d7   : > { %6241 = vmatpush2.bf16.msra.mxu0 %v7757_v30  ;;  %v1601_v30 = vld [vmem:[#allocation11 + $0x3c8] sm:$0xff]  ;;  %v7879_v59 = vcombine.low %v1841_v53, %v1853_v54 }
 0x1d8   : > { %6242 = vmatprep.subr.bf16.mxu0 %v7734_v33  ;;  %v7640_v33 = vcombine.high %v1601_v30, %v1613_v31  ;;  %v7639_v37 = vcombine.low %v1601_v30, %v1613_v31  ;;  %v663_v30 = vrot.slane %v9145_v41, %v9115_v15  ;;  %v1673_v31 = vld [vmem:[#allocation11 + $0x608] sm:$0xff] }
 0x1d9   : > { %6282 = vmatpush2.bf16.msra.mxu1 %v8141_v52 }
 0x1da   : > { %6283 = vmatprep.subr.bf16.mxu1 %v8118_v56  ;;  %v7880_v56 = vcombine.high %v1841_v53, %v1853_v54  ;;  %v1626_v53 = vld [vmem:[#allocation11 + $0x490] sm:$0xff] }
 0x1db   : > { %6243 = vmatpush2.bf16.msra.mxu0 %v7733_v39  ;;  %v1553_v39 = vld [vmem:[#allocation11 + $0x248] sm:$0xff]  ;;  %v1638_v54 = vld [vmem:[#allocation11 + $0x4f0] sm:$0xff] }
 0x1dc   : > { %6244 = vmatprep.subr.bf16.mxu0 %v7710_v43  ;;  %v7592_v43 = vcombine.high %v1553_v39, %v1565_v40  ;;  %v7591_v34 = vcombine.low %v1553_v39, %v1565_v40 }
 0x1dd   : > { %6284 = vmatpush2.bf16.msra.mxu1 %v8117_v57  ;;  %v1817_v57 = vld [vmem:[#allocation11 + $0xa88] sm:$0xff] }
 0x1de   : > { %6285 = vmatprep.subr.bf16.mxu1 %v8094_v60  ;;  %v7856_v60 = vcombine.high %v1817_v57, %v1829_v58 }
 0x1df   : > { %6245 = vmatpush2.bf16.msra.mxu0 %v7709_v46  ;;  %v1517_v46 = vld [vmem:[#allocation11 + $0x128] sm:$0xff] }
 0x1e0   : > { %6296 = vmatprep.subr.bf16.mxu0 %v7688_v49  ;;  %v7544_v48 = vcombine.high %v1505_v45, %v1517_v46  ;;  %v1481_v49 = vld [vmem:[#allocation11 + $0x8] sm:$0xff]  ;;  %v7543_v51 = vcombine.low %v1505_v45, %v1517_v46 }
 0x1e1   : > { %6286 = vmatpush2.bf16.msra.mxu1 %v8093_v61  ;;  %v7520_v52 = vcombine.high %v1481_v49, %v1493_v50  ;;  %v7519_v55 = vcombine.low %v1481_v49, %v1493_v50  ;;  %v1793_v61 = vld [vmem:[#allocation11 + $0x9c8] sm:$0xff] }
 0x1e2   : > { %6337 = vmatprep.subr.bf16.mxu1 %v8072_v0  ;;  %v1805_v0 = vld [vmem:[#allocation11 + $0xa28] sm:$0xff] }
 0x222   : > { %v1342_v5 = vpop.f32.mrf.mxu0  ;;  %v1383_v7 = vpop.f32.mrf.mxu1 }
 0x223   : > { %v1343_v8 = vadd.f32 %v1342_v5, %v651_v3  ;;  %v7855_v3 = vcombine.low %v1817_v57, %v1829_v58  ;;  %v1769_v5 = vld [vmem:[#allocation11 + $0x908] sm:$0xff] }
 0x224   : > { %v1344_v9 = vpop.f32.mrf.mxu0  ;;  %v1385_v13 = vpop.f32.mrf.mxu1 }
 0x225   : > { %v1384_v16 = vadd.f32 %v1383_v7, %v1343_v8  ;;  %v1345_v17 = vadd.f32 %v1344_v9, %v655_v4  ;;  %v7832_v4 = vcombine.high %v1793_v61, %v1805_v0  ;;  %v1781_v7 = vld [vmem:[#allocation11 + $0x968] sm:$0xff]  ;;  %v7831_v8 = vcombine.low %v1793_v61, %v1805_v0  ;;  %v1602_v0 = vld [vmem:[#allocation11 + $0x3d0] sm:$0xff] }
 0x226   : > { %v1346_v18 = vpop.f32.mrf.mxu0  ;;  %v1387_v19 = vpop.f32.mrf.mxu1  ;;  %v7808_v9 = vcombine.high %v1769_v5, %v1781_v7  ;;  %v1997_v61 = vld [vmem:[#allocation11 + $0x1028] sm:$0xff] }
 0x227   : > { %v1386_v20 = vadd.f32 %v1385_v13, %v1345_v17  ;;  %v1472_v21 = vmax.f32 %v1384_v16, 0.0  ;;  %v1745_v13 = vld [vmem:[#allocation11 + $0x848] sm:$0xff]  ;;  %v7807_v17 = vcombine.low %v1769_v5, %v1781_v7  ;;  %v7665_v5 = vcombine.low %v1626_v53, %v1638_v54 }
 0x228   : > { %v1347_v22 = vpop.f32.mrf.mxu0  ;;  %v1388_v23 = vpop.f32.mrf.mxu1  ;;  %v1757_v16 = vld [vmem:[#allocation11 + $0x8a8] sm:$0xff] }
 0x229   : > { %v1473_v24 = vmax.f32 %v1386_v20, 0.0  ;;  %v9153_v28 = vpack.c.bf16 %v1472_v21, %v1472_v21  ;;  %v7784_v18 = vcombine.high %v1745_v13, %v1757_v16  ;;  %v1721_v19 = vld [vmem:[#allocation11 + $0x788] sm:$0xff]  ;;  %v7783_v21 = vcombine.low %v1745_v13, %v1757_v16  ;;  %v1578_v16 = vld [vmem:[#allocation11 + $0x310] sm:$0xff] }
 0x22a   : > { %v1733_v20 = vld [vmem:[#allocation11 + $0x7e8] sm:$0xff] }
 0x22b   : > { %v9151_v27 = vpack.c.bf16 %v1473_v24, %v1473_v24  ;;  %v7760_v22 = vcombine.high %v1721_v19, %v1733_v20  ;;  %v1697_v23 = vld [vmem:[#allocation11 + $0x6c8] sm:$0xff]  ;;  %v7759_v26 = vcombine.low %v1721_v19, %v1733_v20 }
 0x22c   : > { %v1709_v24 = vld [vmem:[#allocation11 + $0x728] sm:$0xff] }
 0x22d   : > { %6246 = vmatprep.mubr.bf16.mxu0 %v9151_v27  ;;  %v1973_v13 = vld [vmem:[#allocation11 + $0xf68] sm:$0xff] }
 0x22e   : > { %6247 = vmatmul.mubr.bf16.vlgmr.msra.gmra.mxu0 %v9153_v28  ;;  %v1937_v19 = vld [vmem:[#allocation11 + $0xe48] sm:$0xff] }
 0x22f   : > { %6297 = vmatpush1.bf16.msra.mxu0 %v7687_v6  ;;  %6328 = vmatprep.mubr.bf16.mxu0 %v9151_v27  ;;  %v7568_v6 = vcombine.high %v1529_v44, %v1541_v2  ;;  %v1650_v44 = vld [vmem:[#allocation11 + $0x550] sm:$0xff]  ;;  %v1949_v20 = vld [vmem:[#allocation11 + $0xea8] sm:$0xff] }
 0x230   : > { %6298 = vmatprep.subr.bf16.mxu0 %v7664_v29  ;;  %v7736_v29 = vcombine.high %v1697_v23, %v1709_v24  ;;  %v1662_v2 = vld [vmem:[#allocation11 + $0x5b0] sm:$0xff] }
 0x231   : > { %v7690_v49 = vcombine.high %v1650_v44, %v1662_v2  ;;  %v7689_v57 = vcombine.low %v1650_v44, %v1662_v2 }
 0x233   : > { %6299 = vmatpush1.bf16.msra.mxu0 %v7663_v32  ;;  %v1685_v32 = vld [vmem:[#allocation11 + $0x668] sm:$0xff] }
 0x234   : > { %6300 = vmatprep.subr.bf16.mxu0 %v7640_v33  ;;  %v7712_v40 = vcombine.high %v1673_v31, %v1685_v32  ;;  %v7711_v41 = vcombine.low %v1673_v31, %v1685_v32  ;;  %v1530_v31 = vld [vmem:[#allocation11 + $0x190] sm:$0xff] }
 0x235   : > { %v1542_v32 = vld [vmem:[#allocation11 + $0x1f0] sm:$0xff] }
 0x236   : > { %v7569_v44 = vcombine.low %v1530_v31, %v1542_v32 }
 0x237   : > { %6301 = vmatpush1.bf16.msra.mxu0 %v7639_v37  ;;  %v7735_v37 = vcombine.low %v1697_v23, %v1709_v24 }
 0x238   : > { %6302 = vmatprep.subr.bf16.mxu0 %v7616_v38 }
 0x23b   : > { %6303 = vmatpush1.bf16.msra.mxu0 %v7615_v42 }
 0x23c   : > { %6304 = vmatprep.subr.bf16.mxu0 %v7592_v43 }
 0x23f   : > { %6305 = vmatpush1.bf16.msra.mxu0 %v7591_v34 }
 0x240   : > { %6306 = vmatprep.subr.bf16.mxu0 %v7568_v6 }
 0x243   : > { %6307 = vmatpush1.bf16.msra.mxu0 %v7567_v47 }
 0x244   : > { %6308 = vmatprep.subr.bf16.mxu0 %v7544_v48 }
 0x247   : > { %6309 = vmatpush1.bf16.msra.mxu0 %v7543_v51  ;;  %v2009_v51 = vld [vmem:[#allocation11 + $0x1088] sm:$0xff] }
 0x248   : > { %6310 = vmatprep.subr.bf16.mxu0 %v7520_v52  ;;  %v2021_v52 = vld [vmem:[#allocation11 + $0x10e8] sm:$0xff] }
 0x249   : > { %v8048_v58 = vcombine.high %v2009_v51, %v2021_v52 }
 0x24b   : > { %6311 = vmatpush1.bf16.msra.mxu0 %v7519_v55 }
 0x24c   : > { %6312 = vmatprep.subr.bf16.mxu0 %v7880_v56 }
 0x24f   : > { %6313 = vmatpush2.bf16.msra.mxu0 %v7879_v59  ;;  %v7666_v59 = vcombine.high %v1626_v53, %v1638_v54  ;;  %v1842_v53 = vld [vmem:[#allocation11 + $0xb50] sm:$0xff] }
 0x250   : > { %6314 = vmatprep.subr.bf16.mxu0 %v7856_v60  ;;  %v1985_v60 = vld [vmem:[#allocation11 + $0xfc8] sm:$0xff]  ;;  %v1854_v54 = vld [vmem:[#allocation11 + $0xbb0] sm:$0xff] }
 0x251   : > { %v8024_v7 = vcombine.high %v1985_v60, %v1997_v61 }
 0x253   : > { %6315 = vmatpush2.bf16.msra.mxu0 %v7855_v3  ;;  %v1614_v3 = vld [vmem:[#allocation11 + $0x430] sm:$0xff] }
 0x254   : > { %6316 = vmatprep.subr.bf16.mxu0 %v7832_v4  ;;  %v8047_v4 = vcombine.low %v2009_v51, %v2021_v52  ;;  %v7641_v62 = vcombine.low %v1602_v0, %v1614_v3  ;;  %v2225_v51 = vld [vmem:[#allocation11 + $0x1748] sm:$0xff] }
 0x255   : > { %v2237_v52 = vld [vmem:[#allocation11 + $0x17a8] sm:$0xff] }
 0x257   : > { %6317 = vmatpush2.bf16.msra.mxu0 %v7831_v8  ;;  %v7642_v8 = vcombine.high %v1602_v0, %v1614_v3  ;;  %v2213_v0 = vld [vmem:[#allocation11 + $0x16e8] sm:$0xff]  ;;  %v1818_v3 = vld [vmem:[#allocation11 + $0xa90] sm:$0xff] }
 0x258   : > { %6318 = vmatprep.subr.bf16.mxu0 %v7808_v9  ;;  %v1961_v9 = vld [vmem:[#allocation11 + $0xf08] sm:$0xff] }
 0x259   : > { %v8000_v63 = vcombine.high %v1961_v9, %v1973_v13  ;;  %v7999_v23 = vcombine.low %v1961_v9, %v1973_v13  ;;  %v2177_v13 = vld [vmem:[#allocation11 + $0x15c8] sm:$0xff] }
 0x25b   : > { %6319 = vmatpush2.bf16.msra.mxu0 %v7807_v17  ;;  %v1590_v17 = vld [vmem:[#allocation11 + $0x370] sm:$0xff] }
 0x25c   : > { %6320 = vmatprep.subr.bf16.mxu0 %v7784_v18  ;;  %v8023_v18 = vcombine.low %v1985_v60, %v1997_v61  ;;  %v7617_v24 = vcombine.low %v1578_v16, %v1590_v17  ;;  %v7882_v60 = vcombine.high %v1842_v53, %v1854_v54  ;;  %v2201_v61 = vld [vmem:[#allocation11 + $0x1688] sm:$0xff] }
 0x25f   : > { %6321 = vmatpush2.bf16.msra.mxu0 %v7783_v21  ;;  %v1554_v21 = vld [vmem:[#allocation11 + $0x250] sm:$0xff] }
 0x260   : > { %6322 = vmatprep.subr.bf16.mxu0 %v7760_v22  ;;  %v1566_v22 = vld [vmem:[#allocation11 + $0x2b0] sm:$0xff] }
 0x262   : > { %v1424_v33 = vpop.f32.mrf.mxu0  ;;  %v1465_v35 = vpop.f32.mrf.mxu1 }
 0x263   : > { %v1425_v36 = vadd.f32 %v1424_v33, %v659_v25  ;;  %6323 = vmatpush2.bf16.msra.mxu0 %v7759_v26  ;;  %v7976_v25 = vcombine.high %v1937_v19, %v1949_v20  ;;  %v7594_v26 = vcombine.high %v1554_v21, %v1566_v22  ;;  %v7975_v33 = vcombine.low %v1937_v19, %v1949_v20  ;;  %v2153_v20 = vld [vmem:[#allocation11 + $0x1508] sm:$0xff] }
 0x264   : > { %v1426_v38 = vpop.f32.mrf.mxu0  ;;  %v1467_v39 = vpop.f32.mrf.mxu1  ;;  %6324 = vmatprep.subr.bf16.mxu0 %v7736_v29  ;;  %v1913_v29 = vld [vmem:[#allocation11 + $0xd88] sm:$0xff] }
 0x265   : > { %v1466_v42 = vadd.f32 %v1465_v35, %v1425_v36  ;;  %v1427_v43 = vadd.f32 %v1426_v38, %v663_v30  ;;  %v1925_v30 = vld [vmem:[#allocation11 + $0xde8] sm:$0xff]  ;;  %v7593_v35 = vcombine.low %v1554_v21, %v1566_v22  ;;  %v1770_v22 = vld [vmem:[#allocation11 + $0x910] sm:$0xff] }
 0x266   : > { %v1428_v34 = vpop.f32.mrf.mxu0  ;;  %v1469_v6 = vpop.f32.mrf.mxu1  ;;  %v7952_v36 = vcombine.high %v1913_v29, %v1925_v30  ;;  %v1889_v38 = vld [vmem:[#allocation11 + $0xcc8] sm:$0xff] }
 0x267   : > { %v1468_v45 = vadd.f32 %v1467_v39, %v1427_v43  ;;  %6325 = vmatpush2.bf16.msra.mxu0 %v7735_v37  ;;  %v1474_v46 = vmax.f32 %v1466_v42, 0.0  ;;  %v7570_v37 = vcombine.high %v1530_v31, %v1542_v32  ;;  %v1901_v39 = vld [vmem:[#allocation11 + $0xd28] sm:$0xff]  ;;  %v1518_v42 = vld [vmem:[#allocation11 + $0x130] sm:$0xff]  ;;  %v7951_v43 = vcombine.low %v1913_v29, %v1925_v30 }
 0x268   : > { %v1429_v47 = vpop.f32.mrf.mxu0  ;;  %v1470_v48 = vpop.f32.mrf.mxu1  ;;  %6326 = vmatprep.subr.bf16.mxu0 %v7712_v40  ;;  %v1506_v40 = vld [vmem:[#allocation11 + $0xd0] sm:$0xff]  ;;  %v7928_v2 = vcombine.high %v1889_v38, %v1901_v39  ;;  %v1865_v6 = vld [vmem:[#allocation11 + $0xc08] sm:$0xff] }
 0x269   : > { %v1475_v50 = vmax.f32 %v1468_v45, 0.0  ;;  %v9167_v56 = vpack.c.bf16 %v1474_v46, %v1474_v46  ;;  %v7546_v34 = vcombine.high %v1506_v40, %v1518_v42  ;;  %v1877_v45 = vld [vmem:[#allocation11 + $0xc68] sm:$0xff]  ;;  %v1494_v46 = vld [vmem:[#allocation11 + $0x70] sm:$0xff]  ;;  %v7927_v47 = vcombine.low %v1889_v38, %v1901_v39 }
 0x26a   : > { %v7545_v48 = vcombine.low %v1506_v40, %v1518_v42  ;;  %v2165_v21 = vld [vmem:[#allocation11 + $0x1568] sm:$0xff]  ;;  %v1746_v32 = vld [vmem:[#allocation11 + $0x850] sm:$0xff] }
 0x26b   : > { %v9165_v55 = vpack.c.bf16 %v1475_v50, %v1475_v50  ;;  %6327 = vmatpush2.bf16.msra.mxu0 %v7711_v41  ;;  %v1482_v41 = vld [vmem:[#allocation11 + $0x10] sm:$0xff]  ;;  %v2129_v30 = vld [vmem:[#allocation11 + $0x1448] sm:$0xff] }
 0x26c   : > { %6378 = vmatprep.subr.bf16.mxu0 %v7690_v49  ;;  %v7904_v49 = vcombine.high %v1865_v6, %v1877_v45  ;;  %v7522_v50 = vcombine.high %v1482_v41, %v1494_v46  ;;  %v2141_v31 = vld [vmem:[#allocation11 + $0x14a8] sm:$0xff]  ;;  %v1722_v42 = vld [vmem:[#allocation11 + $0x790] sm:$0xff] }
 0x26d   : > { %6287 = vmatprep.mubr.bf16.mxu1 %v9165_v55  ;;  %v2105_v39 = vld [vmem:[#allocation11 + $0x1388] sm:$0xff] }
 0x26e   : > { %6288 = vmatmul.mubr.bf16.vlgmr.msra.gmra.mxu1 %v9167_v56  ;;  %6329 = vmatmul.mubr.bf16.vlgmr.msra.gmra.mxu0 %v9153_v28  ;;  %v2117_v40 = vld [vmem:[#allocation11 + $0x13e8] sm:$0xff] }
 0x26f   : > { %6338 = vmatpush1.bf16.msra.mxu1 %v8071_v1  ;;  %6369 = vmatprep.mubr.bf16.mxu1 %v9165_v55  ;;  %v7618_v1 = vcombine.high %v1578_v16, %v1590_v17  ;;  %v2189_v16 = vld [vmem:[#allocation11 + $0x1628] sm:$0xff]  ;;  %v1794_v17 = vld [vmem:[#allocation11 + $0x9d0] sm:$0xff] }
 0x270   : > { %6379 = vmatpush1.bf16.msra.mxu0 %v7689_v57  ;;  %6410 = vmatprep.mubr.bf16.mxu0 %v9151_v27  ;;  %v7903_v57 = vcombine.low %v1865_v6, %v1877_v45  ;;  %v2081_v45 = vld [vmem:[#allocation11 + $0x12c8] sm:$0xff] }
 0x271   : > { %6339 = vmatprep.subr.bf16.mxu1 %v8048_v58  ;;  %6380 = vmatprep.subr.bf16.mxu0 %v7666_v59  ;;  %v7521_v58 = vcombine.low %v1482_v41, %v1494_v46  ;;  %v8264_v59 = vcombine.high %v2225_v51, %v2237_v52  ;;  %v2093_v41 = vld [vmem:[#allocation11 + $0x1328] sm:$0xff]  ;;  %v1698_v46 = vld [vmem:[#allocation11 + $0x6d0] sm:$0xff] }
 0x273   : > { %6340 = vmatpush1.bf16.msra.mxu1 %v8047_v4  ;;  %v1830_v4 = vld [vmem:[#allocation11 + $0xaf0] sm:$0xff] }
 0x274   : > { %6381 = vmatpush1.bf16.msra.mxu0 %v7665_v5  ;;  %6341 = vmatprep.subr.bf16.mxu1 %v8024_v7  ;;  %v8263_v5 = vcombine.low %v2225_v51, %v2237_v52  ;;  %v7881_v7 = vcombine.low %v1842_v53, %v1854_v54  ;;  %v7858_v9 = vcombine.high %v1818_v3, %v1830_v4  ;;  %v2057_v52 = vld [vmem:[#allocation11 + $0x1208] sm:$0xff]  ;;  %v1674_v54 = vld [vmem:[#allocation11 + $0x610] sm:$0xff] }
 0x275   : > { %6382 = vmatprep.subr.bf16.mxu0 %v7642_v8  ;;  %v8240_v8 = vcombine.high %v2201_v61, %v2213_v0  ;;  %v2069_v53 = vld [vmem:[#allocation11 + $0x1268] sm:$0xff] }
 0x277   : > { %6342 = vmatpush1.bf16.msra.mxu1 %v8023_v18  ;;  %v1806_v18 = vld [vmem:[#allocation11 + $0xa30] sm:$0xff] }
 0x278   : > { %6383 = vmatpush1.bf16.msra.mxu0 %v7641_v62  ;;  %6343 = vmatprep.subr.bf16.mxu1 %v8000_v63  ;;  %v8239_v62 = vcombine.low %v2201_v61, %v2213_v0  ;;  %v7857_v63 = vcombine.low %v1818_v3, %v1830_v4  ;;  %v7834_v19 = vcombine.high %v1794_v17, %v1806_v18  ;;  %v2034_v0 = vld [vmem:[#allocation11 + $0x1150] sm:$0xff]  ;;  %v1651_v4 = vld [vmem:[#allocation11 + $0x558] sm:$0xff] }
 0x279   : > { %6384 = vmatprep.subr.bf16.mxu0 %v7618_v1  ;;  %v8216_v1 = vcombine.high %v2177_v13, %v2189_v16  ;;  %v2046_v3 = vld [vmem:[#allocation11 + $0x11b0] sm:$0xff] }
 0x27b   : > { %6344 = vmatpush1.bf16.msra.mxu1 %v7999_v23  ;;  %v1782_v23 = vld [vmem:[#allocation11 + $0x970] sm:$0xff] }
 0x27c   : > { %6385 = vmatpush1.bf16.msra.mxu0 %v7617_v24  ;;  %6345 = vmatprep.subr.bf16.mxu1 %v7976_v25  ;;  %v8215_v24 = vcombine.low %v2177_v13, %v2189_v16  ;;  %v7833_v25 = vcombine.low %v1794_v17, %v1806_v18  ;;  %v7810_v29 = vcombine.high %v1770_v22, %v1782_v23  ;;  %v2010_v16 = vld [vmem:[#allocation11 + $0x1090] sm:$0xff] }
 0x27d   : > { %6386 = vmatprep.subr.bf16.mxu0 %v7594_v26  ;;  %v8192_v26 = vcombine.high %v2153_v20, %v2165_v21  ;;  %v2022_v17 = vld [vmem:[#allocation11 + $0x10f0] sm:$0xff]  ;;  %v8073_v18 = vcombine.low %v2034_v0, %v2046_v3 }
 0x27f   : > { %6346 = vmatpush1.bf16.msra.mxu1 %v7975_v33  ;;  %v1758_v33 = vld [vmem:[#allocation11 + $0x8b0] sm:$0xff] }
 0x280   : > { %6387 = vmatpush1.bf16.msra.mxu0 %v7593_v35  ;;  %6347 = vmatprep.subr.bf16.mxu1 %v7952_v36  ;;  %v8191_v35 = vcombine.low %v2153_v20, %v2165_v21  ;;  %v7809_v36 = vcombine.low %v1770_v22, %v1782_v23  ;;  %v7786_v38 = vcombine.high %v1746_v32, %v1758_v33  ;;  %v1986_v20 = vld [vmem:[#allocation11 + $0xfd0] sm:$0xff]  ;;  %v1603_v23 = vld [vmem:[#allocation11 + $0x3d8] sm:$0xff] }
 0x281   : > { %6388 = vmatprep.subr.bf16.mxu0 %v7570_v37  ;;  %v8168_v37 = vcombine.high %v2129_v30, %v2141_v31  ;;  %v1998_v21 = vld [vmem:[#allocation11 + $0x1030] sm:$0xff] }
 0x283   : > { %6348 = vmatpush1.bf16.msra.mxu1 %v7951_v43  ;;  %v1734_v43 = vld [vmem:[#allocation11 + $0x7f0] sm:$0xff] }
 0x284   : > { %6389 = vmatpush1.bf16.msra.mxu0 %v7569_v44  ;;  %6349 = vmatprep.subr.bf16.mxu1 %v7928_v2  ;;  %v8167_v44 = vcombine.low %v2129_v30, %v2141_v31  ;;  %v7785_v2 = vcombine.low %v1746_v32, %v1758_v33  ;;  %v7762_v6 = vcombine.high %v1722_v42, %v1734_v43  ;;  %v1962_v31 = vld [vmem:[#allocation11 + $0xf10] sm:$0xff]  ;;  %v1579_v33 = vld [vmem:[#allocation11 + $0x318] sm:$0xff] }
 0x285   : > { %6390 = vmatprep.subr.bf16.mxu0 %v7546_v34  ;;  %v8144_v34 = vcombine.high %v2105_v39, %v2117_v40  ;;  %v1974_v32 = vld [vmem:[#allocation11 + $0xf70] sm:$0xff] }
 0x287   : > { %6350 = vmatpush1.bf16.msra.mxu1 %v7927_v47  ;;  %v1710_v47 = vld [vmem:[#allocation11 + $0x730] sm:$0xff] }
 0x288   : > { %6391 = vmatpush1.bf16.msra.mxu0 %v7545_v48  ;;  %6351 = vmatprep.subr.bf16.mxu1 %v7904_v49  ;;  %v8143_v48 = vcombine.low %v2105_v39, %v2117_v40  ;;  %v7761_v49 = vcombine.low %v1722_v42, %v1734_v43  ;;  %v7738_v51 = vcombine.high %v1698_v46, %v1710_v47  ;;  %v1938_v40 = vld [vmem:[#allocation11 + $0xe50] sm:$0xff]  ;;  %v1555_v43 = vld [vmem:[#allocation11 + $0x258] sm:$0xff] }
 0x289   : > { %6392 = vmatprep.subr.bf16.mxu0 %v7522_v50  ;;  %v8120_v50 = vcombine.high %v2081_v45, %v2093_v41  ;;  %v1950_v42 = vld [vmem:[#allocation11 + $0xeb0] sm:$0xff] }
 0x28b   : > { %6352 = vmatpush1.bf16.msra.mxu1 %v7903_v57  ;;  %v1686_v57 = vld [vmem:[#allocation11 + $0x670] sm:$0xff] }
 0x28c   : > { %6393 = vmatpush1.bf16.msra.mxu0 %v7521_v58  ;;  %6353 = vmatprep.subr.bf16.mxu1 %v8264_v59  ;;  %v8119_v58 = vcombine.low %v2081_v45, %v2093_v41  ;;  %v7737_v59 = vcombine.low %v1698_v46, %v1710_v47  ;;  %v7714_v61 = vcombine.high %v1674_v54, %v1686_v57  ;;  %v1914_v41 = vld [vmem:[#allocation11 + $0xd90] sm:$0xff]  ;;  %v1531_v47 = vld [vmem:[#allocation11 + $0x198] sm:$0xff] }
 0x28d   : > { %6394 = vmatprep.subr.bf16.mxu0 %v7882_v60  ;;  %v8096_v60 = vcombine.high %v2057_v52, %v2069_v53  ;;  %v1926_v46 = vld [vmem:[#allocation11 + $0xdf0] sm:$0xff] }
 0x28f   : > { %6354 = vmatpush2.bf16.msra.mxu1 %v8263_v5  ;;  %v1663_v5 = vld [vmem:[#allocation11 + $0x5b8] sm:$0xff] }
 0x290   : > { %6395 = vmatpush2.bf16.msra.mxu0 %v7881_v7  ;;  %6355 = vmatprep.subr.bf16.mxu1 %v8240_v8  ;;  %v8095_v7 = vcombine.low %v2057_v52, %v2069_v53  ;;  %v7713_v8 = vcombine.low %v1674_v54, %v1686_v57  ;;  %v7692_v13 = vcombine.high %v1651_v4, %v1663_v5  ;;  %v1890_v53 = vld [vmem:[#allocation11 + $0xcd0] sm:$0xff]  ;;  %v1507_v57 = vld [vmem:[#allocation11 + $0xd8] sm:$0xff] }
 0x291   : > { %6396 = vmatprep.subr.bf16.mxu0 %v7858_v9  ;;  %v8074_v9 = vcombine.high %v2034_v0, %v2046_v3  ;;  %v1902_v54 = vld [vmem:[#allocation11 + $0xd30] sm:$0xff] }
 0x292   : > { %v1866_v3 = vld [vmem:[#allocation11 + $0xc10] sm:$0xff] }
 0x293   : > { %6356 = vmatpush2.bf16.msra.mxu1 %v8239_v62  ;;  %v1627_v62 = vld [vmem:[#allocation11 + $0x498] sm:$0xff] }
 0x294   : > { %6397 = vmatpush2.bf16.msra.mxu0 %v7857_v63  ;;  %6357 = vmatprep.subr.bf16.mxu1 %v8216_v1  ;;  %v1639_v63 = vld [vmem:[#allocation11 + $0x4f8] sm:$0xff]  ;;  %v7691_v1 = vcombine.low %v1651_v4, %v1663_v5  ;;  %v1878_v4 = vld [vmem:[#allocation11 + $0xc70] sm:$0xff] }
 0x295   : > { %6398 = vmatprep.subr.bf16.mxu0 %v7834_v19  ;;  %v8050_v19 = vcombine.high %v2010_v16, %v2022_v17  ;;  %v7668_v22 = vcombine.high %v1627_v62, %v1639_v63  ;;  %v1483_v5 = vld [vmem:[#allocation11 + $0x18] sm:$0xff] }
 0x297   : > { %6358 = vmatpush2.bf16.msra.mxu1 %v8215_v24  ;;  %v1615_v24 = vld [vmem:[#allocation11 + $0x438] sm:$0xff] }
 0x298   : > { %6399 = vmatpush2.bf16.msra.mxu0 %v7833_v25  ;;  %6359 = vmatprep.subr.bf16.mxu1 %v8192_v26  ;;  %v8049_v25 = vcombine.low %v2010_v16, %v2022_v17  ;;  %v7667_v26 = vcombine.low %v1627_v62, %v1639_v63  ;;  %v7644_v30 = vcombine.high %v1603_v23, %v1615_v24  ;;  %v2226_v17 = vld [vmem:[#allocation11 + $0x1750] sm:$0xff]  ;;  %v1843_v62 = vld [vmem:[#allocation11 + $0xb58] sm:$0xff] }
 0x299   : > { %6400 = vmatprep.subr.bf16.mxu0 %v7810_v29  ;;  %v8026_v29 = vcombine.high %v1986_v20, %v1998_v21  ;;  %v1855_v63 = vld [vmem:[#allocation11 + $0xbb8] sm:$0xff] }
 0x29b   : > { %6360 = vmatpush2.bf16.msra.mxu1 %v8191_v35  ;;  %v1591_v35 = vld [vmem:[#allocation11 + $0x378] sm:$0xff] }
 0x29c   : > { %6401 = vmatpush2.bf16.msra.mxu0 %v7809_v36  ;;  %6361 = vmatprep.subr.bf16.mxu1 %v8168_v37  ;;  %v8025_v36 = vcombine.low %v1986_v20, %v1998_v21  ;;  %v7643_v37 = vcombine.low %v1603_v23, %v1615_v24  ;;  %v7620_v39 = vcombine.high %v1579_v33, %v1591_v35  ;;  %v2214_v23 = vld [vmem:[#allocation11 + $0x16f0] sm:$0xff]  ;;  %v1819_v24 = vld [vmem:[#allocation11 + $0xa98] sm:$0xff] }
 0x29d   : > { %6402 = vmatprep.subr.bf16.mxu0 %v7786_v38  ;;  %v8002_v38 = vcombine.high %v1962_v31, %v1974_v32  ;;  %v7884_v21 = vcombine.high %v1843_v62, %v1855_v63 }
 0x29f   : > { %6362 = vmatpush2.bf16.msra.mxu1 %v8167_v44  ;;  %v1567_v44 = vld [vmem:[#allocation11 + $0x2b8] sm:$0xff] }
 0x2a0   : > { %6403 = vmatpush2.bf16.msra.mxu0 %v7785_v2  ;;  %6363 = vmatprep.subr.bf16.mxu1 %v8144_v34  ;;  %v8001_v2 = vcombine.low %v1962_v31, %v1974_v32  ;;  %v7619_v34 = vcombine.low %v1579_v33, %v1591_v35  ;;  %v7596_v45 = vcombine.high %v1555_v43, %v1567_v44  ;;  %v2178_v32 = vld [vmem:[#allocation11 + $0x15d0] sm:$0xff]  ;;  %v1795_v35 = vld [vmem:[#allocation11 + $0x9d8] sm:$0xff] }
 0x2a1   : > { %6404 = vmatprep.subr.bf16.mxu0 %v7762_v6  ;;  %v7978_v6 = vcombine.high %v1938_v40, %v1950_v42  ;;  %v2190_v33 = vld [vmem:[#allocation11 + $0x1630] sm:$0xff] }
 0x2a3   : > { %6364 = vmatpush2.bf16.msra.mxu1 %v8143_v48  ;;  %v1543_v48 = vld [vmem:[#allocation11 + $0x1f8] sm:$0xff] }
 0x2a4   : > { %6405 = vmatpush2.bf16.msra.mxu0 %v7761_v49  ;;  %6365 = vmatprep.subr.bf16.mxu1 %v8120_v50  ;;  %v7977_v49 = vcombine.low %v1938_v40, %v1950_v42  ;;  %v7595_v50 = vcombine.low %v1555_v43, %v1567_v44  ;;  %v7572_v52 = vcombine.high %v1531_v47, %v1543_v48  ;;  %v2154_v42 = vld [vmem:[#allocation11 + $0x1510] sm:$0xff]  ;;  %v1771_v44 = vld [vmem:[#allocation11 + $0x918] sm:$0xff] }
 0x2a5   : > { %6406 = vmatprep.subr.bf16.mxu0 %v7738_v51  ;;  %v7954_v51 = vcombine.high %v1914_v41, %v1926_v46  ;;  %v2166_v43 = vld [vmem:[#allocation11 + $0x1570] sm:$0xff] }
 0x2a7   : > { %6366 = vmatpush2.bf16.msra.mxu1 %v8119_v58  ;;  %v1519_v58 = vld [vmem:[#allocation11 + $0x138] sm:$0xff] }
 0x2a8   : > { %6407 = vmatpush2.bf16.msra.mxu0 %v7737_v59  ;;  %6367 = vmatprep.subr.bf16.mxu1 %v8096_v60  ;;  %v7953_v59 = vcombine.low %v1914_v41, %v1926_v46  ;;  %v7571_v60 = vcombine.low %v1531_v47, %v1543_v48  ;;  %v7548_v0 = vcombine.high %v1507_v57, %v1519_v58  ;;  %v2130_v46 = vld [vmem:[#allocation11 + $0x1450] sm:$0xff]  ;;  %v1747_v48 = vld [vmem:[#allocation11 + $0x858] sm:$0xff] }
 0x2a9   : > { %6408 = vmatprep.subr.bf16.mxu0 %v7714_v61  ;;  %v7930_v61 = vcombine.high %v1890_v53, %v1902_v54  ;;  %v2142_v47 = vld [vmem:[#allocation11 + $0x14b0] sm:$0xff] }
 0x2ab   : > { %6368 = vmatpush2.bf16.msra.mxu1 %v8095_v7  ;;  %v1495_v7 = vld [vmem:[#allocation11 + $0x78] sm:$0xff] }
 0x2ac   : > { %6409 = vmatpush2.bf16.msra.mxu0 %v7713_v8  ;;  %6419 = vmatprep.subr.bf16.mxu1 %v8074_v9  ;;  %v7929_v8 = vcombine.low %v1890_v53, %v1902_v54  ;;  %v7547_v9 = vcombine.low %v1507_v57, %v1519_v58  ;;  %v7524_v16 = vcombine.high %v1483_v5, %v1495_v7  ;;  %v2106_v54 = vld [vmem:[#allocation11 + $0x1390] sm:$0xff]  ;;  %v1723_v58 = vld [vmem:[#allocation11 + $0x798] sm:$0xff] }
 0x2ad   : > { %6460 = vmatprep.subr.bf16.mxu0 %v7692_v13  ;;  %v7906_v13 = vcombine.high %v1866_v3, %v1878_v4  ;;  %v2118_v57 = vld [vmem:[#allocation11 + $0x13f0] sm:$0xff] }
 0x2ae   : > { %6370 = vmatmul.mubr.bf16.vlgmr.msra.gmra.mxu1 %v9167_v56 }
 0x2af   : > { %6411 = vmatmul.mubr.bf16.vlgmr.msra.gmra.mxu0 %v9153_v28  ;;  %6420 = vmatpush1.bf16.msra.mxu1 %v8073_v18  ;;  %v2238_v18 = vld [vmem:[#allocation11 + $0x17b0] sm:$0xff] }
 0x2b0   : > { %6451 = vmatprep.mubr.bf16.mxu1 %v9165_v55  ;;  %6461 = vmatpush1.bf16.msra.mxu0 %v7691_v1  ;;  %v7905_v1 = vcombine.low %v1866_v3, %v1878_v4  ;;  %v8266_v20 = vcombine.high %v2226_v17, %v2238_v18  ;;  %v2082_v4 = vld [vmem:[#allocation11 + $0x12d0] sm:$0xff] }
 0x2b1   : > { %6492 = vmatprep.mubr.bf16.mxu0 %v9151_v27  ;;  %6421 = vmatprep.subr.bf16.mxu1 %v8050_v19  ;;  %v7523_v19 = vcombine.low %v1483_v5, %v1495_v7  ;;  %v2094_v5 = vld [vmem:[#allocation11 + $0x1330] sm:$0xff]  ;;  %v1699_v7 = vld [vmem:[#allocation11 + $0x6d8] sm:$0xff] }
 0x2b2   : > { %6462 = vmatprep.subr.bf16.mxu0 %v7668_v22  ;;  %v2202_v22 = vld [vmem:[#allocation11 + $0x1690] sm:$0xff] }
 0x2b3   : > { %6422 = vmatpush1.bf16.msra.mxu1 %v8049_v25  ;;  %v1831_v25 = vld [vmem:[#allocation11 + $0xaf8] sm:$0xff] }
 0x2b4   : > { %6463 = vmatpush1.bf16.msra.mxu0 %v7667_v26  ;;  %6423 = vmatprep.subr.bf16.mxu1 %v8026_v29  ;;  %v8265_v26 = vcombine.low %v2226_v17, %v2238_v18  ;;  %v7883_v29 = vcombine.low %v1843_v62, %v1855_v63  ;;  %v7860_v31 = vcombine.high %v1819_v24, %v1831_v25  ;;  %v2058_v18 = vld [vmem:[#allocation11 + $0x1210] sm:$0xff]  ;;  %v1675_v63 = vld [vmem:[#allocation11 + $0x618] sm:$0xff] }
 0x2b5   : > { %6464 = vmatprep.subr.bf16.mxu0 %v7644_v30  ;;  %v8242_v30 = vcombine.high %v2202_v22, %v2214_v23  ;;  %v2070_v62 = vld [vmem:[#allocation11 + $0x1270] sm:$0xff] }
 0x2b7   : > { %6424 = vmatpush1.bf16.msra.mxu1 %v8025_v36  ;;  %v1807_v36 = vld [vmem:[#allocation11 + $0xa38] sm:$0xff] }
 0x2b8   : > { %6465 = vmatpush1.bf16.msra.mxu0 %v7643_v37  ;;  %6425 = vmatprep.subr.bf16.mxu1 %v8002_v38  ;;  %v8241_v37 = vcombine.low %v2202_v22, %v2214_v23  ;;  %v7859_v38 = vcombine.low %v1819_v24, %v1831_v25  ;;  %v7836_v40 = vcombine.high %v1795_v35, %v1807_v36  ;;  %v2035_v23 = vld [vmem:[#allocation11 + $0x1158] sm:$0xff]  ;;  %v1652_v25 = vld [vmem:[#allocation11 + $0x560] sm:$0xff] }
 0x2b9   : > { %6466 = vmatprep.subr.bf16.mxu0 %v7620_v39  ;;  %v8218_v39 = vcombine.high %v2178_v32, %v2190_v33  ;;  %v2047_v24 = vld [vmem:[#allocation11 + $0x11b8] sm:$0xff] }
 0x2bb   : > { %6426 = vmatpush1.bf16.msra.mxu1 %v8001_v2  ;;  %v1783_v2 = vld [vmem:[#allocation11 + $0x978] sm:$0xff] }
 0x2bc   : > { %6467 = vmatpush1.bf16.msra.mxu0 %v7619_v34  ;;  %6427 = vmatprep.subr.bf16.mxu1 %v7978_v6  ;;  %v8217_v34 = vcombine.low %v2178_v32, %v2190_v33  ;;  %v7835_v6 = vcombine.low %v1795_v35, %v1807_v36  ;;  %v7812_v41 = vcombine.high %v1771_v44, %v1783_v2  ;;  %v2011_v33 = vld [vmem:[#allocation11 + $0x1098] sm:$0xff] }
 0x2bd   : > { %6468 = vmatprep.subr.bf16.mxu0 %v7596_v45  ;;  %v8194_v45 = vcombine.high %v2154_v42, %v2166_v43  ;;  %v2023_v35 = vld [vmem:[#allocation11 + $0x10f8] sm:$0xff]  ;;  %v8075_v36 = vcombine.low %v2035_v23, %v2047_v24 }
 0x2bf   : > { %6428 = vmatpush1.bf16.msra.mxu1 %v7977_v49  ;;  %v1759_v49 = vld [vmem:[#allocation11 + $0x8b8] sm:$0xff] }
 0x2c0   : > { %6469 = vmatpush1.bf16.msra.mxu0 %v7595_v50  ;;  %6429 = vmatprep.subr.bf16.mxu1 %v7954_v51  ;;  %v8193_v50 = vcombine.low %v2154_v42, %v2166_v43  ;;  %v7811_v51 = vcombine.low %v1771_v44, %v1783_v2  ;;  %v7788_v53 = vcombine.high %v1747_v48, %v1759_v49  ;;  %v1987_v42 = vld [vmem:[#allocation11 + $0xfd8] sm:$0xff] }
 0x2c1   : > { %6470 = vmatprep.subr.bf16.mxu0 %v7572_v52  ;;  %v8170_v52 = vcombine.high %v2130_v46, %v2142_v47  ;;  %v1999_v43 = vld [vmem:[#allocation11 + $0x1038] sm:$0xff] }
 0x2c3   : > { %6430 = vmatpush1.bf16.msra.mxu1 %v7953_v59  ;;  %v1735_v59 = vld [vmem:[#allocation11 + $0x7f8] sm:$0xff] }
 0x2c4   : > { %6471 = vmatpush1.bf16.msra.mxu0 %v7571_v60  ;;  %6431 = vmatprep.subr.bf16.mxu1 %v7930_v61  ;;  %v8169_v60 = vcombine.low %v2130_v46, %v2142_v47  ;;  %v7787_v61 = vcombine.low %v1747_v48, %v1759_v49  ;;  %v7764_v3 = vcombine.high %v1723_v58, %v1735_v59  ;;  %v1963_v49 = vld [vmem:[#allocation11 + $0xf18] sm:$0xff] }
 0x2c5   : > { %6472 = vmatprep.subr.bf16.mxu0 %v7548_v0  ;;  %v8146_v0 = vcombine.high %v2106_v54, %v2118_v57  ;;  %v8028_v47 = vcombine.high %v1987_v42, %v1999_v43 }
 0x2c7   : > { %6432 = vmatpush1.bf16.msra.mxu1 %v7929_v8  ;;  %v1711_v8 = vld [vmem:[#allocation11 + $0x738] sm:$0xff] }
 0x2c8   : > { %6473 = vmatpush1.bf16.msra.mxu0 %v7547_v9  ;;  %6433 = vmatprep.subr.bf16.mxu1 %v7906_v13  ;;  %v8145_v9 = vcombine.low %v2106_v54, %v2118_v57  ;;  %v7763_v13 = vcombine.low %v1723_v58, %v1735_v59  ;;  %v7740_v17 = vcombine.high %v1699_v7, %v1711_v8 }
 0x2c9   : > { %6474 = vmatprep.subr.bf16.mxu0 %v7524_v16  ;;  %v8122_v16 = vcombine.high %v2082_v4, %v2094_v5  ;;  %v8027_v54 = vcombine.low %v1987_v42, %v1999_v43  ;;  %v1844_v42 = vld [vmem:[#allocation11 + $0xb60] sm:$0xff] }
 0x2ca   : > { %v1856_v43 = vld [vmem:[#allocation11 + $0xbc0] sm:$0xff] }
 0x2cb   : > { %6434 = vmatpush1.bf16.msra.mxu1 %v7905_v1  ;;  %v1687_v1 = vld [vmem:[#allocation11 + $0x678] sm:$0xff] }
 0x2cc   : > { %6475 = vmatpush1.bf16.msra.mxu0 %v7523_v19  ;;  %6435 = vmatprep.subr.bf16.mxu1 %v8266_v20  ;;  %v8121_v19 = vcombine.low %v2082_v4, %v2094_v5  ;;  %v7739_v20 = vcombine.low %v1699_v7, %v1711_v8  ;;  %v7716_v22 = vcombine.high %v1675_v63, %v1687_v1  ;;  %v1568_v4 = vld [vmem:[#allocation11 + $0x2c0] sm:$0xff] }
 0x2cd   : > { %6476 = vmatprep.subr.bf16.mxu0 %v7884_v21  ;;  %v8098_v21 = vcombine.high %v2058_v18, %v2070_v62 }
 0x2cf   : > { %6436 = vmatpush2.bf16.msra.mxu1 %v8265_v26  ;;  %v1664_v26 = vld [vmem:[#allocation11 + $0x5c0] sm:$0xff] }
 0x2d0   : > { %6477 = vmatpush2.bf16.msra.mxu0 %v7883_v29  ;;  %6437 = vmatprep.subr.bf16.mxu1 %v8242_v30  ;;  %v8097_v29 = vcombine.low %v2058_v18, %v2070_v62  ;;  %v7715_v30 = vcombine.low %v1675_v63, %v1687_v1  ;;  %v7694_v32 = vcombine.high %v1652_v25, %v1664_v26  ;;  %v1544_v18 = vld [vmem:[#allocation11 + $0x200] sm:$0xff] }
 0x2d1   : > { %6478 = vmatprep.subr.bf16.mxu0 %v7860_v31  ;;  %v8076_v31 = vcombine.high %v2035_v23, %v2047_v24  ;;  %v1520_v23 = vld [vmem:[#allocation11 + $0x140] sm:$0xff] }
 0x2d3   : > { %6438 = vmatpush2.bf16.msra.mxu1 %v8241_v37  ;;  %v1628_v37 = vld [vmem:[#allocation11 + $0x4a0] sm:$0xff] }
 0x2d4   : > { %6479 = vmatpush2.bf16.msra.mxu0 %v7859_v38  ;;  %6439 = vmatprep.subr.bf16.mxu1 %v8218_v39  ;;  %v1640_v38 = vld [vmem:[#allocation11 + $0x500] sm:$0xff]  ;;  %v7693_v39 = vcombine.low %v1652_v25, %v1664_v26 }
 0x2d5   : > { %6480 = vmatprep.subr.bf16.mxu0 %v7836_v40  ;;  %v8052_v40 = vcombine.high %v2011_v33, %v2023_v35  ;;  %v7670_v2 = vcombine.high %v1628_v37, %v1640_v38  ;;  %v7669_v46 = vcombine.low %v1628_v37, %v1640_v38 }
 0x2d7   : > { %6440 = vmatpush2.bf16.msra.mxu1 %v8217_v34  ;;  %v1604_v34 = vld [vmem:[#allocation11 + $0x3e0] sm:$0xff] }
 0x2d8   : > { %6481 = vmatpush2.bf16.msra.mxu0 %v7835_v6  ;;  %6441 = vmatprep.subr.bf16.mxu1 %v8194_v45  ;;  %v1616_v6 = vld [vmem:[#allocation11 + $0x440] sm:$0xff]  ;;  %v8051_v45 = vcombine.low %v2011_v33, %v2023_v35 }
 0x2d9   : > { %6482 = vmatprep.subr.bf16.mxu0 %v7812_v41  ;;  %v7646_v48 = vcombine.high %v1604_v34, %v1616_v6  ;;  %v7645_v58 = vcombine.low %v1604_v34, %v1616_v6  ;;  %v1496_v33 = vld [vmem:[#allocation11 + $0x80] sm:$0xff] }
 0x2db   : > { %6442 = vmatpush2.bf16.msra.mxu1 %v8193_v50  ;;  %v1975_v50 = vld [vmem:[#allocation11 + $0xf78] sm:$0xff] }
 0x2dc   : > { %6483 = vmatpush2.bf16.msra.mxu0 %v7811_v51  ;;  %6443 = vmatprep.subr.bf16.mxu1 %v8170_v52  ;;  %v1580_v52 = vld [vmem:[#allocation11 + $0x320] sm:$0xff]  ;;  %v8004_v59 = vcombine.high %v1963_v49, %v1975_v50  ;;  %v8003_v5 = vcombine.low %v1963_v49, %v1975_v50 }
 0x2dd   : > { %6484 = vmatprep.subr.bf16.mxu0 %v7788_v53  ;;  %v1592_v53 = vld [vmem:[#allocation11 + $0x380] sm:$0xff] }
 0x2de   : > { %v7621_v7 = vcombine.low %v1580_v52, %v1592_v53  ;;  %v1832_v49 = vld [vmem:[#allocation11 + $0xb00] sm:$0xff] }
 0x2df   : > { %6444 = vmatpush2.bf16.msra.mxu1 %v8169_v60  ;;  %v7622_v60 = vcombine.high %v1580_v52, %v1592_v53 }
 0x2e0   : > { %6485 = vmatpush2.bf16.msra.mxu0 %v7787_v61  ;;  %6445 = vmatprep.subr.bf16.mxu1 %v8146_v0  ;;  %v1939_v61 = vld [vmem:[#allocation11 + $0xe58] sm:$0xff] }
 0x2e1   : > { %6486 = vmatprep.subr.bf16.mxu0 %v7764_v3  ;;  %v1951_v0 = vld [vmem:[#allocation11 + $0xeb8] sm:$0xff]  ;;  %v1556_v3 = vld [vmem:[#allocation11 + $0x260] sm:$0xff] }
 0x2e2   : > { %v7980_v8 = vcombine.high %v1939_v61, %v1951_v0  ;;  %v7979_v62 = vcombine.low %v1939_v61, %v1951_v0  ;;  %v7597_v63 = vcombine.low %v1556_v3, %v1568_v4 }
 0x2e3   : > { %6446 = vmatpush2.bf16.msra.mxu1 %v8145_v9  ;;  %v7598_v9 = vcombine.high %v1556_v3, %v1568_v4  ;;  %v2155_v4 = vld [vmem:[#allocation11 + $0x1518] sm:$0xff] }
 0x2e4   : > { %6487 = vmatpush2.bf16.msra.mxu0 %v7763_v13  ;;  %6447 = vmatprep.subr.bf16.mxu1 %v8122_v16  ;;  %v1915_v13 = vld [vmem:[#allocation11 + $0xd98] sm:$0xff] }
 0x2e5   : > { %6488 = vmatprep.subr.bf16.mxu0 %v7740_v17  ;;  %v1927_v16 = vld [vmem:[#allocation11 + $0xdf8] sm:$0xff]  ;;  %v1532_v17 = vld [vmem:[#allocation11 + $0x1a0] sm:$0xff] }
 0x2e6   : > { %v7956_v1 = vcombine.high %v1915_v13, %v1927_v16  ;;  %v7955_v24 = vcombine.low %v1915_v13, %v1927_v16  ;;  %v7573_v25 = vcombine.low %v1532_v17, %v1544_v18 }
 0x2e7   : > { %6448 = vmatpush2.bf16.msra.mxu1 %v8121_v19  ;;  %v7574_v19 = vcombine.high %v1532_v17, %v1544_v18  ;;  %v2131_v18 = vld [vmem:[#allocation11 + $0x1458] sm:$0xff] }
 0x2e8   : > { %6489 = vmatpush2.bf16.msra.mxu0 %v7739_v20  ;;  %6449 = vmatprep.subr.bf16.mxu1 %v8098_v21  ;;  %v1891_v20 = vld [vmem:[#allocation11 + $0xcd8] sm:$0xff] }
 0x2e9   : > { %6490 = vmatprep.subr.bf16.mxu0 %v7716_v22  ;;  %v1903_v21 = vld [vmem:[#allocation11 + $0xd38] sm:$0xff]  ;;  %v1508_v22 = vld [vmem:[#allocation11 + $0xe0] sm:$0xff] }
 0x2ea   : > { %v7932_v26 = vcombine.high %v1891_v20, %v1903_v21  ;;  %v7931_v35 = vcombine.low %v1891_v20, %v1903_v21 }
 0x2eb   : > { %6450 = vmatpush2.bf16.msra.mxu1 %v8097_v29  ;;  %v7550_v29 = vcombine.high %v1508_v22, %v1520_v23 }
 0x2ec   : > { %6491 = vmatpush2.bf16.msra.mxu0 %v7715_v30  ;;  %6501 = vmatprep.subr.bf16.mxu1 %v8076_v31  ;;  %v1867_v30 = vld [vmem:[#allocation11 + $0xc18] sm:$0xff] }
 0x2ed   : > { %6542 = vmatprep.subr.bf16.mxu0 %v7694_v32  ;;  %v1879_v31 = vld [vmem:[#allocation11 + $0xc78] sm:$0xff]  ;;  %v1484_v32 = vld [vmem:[#allocation11 + $0x20] sm:$0xff] }
 0x2ee   : > { %6452 = vmatmul.mubr.bf16.vlgmr.msra.gmra.mxu1 %v9167_v56  ;;  %v9182_v44 = vpop.f32.mrf.mxu0  ;;  %v7908_v37 = vcombine.high %v1867_v30, %v1879_v31  ;;  %v7526_v38 = vcombine.high %v1484_v32, %v1496_v33  ;;  %v7525_v34 = vcombine.low %v1484_v32, %v1496_v33  ;;  %v2083_v33 = vld [vmem:[#allocation11 + $0x12d8] sm:$0xff] }
 0x2ef   : > { %6493 = vmatmul.mubr.bf16.vlgmr.msra.gmra.mxu0 %v9153_v28  ;;  %6502 = vmatpush1.bf16.msra.mxu1 %v8075_v36  ;;  %v7549_v36 = vcombine.low %v1508_v22, %v1520_v23  ;;  %v2107_v23 = vld [vmem:[#allocation11 + $0x1398] sm:$0xff] }
 0x2f0   : > { %6533 = vmatprep.mubr.bf16.mxu1 %v9165_v55  ;;  %6543 = vmatpush1.bf16.msra.mxu0 %v7693_v39  ;;  %v9186_v41 = vpop.f32.mrf.mxu0  ;;  %v2227_v39 = vld [vmem:[#allocation11 + $0x1758] sm:$0xff] }
 0x2f1   : > { %6574 = vmatprep.mubr.bf16.mxu0 %v9151_v27  ;;  %6503 = vmatprep.subr.bf16.mxu1 %v8052_v40  ;;  %v2239_v40 = vld [vmem:[#allocation11 + $0x17b8] sm:$0xff] }
 0x2f2   : > { %6544 = vmatprep.subr.bf16.mxu0 %v7670_v2  ;;  %v6252_v51 = vpop.f32.mrf.mxu0  ;;  %v7907_v2 = vcombine.low %v1867_v30, %v1879_v31  ;;  %v8268_v6 = vcombine.high %v2227_v39, %v2239_v40  ;;  %v8267_v50 = vcombine.low %v2227_v39, %v2239_v40 }
 0x2f3   : > { %6504 = vmatpush1.bf16.msra.mxu1 %v8051_v45  ;;  %v7886_v45 = vcombine.high %v1844_v42, %v1856_v43  ;;  %v7885_v51 = vcombine.low %v1844_v42, %v1856_v43  ;;  %v2059_v43 = vld [vmem:[#allocation11 + $0x1218] sm:$0xff] }
 0x2f4   : > { %6545 = vmatpush1.bf16.msra.mxu0 %v7669_v46  ;;  %v6253_v57 = vpop.f32.mrf.mxu0  ;;  %6505 = vmatprep.subr.bf16.mxu1 %v8028_v47  ;;  %v2203_v46 = vld [vmem:[#allocation11 + $0x1698] sm:$0xff] }
 0x2f5   : > { %6546 = vmatprep.subr.bf16.mxu0 %v7646_v48  ;;  %v2215_v47 = vld [vmem:[#allocation11 + $0x16f8] sm:$0xff]  ;;  %v1820_v48 = vld [vmem:[#allocation11 + $0xaa0] sm:$0xff] }
 0x2f6   : > { %v8244_v52 = vcombine.high %v2203_v46, %v2215_v47  ;;  %v7862_v53 = vcombine.high %v1820_v48, %v1832_v49  ;;  %v2191_v57 = vld [vmem:[#allocation11 + $0x1638] sm:$0xff]  ;;  %v7861_v61 = vcombine.low %v1820_v48, %v1832_v49  ;;  %v2036_v49 = vld [vmem:[#allocation11 + $0x1160] sm:$0xff] }
 0x2f7   : > { %6506 = vmatpush1.bf16.msra.mxu1 %v8027_v54  ;;  %v2179_v54 = vld [vmem:[#allocation11 + $0x15d8] sm:$0xff] }
 0x2f8   : > { %6547 = vmatpush1.bf16.msra.mxu0 %v7645_v58  ;;  %6507 = vmatprep.subr.bf16.mxu1 %v8004_v59  ;;  %v1796_v58 = vld [vmem:[#allocation11 + $0x9e0] sm:$0xff]  ;;  %v8220_v0 = vcombine.high %v2179_v54, %v2191_v57 }
 0x2f9   : > { %6548 = vmatprep.subr.bf16.mxu0 %v7622_v60  ;;  %v1808_v59 = vld [vmem:[#allocation11 + $0xa40] sm:$0xff]  ;;  %v8243_v60 = vcombine.low %v2203_v46, %v2215_v47 }
 0x2fa   : > { %v7838_v3 = vcombine.high %v1796_v58, %v1808_v59  ;;  %v7837_v13 = vcombine.low %v1796_v58, %v1808_v59 }
 0x2fb   : > { %6508 = vmatpush1.bf16.msra.mxu1 %v8003_v5  ;;  %v2167_v5 = vld [vmem:[#allocation11 + $0x1578] sm:$0xff] }
 0x2fc   : > { %6549 = vmatpush1.bf16.msra.mxu0 %v7621_v7  ;;  %6509 = vmatprep.subr.bf16.mxu1 %v7980_v8  ;;  %v1772_v7 = vld [vmem:[#allocation11 + $0x920] sm:$0xff]  ;;  %v8196_v16 = vcombine.high %v2155_v4, %v2167_v5 }
 0x2fd   : > { %6550 = vmatprep.subr.bf16.mxu0 %v7598_v9  ;;  %v1784_v8 = vld [vmem:[#allocation11 + $0x980] sm:$0xff]  ;;  %v8219_v9 = vcombine.low %v2179_v54, %v2191_v57 }
 0x2fe   : > { %v7814_v17 = vcombine.high %v1772_v7, %v1784_v8  ;;  %v7813_v20 = vcombine.low %v1772_v7, %v1784_v8  ;;  %v1641_v7 = vld [vmem:[#allocation11 + $0x508] sm:$0xff] }
 0x2ff   : > { %6510 = vmatpush1.bf16.msra.mxu1 %v7979_v62  ;;  %v2143_v62 = vld [vmem:[#allocation11 + $0x14b8] sm:$0xff] }
 0x300   : > { %6551 = vmatpush1.bf16.msra.mxu0 %v7597_v63  ;;  %6511 = vmatprep.subr.bf16.mxu1 %v7956_v1  ;;  %v1748_v63 = vld [vmem:[#allocation11 + $0x860] sm:$0xff]  ;;  %v8172_v21 = vcombine.high %v2131_v18, %v2143_v62 }
 0x301   : > { %6552 = vmatprep.subr.bf16.mxu0 %v7574_v19  ;;  %v1760_v1 = vld [vmem:[#allocation11 + $0x8c0] sm:$0xff]  ;;  %v8195_v19 = vcombine.low %v2155_v4, %v2167_v5  ;;  %v1629_v5 = vld [vmem:[#allocation11 + $0x4a8] sm:$0xff] }
 0x302   : > { %v7790_v22 = vcombine.high %v1748_v63, %v1760_v1  ;;  %v7789_v30 = vcombine.low %v1748_v63, %v1760_v1  ;;  %v7672_v63 = vcombine.high %v1629_v5, %v1641_v7  ;;  %v1605_v1 = vld [vmem:[#allocation11 + $0x3e8] sm:$0xff] }
 0x303   : > { %6512 = vmatpush1.bf16.msra.mxu1 %v7955_v24  ;;  %v2119_v24 = vld [vmem:[#allocation11 + $0x13f8] sm:$0xff] }
 0x304   : > { %6553 = vmatpush1.bf16.msra.mxu0 %v7573_v25  ;;  %6513 = vmatprep.subr.bf16.mxu1 %v7932_v26  ;;  %v1724_v25 = vld [vmem:[#allocation11 + $0x7a0] sm:$0xff]  ;;  %v8148_v31 = vcombine.high %v2107_v23, %v2119_v24 }
 0x305   : > { %6554 = vmatprep.subr.bf16.mxu0 %v7550_v29  ;;  %v1736_v26 = vld [vmem:[#allocation11 + $0x800] sm:$0xff]  ;;  %v8171_v29 = vcombine.low %v2131_v18, %v2143_v62 }
 0x306   : > { %v7766_v32 = vcombine.high %v1724_v25, %v1736_v26  ;;  %v7765_v39 = vcombine.low %v1724_v25, %v1736_v26 }
 0x307   : > { %6514 = vmatpush1.bf16.msra.mxu1 %v7931_v35  ;;  %v2095_v35 = vld [vmem:[#allocation11 + $0x1338] sm:$0xff] }
 0x308   : > { %6555 = vmatpush1.bf16.msra.mxu0 %v7549_v36  ;;  %6515 = vmatprep.subr.bf16.mxu1 %v7908_v37  ;;  %v1700_v36 = vld [vmem:[#allocation11 + $0x6e0] sm:$0xff]  ;;  %v8124_v40 = vcombine.high %v2083_v33, %v2095_v35 }
 0x309   : > { %6556 = vmatprep.subr.bf16.mxu0 %v7526_v38  ;;  %v1712_v37 = vld [vmem:[#allocation11 + $0x740] sm:$0xff]  ;;  %v8147_v38 = vcombine.low %v2107_v23, %v2119_v24  ;;  %v7671_v24 = vcombine.low %v1629_v5, %v1641_v7 }
 0x30a   : > { %v7742_v42 = vcombine.high %v1700_v36, %v1712_v37  ;;  %v7741_v46 = vcombine.low %v1700_v36, %v1712_v37 }
 0x30b   : > { %6516 = vmatpush1.bf16.msra.mxu1 %v7907_v2  ;;  %v2071_v2 = vld [vmem:[#allocation11 + $0x1278] sm:$0xff] }
 0x30c   : > { %6557 = vmatpush1.bf16.msra.mxu0 %v7525_v34  ;;  %6517 = vmatprep.subr.bf16.mxu1 %v8268_v6  ;;  %v1676_v34 = vld [vmem:[#allocation11 + $0x620] sm:$0xff]  ;;  %v8100_v47 = vcombine.high %v2059_v43, %v2071_v2  ;;  %v8099_v54 = vcombine.low %v2059_v43, %v2071_v2 }
 0x30d   : > { %6558 = vmatprep.subr.bf16.mxu0 %v7886_v45  ;;  %v1688_v6 = vld [vmem:[#allocation11 + $0x680] sm:$0xff]  ;;  %v8123_v45 = vcombine.low %v2083_v33, %v2095_v35  ;;  %v1581_v33 = vld [vmem:[#allocation11 + $0x328] sm:$0xff] }
 0x30e   : > { %v7718_v48 = vcombine.high %v1676_v34, %v1688_v6  ;;  %v7717_v57 = vcombine.low %v1676_v34, %v1688_v6  ;;  %v1593_v35 = vld [vmem:[#allocation11 + $0x388] sm:$0xff]  ;;  %v1940_v43 = vld [vmem:[#allocation11 + $0xe60] sm:$0xff] }
 0x30f   : > { %6518 = vmatpush2.bf16.msra.mxu1 %v8267_v50  ;;  %v2048_v50 = vld [vmem:[#allocation11 + $0x11c0] sm:$0xff]  ;;  %v1557_v34 = vld [vmem:[#allocation11 + $0x268] sm:$0xff] }
 0x310   : > { %6559 = vmatpush2.bf16.msra.mxu0 %v7885_v51  ;;  %6519 = vmatprep.subr.bf16.mxu1 %v8244_v52  ;;  %v9189_v51 = vld [vmem:[#allocation13] sm:$0xff]  ;;  %v1653_v52 = vld [vmem:[#allocation11 + $0x568] sm:$0xff]  ;;  %v8078_v58 = vcombine.high %v2036_v49, %v2048_v50  ;;  %v8077_v4 = vcombine.low %v2036_v49, %v2048_v50 }
 0x311   : > { %6560 = vmatprep.subr.bf16.mxu0 %v7862_v53  ;;  %v1665_v53 = vld [vmem:[#allocation11 + $0x5c8] sm:$0xff]  ;;  %v2257_v59 = vrot.slane %v9189_v51, %v9106_v11  ;;  %v1952_v2 = vld [vmem:[#allocation11 + $0xec0] sm:$0xff] }
 0x312   : > { %v7695_v8 = vcombine.low %v1653_v52, %v1665_v53  ;;  %v1569_v6 = vld [vmem:[#allocation11 + $0x2c8] sm:$0xff]  ;;  %v1916_v49 = vld [vmem:[#allocation11 + $0xda0] sm:$0xff] }
 0x313   : > { %6520 = vmatpush2.bf16.msra.mxu1 %v8243_v60  ;;  %v7696_v60 = vcombine.high %v1653_v52, %v1665_v53  ;;  %v1928_v50 = vld [vmem:[#allocation11 + $0xe00] sm:$0xff]  ;;  %v1533_v52 = vld [vmem:[#allocation11 + $0x1a8] sm:$0xff] }
 0x314   : > { %6561 = vmatpush2.bf16.msra.mxu0 %v7861_v61  ;;  %6521 = vmatprep.subr.bf16.mxu1 %v8220_v0  ;;  %v2012_v61 = vld [vmem:[#allocation11 + $0x10a0] sm:$0xff]  ;;  %v1545_v53 = vld [vmem:[#allocation11 + $0x208] sm:$0xff] }
 0x315   : > { %6562 = vmatprep.subr.bf16.mxu0 %v7838_v3  ;;  %v2024_v0 = vld [vmem:[#allocation11 + $0x1100] sm:$0xff]  ;;  %v2261_v3 = vrot.slane %v9189_v51, %v9112_v14  ;;  %v7575_v5 = vcombine.low %v1533_v52, %v1545_v53 }
 0x317   : > { %6522 = vmatpush2.bf16.msra.mxu1 %v8219_v9  ;;  %v6249_v9 = vadd.f32 %v9182_v44, %v2257_v59  ;;  %v8053_v44 = vcombine.low %v2012_v61, %v2024_v0  ;;  %v7576_v59 = vcombine.high %v1533_v52, %v1545_v53 }
 0x318   : > { %6563 = vmatpush2.bf16.msra.mxu0 %v7837_v13  ;;  %6523 = vmatprep.subr.bf16.mxu1 %v8196_v16  ;;  %v8054_v13 = vcombine.high %v2012_v61, %v2024_v0  ;;  %v1988_v16 = vld [vmem:[#allocation11 + $0xfe0] sm:$0xff]  ;;  %v1509_v0 = vld [vmem:[#allocation11 + $0xe8] sm:$0xff] }
 0x319   : > { %6564 = vmatprep.subr.bf16.mxu0 %v7814_v17  ;;  %v2000_v17 = vld [vmem:[#allocation11 + $0x1040] sm:$0xff] }
 0x31a   : > { %v8030_v25 = vcombine.high %v1988_v16, %v2000_v17  ;;  %v8029_v36 = vcombine.low %v1988_v16, %v2000_v17  ;;  %v1904_v61 = vld [vmem:[#allocation11 + $0xd40] sm:$0xff]  ;;  %v1485_v16 = vld [vmem:[#allocation11 + $0x28] sm:$0xff] }
 0x31b   : > { %6524 = vmatpush2.bf16.msra.mxu1 %v8195_v19  ;;  %v1617_v19 = vld [vmem:[#allocation11 + $0x448] sm:$0xff] }
 0x31c   : > { %6565 = vmatpush2.bf16.msra.mxu0 %v7813_v20  ;;  %6525 = vmatprep.subr.bf16.mxu1 %v8172_v21  ;;  %v6251_v20 = vadd.f32 %v9186_v41, %v2261_v3  ;;  %v7648_v26 = vcombine.high %v1605_v1, %v1617_v19  ;;  %v1521_v3 = vld [vmem:[#allocation11 + $0x148] sm:$0xff] }
 0x31d   : > { %6566 = vmatprep.subr.bf16.mxu0 %v7790_v22  ;;  %v1497_v17 = vld [vmem:[#allocation11 + $0x88] sm:$0xff] }
 0x31f   : > { %6526 = vmatpush2.bf16.msra.mxu1 %v8171_v29  ;;  %v1964_v29 = vld [vmem:[#allocation11 + $0xf20] sm:$0xff] }
 0x320   : > { %6567 = vmatpush2.bf16.msra.mxu0 %v7789_v30  ;;  %6527 = vmatprep.subr.bf16.mxu1 %v8148_v31  ;;  %v1976_v30 = vld [vmem:[#allocation11 + $0xf80] sm:$0xff] }
 0x321   : > { %6568 = vmatprep.subr.bf16.mxu0 %v7766_v32 }
 0x323   : > { %6528 = vmatpush2.bf16.msra.mxu1 %v8147_v38 }
 0x324   : > { %6569 = vmatpush2.bf16.msra.mxu0 %v7765_v39  ;;  %6529 = vmatprep.subr.bf16.mxu1 %v8124_v40  ;;  %v7647_v39 = vcombine.low %v1605_v1, %v1617_v19  ;;  %v8006_v40 = vcombine.high %v1964_v29, %v1976_v30  ;;  %v7528_v19 = vcombine.high %v1485_v16, %v1497_v17 }
 0x325   : > { %6570 = vmatprep.subr.bf16.mxu0 %v7742_v42  ;;  %v7624_v42 = vcombine.high %v1581_v33, %v1593_v35 }
 0x327   : > { %6530 = vmatpush2.bf16.msra.mxu1 %v8123_v45  ;;  %v8005_v45 = vcombine.low %v1964_v29, %v1976_v30  ;;  %v2204_v29 = vld [vmem:[#allocation11 + $0x16a0] sm:$0xff] }
 0x328   : > { %6571 = vmatpush2.bf16.msra.mxu0 %v7741_v46  ;;  %6531 = vmatprep.subr.bf16.mxu1 %v8100_v47  ;;  %v7623_v46 = vcombine.low %v1581_v33, %v1593_v35  ;;  %v7982_v47 = vcombine.high %v1940_v43, %v1952_v2  ;;  %v2216_v30 = vld [vmem:[#allocation11 + $0x1700] sm:$0xff] }
 0x329   : > { %6572 = vmatprep.subr.bf16.mxu0 %v7718_v48  ;;  %v7600_v48 = vcombine.high %v1557_v34, %v1569_v6 }
 0x32b   : > { %6532 = vmatpush2.bf16.msra.mxu1 %v8099_v54  ;;  %v7981_v54 = vcombine.low %v1940_v43, %v1952_v2  ;;  %v8245_v43 = vcombine.low %v2204_v29, %v2216_v30 }
 0x32c   : > { %6573 = vmatpush2.bf16.msra.mxu0 %v7717_v57  ;;  %6583 = vmatprep.subr.bf16.mxu1 %v8078_v58  ;;  %v7599_v57 = vcombine.low %v1557_v34, %v1569_v6  ;;  %v7958_v58 = vcombine.high %v1916_v49, %v1928_v50 }
 0x32d   : > { %6624 = vmatprep.subr.bf16.mxu0 %v7696_v60  ;;  %v1892_v60 = vld [vmem:[#allocation11 + $0xce0] sm:$0xff] }
 0x32e   : > { %6534 = vmatmul.mubr.bf16.vlgmr.msra.gmra.mxu1 %v9167_v56  ;;  %v6289_v18 = vpop.f32.mrf.mxu1  ;;  %v9198_v62 = vpop.f32.mrf.mxu0  ;;  %v7934_v7 = vcombine.high %v1892_v60, %v1904_v61 }
 0x32f   : > { %v6290_v21 = vadd.f32 %v6289_v18, %v6249_v9  ;;  %6575 = vmatmul.mubr.bf16.vlgmr.msra.gmra.mxu0 %v9153_v28  ;;  %6584 = vmatpush1.bf16.msra.mxu1 %v8077_v4  ;;  %v7957_v4 = vcombine.low %v1916_v49, %v1928_v50  ;;  %v1868_v9 = vld [vmem:[#allocation11 + $0xc20] sm:$0xff]  ;;  %v7933_v18 = vcombine.low %v1892_v60, %v1904_v61 }
 0x330   : > { %6615 = vmatprep.mubr.bf16.mxu1 %v9165_v55  ;;  %6625 = vmatpush1.bf16.msra.mxu0 %v7695_v8  ;;  %v6291_v22 = vpop.f32.mrf.mxu1  ;;  %v9203_v23 = vpop.f32.mrf.mxu0  ;;  %v7552_v8 = vcombine.high %v1509_v0, %v1521_v3 }
 0x331   : > { %7198 = vst [vmem:[%s9207_s8] sm:$0xff] %v6290_v21  ;;  %6656 = vmatprep.mubr.bf16.mxu0 %v9151_v27  ;;  %v6292_v41 = vadd.f32 %v6291_v22, %v6251_v20  ;;  %6585 = vmatprep.subr.bf16.mxu1 %v8054_v13  ;;  %v1880_v13 = vld [vmem:[#allocation11 + $0xc80] sm:$0xff]  ;;  %v1857_v22 = vld [vmem:[#allocation11 + $0xbc8] sm:$0xff] }
 0x332   : > { %v6293_v31 = vpop.f32.mrf.mxu1  ;;  %v6334_v32 = vpop.f32.mrf.mxu0  ;;  %6626 = vmatprep.subr.bf16.mxu0 %v7672_v63  ;;  %v7551_v63 = vcombine.low %v1509_v0, %v1521_v3  ;;  %v7910_v1 = vcombine.high %v1868_v9, %v1880_v13  ;;  %v2228_v20 = vld [vmem:[#allocation11 + $0x1760] sm:$0xff] }
 0x333   : > { %7199 = vst [vmem:[%s9207_s8 + $0x8] sm:$0xff] %v6292_v41  ;;  %6586 = vmatpush1.bf16.msra.mxu1 %v8053_v44  ;;  %v2240_v21 = vld [vmem:[#allocation11 + $0x17c0] sm:$0xff]  ;;  %v1845_v44 = vld [vmem:[#allocation11 + $0xb68] sm:$0xff] }
 0x334   : > { %6627 = vmatpush1.bf16.msra.mxu0 %v7671_v24  ;;  %v6294_v37 = vpop.f32.mrf.mxu1  ;;  %v6335_v38 = vpop.f32.mrf.mxu0  ;;  %6587 = vmatprep.subr.bf16.mxu1 %v8030_v25  ;;  %v7909_v24 = vcombine.low %v1868_v9, %v1880_v13  ;;  %v7527_v25 = vcombine.low %v1485_v16, %v1497_v17  ;;  %v8270_v41 = vcombine.high %v2228_v20, %v2240_v21  ;;  %v1821_v31 = vld [vmem:[#allocation11 + $0xaa8] sm:$0xff] }
 0x335   : > { %6628 = vmatprep.subr.bf16.mxu0 %v7648_v26  ;;  %v7888_v26 = vcombine.high %v1845_v44, %v1857_v22  ;;  %v1833_v32 = vld [vmem:[#allocation11 + $0xb08] sm:$0xff]  ;;  %v8269_v33 = vcombine.low %v2228_v20, %v2240_v21  ;;  %v7887_v35 = vcombine.low %v1845_v44, %v1857_v22  ;;  %v2180_v38 = vld [vmem:[#allocation11 + $0x15e0] sm:$0xff] }
 0x336   : > { %v7864_v37 = vcombine.high %v1821_v31, %v1833_v32  ;;  %v7863_v2 = vcombine.low %v1821_v31, %v1833_v32 }
 0x337   : > { %6588 = vmatpush1.bf16.msra.mxu1 %v8029_v36  ;;  %v8246_v36 = vcombine.high %v2204_v29, %v2216_v30 }
 0x338   : > { %6629 = vmatpush1.bf16.msra.mxu0 %v7647_v39  ;;  %6589 = vmatprep.subr.bf16.mxu1 %v8006_v40  ;;  %v2192_v39 = vld [vmem:[#allocation11 + $0x1640] sm:$0xff]  ;;  %v1797_v40 = vld [vmem:[#allocation11 + $0x9e8] sm:$0xff] }
 0x339   : > { %6630 = vmatprep.subr.bf16.mxu0 %v7624_v42  ;;  %v1809_v42 = vld [vmem:[#allocation11 + $0xa48] sm:$0xff]  ;;  %v8222_v34 = vcombine.high %v2180_v38, %v2192_v39  ;;  %v8221_v49 = vcombine.low %v2180_v38, %v2192_v39 }
 0x33a   : > { %v7840_v6 = vcombine.high %v1797_v40, %v1809_v42  ;;  %v7839_v50 = vcombine.low %v1797_v40, %v1809_v42  ;;  %v2265_v42 = vrot.slane %v9189_v51, %v9109_v12 }
 0x33b   : > { %6590 = vmatpush1.bf16.msra.mxu1 %v8005_v45  ;;  %v2156_v45 = vld [vmem:[#allocation11 + $0x1520] sm:$0xff] }
 0x33c   : > { %6631 = vmatpush1.bf16.msra.mxu0 %v7623_v46  ;;  %6591 = vmatprep.subr.bf16.mxu1 %v7982_v47  ;;  %v2168_v46 = vld [vmem:[#allocation11 + $0x1580] sm:$0xff]  ;;  %v1773_v47 = vld [vmem:[#allocation11 + $0x928] sm:$0xff] }
 0x33d   : > { %6632 = vmatprep.subr.bf16.mxu0 %v7600_v48  ;;  %v1785_v48 = vld [vmem:[#allocation11 + $0x988] sm:$0xff]  ;;  %v8198_v52 = vcombine.high %v2156_v45, %v2168_v46  ;;  %v8197_v60 = vcombine.low %v2156_v45, %v2168_v46  ;;  %v1630_v46 = vld [vmem:[#allocation11 + $0x4b0] sm:$0xff] }
 0x33e   : > { %v7816_v53 = vcombine.high %v1773_v47, %v1785_v48  ;;  %v7815_v61 = vcombine.low %v1773_v47, %v1785_v48  ;;  %v1642_v47 = vld [vmem:[#allocation11 + $0x510] sm:$0xff] }
 0x33f   : > { %6592 = vmatpush1.bf16.msra.mxu1 %v7981_v54  ;;  %v2132_v54 = vld [vmem:[#allocation11 + $0x1460] sm:$0xff] }
 0x340   : > { %6633 = vmatpush1.bf16.msra.mxu0 %v7599_v57  ;;  %6593 = vmatprep.subr.bf16.mxu1 %v7958_v58  ;;  %v2144_v57 = vld [vmem:[#allocation11 + $0x14c0] sm:$0xff]  ;;  %v1749_v58 = vld [vmem:[#allocation11 + $0x868] sm:$0xff] }
 0x341   : > { %6634 = vmatprep.subr.bf16.mxu0 %v7576_v59  ;;  %v1761_v59 = vld [vmem:[#allocation11 + $0x8c8] sm:$0xff]  ;;  %v8174_v0 = vcombine.high %v2132_v54, %v2144_v57  ;;  %v8173_v9 = vcombine.low %v2132_v54, %v2144_v57  ;;  %v7674_v57 = vcombine.high %v1630_v46, %v1642_v47 }
 0x342   : > { %v7792_v3 = vcombine.high %v1749_v58, %v1761_v59  ;;  %v7791_v13 = vcombine.low %v1749_v58, %v1761_v59  ;;  %v1606_v58 = vld [vmem:[#allocation11 + $0x3f0] sm:$0xff] }
 0x343   : > { %6594 = vmatpush1.bf16.msra.mxu1 %v7957_v4  ;;  %v2108_v4 = vld [vmem:[#allocation11 + $0x13a0] sm:$0xff]  ;;  %v1618_v59 = vld [vmem:[#allocation11 + $0x450] sm:$0xff] }
 0x344   : > { %6635 = vmatpush1.bf16.msra.mxu0 %v7575_v5  ;;  %6595 = vmatprep.subr.bf16.mxu1 %v7934_v7  ;;  %v2120_v5 = vld [vmem:[#allocation11 + $0x1400] sm:$0xff]  ;;  %v1725_v7 = vld [vmem:[#allocation11 + $0x7a8] sm:$0xff] }
 0x345   : > { %6636 = vmatprep.subr.bf16.mxu0 %v7552_v8  ;;  %v1737_v8 = vld [vmem:[#allocation11 + $0x808] sm:$0xff]  ;;  %v8150_v16 = vcombine.high %v2108_v4, %v2120_v5  ;;  %v8149_v20 = vcombine.low %v2108_v4, %v2120_v5  ;;  %v7673_v4 = vcombine.low %v1630_v46, %v1642_v47 }
 0x346   : > { %v7768_v17 = vcombine.high %v1725_v7, %v1737_v8  ;;  %v7767_v21 = vcombine.low %v1725_v7, %v1737_v8 }
 0x347   : > { %6596 = vmatpush1.bf16.msra.mxu1 %v7933_v18  ;;  %v2084_v18 = vld [vmem:[#allocation11 + $0x12e0] sm:$0xff] }
 0x348   : > { %6637 = vmatpush1.bf16.msra.mxu0 %v7551_v63  ;;  %6597 = vmatprep.subr.bf16.mxu1 %v7910_v1  ;;  %v2096_v63 = vld [vmem:[#allocation11 + $0x1340] sm:$0xff]  ;;  %v1701_v1 = vld [vmem:[#allocation11 + $0x6e8] sm:$0xff] }
 0x349   : > { %6638 = vmatprep.subr.bf16.mxu0 %v7528_v19  ;;  %v1713_v19 = vld [vmem:[#allocation11 + $0x748] sm:$0xff]  ;;  %v8126_v44 = vcombine.high %v2084_v18, %v2096_v63  ;;  %v8125_v29 = vcombine.low %v2084_v18, %v2096_v63  ;;  %v1594_v18 = vld [vmem:[#allocation11 + $0x390] sm:$0xff] }
 0x34a   : > { %v7744_v22 = vcombine.high %v1701_v1, %v1713_v19  ;;  %v7743_v30 = vcombine.low %v1701_v1, %v1713_v19 }
 0x34b   : > { %6598 = vmatpush1.bf16.msra.mxu1 %v7909_v24  ;;  %v2060_v24 = vld [vmem:[#allocation11 + $0x1220] sm:$0xff] }
 0x34c   : > { %6639 = vmatpush1.bf16.msra.mxu0 %v7527_v25  ;;  %6599 = vmatprep.subr.bf16.mxu1 %v8270_v41  ;;  %v2072_v25 = vld [vmem:[#allocation11 + $0x1280] sm:$0xff]  ;;  %v1677_v41 = vld [vmem:[#allocation11 + $0x628] sm:$0xff] }
 0x34d   : > { %6640 = vmatprep.subr.bf16.mxu0 %v7888_v26  ;;  %v1689_v26 = vld [vmem:[#allocation11 + $0x688] sm:$0xff]  ;;  %v8102_v31 = vcombine.high %v2060_v24, %v2072_v25  ;;  %v8101_v38 = vcombine.low %v2060_v24, %v2072_v25 }
 0x34e   : > { %v7720_v32 = vcombine.high %v1677_v41, %v1689_v26  ;;  %v7719_v39 = vcombine.low %v1677_v41, %v1689_v26  ;;  %v1941_v24 = vld [vmem:[#allocation11 + $0xe68] sm:$0xff]  ;;  %v1558_v41 = vld [vmem:[#allocation11 + $0x270] sm:$0xff] }
 0x34f   : > { %6600 = vmatpush2.bf16.msra.mxu1 %v8269_v33  ;;  %v2037_v33 = vld [vmem:[#allocation11 + $0x1168] sm:$0xff]  ;;  %v1570_v26 = vld [vmem:[#allocation11 + $0x2d0] sm:$0xff] }
 0x350   : > { %6641 = vmatpush2.bf16.msra.mxu0 %v7887_v35  ;;  %6601 = vmatprep.subr.bf16.mxu1 %v8246_v36  ;;  %v2049_v35 = vld [vmem:[#allocation11 + $0x11c8] sm:$0xff]  ;;  %v1654_v36 = vld [vmem:[#allocation11 + $0x570] sm:$0xff] }
 0x351   : > { %6642 = vmatprep.subr.bf16.mxu0 %v7864_v37  ;;  %v1666_v37 = vld [vmem:[#allocation11 + $0x5d0] sm:$0xff]  ;;  %v8080_v40 = vcombine.high %v2037_v33, %v2049_v35  ;;  %v8079_v45 = vcombine.low %v2037_v33, %v2049_v35  ;;  %v1953_v25 = vld [vmem:[#allocation11 + $0xec8] sm:$0xff] }
 0x352   : > { %v7697_v48 = vcombine.low %v1654_v36, %v1666_v37  ;;  %v1917_v33 = vld [vmem:[#allocation11 + $0xda8] sm:$0xff] }
 0x353   : > { %6602 = vmatpush2.bf16.msra.mxu1 %v8245_v43  ;;  %v7698_v43 = vcombine.high %v1654_v36, %v1666_v37  ;;  %v1929_v35 = vld [vmem:[#allocation11 + $0xe08] sm:$0xff]  ;;  %v1534_v36 = vld [vmem:[#allocation11 + $0x1b0] sm:$0xff] }
 0x354   : > { %6643 = vmatpush2.bf16.msra.mxu0 %v7863_v2  ;;  %6603 = vmatprep.subr.bf16.mxu1 %v8222_v34  ;;  %v2013_v2 = vld [vmem:[#allocation11 + $0x10a8] sm:$0xff]  ;;  %v1546_v37 = vld [vmem:[#allocation11 + $0x210] sm:$0xff] }
 0x355   : > { %6644 = vmatprep.subr.bf16.mxu0 %v7840_v6  ;;  %v2025_v34 = vld [vmem:[#allocation11 + $0x1108] sm:$0xff]  ;;  %v2269_v6 = vrot.slane %v9189_v51, %v9115_v15  ;;  %v7577_v46 = vcombine.low %v1534_v36, %v1546_v37 }
 0x357   : > { %6604 = vmatpush2.bf16.msra.mxu1 %v8221_v49  ;;  %v6331_v49 = vadd.f32 %v9198_v62, %v2265_v42  ;;  %v8055_v62 = vcombine.low %v2013_v2, %v2025_v34  ;;  %v7578_v42 = vcombine.high %v1534_v36, %v1546_v37 }
 0x358   : > { %6645 = vmatpush2.bf16.msra.mxu0 %v7839_v50  ;;  %6605 = vmatprep.subr.bf16.mxu1 %v8198_v52  ;;  %v8056_v50 = vcombine.high %v2013_v2, %v2025_v34  ;;  %v1989_v52 = vld [vmem:[#allocation11 + $0xfe8] sm:$0xff]  ;;  %v1510_v34 = vld [vmem:[#allocation11 + $0xf0] sm:$0xff] }
 0x359   : > { %6646 = vmatprep.subr.bf16.mxu0 %v7816_v53  ;;  %v2001_v53 = vld [vmem:[#allocation11 + $0x1048] sm:$0xff] }
 0x35a   : > { %v8032_v5 = vcombine.high %v1989_v52, %v2001_v53  ;;  %v8031_v1 = vcombine.low %v1989_v52, %v2001_v53  ;;  %v1905_v2 = vld [vmem:[#allocation11 + $0xd48] sm:$0xff]  ;;  %v1486_v52 = vld [vmem:[#allocation11 + $0x30] sm:$0xff] }
 0x35b   : > { %6606 = vmatpush2.bf16.msra.mxu1 %v8197_v60  ;;  %v6333_v60 = vadd.f32 %v9203_v23, %v2269_v6  ;;  %v7650_v23 = vcombine.high %v1606_v58, %v1618_v59  ;;  %v1522_v6 = vld [vmem:[#allocation11 + $0x150] sm:$0xff] }
 0x35c   : > { %6647 = vmatpush2.bf16.msra.mxu0 %v7815_v61  ;;  %6607 = vmatprep.subr.bf16.mxu1 %v8174_v0  ;;  %v1498_v53 = vld [vmem:[#allocation11 + $0x90] sm:$0xff] }
 0x35d   : > { %6648 = vmatprep.subr.bf16.mxu0 %v7792_v3 }
 0x35f   : > { %6608 = vmatpush2.bf16.msra.mxu1 %v8173_v9  ;;  %v1965_v9 = vld [vmem:[#allocation11 + $0xf28] sm:$0xff] }
 0x360   : > { %6649 = vmatpush2.bf16.msra.mxu0 %v7791_v13  ;;  %6609 = vmatprep.subr.bf16.mxu1 %v8150_v16  ;;  %v1977_v13 = vld [vmem:[#allocation11 + $0xf88] sm:$0xff] }
 0x361   : > { %6650 = vmatprep.subr.bf16.mxu0 %v7768_v17  ;;  %v1582_v17 = vld [vmem:[#allocation11 + $0x330] sm:$0xff] }
 0x363   : > { %6610 = vmatpush2.bf16.msra.mxu1 %v8149_v20  ;;  %v7649_v20 = vcombine.low %v1606_v58, %v1618_v59  ;;  %v7530_v59 = vcombine.high %v1486_v52, %v1498_v53 }
 0x364   : > { %6651 = vmatpush2.bf16.msra.mxu0 %v7767_v21  ;;  %6611 = vmatprep.subr.bf16.mxu1 %v8126_v44  ;;  %v8008_v21 = vcombine.high %v1965_v9, %v1977_v13 }
 0x365   : > { %6652 = vmatprep.subr.bf16.mxu0 %v7744_v22  ;;  %v7626_v22 = vcombine.high %v1582_v17, %v1594_v18 }
 0x367   : > { %6612 = vmatpush2.bf16.msra.mxu1 %v8125_v29  ;;  %v8007_v29 = vcombine.low %v1965_v9, %v1977_v13  ;;  %v2205_v9 = vld [vmem:[#allocation11 + $0x16a8] sm:$0xff] }
 0x368   : > { %6653 = vmatpush2.bf16.msra.mxu0 %v7743_v30  ;;  %6613 = vmatprep.subr.bf16.mxu1 %v8102_v31  ;;  %v7625_v30 = vcombine.low %v1582_v17, %v1594_v18  ;;  %v7984_v31 = vcombine.high %v1941_v24, %v1953_v25  ;;  %v2217_v13 = vld [vmem:[#allocation11 + $0x1708] sm:$0xff]  ;;  %v1834_v17 = vld [vmem:[#allocation11 + $0xb10] sm:$0xff] }
 0x369   : > { %6654 = vmatprep.subr.bf16.mxu0 %v7720_v32  ;;  %v7602_v32 = vcombine.high %v1558_v41, %v1570_v26 }
 0x36b   : > { %6614 = vmatpush2.bf16.msra.mxu1 %v8101_v38  ;;  %v7983_v38 = vcombine.low %v1941_v24, %v1953_v25  ;;  %v8247_v24 = vcombine.low %v2205_v9, %v2217_v13 }
 0x36c   : > { %6655 = vmatpush2.bf16.msra.mxu0 %v7719_v39  ;;  %6665 = vmatprep.subr.bf16.mxu1 %v8080_v40  ;;  %v7601_v39 = vcombine.low %v1558_v41, %v1570_v26  ;;  %v7960_v40 = vcombine.high %v1917_v33, %v1929_v35 }
 0x36d   : > { %6706 = vmatprep.subr.bf16.mxu0 %v7698_v43  ;;  %v1893_v43 = vld [vmem:[#allocation11 + $0xce8] sm:$0xff] }
 0x36e   : > { %v6371_v54 = vpop.f32.mrf.mxu1  ;;  %6616 = vmatmul.mubr.bf16.vlgmr.msra.gmra.mxu1 %v9167_v56  ;;  %v7936_v47 = vcombine.high %v1893_v43, %v1905_v2 }
 0x36f   : > { %v6372_v61 = vadd.f32 %v6371_v54, %v6331_v49  ;;  %v9219_v0 = vpop.f32.mrf.mxu0  ;;  %6657 = vmatmul.mubr.bf16.vlgmr.msra.gmra.mxu0 %v9153_v28  ;;  %6666 = vmatpush1.bf16.msra.mxu1 %v8079_v45  ;;  %v7959_v45 = vcombine.low %v1917_v33, %v1929_v35  ;;  %v1869_v49 = vld [vmem:[#allocation11 + $0xc28] sm:$0xff]  ;;  %v7935_v54 = vcombine.low %v1893_v43, %v1905_v2 }
 0x370   : > { %6697 = vmatprep.mubr.bf16.mxu1 %v9165_v55  ;;  %v6373_v3 = vpop.f32.mrf.mxu1  ;;  %6707 = vmatpush1.bf16.msra.mxu0 %v7697_v48  ;;  %v7554_v48 = vcombine.high %v1510_v34, %v1522_v6 }
 0x371   : > { %7200 = vst [vmem:[%s9207_s8 + $0x10] sm:$0xff] %v6372_v61  ;;  %v6374_v7 = vadd.f32 %v6373_v3, %v6333_v60  ;;  %6738 = vmatprep.mubr.bf16.mxu0 %v9151_v27  ;;  %v9225_v8 = vpop.f32.mrf.mxu0  ;;  %6667 = vmatprep.subr.bf16.mxu1 %v8056_v50  ;;  %v1881_v50 = vld [vmem:[#allocation11 + $0xc88] sm:$0xff]  ;;  %v1858_v3 = vld [vmem:[#allocation11 + $0xbd0] sm:$0xff] }
 0x372   : > { %v6375_v16 = vpop.f32.mrf.mxu1  ;;  %6708 = vmatprep.subr.bf16.mxu0 %v7674_v57  ;;  %v7553_v57 = vcombine.low %v1510_v34, %v1522_v6  ;;  %v7912_v58 = vcombine.high %v1869_v49, %v1881_v50  ;;  %v2229_v60 = vld [vmem:[#allocation11 + $0x1768] sm:$0xff] }
 0x373   : > { %7201 = vst [vmem:[%s9207_s8 + $0x18] sm:$0xff] %v6374_v7  ;;  %v6416_v63 = vpop.f32.mrf.mxu0  ;;  %6668 = vmatpush1.bf16.msra.mxu1 %v8055_v62  ;;  %v2241_v61 = vld [vmem:[#allocation11 + $0x17c8] sm:$0xff]  ;;  %v1846_v62 = vld [vmem:[#allocation11 + $0xb70] sm:$0xff] }
 0x374   : > { %v6376_v19 = vpop.f32.mrf.mxu1  ;;  %6709 = vmatpush1.bf16.msra.mxu0 %v7673_v4  ;;  %6669 = vmatprep.subr.bf16.mxu1 %v8032_v5  ;;  %v7911_v4 = vcombine.low %v1869_v49, %v1881_v50  ;;  %v7529_v5 = vcombine.low %v1486_v52, %v1498_v53  ;;  %v8272_v7 = vcombine.high %v2229_v60, %v2241_v61  ;;  %v1822_v16 = vld [vmem:[#allocation11 + $0xab0] sm:$0xff] }
 0x375   : > { %v6417_v44 = vpop.f32.mrf.mxu0  ;;  %6710 = vmatprep.subr.bf16.mxu0 %v7650_v23  ;;  %v7890_v23 = vcombine.high %v1846_v62, %v1858_v3  ;;  %v8271_v18 = vcombine.low %v2229_v60, %v2241_v61  ;;  %v7889_v63 = vcombine.low %v1846_v62, %v1858_v3  ;;  %v7866_v19 = vcombine.high %v1822_v16, %v1834_v17 }
 0x376   : > { %v1798_v44 = vld [vmem:[#allocation11 + $0x9f0] sm:$0xff]  ;;  %v7865_v25 = vcombine.low %v1822_v16, %v1834_v17  ;;  %v9229_v17 = vsub.s32 4, %v9103_v10 }
 0x377   : > { %6670 = vmatpush1.bf16.msra.mxu1 %v8031_v1  ;;  %v8248_v1 = vcombine.high %v2205_v9, %v2217_v13 }
 0x378   : > { %6711 = vmatpush1.bf16.msra.mxu0 %v7649_v20  ;;  %6671 = vmatprep.subr.bf16.mxu1 %v8008_v21  ;;  %v2181_v20 = vld [vmem:[#allocation11 + $0x15e8] sm:$0xff] }
 0x379   : > { %6712 = vmatprep.subr.bf16.mxu0 %v7626_v22  ;;  %v2193_v21 = vld [vmem:[#allocation11 + $0x1648] sm:$0xff]  ;;  %v1810_v22 = vld [vmem:[#allocation11 + $0xa50] sm:$0xff] }
 0x37a   : > { %v8224_v41 = vcombine.high %v2181_v20, %v2193_v21  ;;  %v7842_v26 = vcombine.high %v1798_v44, %v1810_v22  ;;  %v8223_v33 = vcombine.low %v2181_v20, %v2193_v21  ;;  %v7841_v35 = vcombine.low %v1798_v44, %v1810_v22  ;;  %v1667_v20 = vld [vmem:[#allocation11 + $0x5d8] sm:$0xff] }
 0x37b   : > { %6672 = vmatpush1.bf16.msra.mxu1 %v8007_v29  ;;  %v2157_v29 = vld [vmem:[#allocation11 + $0x1528] sm:$0xff]  ;;  %v9232_v21 = vsub.s32 5, %v9103_v10 }
 0x37c   : > { %6713 = vmatpush1.bf16.msra.mxu0 %v7625_v30  ;;  %6673 = vmatprep.subr.bf16.mxu1 %v7984_v31  ;;  %v2169_v30 = vld [vmem:[#allocation11 + $0x1588] sm:$0xff]  ;;  %v1774_v31 = vld [vmem:[#allocation11 + $0x930] sm:$0xff] }
 0x37d   : > { %6714 = vmatprep.subr.bf16.mxu0 %v7602_v32  ;;  %v1786_v32 = vld [vmem:[#allocation11 + $0x990] sm:$0xff]  ;;  %v8200_v36 = vcombine.high %v2157_v29, %v2169_v30  ;;  %v8199_v43 = vcombine.low %v2157_v29, %v2169_v30  ;;  %v2277_v30 = vrot.slane %v9189_v51, %v9232_v21 }
 0x37e   : > { %v7818_v37 = vcombine.high %v1774_v31, %v1786_v32  ;;  %v7817_v2 = vcombine.low %v1774_v31, %v1786_v32  ;;  %v2026_v29 = vld [vmem:[#allocation11 + $0x1110] sm:$0xff]  ;;  %v1631_v32 = vld [vmem:[#allocation11 + $0x4b8] sm:$0xff] }
 0x37f   : > { %6674 = vmatpush1.bf16.msra.mxu1 %v7983_v38  ;;  %v2133_v38 = vld [vmem:[#allocation11 + $0x1468] sm:$0xff] }
 0x380   : > { %6715 = vmatpush1.bf16.msra.mxu0 %v7601_v39  ;;  %6675 = vmatprep.subr.bf16.mxu1 %v7960_v40  ;;  %v2145_v39 = vld [vmem:[#allocation11 + $0x14c8] sm:$0xff]  ;;  %v1750_v40 = vld [vmem:[#allocation11 + $0x870] sm:$0xff] }
 0x381   : > { %6716 = vmatprep.subr.bf16.mxu0 %v7578_v42  ;;  %v1762_v42 = vld [vmem:[#allocation11 + $0x8d0] sm:$0xff]  ;;  %v8176_v34 = vcombine.high %v2133_v38, %v2145_v39  ;;  %v8175_v49 = vcombine.low %v2133_v38, %v2145_v39 }
 0x382   : > { %v7794_v6 = vcombine.high %v1750_v40, %v1762_v42  ;;  %v7793_v50 = vcombine.low %v1750_v40, %v1762_v42  ;;  %v1990_v38 = vld [vmem:[#allocation11 + $0xff0] sm:$0xff] }
 0x383   : > { %6676 = vmatpush1.bf16.msra.mxu1 %v7959_v45  ;;  %v2109_v45 = vld [vmem:[#allocation11 + $0x13a8] sm:$0xff]  ;;  %v2002_v39 = vld [vmem:[#allocation11 + $0x1050] sm:$0xff] }
 0x384   : > { %6717 = vmatpush1.bf16.msra.mxu0 %v7577_v46  ;;  %6677 = vmatprep.subr.bf16.mxu1 %v7936_v47  ;;  %v2121_v46 = vld [vmem:[#allocation11 + $0x1408] sm:$0xff]  ;;  %v1726_v47 = vld [vmem:[#allocation11 + $0x7b0] sm:$0xff] }
 0x385   : > { %6718 = vmatprep.subr.bf16.mxu0 %v7554_v48  ;;  %v1738_v48 = vld [vmem:[#allocation11 + $0x810] sm:$0xff]  ;;  %v8152_v52 = vcombine.high %v2109_v45, %v2121_v46  ;;  %v8151_v60 = vcombine.low %v2109_v45, %v2121_v46 }
 0x386   : > { %v7770_v53 = vcombine.high %v1726_v47, %v1738_v48  ;;  %v7769_v61 = vcombine.low %v1726_v47, %v1738_v48  ;;  %v8034_v47 = vcombine.high %v1990_v38, %v2002_v39 }
 0x387   : > { %6678 = vmatpush1.bf16.msra.mxu1 %v7935_v54  ;;  %v2085_v54 = vld [vmem:[#allocation11 + $0x12e8] sm:$0xff] }
 0x388   : > { %6719 = vmatpush1.bf16.msra.mxu0 %v7553_v57  ;;  %6679 = vmatprep.subr.bf16.mxu1 %v7912_v58  ;;  %v2097_v57 = vld [vmem:[#allocation11 + $0x1348] sm:$0xff]  ;;  %v1702_v58 = vld [vmem:[#allocation11 + $0x6f0] sm:$0xff] }
 0x389   : > { %6720 = vmatprep.subr.bf16.mxu0 %v7530_v59  ;;  %v1714_v59 = vld [vmem:[#allocation11 + $0x750] sm:$0xff]  ;;  %v8128_v62 = vcombine.high %v2085_v54, %v2097_v57  ;;  %v8127_v9 = vcombine.low %v2085_v54, %v2097_v57  ;;  %v1583_v54 = vld [vmem:[#allocation11 + $0x338] sm:$0xff] }
 0x38a   : > { %v7746_v3 = vcombine.high %v1702_v58, %v1714_v59  ;;  %v7745_v13 = vcombine.low %v1702_v58, %v1714_v59  ;;  %v1595_v57 = vld [vmem:[#allocation11 + $0x398] sm:$0xff]  ;;  %v8033_v59 = vcombine.low %v1990_v38, %v2002_v39  ;;  %v1882_v38 = vld [vmem:[#allocation11 + $0xc90] sm:$0xff] }
 0x38b   : > { %6680 = vmatpush1.bf16.msra.mxu1 %v7911_v4  ;;  %v2061_v4 = vld [vmem:[#allocation11 + $0x1228] sm:$0xff]  ;;  %v1487_v39 = vld [vmem:[#allocation11 + $0x38] sm:$0xff] }
 0x38c   : > { %6721 = vmatpush1.bf16.msra.mxu0 %v7529_v5  ;;  %6681 = vmatprep.subr.bf16.mxu1 %v8272_v7  ;;  %v2073_v5 = vld [vmem:[#allocation11 + $0x1288] sm:$0xff]  ;;  %v1678_v7 = vld [vmem:[#allocation11 + $0x630] sm:$0xff] }
 0x38d   : > { %6722 = vmatprep.subr.bf16.mxu0 %v7890_v23  ;;  %v1690_v23 = vld [vmem:[#allocation11 + $0x690] sm:$0xff]  ;;  %v8104_v16 = vcombine.high %v2061_v4, %v2073_v5  ;;  %v8103_v44 = vcombine.low %v2061_v4, %v2073_v5  ;;  %v7628_v4 = vcombine.high %v1583_v54, %v1595_v57 }
 0x38e   : > { %v7721_v22 = vcombine.low %v1678_v7, %v1690_v23  ;;  %v1942_v5 = vld [vmem:[#allocation11 + $0xe70] sm:$0xff] }
 0x38f   : > { %6682 = vmatpush2.bf16.msra.mxu1 %v8271_v18  ;;  %v7722_v18 = vcombine.high %v1678_v7, %v1690_v23  ;;  %v1954_v7 = vld [vmem:[#allocation11 + $0xed0] sm:$0xff]  ;;  %v1559_v23 = vld [vmem:[#allocation11 + $0x278] sm:$0xff] }
 0x390   : > { %6723 = vmatpush2.bf16.msra.mxu0 %v7889_v63  ;;  %6683 = vmatprep.subr.bf16.mxu1 %v8248_v1  ;;  %v2038_v63 = vld [vmem:[#allocation11 + $0x1170] sm:$0xff] }
 0x391   : > { %6724 = vmatprep.subr.bf16.mxu0 %v7866_v19  ;;  %v2050_v1 = vld [vmem:[#allocation11 + $0x11d0] sm:$0xff]  ;;  %v1655_v19 = vld [vmem:[#allocation11 + $0x578] sm:$0xff] }
 0x392   : > { %v8081_v31 = vcombine.low %v2038_v63, %v2050_v1 }
 0x393   : > { %6684 = vmatpush2.bf16.msra.mxu1 %v8247_v24  ;;  %v8082_v24 = vcombine.high %v2038_v63, %v2050_v1  ;;  %v1918_v1 = vld [vmem:[#allocation11 + $0xdb0] sm:$0xff] }
 0x394   : > { %6725 = vmatpush2.bf16.msra.mxu0 %v7865_v25  ;;  %6685 = vmatprep.subr.bf16.mxu1 %v8224_v41  ;;  %v2273_v25 = vrot.slane %v9189_v51, %v9229_v17  ;;  %v7700_v41 = vcombine.high %v1655_v19, %v1667_v20  ;;  %v1619_v51 = vld [vmem:[#allocation11 + $0x458] sm:$0xff] }
 0x395   : > { %6726 = vmatprep.subr.bf16.mxu0 %v7842_v26  ;;  %v2014_v26 = vld [vmem:[#allocation11 + $0x10b0] sm:$0xff] }
 0x397   : > { %6686 = vmatpush2.bf16.msra.mxu1 %v8223_v33  ;;  %v1643_v33 = vld [vmem:[#allocation11 + $0x518] sm:$0xff] }
 0x398   : > { %6727 = vmatpush2.bf16.msra.mxu0 %v7841_v35  ;;  %6687 = vmatprep.subr.bf16.mxu1 %v8200_v36  ;;  %v7699_v35 = vcombine.low %v1655_v19, %v1667_v20  ;;  %v6413_v36 = vadd.f32 %v9219_v0, %v2273_v25  ;;  %v7676_v42 = vcombine.high %v1631_v32, %v1643_v33  ;;  %v1930_v19 = vld [vmem:[#allocation11 + $0xe10] sm:$0xff]  ;;  %v1535_v20 = vld [vmem:[#allocation11 + $0x1b8] sm:$0xff] }
 0x399   : > { %6728 = vmatprep.subr.bf16.mxu0 %v7818_v37  ;;  %v8058_v37 = vcombine.high %v2014_v26, %v2026_v29  ;;  %v8057_v0 = vcombine.low %v2014_v26, %v2026_v29  ;;  %v7675_v46 = vcombine.low %v1631_v32, %v1643_v33  ;;  %v7962_v25 = vcombine.high %v1918_v1, %v1930_v19  ;;  %v1894_v26 = vld [vmem:[#allocation11 + $0xcf0] sm:$0xff] }
 0x39a   : > { %v1906_v29 = vld [vmem:[#allocation11 + $0xd50] sm:$0xff]  ;;  %v7961_v32 = vcombine.low %v1918_v1, %v1930_v19  ;;  %v1787_v1 = vld [vmem:[#allocation11 + $0x998] sm:$0xff] }
 0x39b   : > { %6688 = vmatpush2.bf16.msra.mxu1 %v8199_v43  ;;  %v1607_v43 = vld [vmem:[#allocation11 + $0x3f8] sm:$0xff] }
 0x39c   : > { %6729 = vmatpush2.bf16.msra.mxu0 %v7817_v2  ;;  %6689 = vmatprep.subr.bf16.mxu1 %v8176_v34  ;;  %v6415_v2 = vadd.f32 %v9225_v8, %v2277_v30  ;;  %v7652_v8 = vcombine.high %v1607_v43, %v1619_v51  ;;  %v1511_v30 = vld [vmem:[#allocation11 + $0xf8] sm:$0xff] }
 0x39d   : > { %6730 = vmatprep.subr.bf16.mxu0 %v7794_v6 }
 0x39f   : > { %6690 = vmatpush2.bf16.msra.mxu1 %v8175_v49 }
 0x3a0   : > { %6731 = vmatpush2.bf16.msra.mxu0 %v7793_v50  ;;  %6691 = vmatprep.subr.bf16.mxu1 %v8152_v52  ;;  %v1966_v50 = vld [vmem:[#allocation11 + $0xf30] sm:$0xff] }
 0x3a1   : > { %6732 = vmatprep.subr.bf16.mxu0 %v7770_v53  ;;  %v1978_v52 = vld [vmem:[#allocation11 + $0xf90] sm:$0xff] }
 0x3a3   : > { %6692 = vmatpush2.bf16.msra.mxu1 %v8151_v60 }
 0x3a4   : > { %6733 = vmatpush2.bf16.msra.mxu0 %v7769_v61  ;;  %6693 = vmatprep.subr.bf16.mxu1 %v8128_v62  ;;  %v7651_v61 = vcombine.low %v1607_v43, %v1619_v51  ;;  %v8010_v62 = vcombine.high %v1966_v50, %v1978_v52 }
 0x3a5   : > { %6734 = vmatprep.subr.bf16.mxu0 %v7746_v3 }
 0x3a7   : > { %6694 = vmatpush2.bf16.msra.mxu1 %v8127_v9  ;;  %v1571_v9 = vld [vmem:[#allocation11 + $0x2d8] sm:$0xff] }
 0x3a8   : > { %6735 = vmatpush2.bf16.msra.mxu0 %v7745_v13  ;;  %6695 = vmatprep.subr.bf16.mxu1 %v8104_v16  ;;  %v8009_v13 = vcombine.low %v1966_v50, %v1978_v52  ;;  %v7627_v16 = vcombine.low %v1583_v54, %v1595_v57  ;;  %v7604_v63 = vcombine.high %v1559_v23, %v1571_v9  ;;  %v2206_v52 = vld [vmem:[#allocation11 + $0x16b0] sm:$0xff]  ;;  %v1823_v54 = vld [vmem:[#allocation11 + $0xab8] sm:$0xff] }
 0x3a9   : > { %6736 = vmatprep.subr.bf16.mxu0 %v7722_v18  ;;  %v7986_v18 = vcombine.high %v1942_v5, %v1954_v7  ;;  %v1835_v57 = vld [vmem:[#allocation11 + $0xb18] sm:$0xff] }
 0x3ab   : > { %6696 = vmatpush2.bf16.msra.mxu1 %v8103_v44  ;;  %v1547_v44 = vld [vmem:[#allocation11 + $0x218] sm:$0xff] }
 0x3ac   : > { %6737 = vmatpush2.bf16.msra.mxu0 %v7721_v22  ;;  %6747 = vmatprep.subr.bf16.mxu1 %v8082_v24  ;;  %v7985_v22 = vcombine.low %v1942_v5, %v1954_v7  ;;  %v7603_v24 = vcombine.low %v1559_v23, %v1571_v9  ;;  %v7579_v33 = vcombine.low %v1535_v20, %v1547_v44  ;;  %v1811_v5 = vld [vmem:[#allocation11 + $0xa58] sm:$0xff] }
 0x3ad   : > { %6788 = vmatprep.subr.bf16.mxu0 %v7700_v41  ;;  %v7580_v41 = vcombine.high %v1535_v20, %v1547_v44  ;;  %v7867_v23 = vcombine.low %v1823_v54, %v1835_v57 }
 0x3ae   : > { %v6453_v40 = vpop.f32.mrf.mxu1  ;;  %6698 = vmatmul.mubr.bf16.vlgmr.msra.gmra.mxu1 %v9167_v56 }
 0x3af   : > { %v6454_v34 = vadd.f32 %v6453_v40, %v6413_v36  ;;  %v9241_v6 = vpop.f32.mrf.mxu0  ;;  %6739 = vmatmul.mubr.bf16.vlgmr.msra.gmra.mxu0 %v9153_v28  ;;  %6748 = vmatpush1.bf16.msra.mxu1 %v8081_v31  ;;  %v1523_v31 = vld [vmem:[#allocation11 + $0x158] sm:$0xff] }
 0x3b0   : > { %6779 = vmatprep.mubr.bf16.mxu1 %v9165_v55  ;;  %v6455_v45 = vpop.f32.mrf.mxu1  ;;  %6789 = vmatpush1.bf16.msra.mxu0 %v7699_v35  ;;  %v7938_v35 = vcombine.high %v1894_v26, %v1906_v29  ;;  %v7556_v36 = vcombine.high %v1511_v30, %v1523_v31  ;;  %v1499_v40 = vld [vmem:[#allocation11 + $0x98] sm:$0xff]  ;;  %v7555_v43 = vcombine.low %v1511_v30, %v1523_v31 }
 0x3b1   : > { %7202 = vst [vmem:[%s9207_s8 + $0x20] sm:$0xff] %v6454_v34  ;;  %v6456_v48 = vadd.f32 %v6455_v45, %v6415_v2  ;;  %6820 = vmatprep.mubr.bf16.mxu0 %v9151_v27  ;;  %v9247_v49 = vpop.f32.mrf.mxu0  ;;  %6749 = vmatprep.subr.bf16.mxu1 %v8058_v37  ;;  %v1870_v37 = vld [vmem:[#allocation11 + $0xc30] sm:$0xff]  ;;  %v7532_v2 = vcombine.high %v1487_v39, %v1499_v40  ;;  %v1847_v45 = vld [vmem:[#allocation11 + $0xb78] sm:$0xff] }
 0x3b2   : > { %v6457_v53 = vpop.f32.mrf.mxu1  ;;  %6790 = vmatprep.subr.bf16.mxu0 %v7676_v42  ;;  %v7937_v42 = vcombine.low %v1894_v26, %v1906_v29  ;;  %v7914_v51 = vcombine.high %v1870_v37, %v1882_v38  ;;  %v2230_v34 = vld [vmem:[#allocation11 + $0x1770] sm:$0xff]  ;;  %v1763_v26 = vld [vmem:[#allocation11 + $0x8d8] sm:$0xff] }
 0x3b3   : > { %7203 = vst [vmem:[%s9207_s8 + $0x28] sm:$0xff] %v6456_v48  ;;  %v6498_v58 = vpop.f32.mrf.mxu0  ;;  %6750 = vmatpush1.bf16.msra.mxu1 %v8057_v0  ;;  %v2242_v0 = vld [vmem:[#allocation11 + $0x17d0] sm:$0xff]  ;;  %v7531_v48 = vcombine.low %v1487_v39, %v1499_v40 }
 0x3b4   : > { %v6458_v60 = vpop.f32.mrf.mxu1  ;;  %6791 = vmatpush1.bf16.msra.mxu0 %v7675_v46  ;;  %6751 = vmatprep.subr.bf16.mxu1 %v8034_v47  ;;  %v1859_v46 = vld [vmem:[#allocation11 + $0xbd8] sm:$0xff]  ;;  %v7913_v47 = vcombine.low %v1870_v37, %v1882_v38  ;;  %v2218_v53 = vld [vmem:[#allocation11 + $0x1710] sm:$0xff]  ;;  %v8273_v58 = vcombine.low %v2230_v34, %v2242_v0 }
 0x3b5   : > { %v6499_v3 = vpop.f32.mrf.mxu0  ;;  %6792 = vmatprep.subr.bf16.mxu0 %v7652_v8  ;;  %v8274_v8 = vcombine.high %v2230_v34, %v2242_v0  ;;  %v7892_v50 = vcombine.high %v1847_v45, %v1859_v46  ;;  %v8250_v60 = vcombine.high %v2206_v52, %v2218_v53  ;;  %v8249_v7 = vcombine.low %v2206_v52, %v2218_v53  ;;  %v1739_v37 = vld [vmem:[#allocation11 + $0x818] sm:$0xff] }
 0x3b6   : > { %v2194_v3 = vld [vmem:[#allocation11 + $0x1650] sm:$0xff]  ;;  %v1715_v34 = vld [vmem:[#allocation11 + $0x758] sm:$0xff] }
 0x3b7   : > { %6752 = vmatpush1.bf16.msra.mxu1 %v8033_v59  ;;  %v7891_v59 = vcombine.low %v1847_v45, %v1859_v46  ;;  %v1691_v52 = vld [vmem:[#allocation11 + $0x698] sm:$0xff] }
 0x3b8   : > { %6793 = vmatpush1.bf16.msra.mxu0 %v7651_v61  ;;  %6753 = vmatprep.subr.bf16.mxu1 %v8010_v62  ;;  %v7868_v61 = vcombine.high %v1823_v54, %v1835_v57  ;;  %v2182_v62 = vld [vmem:[#allocation11 + $0x15f0] sm:$0xff] }
 0x3b9   : > { %6794 = vmatprep.subr.bf16.mxu0 %v7628_v4  ;;  %v1799_v4 = vld [vmem:[#allocation11 + $0x9f8] sm:$0xff]  ;;  %v8226_v9 = vcombine.high %v2182_v62, %v2194_v3  ;;  %v8225_v19 = vcombine.low %v2182_v62, %v2194_v3  ;;  %v1656_v62 = vld [vmem:[#allocation11 + $0x580] sm:$0xff] }
 0x3ba   : > { %v7843_v20 = vcombine.low %v1799_v4, %v1811_v5  ;;  %v1668_v3 = vld [vmem:[#allocation11 + $0x5e0] sm:$0xff] }
 0x3bb   : > { %6754 = vmatpush1.bf16.msra.mxu1 %v8009_v13  ;;  %v7844_v13 = vcombine.high %v1799_v4, %v1811_v5  ;;  %v9254_v4 = vsub.s32 7, %v9103_v10 }
 0x3bc   : > { %6795 = vmatpush1.bf16.msra.mxu0 %v7627_v16  ;;  %6755 = vmatprep.subr.bf16.mxu1 %v7986_v18  ;;  %v2158_v16 = vld [vmem:[#allocation11 + $0x1530] sm:$0xff] }
 0x3bd   : > { %6796 = vmatprep.subr.bf16.mxu0 %v7604_v63  ;;  %v2170_v18 = vld [vmem:[#allocation11 + $0x1590] sm:$0xff]  ;;  %v1775_v63 = vld [vmem:[#allocation11 + $0x938] sm:$0xff] }
 0x3be   : > { %v8202_v44 = vcombine.high %v2158_v16, %v2170_v18  ;;  %v8201_v29 = vcombine.low %v2158_v16, %v2170_v18  ;;  %v7819_v30 = vcombine.low %v1775_v63, %v1787_v1  ;;  %v7702_v16 = vcombine.high %v1656_v62, %v1668_v3  ;;  %v2015_v18 = vld [vmem:[#allocation11 + $0x10b8] sm:$0xff] }
 0x3bf   : > { %6756 = vmatpush1.bf16.msra.mxu1 %v7985_v22  ;;  %v7820_v22 = vcombine.high %v1775_v63, %v1787_v1  ;;  %v2027_v63 = vld [vmem:[#allocation11 + $0x1118] sm:$0xff] }
 0x3c0   : > { %6797 = vmatpush1.bf16.msra.mxu0 %v7603_v24  ;;  %6757 = vmatprep.subr.bf16.mxu1 %v7962_v25  ;;  %v2134_v24 = vld [vmem:[#allocation11 + $0x1470] sm:$0xff] }
 0x3c1   : > { %6798 = vmatprep.subr.bf16.mxu0 %v7580_v41  ;;  %v2146_v25 = vld [vmem:[#allocation11 + $0x14d0] sm:$0xff]  ;;  %v1751_v41 = vld [vmem:[#allocation11 + $0x878] sm:$0xff] }
 0x3c2   : > { %v8178_v31 = vcombine.high %v2134_v24, %v2146_v25  ;;  %v8177_v38 = vcombine.low %v2134_v24, %v2146_v25  ;;  %v7795_v39 = vcombine.low %v1751_v41, %v1763_v26  ;;  %v8060_v24 = vcombine.high %v2015_v18, %v2027_v63  ;;  %v1991_v25 = vld [vmem:[#allocation11 + $0xff8] sm:$0xff] }
 0x3c3   : > { %6758 = vmatpush1.bf16.msra.mxu1 %v7961_v32  ;;  %v7796_v32 = vcombine.high %v1751_v41, %v1763_v26  ;;  %v2003_v41 = vld [vmem:[#allocation11 + $0x1058] sm:$0xff] }
 0x3c4   : > { %6799 = vmatpush1.bf16.msra.mxu0 %v7579_v33  ;;  %6759 = vmatprep.subr.bf16.mxu1 %v7938_v35  ;;  %v2110_v33 = vld [vmem:[#allocation11 + $0x13b0] sm:$0xff] }
 0x3c5   : > { %6800 = vmatprep.subr.bf16.mxu0 %v7556_v36  ;;  %v2122_v35 = vld [vmem:[#allocation11 + $0x1410] sm:$0xff]  ;;  %v1727_v36 = vld [vmem:[#allocation11 + $0x7b8] sm:$0xff] }
 0x3c6   : > { %v8154_v40 = vcombine.high %v2110_v33, %v2122_v35  ;;  %v8153_v0 = vcombine.low %v2110_v33, %v2122_v35  ;;  %v7771_v45 = vcombine.low %v1727_v36, %v1739_v37 }
 0x3c7   : > { %6760 = vmatpush1.bf16.msra.mxu1 %v7937_v42  ;;  %v7772_v42 = vcombine.high %v1727_v36, %v1739_v37 }
 0x3c8   : > { %6801 = vmatpush1.bf16.msra.mxu0 %v7555_v43  ;;  %6761 = vmatprep.subr.bf16.mxu1 %v7914_v51  ;;  %v2086_v43 = vld [vmem:[#allocation11 + $0x12f0] sm:$0xff] }
 0x3c9   : > { %6802 = vmatprep.subr.bf16.mxu0 %v7532_v2  ;;  %v2098_v51 = vld [vmem:[#allocation11 + $0x1350] sm:$0xff]  ;;  %v1703_v2 = vld [vmem:[#allocation11 + $0x6f8] sm:$0xff] }
 0x3ca   : > { %v8130_v46 = vcombine.high %v2086_v43, %v2098_v51  ;;  %v8129_v53 = vcombine.low %v2086_v43, %v2098_v51  ;;  %v7747_v54 = vcombine.low %v1703_v2, %v1715_v34  ;;  %v1979_v43 = vld [vmem:[#allocation11 + $0xf98] sm:$0xff] }
 0x3cb   : > { %6762 = vmatpush1.bf16.msra.mxu1 %v7913_v47  ;;  %v7748_v47 = vcombine.high %v1703_v2, %v1715_v34  ;;  %v1584_v2 = vld [vmem:[#allocation11 + $0x340] sm:$0xff] }
 0x3cc   : > { %6803 = vmatpush1.bf16.msra.mxu0 %v7531_v48  ;;  %6763 = vmatprep.subr.bf16.mxu1 %v8274_v8  ;;  %v2062_v48 = vld [vmem:[#allocation11 + $0x1230] sm:$0xff]  ;;  %v1596_v34 = vld [vmem:[#allocation11 + $0x3a0] sm:$0xff] }
 0x3cd   : > { %6804 = vmatprep.subr.bf16.mxu0 %v7892_v50  ;;  %v2074_v8 = vld [vmem:[#allocation11 + $0x1290] sm:$0xff]  ;;  %v1679_v50 = vld [vmem:[#allocation11 + $0x638] sm:$0xff] }
 0x3ce   : > { %v8106_v57 = vcombine.high %v2062_v48, %v2074_v8  ;;  %v8105_v5 = vcombine.low %v2062_v48, %v2074_v8 }
 0x3cf   : > { %6764 = vmatpush2.bf16.msra.mxu1 %v8273_v58  ;;  %v9251_v58 = vsub.s32 6, %v9103_v10  ;;  %v1644_v10 = vld [vmem:[#allocation11 + $0x520] sm:$0xff] }
 0x3d0   : > { %6805 = vmatpush2.bf16.msra.mxu0 %v7891_v59  ;;  %6765 = vmatprep.subr.bf16.mxu1 %v8250_v60  ;;  %v7724_v59 = vcombine.high %v1679_v50, %v1691_v52  ;;  %v2039_v60 = vld [vmem:[#allocation11 + $0x1178] sm:$0xff] }
 0x3d1   : > { %6806 = vmatprep.subr.bf16.mxu0 %v7868_v61  ;;  %v2051_v61 = vld [vmem:[#allocation11 + $0x11d8] sm:$0xff] }
 0x3d3   : > { %6766 = vmatpush2.bf16.msra.mxu1 %v8249_v7  ;;  %v7723_v7 = vcombine.low %v1679_v50, %v1691_v52  ;;  %v7630_v50 = vcombine.high %v1584_v2, %v1596_v34  ;;  %v1943_v52 = vld [vmem:[#allocation11 + $0xe78] sm:$0xff] }
 0x3d4   : > { %6807 = vmatpush2.bf16.msra.mxu0 %v7867_v23  ;;  %6767 = vmatprep.subr.bf16.mxu1 %v8226_v9  ;;  %v8084_v23 = vcombine.high %v2039_v60, %v2051_v61  ;;  %v8600_v9 = vld [vmem:[#allocation13] sm:$0xff] }
 0x3d5   : > { %6808 = vmatprep.subr.bf16.mxu0 %v7844_v13  ;;  %v2281_v13 = vrot.slane %v8600_v9, %v9251_v58  ;;  %v2285_v1 = vrot.slane %v8600_v9, %v9254_v4 }
 0x3d7   : > { %6768 = vmatpush2.bf16.msra.mxu1 %v8225_v19  ;;  %v8083_v19 = vcombine.low %v2039_v60, %v2051_v61  ;;  %v7629_v60 = vcombine.low %v1584_v2, %v1596_v34  ;;  %v2219_v2 = vld [vmem:[#allocation11 + $0x1718] sm:$0xff]  ;;  %v1824_v34 = vld [vmem:[#allocation11 + $0xac0] sm:$0xff] }
 0x3d8   : > { %6809 = vmatpush2.bf16.msra.mxu0 %v7843_v20  ;;  %6769 = vmatprep.subr.bf16.mxu1 %v8202_v44  ;;  %v1632_v20 = vld [vmem:[#allocation11 + $0x4c0] sm:$0xff]  ;;  %v7701_v44 = vcombine.low %v1656_v62, %v1668_v3  ;;  %v1919_v3 = vld [vmem:[#allocation11 + $0xdb8] sm:$0xff] }
 0x3d9   : > { %6810 = vmatprep.subr.bf16.mxu0 %v7820_v22  ;;  %v6495_v22 = vadd.f32 %v9241_v6, %v2281_v13  ;;  %v8059_v6 = vcombine.low %v2015_v18, %v2027_v63  ;;  %v7677_v37 = vcombine.low %v1632_v20, %v1644_v10  ;;  %v1895_v63 = vld [vmem:[#allocation11 + $0xcf8] sm:$0xff] }
 0x3db   : > { %6770 = vmatpush2.bf16.msra.mxu1 %v8201_v29  ;;  %v7678_v29 = vcombine.high %v1632_v20, %v1644_v10  ;;  %v1524_v20 = vld [vmem:[#allocation11 + $0x160] sm:$0xff] }
 0x3dc   : > { %6811 = vmatpush2.bf16.msra.mxu0 %v7819_v30  ;;  %6771 = vmatprep.subr.bf16.mxu1 %v8178_v31  ;;  %v1608_v30 = vld [vmem:[#allocation11 + $0x400] sm:$0xff] }
 0x3dd   : > { %6812 = vmatprep.subr.bf16.mxu0 %v7796_v32  ;;  %v1620_v31 = vld [vmem:[#allocation11 + $0x460] sm:$0xff]  ;;  %v6497_v32 = vadd.f32 %v9247_v49, %v2285_v1  ;;  %v1907_v1 = vld [vmem:[#allocation11 + $0xd58] sm:$0xff] }
 0x3de   : > { %v7654_v49 = vcombine.high %v1608_v30, %v1620_v31 }
 0x3df   : > { %6772 = vmatpush2.bf16.msra.mxu1 %v8177_v38  ;;  %v8036_v38 = vcombine.high %v1991_v25, %v2003_v41 }
 0x3e0   : > { %6813 = vmatpush2.bf16.msra.mxu0 %v7795_v39  ;;  %6773 = vmatprep.subr.bf16.mxu1 %v8154_v40 }
 0x3e1   : > { %6814 = vmatprep.subr.bf16.mxu0 %v7772_v42  ;;  %v1967_v42 = vld [vmem:[#allocation11 + $0xf38] sm:$0xff] }
 0x3e2   : > { %v8012_v48 = vcombine.high %v1967_v42, %v1979_v43 }
 0x3e3   : > { %6774 = vmatpush2.bf16.msra.mxu1 %v8153_v0 }
 0x3e4   : > { %6815 = vmatpush2.bf16.msra.mxu0 %v7771_v45  ;;  %6775 = vmatprep.subr.bf16.mxu1 %v8130_v46  ;;  %v8035_v45 = vcombine.low %v1991_v25, %v2003_v41  ;;  %v1871_v25 = vld [vmem:[#allocation11 + $0xc38] sm:$0xff] }
 0x3e5   : > { %6816 = vmatprep.subr.bf16.mxu0 %v7748_v47  ;;  %v7653_v47 = vcombine.low %v1608_v30, %v1620_v31  ;;  %v1883_v41 = vld [vmem:[#allocation11 + $0xc98] sm:$0xff]  ;;  %v7939_v30 = vcombine.low %v1895_v63, %v1907_v1 }
 0x3e7   : > { %6776 = vmatpush2.bf16.msra.mxu1 %v8129_v53  ;;  %v1955_v53 = vld [vmem:[#allocation11 + $0xed8] sm:$0xff] }
 0x3e8   : > { %6817 = vmatpush2.bf16.msra.mxu0 %v7747_v54  ;;  %6777 = vmatprep.subr.bf16.mxu1 %v8106_v57  ;;  %v1560_v54 = vld [vmem:[#allocation11 + $0x280] sm:$0xff]  ;;  %v7988_v61 = vcombine.high %v1943_v52, %v1955_v53  ;;  %v7987_v9 = vcombine.low %v1943_v52, %v1955_v53 }
 0x3e9   : > { %6818 = vmatprep.subr.bf16.mxu0 %v7724_v59  ;;  %v1572_v57 = vld [vmem:[#allocation11 + $0x2e0] sm:$0xff]  ;;  %v8011_v59 = vcombine.low %v1967_v42, %v1979_v43 }
 0x3ea   : > { %v7606_v62 = vcombine.high %v1560_v54, %v1572_v57  ;;  %v7605_v13 = vcombine.low %v1560_v54, %v1572_v57  ;;  %v1800_v52 = vld [vmem:[#allocation11 + $0xa00] sm:$0xff] }
 0x3eb   : > { %6778 = vmatpush2.bf16.msra.mxu1 %v8105_v5  ;;  %v1931_v5 = vld [vmem:[#allocation11 + $0xe18] sm:$0xff]  ;;  %v1812_v53 = vld [vmem:[#allocation11 + $0xa60] sm:$0xff] }
 0x3ec   : > { %6819 = vmatpush2.bf16.msra.mxu0 %v7723_v7  ;;  %6829 = vmatprep.subr.bf16.mxu1 %v8084_v23  ;;  %v1536_v7 = vld [vmem:[#allocation11 + $0x1c0] sm:$0xff]  ;;  %v7963_v10 = vcombine.low %v1919_v3, %v1931_v5 }
 0x3ed   : > { %6870 = vmatprep.subr.bf16.mxu0 %v7702_v16  ;;  %v1548_v23 = vld [vmem:[#allocation11 + $0x220] sm:$0xff]  ;;  %v7964_v16 = vcombine.high %v1919_v3, %v1931_v5 }
 0x3ee   : > { %v6535_v26 = vpop.f32.mrf.mxu1  ;;  %6780 = vmatmul.mubr.bf16.vlgmr.msra.gmra.mxu1 %v9167_v56  ;;  %v7582_v18 = vcombine.high %v1536_v7, %v1548_v23  ;;  %v1776_v3 = vld [vmem:[#allocation11 + $0x940] sm:$0xff] }
 0x3ef   : > { %v6536_v33 = vadd.f32 %v6535_v26, %v6495_v22  ;;  %v9261_v35 = vpop.f32.mrf.mxu0  ;;  %6821 = vmatmul.mubr.bf16.vlgmr.msra.gmra.mxu0 %v9153_v28  ;;  %6830 = vmatpush1.bf16.msra.mxu1 %v8083_v19  ;;  %v1512_v19 = vld [vmem:[#allocation11 + $0x100] sm:$0xff]  ;;  %v7940_v22 = vcombine.high %v1895_v63, %v1907_v1 }
 0x3f0   : > { %6861 = vmatprep.mubr.bf16.mxu1 %v9165_v55  ;;  %v6537_v36 = vpop.f32.mrf.mxu1  ;;  %6871 = vmatpush1.bf16.msra.mxu0 %v7701_v44  ;;  %v7581_v44 = vcombine.low %v1536_v7, %v1548_v23  ;;  %v1488_v26 = vld [vmem:[#allocation11 + $0x40] sm:$0xff]  ;;  %v7557_v31 = vcombine.low %v1512_v19, %v1524_v20  ;;  %v7845_v23 = vcombine.low %v1800_v52, %v1812_v53 }
 0x3f1   : > { %7204 = vst [vmem:[%s9207_s8 + $0x30] sm:$0xff] %v6536_v33  ;;  %v6538_v39 = vadd.f32 %v6537_v36, %v6497_v32  ;;  %6902 = vmatprep.mubr.bf16.mxu0 %v9151_v27  ;;  %v9267_v40 = vpop.f32.mrf.mxu0  ;;  %6831 = vmatprep.subr.bf16.mxu1 %v8060_v24  ;;  %v7558_v24 = vcombine.high %v1512_v19, %v1524_v20  ;;  %v2243_v36 = vld [vmem:[#allocation11 + $0x17d8] sm:$0xff]  ;;  %v1788_v5 = vld [vmem:[#allocation11 + $0x9a0] sm:$0xff] }
 0x3f2   : > { %v6539_v51 = vpop.f32.mrf.mxu1  ;;  %6872 = vmatprep.subr.bf16.mxu0 %v7678_v29  ;;  %v1500_v29 = vld [vmem:[#allocation11 + $0xa0] sm:$0xff]  ;;  %v7916_v32 = vcombine.high %v1871_v25, %v1883_v41  ;;  %v7821_v20 = vcombine.low %v1776_v3, %v1788_v5 }
 0x3f3   : > { %7205 = vst [vmem:[%s9207_s8 + $0x38] sm:$0xff] %v6538_v39  ;;  %v6580_v0 = vpop.f32.mrf.mxu0  ;;  %6832 = vmatpush1.bf16.msra.mxu1 %v8059_v6  ;;  %v7534_v33 = vcombine.high %v1488_v26, %v1500_v29  ;;  %v2231_v6 = vld [vmem:[#allocation11 + $0x1778] sm:$0xff]  ;;  %v7915_v39 = vcombine.low %v1871_v25, %v1883_v41  ;;  %v1752_v63 = vld [vmem:[#allocation11 + $0x880] sm:$0xff] }
 0x3f4   : > { %v6540_v46 = vpop.f32.mrf.mxu1  ;;  %6873 = vmatpush1.bf16.msra.mxu0 %v7677_v37  ;;  %6833 = vmatprep.subr.bf16.mxu1 %v8036_v38  ;;  %v1848_v37 = vld [vmem:[#allocation11 + $0xb80] sm:$0xff]  ;;  %v8276_v42 = vcombine.high %v2231_v6, %v2243_v36  ;;  %v2207_v51 = vld [vmem:[#allocation11 + $0x16b8] sm:$0xff] }
 0x3f5   : > { %v6581_v8 = vpop.f32.mrf.mxu0  ;;  %6874 = vmatprep.subr.bf16.mxu0 %v7654_v49  ;;  %v1860_v38 = vld [vmem:[#allocation11 + $0xbe0] sm:$0xff]  ;;  %v7533_v49 = vcombine.low %v1488_v26, %v1500_v29  ;;  %v8251_v54 = vcombine.low %v2207_v51, %v2219_v2 }
 0x3f6   : > { %v7894_v43 = vcombine.high %v1848_v37, %v1860_v38  ;;  %v1836_v0 = vld [vmem:[#allocation11 + $0xb20] sm:$0xff]  ;;  %v7893_v46 = vcombine.low %v1848_v37, %v1860_v38  ;;  %v2183_v8 = vld [vmem:[#allocation11 + $0x15f8] sm:$0xff] }
 0x3f7   : > { %6834 = vmatpush1.bf16.msra.mxu1 %v8035_v45  ;;  %v8275_v45 = vcombine.low %v2231_v6, %v2243_v36  ;;  %v7869_v57 = vcombine.low %v1824_v34, %v1836_v0  ;;  %v1764_v1 = vld [vmem:[#allocation11 + $0x8e0] sm:$0xff] }
 0x3f8   : > { %6875 = vmatpush1.bf16.msra.mxu0 %v7653_v47  ;;  %6835 = vmatprep.subr.bf16.mxu1 %v8012_v48  ;;  %v8252_v47 = vcombine.high %v2207_v51, %v2219_v2  ;;  %v7870_v48 = vcombine.high %v1824_v34, %v1836_v0  ;;  %v1728_v25 = vld [vmem:[#allocation11 + $0x7c0] sm:$0xff]  ;;  %v7797_v29 = vcombine.low %v1752_v63, %v1764_v1 }
 0x3f9   : > { %6876 = vmatprep.subr.bf16.mxu0 %v7630_v50  ;;  %v2195_v50 = vld [vmem:[#allocation11 + $0x1658] sm:$0xff]  ;;  %v1740_v41 = vld [vmem:[#allocation11 + $0x820] sm:$0xff] }
 0x3fa   : > { %v8227_v7 = vcombine.low %v2183_v8, %v2195_v50  ;;  %v1704_v6 = vld [vmem:[#allocation11 + $0x700] sm:$0xff]  ;;  %v7773_v38 = vcombine.low %v1728_v25, %v1740_v41 }
 0x3fb   : > { %6836 = vmatpush1.bf16.msra.mxu1 %v8011_v59  ;;  %v8228_v59 = vcombine.high %v2183_v8, %v2195_v50  ;;  %v1716_v36 = vld [vmem:[#allocation11 + $0x760] sm:$0xff]  ;;  %v9270_v8 = vld [vmem:[#allocation13 + $0x8] sm:$0xff] }
 0x3fc   : > { %6877 = vmatpush1.bf16.msra.mxu0 %v7629_v60  ;;  %6837 = vmatprep.subr.bf16.mxu1 %v7988_v61  ;;  %v7846_v60 = vcombine.high %v1800_v52, %v1812_v53  ;;  %v2159_v61 = vld [vmem:[#allocation11 + $0x1538] sm:$0xff]  ;;  %v1680_v51 = vld [vmem:[#allocation11 + $0x640] sm:$0xff]  ;;  %v7749_v0 = vcombine.low %v1704_v6, %v1716_v36  ;;  %v1657_v50 = vld [vmem:[#allocation11 + $0x588] sm:$0xff] }
 0x3fd   : > { %6878 = vmatprep.subr.bf16.mxu0 %v7606_v62  ;;  %v2171_v62 = vld [vmem:[#allocation11 + $0x1598] sm:$0xff]  ;;  %v1692_v2 = vld [vmem:[#allocation11 + $0x6a0] sm:$0xff]  ;;  %v1669_v52 = vld [vmem:[#allocation11 + $0x5e8] sm:$0xff] }
 0x3fe   : > { %v8203_v19 = vcombine.low %v2159_v61, %v2171_v62 }
 0x3ff   : > { %6838 = vmatpush1.bf16.msra.mxu1 %v7987_v9  ;;  %v8204_v9 = vcombine.high %v2159_v61, %v2171_v62  ;;  %v2016_v61 = vld [vmem:[#allocation11 + $0x10c0] sm:$0xff] }
 0x400   : > { %6879 = vmatpush1.bf16.msra.mxu0 %v7605_v13  ;;  %6839 = vmatprep.subr.bf16.mxu1 %v7964_v16  ;;  %v7822_v13 = vcombine.high %v1776_v3, %v1788_v5  ;;  %v2135_v16 = vld [vmem:[#allocation11 + $0x1478] sm:$0xff]  ;;  %v2028_v62 = vld [vmem:[#allocation11 + $0x1120] sm:$0xff]  ;;  %v2293_v3 = vrot.slane %v9270_v8, %v9112_v14 }
 0x401   : > { %6880 = vmatprep.subr.bf16.mxu0 %v7582_v18  ;;  %v2147_v18 = vld [vmem:[#allocation11 + $0x14d8] sm:$0xff] }
 0x402   : > { %v8179_v26 = vcombine.low %v2135_v16, %v2147_v18 }
 0x403   : > { %6840 = vmatpush1.bf16.msra.mxu1 %v7963_v10  ;;  %v8180_v10 = vcombine.high %v2135_v16, %v2147_v18  ;;  %v8062_v16 = vcombine.high %v2016_v61, %v2028_v62  ;;  %v1992_v18 = vld [vmem:[#allocation11 + $0x1000] sm:$0xff] }
 0x404   : > { %6881 = vmatpush1.bf16.msra.mxu0 %v7581_v44  ;;  %6841 = vmatprep.subr.bf16.mxu1 %v7940_v22  ;;  %v7798_v44 = vcombine.high %v1752_v63, %v1764_v1  ;;  %v2111_v22 = vld [vmem:[#allocation11 + $0x13b8] sm:$0xff]  ;;  %v2004_v63 = vld [vmem:[#allocation11 + $0x1060] sm:$0xff] }
 0x405   : > { %6882 = vmatprep.subr.bf16.mxu0 %v7558_v24  ;;  %v2123_v24 = vld [vmem:[#allocation11 + $0x1418] sm:$0xff] }
 0x406   : > { %v8155_v37 = vcombine.low %v2111_v22, %v2123_v24 }
 0x407   : > { %6842 = vmatpush1.bf16.msra.mxu1 %v7939_v30  ;;  %v8156_v30 = vcombine.high %v2111_v22, %v2123_v24 }
 0x408   : > { %6883 = vmatpush1.bf16.msra.mxu0 %v7557_v31  ;;  %6843 = vmatprep.subr.bf16.mxu1 %v7916_v32  ;;  %v7774_v31 = vcombine.high %v1728_v25, %v1740_v41  ;;  %v2087_v32 = vld [vmem:[#allocation11 + $0x12f8] sm:$0xff] }
 0x409   : > { %6884 = vmatprep.subr.bf16.mxu0 %v7534_v33  ;;  %v2099_v33 = vld [vmem:[#allocation11 + $0x1358] sm:$0xff] }
 0x40a   : > { %v8131_v34 = vcombine.low %v2087_v32, %v2099_v33 }
 0x40b   : > { %6844 = vmatpush1.bf16.msra.mxu1 %v7915_v39  ;;  %v8132_v39 = vcombine.high %v2087_v32, %v2099_v33  ;;  %v1980_v32 = vld [vmem:[#allocation11 + $0xfa0] sm:$0xff] }
 0x40c   : > { %6885 = vmatpush1.bf16.msra.mxu0 %v7533_v49  ;;  %6845 = vmatprep.subr.bf16.mxu1 %v8276_v42  ;;  %v7750_v49 = vcombine.high %v1704_v6, %v1716_v36  ;;  %v2063_v42 = vld [vmem:[#allocation11 + $0x1238] sm:$0xff]  ;;  %v1585_v6 = vld [vmem:[#allocation11 + $0x348] sm:$0xff] }
 0x40d   : > { %6886 = vmatprep.subr.bf16.mxu0 %v7894_v43  ;;  %v2075_v43 = vld [vmem:[#allocation11 + $0x1298] sm:$0xff]  ;;  %v1597_v36 = vld [vmem:[#allocation11 + $0x3a8] sm:$0xff] }
 0x40e   : > { %v8107_v53 = vcombine.low %v2063_v42, %v2075_v43 }
 0x40f   : > { %6846 = vmatpush2.bf16.msra.mxu1 %v8275_v45  ;;  %v8108_v45 = vcombine.high %v2063_v42, %v2075_v43 }
 0x410   : > { %6887 = vmatpush2.bf16.msra.mxu0 %v7893_v46  ;;  %6847 = vmatprep.subr.bf16.mxu1 %v8252_v47  ;;  %v7726_v46 = vcombine.high %v1680_v51, %v1692_v2  ;;  %v2040_v47 = vld [vmem:[#allocation11 + $0x1180] sm:$0xff] }
 0x411   : > { %6888 = vmatprep.subr.bf16.mxu0 %v7870_v48  ;;  %v2052_v48 = vld [vmem:[#allocation11 + $0x11e0] sm:$0xff] }
 0x412   : > { %v8085_v5 = vcombine.low %v2040_v47, %v2052_v48 }
 0x413   : > { %6848 = vmatpush2.bf16.msra.mxu1 %v8251_v54  ;;  %v7725_v54 = vcombine.low %v1680_v51, %v1692_v2  ;;  %v7632_v51 = vcombine.high %v1585_v6, %v1597_v36  ;;  %v1944_v2 = vld [vmem:[#allocation11 + $0xe80] sm:$0xff] }
 0x414   : > { %6889 = vmatpush2.bf16.msra.mxu0 %v7869_v57  ;;  %6849 = vmatprep.subr.bf16.mxu1 %v8228_v59  ;;  %v8086_v57 = vcombine.high %v2040_v47, %v2052_v48  ;;  %v2289_v59 = vrot.slane %v9270_v8, %v9106_v11  ;;  %v7631_v47 = vcombine.low %v1585_v6, %v1597_v36  ;;  %v2208_v6 = vld [vmem:[#allocation11 + $0x16c0] sm:$0xff] }
 0x415   : > { %6890 = vmatprep.subr.bf16.mxu0 %v7846_v60  ;;  %v7704_v60 = vcombine.high %v1657_v50, %v1669_v52  ;;  %v2220_v36 = vld [vmem:[#allocation11 + $0x1720] sm:$0xff] }
 0x417   : > { %6850 = vmatpush2.bf16.msra.mxu1 %v8227_v7  ;;  %v1633_v7 = vld [vmem:[#allocation11 + $0x4c8] sm:$0xff] }
 0x418   : > { %6891 = vmatpush2.bf16.msra.mxu0 %v7845_v23  ;;  %6851 = vmatprep.subr.bf16.mxu1 %v8204_v9  ;;  %v1645_v23 = vld [vmem:[#allocation11 + $0x528] sm:$0xff]  ;;  %v7703_v9 = vcombine.low %v1657_v50, %v1669_v52  ;;  %v1920_v52 = vld [vmem:[#allocation11 + $0xdc0] sm:$0xff] }
 0x419   : > { %6892 = vmatprep.subr.bf16.mxu0 %v7822_v13  ;;  %v6577_v13 = vadd.f32 %v9261_v35, %v2289_v59  ;;  %v8061_v35 = vcombine.low %v2016_v61, %v2028_v62  ;;  %v7679_v41 = vcombine.low %v1633_v7, %v1645_v23 }
 0x41b   : > { %6852 = vmatpush2.bf16.msra.mxu1 %v8203_v19  ;;  %v7680_v19 = vcombine.high %v1633_v7, %v1645_v23  ;;  %v1513_v7 = vld [vmem:[#allocation11 + $0x108] sm:$0xff] }
 0x41c   : > { %6893 = vmatpush2.bf16.msra.mxu0 %v7821_v20  ;;  %6853 = vmatprep.subr.bf16.mxu1 %v8180_v10  ;;  %v1609_v20 = vld [vmem:[#allocation11 + $0x408] sm:$0xff] }
 0x41d   : > { %6894 = vmatprep.subr.bf16.mxu0 %v7798_v44  ;;  %v1621_v10 = vld [vmem:[#allocation11 + $0x468] sm:$0xff]  ;;  %v6579_v44 = vadd.f32 %v9267_v40, %v2293_v3  ;;  %v1896_v3 = vld [vmem:[#allocation11 + $0xd00] sm:$0xff] }
 0x41e   : > { %v7656_v40 = vcombine.high %v1609_v20, %v1621_v10  ;;  %v1525_v23 = vld [vmem:[#allocation11 + $0x168] sm:$0xff] }
 0x41f   : > { %6854 = vmatpush2.bf16.msra.mxu1 %v8179_v26  ;;  %v8038_v26 = vcombine.high %v1992_v18, %v2004_v63 }
 0x420   : > { %6895 = vmatpush2.bf16.msra.mxu0 %v7797_v29  ;;  %6855 = vmatprep.subr.bf16.mxu1 %v8156_v30 }
 0x421   : > { %6896 = vmatprep.subr.bf16.mxu0 %v7774_v31  ;;  %v1968_v31 = vld [vmem:[#allocation11 + $0xf40] sm:$0xff] }
 0x422   : > { %v8014_v42 = vcombine.high %v1968_v31, %v1980_v32 }
 0x423   : > { %6856 = vmatpush2.bf16.msra.mxu1 %v8155_v37 }
 0x424   : > { %6897 = vmatpush2.bf16.msra.mxu0 %v7773_v38  ;;  %6857 = vmatprep.subr.bf16.mxu1 %v8132_v39  ;;  %v8037_v38 = vcombine.low %v1992_v18, %v2004_v63  ;;  %v7560_v18 = vcombine.high %v1513_v7, %v1525_v23  ;;  %v1872_v63 = vld [vmem:[#allocation11 + $0xc40] sm:$0xff] }
 0x425   : > { %6898 = vmatprep.subr.bf16.mxu0 %v7750_v49  ;;  %v7655_v49 = vcombine.low %v1609_v20, %v1621_v10  ;;  %v1501_v20 = vld [vmem:[#allocation11 + $0xa8] sm:$0xff] }
 0x427   : > { %6858 = vmatpush2.bf16.msra.mxu1 %v8131_v34  ;;  %v1956_v34 = vld [vmem:[#allocation11 + $0xee0] sm:$0xff] }
 0x428   : > { %6899 = vmatpush2.bf16.msra.mxu0 %v7749_v0  ;;  %6859 = vmatprep.subr.bf16.mxu1 %v8108_v45  ;;  %v1561_v0 = vld [vmem:[#allocation11 + $0x288] sm:$0xff]  ;;  %v7990_v48 = vcombine.high %v1944_v2, %v1956_v34  ;;  %v7989_v59 = vcombine.low %v1944_v2, %v1956_v34  ;;  %v2196_v2 = vld [vmem:[#allocation11 + $0x1660] sm:$0xff] }
 0x429   : > { %6900 = vmatprep.subr.bf16.mxu0 %v7726_v46  ;;  %v1573_v45 = vld [vmem:[#allocation11 + $0x2e8] sm:$0xff]  ;;  %v8013_v46 = vcombine.low %v1968_v31, %v1980_v32 }
 0x42a   : > { %v7608_v50 = vcombine.high %v1561_v0, %v1573_v45  ;;  %v1801_v34 = vld [vmem:[#allocation11 + $0xa08] sm:$0xff] }
 0x42b   : > { %6860 = vmatpush2.bf16.msra.mxu1 %v8107_v53  ;;  %v1932_v53 = vld [vmem:[#allocation11 + $0xe20] sm:$0xff] }
 0x42c   : > { %6901 = vmatpush2.bf16.msra.mxu0 %v7725_v54  ;;  %6911 = vmatprep.subr.bf16.mxu1 %v8086_v57  ;;  %v1537_v54 = vld [vmem:[#allocation11 + $0x1c8] sm:$0xff]  ;;  %v7966_v61 = vcombine.high %v1920_v52, %v1932_v53 }
 0x42d   : > { %6952 = vmatprep.subr.bf16.mxu0 %v7704_v60  ;;  %v1549_v57 = vld [vmem:[#allocation11 + $0x228] sm:$0xff]  ;;  %v7607_v60 = vcombine.low %v1561_v0, %v1573_v45  ;;  %v8253_v45 = vcombine.low %v2208_v6, %v2220_v36 }
 0x42e   : > { %v6617_v1 = vpop.f32.mrf.mxu1  ;;  %6862 = vmatmul.mubr.bf16.vlgmr.msra.gmra.mxu1 %v9167_v56  ;;  %v7584_v62 = vcombine.high %v1537_v54, %v1549_v57  ;;  %v1813_v0 = vld [vmem:[#allocation11 + $0xa68] sm:$0xff] }
 0x42f   : > { %v6618_v22 = vadd.f32 %v6617_v1, %v6577_v13  ;;  %v9279_v24 = vpop.f32.mrf.mxu0  ;;  %6903 = vmatmul.mubr.bf16.vlgmr.msra.gmra.mxu0 %v9153_v28  ;;  %6912 = vmatpush1.bf16.msra.mxu1 %v8085_v5  ;;  %v1908_v5 = vld [vmem:[#allocation11 + $0xd60] sm:$0xff]  ;;  %v7583_v13 = vcombine.low %v1537_v54, %v1549_v57  ;;  %v1789_v54 = vld [vmem:[#allocation11 + $0x9a8] sm:$0xff] }
 0x430   : > { %6943 = vmatprep.mubr.bf16.mxu1 %v9165_v55  ;;  %v6619_v25 = vpop.f32.mrf.mxu1  ;;  %6953 = vmatpush1.bf16.msra.mxu0 %v7703_v9  ;;  %v7965_v9 = vcombine.low %v1920_v52, %v1932_v53  ;;  %v1884_v1 = vld [vmem:[#allocation11 + $0xca0] sm:$0xff]  ;;  %v7941_v10 = vcombine.low %v1896_v3, %v1908_v5  ;;  %v1777_v53 = vld [vmem:[#allocation11 + $0x948] sm:$0xff] }
 0x431   : > { %7206 = vst [vmem:[%s9207_s8 + $0x40] sm:$0xff] %v6618_v22  ;;  %v6620_v29 = vadd.f32 %v6619_v25, %v6579_v44  ;;  %6984 = vmatprep.mubr.bf16.mxu0 %v9151_v27  ;;  %v9285_v30 = vpop.f32.mrf.mxu0  ;;  %6913 = vmatprep.subr.bf16.mxu1 %v8062_v16  ;;  %v7942_v16 = vcombine.high %v1896_v3, %v1908_v5  ;;  %v2232_v25 = vld [vmem:[#allocation11 + $0x1780] sm:$0xff]  ;;  %v1753_v5 = vld [vmem:[#allocation11 + $0x888] sm:$0xff] }
 0x432   : > { %v6621_v33 = vpop.f32.mrf.mxu1  ;;  %6954 = vmatprep.subr.bf16.mxu0 %v7680_v19  ;;  %v1489_v19 = vld [vmem:[#allocation11 + $0x48] sm:$0xff]  ;;  %v7559_v44 = vcombine.low %v1513_v7, %v1525_v23  ;;  %v7918_v22 = vcombine.high %v1872_v63, %v1884_v1  ;;  %v2172_v52 = vld [vmem:[#allocation11 + $0x15a0] sm:$0xff] }
 0x433   : > { %7207 = vst [vmem:[%s9207_s8 + $0x48] sm:$0xff] %v6620_v29  ;;  %v6662_v37 = vpop.f32.mrf.mxu0  ;;  %6914 = vmatpush1.bf16.msra.mxu1 %v8061_v35  ;;  %v7536_v35 = vcombine.high %v1489_v19, %v1501_v20  ;;  %v1861_v29 = vld [vmem:[#allocation11 + $0xbe8] sm:$0xff]  ;;  %v7535_v31 = vcombine.low %v1489_v19, %v1501_v20  ;;  %v2148_v3 = vld [vmem:[#allocation11 + $0x14e0] sm:$0xff] }
 0x434   : > { %v6622_v39 = vpop.f32.mrf.mxu1  ;;  %6955 = vmatpush1.bf16.msra.mxu0 %v7679_v41  ;;  %6915 = vmatprep.subr.bf16.mxu1 %v8038_v26  ;;  %v2244_v41 = vld [vmem:[#allocation11 + $0x17e0] sm:$0xff]  ;;  %v1849_v26 = vld [vmem:[#allocation11 + $0xb88] sm:$0xff] }
 0x435   : > { %v6663_v43 = vpop.f32.mrf.mxu0  ;;  %6956 = vmatprep.subr.bf16.mxu0 %v7656_v40  ;;  %v7917_v40 = vcombine.low %v1872_v63, %v1884_v1  ;;  %v8278_v32 = vcombine.high %v2232_v25, %v2244_v41  ;;  %v7896_v33 = vcombine.high %v1849_v26, %v1861_v29  ;;  %v1825_v37 = vld [vmem:[#allocation11 + $0xac8] sm:$0xff]  ;;  %v8277_v39 = vcombine.low %v2232_v25, %v2244_v41  ;;  %v2124_v63 = vld [vmem:[#allocation11 + $0x1420] sm:$0xff] }
 0x436   : > { %v1765_v7 = vld [vmem:[#allocation11 + $0x8e8] sm:$0xff]  ;;  %v2100_v25 = vld [vmem:[#allocation11 + $0x1360] sm:$0xff] }
 0x437   : > { %6916 = vmatpush1.bf16.msra.mxu1 %v8037_v38  ;;  %v1837_v38 = vld [vmem:[#allocation11 + $0xb28] sm:$0xff] }
 0x438   : > { %6957 = vmatpush1.bf16.msra.mxu0 %v7655_v49  ;;  %6917 = vmatprep.subr.bf16.mxu1 %v8014_v42  ;;  %v7895_v49 = vcombine.low %v1849_v26, %v1861_v29  ;;  %v8254_v42 = vcombine.high %v2208_v6, %v2220_v36  ;;  %v7872_v43 = vcombine.high %v1825_v37, %v1837_v38  ;;  %v1729_v1 = vld [vmem:[#allocation11 + $0x7c8] sm:$0xff]  ;;  %v2076_v6 = vld [vmem:[#allocation11 + $0x12a0] sm:$0xff] }
 0x439   : > { %6958 = vmatprep.subr.bf16.mxu0 %v7632_v51  ;;  %v2184_v51 = vld [vmem:[#allocation11 + $0x1600] sm:$0xff]  ;;  %v1741_v19 = vld [vmem:[#allocation11 + $0x828] sm:$0xff] }
 0x43a   : > { %v8229_v57 = vcombine.low %v2184_v51, %v2196_v2  ;;  %v1705_v41 = vld [vmem:[#allocation11 + $0x708] sm:$0xff] }
 0x43b   : > { %6918 = vmatpush1.bf16.msra.mxu1 %v8013_v46  ;;  %v7871_v46 = vcombine.low %v1825_v37, %v1837_v38  ;;  %v1717_v26 = vld [vmem:[#allocation11 + $0x768] sm:$0xff] }
 0x43c   : > { %6959 = vmatpush1.bf16.msra.mxu0 %v7631_v47  ;;  %6919 = vmatprep.subr.bf16.mxu1 %v7990_v48  ;;  %v8230_v47 = vcombine.high %v2184_v51, %v2196_v2  ;;  %v7848_v48 = vcombine.high %v1801_v34, %v1813_v0  ;;  %v1681_v36 = vld [vmem:[#allocation11 + $0x648] sm:$0xff]  ;;  %v1658_v2 = vld [vmem:[#allocation11 + $0x590] sm:$0xff] }
 0x43d   : > { %6960 = vmatprep.subr.bf16.mxu0 %v7608_v50  ;;  %v2160_v50 = vld [vmem:[#allocation11 + $0x1540] sm:$0xff]  ;;  %v1693_v37 = vld [vmem:[#allocation11 + $0x6a8] sm:$0xff] }
 0x43e   : > { %v8205_v23 = vcombine.low %v2160_v50, %v2172_v52  ;;  %v2053_v51 = vld [vmem:[#allocation11 + $0x11e8] sm:$0xff] }
 0x43f   : > { %6920 = vmatpush1.bf16.msra.mxu1 %v7989_v59  ;;  %v7847_v59 = vcombine.low %v1801_v34, %v1813_v0  ;;  %v1670_v34 = vld [vmem:[#allocation11 + $0x5f0] sm:$0xff] }
 0x440   : > { %6961 = vmatpush1.bf16.msra.mxu0 %v7607_v60  ;;  %6921 = vmatprep.subr.bf16.mxu1 %v7966_v61  ;;  %v8206_v60 = vcombine.high %v2160_v50, %v2172_v52  ;;  %v7824_v61 = vcombine.high %v1777_v53, %v1789_v54  ;;  %v2017_v50 = vld [vmem:[#allocation11 + $0x10c8] sm:$0xff] }
 0x441   : > { %6962 = vmatprep.subr.bf16.mxu0 %v7584_v62  ;;  %v2136_v62 = vld [vmem:[#allocation11 + $0x1480] sm:$0xff]  ;;  %v2029_v52 = vld [vmem:[#allocation11 + $0x1128] sm:$0xff] }
 0x442   : > { %v8181_v20 = vcombine.low %v2136_v62, %v2148_v3 }
 0x443   : > { %6922 = vmatpush1.bf16.msra.mxu1 %v7965_v9  ;;  %v7823_v9 = vcombine.low %v1777_v53, %v1789_v54  ;;  %v2301_v53 = vrot.slane %v9270_v8, %v9115_v15 }
 0x444   : > { %6963 = vmatpush1.bf16.msra.mxu0 %v7583_v13  ;;  %6923 = vmatprep.subr.bf16.mxu1 %v7942_v16  ;;  %v8182_v13 = vcombine.high %v2136_v62, %v2148_v3  ;;  %v7800_v16 = vcombine.high %v1753_v5, %v1765_v7  ;;  %v8064_v62 = vcombine.high %v2017_v50, %v2029_v52  ;;  %v1993_v3 = vld [vmem:[#allocation11 + $0x1008] sm:$0xff] }
 0x445   : > { %6964 = vmatprep.subr.bf16.mxu0 %v7560_v18  ;;  %v2112_v18 = vld [vmem:[#allocation11 + $0x13c0] sm:$0xff] }
 0x446   : > { %v8157_v29 = vcombine.low %v2112_v18, %v2124_v63 }
 0x447   : > { %6924 = vmatpush1.bf16.msra.mxu1 %v7941_v10  ;;  %v7799_v10 = vcombine.low %v1753_v5, %v1765_v7  ;;  %v2005_v5 = vld [vmem:[#allocation11 + $0x1068] sm:$0xff] }
 0x448   : > { %6965 = vmatpush1.bf16.msra.mxu0 %v7559_v44  ;;  %6925 = vmatprep.subr.bf16.mxu1 %v7918_v22  ;;  %v8158_v44 = vcombine.high %v2112_v18, %v2124_v63  ;;  %v7776_v22 = vcombine.high %v1729_v1, %v1741_v19 }
 0x449   : > { %6966 = vmatprep.subr.bf16.mxu0 %v7536_v35  ;;  %v2088_v35 = vld [vmem:[#allocation11 + $0x1300] sm:$0xff] }
 0x44a   : > { %v8133_v38 = vcombine.low %v2088_v35, %v2100_v25 }
 0x44b   : > { %6926 = vmatpush1.bf16.msra.mxu1 %v7917_v40  ;;  %v7775_v40 = vcombine.low %v1729_v1, %v1741_v19 }
 0x44c   : > { %6967 = vmatpush1.bf16.msra.mxu0 %v7535_v31  ;;  %6927 = vmatprep.subr.bf16.mxu1 %v8278_v32  ;;  %v8134_v31 = vcombine.high %v2088_v35, %v2100_v25  ;;  %v7752_v32 = vcombine.high %v1705_v41, %v1717_v26  ;;  %v1981_v35 = vld [vmem:[#allocation11 + $0xfa8] sm:$0xff] }
 0x44d   : > { %6968 = vmatprep.subr.bf16.mxu0 %v7896_v33  ;;  %v2064_v33 = vld [vmem:[#allocation11 + $0x1240] sm:$0xff] }
 0x44e   : > { %v8109_v0 = vcombine.low %v2064_v33, %v2076_v6 }
 0x44f   : > { %6928 = vmatpush2.bf16.msra.mxu1 %v8277_v39  ;;  %v7751_v39 = vcombine.low %v1705_v41, %v1717_v26  ;;  %v1586_v41 = vld [vmem:[#allocation11 + $0x350] sm:$0xff] }
 0x450   : > { %6969 = vmatpush2.bf16.msra.mxu0 %v7895_v49  ;;  %6929 = vmatprep.subr.bf16.mxu1 %v8254_v42  ;;  %v8110_v49 = vcombine.high %v2064_v33, %v2076_v6  ;;  %v7728_v42 = vcombine.high %v1681_v36, %v1693_v37  ;;  %v1598_v26 = vld [vmem:[#allocation11 + $0x3b0] sm:$0xff] }
 0x451   : > { %6970 = vmatprep.subr.bf16.mxu0 %v7872_v43  ;;  %v2041_v43 = vld [vmem:[#allocation11 + $0x1188] sm:$0xff] }
 0x452   : > { %v8087_v54 = vcombine.low %v2041_v43, %v2053_v51 }
 0x453   : > { %6930 = vmatpush2.bf16.msra.mxu1 %v8253_v45  ;;  %v7727_v45 = vcombine.low %v1681_v36, %v1693_v37  ;;  %v7634_v36 = vcombine.high %v1586_v41, %v1598_v26  ;;  %v1945_v37 = vld [vmem:[#allocation11 + $0xe88] sm:$0xff] }
 0x454   : > { %6971 = vmatpush2.bf16.msra.mxu0 %v7871_v46  ;;  %6931 = vmatprep.subr.bf16.mxu1 %v8230_v47  ;;  %v8088_v46 = vcombine.high %v2041_v43, %v2053_v51  ;;  %v2297_v47 = vrot.slane %v9270_v8, %v9109_v12  ;;  %v7633_v43 = vcombine.low %v1586_v41, %v1598_v26  ;;  %v2209_v41 = vld [vmem:[#allocation11 + $0x16c8] sm:$0xff] }
 0x455   : > { %6972 = vmatprep.subr.bf16.mxu0 %v7848_v48  ;;  %v7706_v48 = vcombine.high %v1658_v2, %v1670_v34  ;;  %v2221_v26 = vld [vmem:[#allocation11 + $0x1728] sm:$0xff] }
 0x457   : > { %6932 = vmatpush2.bf16.msra.mxu1 %v8229_v57  ;;  %v1634_v57 = vld [vmem:[#allocation11 + $0x4d0] sm:$0xff] }
 0x458   : > { %6973 = vmatpush2.bf16.msra.mxu0 %v7847_v59  ;;  %6933 = vmatprep.subr.bf16.mxu1 %v8206_v60  ;;  %v1646_v59 = vld [vmem:[#allocation11 + $0x530] sm:$0xff]  ;;  %v7705_v60 = vcombine.low %v1658_v2, %v1670_v34  ;;  %v1921_v34 = vld [vmem:[#allocation11 + $0xdc8] sm:$0xff] }
 0x459   : > { %6974 = vmatprep.subr.bf16.mxu0 %v7824_v61  ;;  %v6659_v61 = vadd.f32 %v9279_v24, %v2297_v47  ;;  %v8063_v24 = vcombine.low %v2017_v50, %v2029_v52  ;;  %v7681_v19 = vcombine.low %v1634_v57, %v1646_v59 }
 0x45b   : > { %6934 = vmatpush2.bf16.msra.mxu1 %v8205_v23  ;;  %v7682_v23 = vcombine.high %v1634_v57, %v1646_v59  ;;  %v1514_v57 = vld [vmem:[#allocation11 + $0x110] sm:$0xff] }
 0x45c   : > { %6975 = vmatpush2.bf16.msra.mxu0 %v7823_v9  ;;  %6935 = vmatprep.subr.bf16.mxu1 %v8182_v13  ;;  %v1610_v9 = vld [vmem:[#allocation11 + $0x410] sm:$0xff] }
 0x45d   : > { %6976 = vmatprep.subr.bf16.mxu0 %v7800_v16  ;;  %v1622_v13 = vld [vmem:[#allocation11 + $0x470] sm:$0xff]  ;;  %v6661_v16 = vadd.f32 %v9285_v30, %v2301_v53  ;;  %v1897_v53 = vld [vmem:[#allocation11 + $0xd08] sm:$0xff] }
 0x45e   : > { %v7658_v30 = vcombine.high %v1610_v9, %v1622_v13  ;;  %v1526_v59 = vld [vmem:[#allocation11 + $0x170] sm:$0xff] }
 0x45f   : > { %6936 = vmatpush2.bf16.msra.mxu1 %v8181_v20  ;;  %v8040_v20 = vcombine.high %v1993_v3, %v2005_v5 }
 0x460   : > { %6977 = vmatpush2.bf16.msra.mxu0 %v7799_v10  ;;  %6937 = vmatprep.subr.bf16.mxu1 %v8158_v44 }
 0x461   : > { %6978 = vmatprep.subr.bf16.mxu0 %v7776_v22  ;;  %v1969_v22 = vld [vmem:[#allocation11 + $0xf48] sm:$0xff] }
 0x462   : > { %v8016_v33 = vcombine.high %v1969_v22, %v1981_v35 }
 0x463   : > { %6938 = vmatpush2.bf16.msra.mxu1 %v8157_v29 }
 0x464   : > { %6979 = vmatpush2.bf16.msra.mxu0 %v7775_v40  ;;  %6939 = vmatprep.subr.bf16.mxu1 %v8134_v31  ;;  %v8039_v40 = vcombine.low %v1993_v3, %v2005_v5  ;;  %v7562_v3 = vcombine.high %v1514_v57, %v1526_v59  ;;  %v1873_v5 = vld [vmem:[#allocation11 + $0xc48] sm:$0xff] }
 0x465   : > { %6980 = vmatprep.subr.bf16.mxu0 %v7752_v32  ;;  %v7657_v32 = vcombine.low %v1610_v9, %v1622_v13  ;;  %v1502_v9 = vld [vmem:[#allocation11 + $0xb0] sm:$0xff] }
 0x467   : > { %6940 = vmatpush2.bf16.msra.mxu1 %v8133_v38  ;;  %v1957_v38 = vld [vmem:[#allocation11 + $0xee8] sm:$0xff] }
 0x468   : > { %6981 = vmatpush2.bf16.msra.mxu0 %v7751_v39  ;;  %6941 = vmatprep.subr.bf16.mxu1 %v8110_v49  ;;  %v1562_v39 = vld [vmem:[#allocation11 + $0x290] sm:$0xff]  ;;  %v7992_v51 = vcombine.high %v1945_v37, %v1957_v38  ;;  %v7991_v47 = vcombine.low %v1945_v37, %v1957_v38  ;;  %v2197_v37 = vld [vmem:[#allocation11 + $0x1668] sm:$0xff] }
 0x469   : > { %6982 = vmatprep.subr.bf16.mxu0 %v7728_v42  ;;  %v1574_v49 = vld [vmem:[#allocation11 + $0x2f0] sm:$0xff]  ;;  %v8015_v42 = vcombine.low %v1969_v22, %v1981_v35 }
 0x46a   : > { %v7610_v2 = vcombine.high %v1562_v39, %v1574_v49  ;;  %v1802_v38 = vld [vmem:[#allocation11 + $0xa10] sm:$0xff] }
 0x46b   : > { %6942 = vmatpush2.bf16.msra.mxu1 %v8109_v0  ;;  %v1933_v0 = vld [vmem:[#allocation11 + $0xe28] sm:$0xff] }
 0x46c   : > { %6983 = vmatpush2.bf16.msra.mxu0 %v7727_v45  ;;  %6993 = vmatprep.subr.bf16.mxu1 %v8088_v46  ;;  %v1538_v45 = vld [vmem:[#allocation11 + $0x1d0] sm:$0xff]  ;;  %v7968_v50 = vcombine.high %v1921_v34, %v1933_v0 }
 0x46d   : > { %7034 = vmatprep.subr.bf16.mxu0 %v7706_v48  ;;  %v1550_v46 = vld [vmem:[#allocation11 + $0x230] sm:$0xff]  ;;  %v7609_v48 = vcombine.low %v1562_v39, %v1574_v49  ;;  %v8255_v49 = vcombine.low %v2209_v41, %v2221_v26 }
 0x46e   : > { %v6699_v7 = vpop.f32.mrf.mxu1  ;;  %6944 = vmatmul.mubr.bf16.vlgmr.msra.gmra.mxu1 %v9167_v56  ;;  %v7586_v52 = vcombine.high %v1538_v45, %v1550_v46  ;;  %v1814_v39 = vld [vmem:[#allocation11 + $0xa70] sm:$0xff] }
 0x46f   : > { %v6700_v18 = vadd.f32 %v6699_v7, %v6659_v61  ;;  %v9295_v63 = vpop.f32.mrf.mxu0  ;;  %6985 = vmatmul.mubr.bf16.vlgmr.msra.gmra.mxu0 %v9153_v28  ;;  %6994 = vmatpush1.bf16.msra.mxu1 %v8087_v54  ;;  %v1909_v54 = vld [vmem:[#allocation11 + $0xd68] sm:$0xff]  ;;  %v7585_v61 = vcombine.low %v1538_v45, %v1550_v46  ;;  %v1790_v45 = vld [vmem:[#allocation11 + $0x9b0] sm:$0xff] }
 0x470   : > { %7025 = vmatprep.mubr.bf16.mxu1 %v9165_v55  ;;  %v6701_v1 = vpop.f32.mrf.mxu1  ;;  %7035 = vmatpush1.bf16.msra.mxu0 %v7705_v60  ;;  %v7967_v60 = vcombine.low %v1921_v34, %v1933_v0  ;;  %v1885_v7 = vld [vmem:[#allocation11 + $0xca8] sm:$0xff]  ;;  %v7943_v13 = vcombine.low %v1897_v53, %v1909_v54  ;;  %v1778_v0 = vld [vmem:[#allocation11 + $0x950] sm:$0xff] }
 0x471   : > { %7208 = vst [vmem:[%s9207_s8 + $0x50] sm:$0xff] %v6700_v18  ;;  %v6702_v10 = vadd.f32 %v6701_v1, %v6661_v16  ;;  %7066 = vmatprep.mubr.bf16.mxu0 %v9151_v27  ;;  %v9301_v44 = vpop.f32.mrf.mxu0  ;;  %6995 = vmatprep.subr.bf16.mxu1 %v8064_v62  ;;  %v7944_v62 = vcombine.high %v1897_v53, %v1909_v54  ;;  %v2233_v1 = vld [vmem:[#allocation11 + $0x1788] sm:$0xff]  ;;  %v1754_v54 = vld [vmem:[#allocation11 + $0x890] sm:$0xff] }
 0x472   : > { %v6703_v25 = vpop.f32.mrf.mxu1  ;;  %7036 = vmatprep.subr.bf16.mxu0 %v7682_v23  ;;  %v1490_v23 = vld [vmem:[#allocation11 + $0x50] sm:$0xff]  ;;  %v7561_v16 = vcombine.low %v1514_v57, %v1526_v59  ;;  %v7920_v18 = vcombine.high %v1873_v5, %v1885_v7  ;;  %v2173_v34 = vld [vmem:[#allocation11 + $0x15a8] sm:$0xff] }
 0x473   : > { %7209 = vst [vmem:[%s9207_s8 + $0x58] sm:$0xff] %v6702_v10  ;;  %v6744_v29 = vpop.f32.mrf.mxu0  ;;  %6996 = vmatpush1.bf16.msra.mxu1 %v8063_v24  ;;  %v7538_v24 = vcombine.high %v1490_v23, %v1502_v9  ;;  %v1862_v10 = vld [vmem:[#allocation11 + $0xbf0] sm:$0xff]  ;;  %v7537_v22 = vcombine.low %v1490_v23, %v1502_v9  ;;  %v2149_v53 = vld [vmem:[#allocation11 + $0x14e8] sm:$0xff] }
 0x474   : > { %v6704_v31 = vpop.f32.mrf.mxu1  ;;  %7037 = vmatpush1.bf16.msra.mxu0 %v7681_v19  ;;  %6997 = vmatprep.subr.bf16.mxu1 %v8040_v20  ;;  %v2245_v19 = vld [vmem:[#allocation11 + $0x17e8] sm:$0xff]  ;;  %v1850_v20 = vld [vmem:[#allocation11 + $0xb90] sm:$0xff] }
 0x475   : > { %v6745_v6 = vpop.f32.mrf.mxu0  ;;  %7038 = vmatprep.subr.bf16.mxu0 %v7658_v30  ;;  %v7919_v30 = vcombine.low %v1873_v5, %v1885_v7  ;;  %v8280_v35 = vcombine.high %v2233_v1, %v2245_v19  ;;  %v7898_v25 = vcombine.high %v1850_v20, %v1862_v10  ;;  %v1826_v29 = vld [vmem:[#allocation11 + $0xad0] sm:$0xff]  ;;  %v8279_v31 = vcombine.low %v2233_v1, %v2245_v19  ;;  %v2125_v5 = vld [vmem:[#allocation11 + $0x1428] sm:$0xff] }
 0x476   : > { %v1766_v57 = vld [vmem:[#allocation11 + $0x8f0] sm:$0xff]  ;;  %v2101_v1 = vld [vmem:[#allocation11 + $0x1368] sm:$0xff] }
 0x477   : > { %6998 = vmatpush1.bf16.msra.mxu1 %v8039_v40  ;;  %v1838_v40 = vld [vmem:[#allocation11 + $0xb30] sm:$0xff] }
 0x478   : > { %7039 = vmatpush1.bf16.msra.mxu0 %v7657_v32  ;;  %6999 = vmatprep.subr.bf16.mxu1 %v8016_v33  ;;  %v7897_v32 = vcombine.low %v1850_v20, %v1862_v10  ;;  %v8256_v33 = vcombine.high %v2209_v41, %v2221_v26  ;;  %v7874_v6 = vcombine.high %v1826_v29, %v1838_v40  ;;  %v1730_v7 = vld [vmem:[#allocation11 + $0x7d0] sm:$0xff]  ;;  %v2077_v41 = vld [vmem:[#allocation11 + $0x12a8] sm:$0xff] }
 0x479   : > { %7040 = vmatprep.subr.bf16.mxu0 %v7634_v36  ;;  %v2185_v36 = vld [vmem:[#allocation11 + $0x1608] sm:$0xff]  ;;  %v1742_v23 = vld [vmem:[#allocation11 + $0x830] sm:$0xff] }
 0x47a   : > { %v8231_v46 = vcombine.low %v2185_v36, %v2197_v37  ;;  %v1706_v19 = vld [vmem:[#allocation11 + $0x710] sm:$0xff] }
 0x47b   : > { %7000 = vmatpush1.bf16.msra.mxu1 %v8015_v42  ;;  %v7873_v42 = vcombine.low %v1826_v29, %v1838_v40  ;;  %v1718_v20 = vld [vmem:[#allocation11 + $0x770] sm:$0xff] }
 0x47c   : > { %7041 = vmatpush1.bf16.msra.mxu0 %v7633_v43  ;;  %7001 = vmatprep.subr.bf16.mxu1 %v7992_v51  ;;  %v8232_v43 = vcombine.high %v2185_v36, %v2197_v37  ;;  %v7850_v51 = vcombine.high %v1802_v38, %v1814_v39  ;;  %v1682_v26 = vld [vmem:[#allocation11 + $0x650] sm:$0xff]  ;;  %v1659_v37 = vld [vmem:[#allocation11 + $0x598] sm:$0xff] }
 0x47d   : > { %7042 = vmatprep.subr.bf16.mxu0 %v7610_v2  ;;  %v2161_v2 = vld [vmem:[#allocation11 + $0x1548] sm:$0xff]  ;;  %v1694_v29 = vld [vmem:[#allocation11 + $0x6b0] sm:$0xff] }
 0x47e   : > { %v8207_v59 = vcombine.low %v2161_v2, %v2173_v34  ;;  %v2054_v36 = vld [vmem:[#allocation11 + $0x11f0] sm:$0xff] }
 0x47f   : > { %7002 = vmatpush1.bf16.msra.mxu1 %v7991_v47  ;;  %v7849_v47 = vcombine.low %v1802_v38, %v1814_v39  ;;  %v1671_v38 = vld [vmem:[#allocation11 + $0x5f8] sm:$0xff] }
 0x480   : > { %7043 = vmatpush1.bf16.msra.mxu0 %v7609_v48  ;;  %7003 = vmatprep.subr.bf16.mxu1 %v7968_v50  ;;  %v8208_v48 = vcombine.high %v2161_v2, %v2173_v34  ;;  %v7826_v50 = vcombine.high %v1778_v0, %v1790_v45  ;;  %v2018_v2 = vld [vmem:[#allocation11 + $0x10d0] sm:$0xff] }
 0x481   : > { %7044 = vmatprep.subr.bf16.mxu0 %v7586_v52  ;;  %v2137_v52 = vld [vmem:[#allocation11 + $0x1488] sm:$0xff]  ;;  %v2030_v34 = vld [vmem:[#allocation11 + $0x1130] sm:$0xff] }
 0x482   : > { %v8183_v9 = vcombine.low %v2137_v52, %v2149_v53 }
 0x483   : > { %7004 = vmatpush1.bf16.msra.mxu1 %v7967_v60  ;;  %v7825_v60 = vcombine.low %v1778_v0, %v1790_v45  ;;  %v2309_v0 = vrot.slane %v9270_v8, %v9232_v21 }
 0x484   : > { %7045 = vmatpush1.bf16.msra.mxu0 %v7585_v61  ;;  %7005 = vmatprep.subr.bf16.mxu1 %v7944_v62  ;;  %v8184_v61 = vcombine.high %v2137_v52, %v2149_v53  ;;  %v7802_v62 = vcombine.high %v1754_v54, %v1766_v57  ;;  %v8066_v52 = vcombine.high %v2018_v2, %v2030_v34  ;;  %v1994_v53 = vld [vmem:[#allocation11 + $0x1010] sm:$0xff] }
 0x485   : > { %7046 = vmatprep.subr.bf16.mxu0 %v7562_v3  ;;  %v2113_v3 = vld [vmem:[#allocation11 + $0x13c8] sm:$0xff] }
 0x486   : > { %v8159_v10 = vcombine.low %v2113_v3, %v2125_v5 }
 0x487   : > { %7006 = vmatpush1.bf16.msra.mxu1 %v7943_v13  ;;  %v7801_v13 = vcombine.low %v1754_v54, %v1766_v57  ;;  %v2006_v54 = vld [vmem:[#allocation11 + $0x1070] sm:$0xff] }
 0x488   : > { %7047 = vmatpush1.bf16.msra.mxu0 %v7561_v16  ;;  %7007 = vmatprep.subr.bf16.mxu1 %v7920_v18  ;;  %v8160_v16 = vcombine.high %v2113_v3, %v2125_v5  ;;  %v7778_v18 = vcombine.high %v1730_v7, %v1742_v23 }
 0x489   : > { %7048 = vmatprep.subr.bf16.mxu0 %v7538_v24  ;;  %v2089_v24 = vld [vmem:[#allocation11 + $0x1308] sm:$0xff] }
 0x48a   : > { %v8135_v40 = vcombine.low %v2089_v24, %v2101_v1 }
 0x48b   : > { %7008 = vmatpush1.bf16.msra.mxu1 %v7919_v30  ;;  %v7777_v30 = vcombine.low %v1730_v7, %v1742_v23  ;;  %v8042_v23 = vcombine.high %v1994_v53, %v2006_v54 }
 0x48c   : > { %7049 = vmatpush1.bf16.msra.mxu0 %v7537_v22  ;;  %7009 = vmatprep.subr.bf16.mxu1 %v8280_v35  ;;  %v8136_v22 = vcombine.high %v2089_v24, %v2101_v1  ;;  %v7754_v35 = vcombine.high %v1706_v19, %v1718_v20  ;;  %v1587_v1 = vld [vmem:[#allocation11 + $0x358] sm:$0xff] }
 0x48d   : > { %7050 = vmatprep.subr.bf16.mxu0 %v7898_v25  ;;  %v2065_v25 = vld [vmem:[#allocation11 + $0x1248] sm:$0xff] }
 0x48e   : > { %v8111_v39 = vcombine.low %v2065_v25, %v2077_v41 }
 0x48f   : > { %7010 = vmatpush2.bf16.msra.mxu1 %v8279_v31  ;;  %v7753_v31 = vcombine.low %v1706_v19, %v1718_v20  ;;  %v1599_v19 = vld [vmem:[#allocation11 + $0x3b8] sm:$0xff] }
 0x490   : > { %7051 = vmatpush2.bf16.msra.mxu0 %v7897_v32  ;;  %7011 = vmatprep.subr.bf16.mxu1 %v8256_v33  ;;  %v8112_v32 = vcombine.high %v2065_v25, %v2077_v41  ;;  %v7730_v33 = vcombine.high %v1682_v26, %v1694_v29  ;;  %v7636_v25 = vcombine.high %v1587_v1, %v1599_v19  ;;  %v1946_v41 = vld [vmem:[#allocation11 + $0xe90] sm:$0xff] }
 0x491   : > { %7052 = vmatprep.subr.bf16.mxu0 %v7874_v6  ;;  %v2042_v6 = vld [vmem:[#allocation11 + $0x1190] sm:$0xff] }
 0x492   : > { %v8089_v45 = vcombine.low %v2042_v6, %v2054_v36 }
 0x493   : > { %7012 = vmatpush2.bf16.msra.mxu1 %v8255_v49  ;;  %v7729_v49 = vcombine.low %v1682_v26, %v1694_v29  ;;  %v1958_v26 = vld [vmem:[#allocation11 + $0xef0] sm:$0xff]  ;;  %v1563_v29 = vld [vmem:[#allocation11 + $0x298] sm:$0xff] }
 0x494   : > { %7053 = vmatpush2.bf16.msra.mxu0 %v7873_v42  ;;  %7013 = vmatprep.subr.bf16.mxu1 %v8232_v43  ;;  %v8090_v42 = vcombine.high %v2042_v6, %v2054_v36  ;;  %v2305_v43 = vrot.slane %v9270_v8, %v9229_v17  ;;  %v1623_v8 = vld [vmem:[#allocation11 + $0x478] sm:$0xff]  ;;  %v1922_v36 = vld [vmem:[#allocation11 + $0xdd0] sm:$0xff] }
 0x495   : > { %7054 = vmatprep.subr.bf16.mxu0 %v7850_v51  ;;  %v7708_v51 = vcombine.high %v1659_v37, %v1671_v38 }
 0x497   : > { %7014 = vmatpush2.bf16.msra.mxu1 %v8231_v46  ;;  %v1635_v46 = vld [vmem:[#allocation11 + $0x4d8] sm:$0xff] }
 0x498   : > { %7055 = vmatpush2.bf16.msra.mxu0 %v7849_v47  ;;  %7015 = vmatprep.subr.bf16.mxu1 %v8208_v48  ;;  %v1647_v47 = vld [vmem:[#allocation11 + $0x538] sm:$0xff]  ;;  %v7707_v48 = vcombine.low %v1659_v37, %v1671_v38  ;;  %v1934_v37 = vld [vmem:[#allocation11 + $0xe30] sm:$0xff] }
 0x499   : > { %7056 = vmatprep.subr.bf16.mxu0 %v7826_v50  ;;  %v6741_v50 = vadd.f32 %v9295_v63, %v2305_v43  ;;  %v8065_v63 = vcombine.low %v2018_v2, %v2030_v34  ;;  %v7683_v7 = vcombine.low %v1635_v46, %v1647_v47  ;;  %v1539_v38 = vld [vmem:[#allocation11 + $0x1d8] sm:$0xff]  ;;  %v7970_v43 = vcombine.high %v1922_v36, %v1934_v37  ;;  %v1898_v2 = vld [vmem:[#allocation11 + $0xd10] sm:$0xff] }
 0x49a   : > { %v1910_v34 = vld [vmem:[#allocation11 + $0xd70] sm:$0xff] }
 0x49b   : > { %7016 = vmatpush2.bf16.msra.mxu1 %v8207_v59  ;;  %v7684_v59 = vcombine.high %v1635_v46, %v1647_v47  ;;  %v7969_v46 = vcombine.low %v1922_v36, %v1934_v37  ;;  %v1791_v36 = vld [vmem:[#allocation11 + $0x9b8] sm:$0xff] }
 0x49c   : > { %7057 = vmatpush2.bf16.msra.mxu0 %v7825_v60  ;;  %7017 = vmatprep.subr.bf16.mxu1 %v8184_v61  ;;  %v1611_v60 = vld [vmem:[#allocation11 + $0x418] sm:$0xff]  ;;  %v6743_v61 = vadd.f32 %v9301_v44, %v2309_v0 }
 0x49d   : > { %7058 = vmatprep.subr.bf16.mxu0 %v7802_v62  ;;  %v7660_v44 = vcombine.high %v1611_v60, %v1623_v8  ;;  %v1515_v0 = vld [vmem:[#allocation11 + $0x118] sm:$0xff] }
 0x49f   : > { %7018 = vmatpush2.bf16.msra.mxu1 %v8183_v9 }
 0x4a0   : > { %7059 = vmatpush2.bf16.msra.mxu0 %v7801_v13  ;;  %7019 = vmatprep.subr.bf16.mxu1 %v8160_v16  ;;  %v1970_v16 = vld [vmem:[#allocation11 + $0xf50] sm:$0xff] }
 0x4a1   : > { %7060 = vmatprep.subr.bf16.mxu0 %v7778_v18  ;;  %v1982_v18 = vld [vmem:[#allocation11 + $0xfb0] sm:$0xff] }
 0x4a3   : > { %7020 = vmatpush2.bf16.msra.mxu1 %v8159_v10  ;;  %v8041_v10 = vcombine.low %v1994_v53, %v2006_v54  ;;  %v1886_v53 = vld [vmem:[#allocation11 + $0xcb0] sm:$0xff]  ;;  %v1491_v54 = vld [vmem:[#allocation11 + $0x58] sm:$0xff] }
 0x4a4   : > { %7061 = vmatpush2.bf16.msra.mxu0 %v7777_v30  ;;  %7021 = vmatprep.subr.bf16.mxu1 %v8136_v22  ;;  %v7659_v22 = vcombine.low %v1611_v60, %v1623_v8 }
 0x4a5   : > { %7062 = vmatprep.subr.bf16.mxu0 %v7754_v35  ;;  %v8018_v35 = vcombine.high %v1970_v16, %v1982_v18 }
 0x4a7   : > { %7022 = vmatpush2.bf16.msra.mxu1 %v8135_v40  ;;  %v1575_v40 = vld [vmem:[#allocation11 + $0x2f8] sm:$0xff] }
 0x4a8   : > { %7063 = vmatpush2.bf16.msra.mxu0 %v7753_v31  ;;  %7023 = vmatprep.subr.bf16.mxu1 %v8112_v32  ;;  %v8017_v31 = vcombine.low %v1970_v16, %v1982_v18  ;;  %v7635_v32 = vcombine.low %v1587_v1, %v1599_v19  ;;  %v7612_v6 = vcombine.high %v1563_v29, %v1575_v40  ;;  %v2210_v18 = vld [vmem:[#allocation11 + $0x16d0] sm:$0xff]  ;;  %v1827_v1 = vld [vmem:[#allocation11 + $0xad8] sm:$0xff] }
 0x4a9   : > { %7064 = vmatprep.subr.bf16.mxu0 %v7730_v33  ;;  %v7994_v33 = vcombine.high %v1946_v41, %v1958_v26  ;;  %v1839_v19 = vld [vmem:[#allocation11 + $0xb38] sm:$0xff] }
 0x4ab   : > { %7024 = vmatpush2.bf16.msra.mxu1 %v8111_v39  ;;  %v1551_v39 = vld [vmem:[#allocation11 + $0x238] sm:$0xff] }
 0x4ac   : > { %7065 = vmatpush2.bf16.msra.mxu0 %v7729_v49  ;;  %7075 = vmatprep.subr.bf16.mxu1 %v8090_v42  ;;  %v7993_v49 = vcombine.low %v1946_v41, %v1958_v26  ;;  %v7611_v42 = vcombine.low %v1563_v29, %v1575_v40  ;;  %v7587_v47 = vcombine.low %v1539_v38, %v1551_v39  ;;  %v1815_v41 = vld [vmem:[#allocation11 + $0xa78] sm:$0xff] }
 0x4ad   : > { %7116 = vmatprep.subr.bf16.mxu0 %v7708_v51  ;;  %v7588_v51 = vcombine.high %v1539_v38, %v1551_v39  ;;  %v7875_v29 = vcombine.low %v1827_v1, %v1839_v19 }
 0x4ae   : > { %v6781_v57 = vpop.f32.mrf.mxu1  ;;  %7026 = vmatmul.mubr.bf16.vlgmr.msra.gmra.mxu1 %v9167_v56 }
 0x4af   : > { %v6782_v62 = vadd.f32 %v6781_v57, %v6741_v50  ;;  %v9311_v3 = vpop.f32.mrf.mxu0  ;;  %7067 = vmatmul.mubr.bf16.vlgmr.msra.gmra.mxu0 %v9153_v28  ;;  %7076 = vmatpush1.bf16.msra.mxu1 %v8089_v45  ;;  %v1527_v45 = vld [vmem:[#allocation11 + $0x178] sm:$0xff] }
 0x4b0   : > { %7107 = vmatprep.mubr.bf16.mxu1 %v9165_v55  ;;  %v6783_v5 = vpop.f32.mrf.mxu1  ;;  %7117 = vmatpush1.bf16.msra.mxu0 %v7707_v48  ;;  %v7946_v48 = vcombine.high %v1898_v2, %v1910_v34  ;;  %v7564_v50 = vcombine.high %v1515_v0, %v1527_v45  ;;  %v1503_v57 = vld [vmem:[#allocation11 + $0xb8] sm:$0xff]  ;;  %v7563_v60 = vcombine.low %v1515_v0, %v1527_v45 }
 0x4b1   : > { %7210 = vst [vmem:[%s9207_s8 + $0x60] sm:$0xff] %v6782_v62  ;;  %v6784_v9 = vadd.f32 %v6783_v5, %v6743_v61  ;;  %7148 = vmatprep.mubr.bf16.mxu0 %v9151_v27  ;;  %v9317_v13 = vpop.f32.mrf.mxu0  ;;  %7077 = vmatprep.subr.bf16.mxu1 %v8066_v52  ;;  %v1874_v52 = vld [vmem:[#allocation11 + $0xc50] sm:$0xff]  ;;  %v7540_v61 = vcombine.high %v1491_v54, %v1503_v57  ;;  %v1851_v5 = vld [vmem:[#allocation11 + $0xb98] sm:$0xff] }
 0x4b2   : > { %v6785_v24 = vpop.f32.mrf.mxu1  ;;  %7118 = vmatprep.subr.bf16.mxu0 %v7684_v59  ;;  %v7945_v59 = vcombine.low %v1898_v2, %v1910_v34  ;;  %v7922_v8 = vcombine.high %v1874_v52, %v1886_v53  ;;  %v2234_v62 = vld [vmem:[#allocation11 + $0x1790] sm:$0xff]  ;;  %v1767_v2 = vld [vmem:[#allocation11 + $0x8f8] sm:$0xff] }
 0x4b3   : > { %7211 = vst [vmem:[%s9207_s8 + $0x68] sm:$0xff] %v6784_v9  ;;  %v6826_v20 = vpop.f32.mrf.mxu0  ;;  %7078 = vmatpush1.bf16.msra.mxu1 %v8065_v63  ;;  %v2246_v63 = vld [vmem:[#allocation11 + $0x17f0] sm:$0xff]  ;;  %v7539_v9 = vcombine.low %v1491_v54, %v1503_v57 }
 0x4b4   : > { %v6786_v30 = vpop.f32.mrf.mxu1  ;;  %7119 = vmatpush1.bf16.msra.mxu0 %v7683_v7  ;;  %7079 = vmatprep.subr.bf16.mxu1 %v8042_v23  ;;  %v1863_v7 = vld [vmem:[#allocation11 + $0xbf8] sm:$0xff]  ;;  %v7921_v23 = vcombine.low %v1874_v52, %v1886_v53  ;;  %v2222_v24 = vld [vmem:[#allocation11 + $0x1730] sm:$0xff]  ;;  %v8281_v20 = vcombine.low %v2234_v62, %v2246_v63 }
 0x4b5   : > { %v6827_v27 = vpop.f32.mrf.mxu0  ;;  %7120 = vmatprep.subr.bf16.mxu0 %v7660_v44  ;;  %v8282_v44 = vcombine.high %v2234_v62, %v2246_v63  ;;  %v7900_v16 = vcombine.high %v1851_v5, %v1863_v7  ;;  %v8258_v30 = vcombine.high %v2210_v18, %v2222_v24  ;;  %v8257_v26 = vcombine.low %v2210_v18, %v2222_v24  ;;  %v1743_v52 = vld [vmem:[#allocation11 + $0x838] sm:$0xff] }
 0x4b6   : > { %v2198_v27 = vld [vmem:[#allocation11 + $0x1670] sm:$0xff]  ;;  %v1719_v62 = vld [vmem:[#allocation11 + $0x778] sm:$0xff] }
 0x4b7   : > { %7080 = vmatpush1.bf16.msra.mxu1 %v8041_v10  ;;  %v7899_v10 = vcombine.low %v1851_v5, %v1863_v7  ;;  %v1695_v18 = vld [vmem:[#allocation11 + $0x6b8] sm:$0xff] }
 0x4b8   : > { %7121 = vmatpush1.bf16.msra.mxu0 %v7659_v22  ;;  %7081 = vmatprep.subr.bf16.mxu1 %v8018_v35  ;;  %v7876_v22 = vcombine.high %v1827_v1, %v1839_v19  ;;  %v2186_v35 = vld [vmem:[#allocation11 + $0x1610] sm:$0xff] }
 0x4b9   : > { %7122 = vmatprep.subr.bf16.mxu0 %v7636_v25  ;;  %v1803_v25 = vld [vmem:[#allocation11 + $0xa18] sm:$0xff]  ;;  %v8234_v40 = vcombine.high %v2186_v35, %v2198_v27  ;;  %v8233_v37 = vcombine.low %v2186_v35, %v2198_v27 }
 0x4ba   : > { %v7851_v38 = vcombine.low %v1803_v25, %v1815_v41 }
 0x4bb   : > { %7082 = vmatpush1.bf16.msra.mxu1 %v8017_v31  ;;  %v7852_v31 = vcombine.high %v1803_v25, %v1815_v41  ;;  %v8601_v25 = vld [vmem:[#allocation13 + $0x8] sm:$0xff] }
 0x4bc   : > { %7123 = vmatpush1.bf16.msra.mxu0 %v7635_v32  ;;  %7083 = vmatprep.subr.bf16.mxu1 %v7994_v33  ;;  %v2162_v32 = vld [vmem:[#allocation11 + $0x1550] sm:$0xff]  ;;  %v2313_v41 = vrot.slane %v8601_v25, %v9251_v58 }
 0x4bd   : > { %7124 = vmatprep.subr.bf16.mxu0 %v7612_v6  ;;  %v2174_v33 = vld [vmem:[#allocation11 + $0x15b0] sm:$0xff]  ;;  %v1779_v6 = vld [vmem:[#allocation11 + $0x958] sm:$0xff] }
 0x4be   : > { %v8210_v39 = vcombine.high %v2162_v32, %v2174_v33  ;;  %v8209_v34 = vcombine.low %v2162_v32, %v2174_v33  ;;  %v7827_v0 = vcombine.low %v1779_v6, %v1791_v36  ;;  %v6823_v33 = vadd.f32 %v9311_v3, %v2313_v41  ;;  %v2175_v41 = vld [vmem:[#allocation11 + $0x15b8] sm:$0xff] }
 0x4bf   : > { %7084 = vmatpush1.bf16.msra.mxu1 %v7993_v49  ;;  %v7828_v49 = vcombine.high %v1779_v6, %v1791_v36  ;;  %v1995_v6 = vld [vmem:[#allocation11 + $0x1018] sm:$0xff] }
 0x4c0   : > { %7125 = vmatpush1.bf16.msra.mxu0 %v7611_v42  ;;  %7085 = vmatprep.subr.bf16.mxu1 %v7970_v43  ;;  %v2138_v42 = vld [vmem:[#allocation11 + $0x1490] sm:$0xff]  ;;  %v2007_v36 = vld [vmem:[#allocation11 + $0x1078] sm:$0xff] }
 0x4c1   : > { %7126 = vmatprep.subr.bf16.mxu0 %v7588_v51  ;;  %v2150_v43 = vld [vmem:[#allocation11 + $0x14f0] sm:$0xff]  ;;  %v1755_v51 = vld [vmem:[#allocation11 + $0x898] sm:$0xff]  ;;  %v8044_v3 = vcombine.high %v1995_v6, %v2007_v36 }
 0x4c2   : > { %v8186_v45 = vcombine.high %v2138_v42, %v2150_v43  ;;  %v8185_v53 = vcombine.low %v2138_v42, %v2150_v43  ;;  %v7803_v54 = vcombine.low %v1755_v51, %v1767_v2 }
 0x4c3   : > { %7086 = vmatpush1.bf16.msra.mxu1 %v7969_v46  ;;  %v7804_v46 = vcombine.high %v1755_v51, %v1767_v2 }
 0x4c4   : > { %7127 = vmatpush1.bf16.msra.mxu0 %v7587_v47  ;;  %7087 = vmatprep.subr.bf16.mxu1 %v7946_v48  ;;  %v2114_v47 = vld [vmem:[#allocation11 + $0x13d0] sm:$0xff] }
 0x4c5   : > { %7128 = vmatprep.subr.bf16.mxu0 %v7564_v50  ;;  %v2126_v48 = vld [vmem:[#allocation11 + $0x1430] sm:$0xff]  ;;  %v1731_v50 = vld [vmem:[#allocation11 + $0x7d8] sm:$0xff] }
 0x4c6   : > { %v8162_v57 = vcombine.high %v2114_v47, %v2126_v48  ;;  %v8161_v63 = vcombine.low %v2114_v47, %v2126_v48  ;;  %v7779_v5 = vcombine.low %v1731_v50, %v1743_v52 }
 0x4c7   : > { %7088 = vmatpush1.bf16.msra.mxu1 %v7945_v59  ;;  %v7780_v59 = vcombine.high %v1731_v50, %v1743_v52  ;;  %v1947_v50 = vld [vmem:[#allocation11 + $0xe98] sm:$0xff] }
 0x4c8   : > { %7129 = vmatpush1.bf16.msra.mxu0 %v7563_v60  ;;  %7089 = vmatprep.subr.bf16.mxu1 %v7922_v8  ;;  %v2090_v60 = vld [vmem:[#allocation11 + $0x1310] sm:$0xff] }
 0x4c9   : > { %7130 = vmatprep.subr.bf16.mxu0 %v7540_v61  ;;  %v2102_v8 = vld [vmem:[#allocation11 + $0x1370] sm:$0xff]  ;;  %v1707_v61 = vld [vmem:[#allocation11 + $0x718] sm:$0xff] }
 0x4ca   : > { %v8138_v7 = vcombine.high %v2090_v60, %v2102_v8  ;;  %v8137_v24 = vcombine.low %v2090_v60, %v2102_v8  ;;  %v7755_v1 = vcombine.low %v1707_v61, %v1719_v62  ;;  %v1899_v8 = vld [vmem:[#allocation11 + $0xd18] sm:$0xff] }
 0x4cb   : > { %7090 = vmatpush1.bf16.msra.mxu1 %v7921_v23  ;;  %v7756_v23 = vcombine.high %v1707_v61, %v1719_v62  ;;  %v1911_v61 = vld [vmem:[#allocation11 + $0xd78] sm:$0xff] }
 0x4cc   : > { %7131 = vmatpush1.bf16.msra.mxu0 %v7539_v9  ;;  %7091 = vmatprep.subr.bf16.mxu1 %v8282_v44  ;;  %v2066_v9 = vld [vmem:[#allocation11 + $0x1250] sm:$0xff] }
 0x4cd   : > { %7132 = vmatprep.subr.bf16.mxu0 %v7900_v16  ;;  %v2078_v44 = vld [vmem:[#allocation11 + $0x12b0] sm:$0xff]  ;;  %v1683_v16 = vld [vmem:[#allocation11 + $0x658] sm:$0xff] }
 0x4ce   : > { %v8114_v19 = vcombine.high %v2066_v9, %v2078_v44  ;;  %v7731_v35 = vcombine.low %v1683_v16, %v1695_v18 }
 0x4cf   : > { %7092 = vmatpush2.bf16.msra.mxu1 %v8281_v20  ;;  %v7732_v20 = vcombine.high %v1683_v16, %v1695_v18  ;;  %v2247_v16 = vld [vmem:[#allocation11 + $0x17f8] sm:$0xff] }
 0x4d0   : > { %7133 = vmatpush2.bf16.msra.mxu0 %v7899_v10  ;;  %7093 = vmatprep.subr.bf16.mxu1 %v8258_v30  ;;  %v2043_v10 = vld [vmem:[#allocation11 + $0x1198] sm:$0xff] }
 0x4d1   : > { %7134 = vmatprep.subr.bf16.mxu0 %v7876_v22  ;;  %v2055_v30 = vld [vmem:[#allocation11 + $0x11f8] sm:$0xff]  ;;  %v8113_v22 = vcombine.low %v2066_v9, %v2078_v44 }
 0x4d2   : > { %v8092_v27 = vcombine.high %v2043_v10, %v2055_v30  ;;  %v2235_v44 = vld [vmem:[#allocation11 + $0x1798] sm:$0xff] }
 0x4d3   : > { %7094 = vmatpush2.bf16.msra.mxu1 %v8257_v26  ;;  %v2019_v26 = vld [vmem:[#allocation11 + $0x10d8] sm:$0xff] }
 0x4d4   : > { %7135 = vmatpush2.bf16.msra.mxu0 %v7875_v29  ;;  %7095 = vmatprep.subr.bf16.mxu1 %v8234_v40  ;;  %v2031_v29 = vld [vmem:[#allocation11 + $0x1138] sm:$0xff]  ;;  %v2317_v40 = vrot.slane %v8601_v25, %v9254_v4 }
 0x4d5   : > { %7136 = vmatprep.subr.bf16.mxu0 %v7852_v31  ;;  %v8091_v31 = vcombine.low %v2043_v10, %v2055_v30  ;;  %v8068_v32 = vcombine.high %v2019_v26, %v2031_v29  ;;  %v8067_v42 = vcombine.low %v2019_v26, %v2031_v29  ;;  %v2187_v30 = vld [vmem:[#allocation11 + $0x1618] sm:$0xff] }
 0x4d6   : > { %v2163_v25 = vld [vmem:[#allocation11 + $0x1558] sm:$0xff] }
 0x4d7   : > { %7096 = vmatpush2.bf16.msra.mxu1 %v8233_v37  ;;  %v8212_v29 = vcombine.high %v2163_v25, %v2175_v41 }
 0x4d8   : > { %7137 = vmatpush2.bf16.msra.mxu0 %v7851_v38  ;;  %7097 = vmatprep.subr.bf16.mxu1 %v8210_v39  ;;  %v6825_v38 = vadd.f32 %v9317_v13, %v2317_v40  ;;  %v2139_v40 = vld [vmem:[#allocation11 + $0x1498] sm:$0xff] }
 0x4d9   : > { %7138 = vmatprep.subr.bf16.mxu0 %v7828_v49 }
 0x4db   : > { %7098 = vmatpush2.bf16.msra.mxu1 %v8209_v34  ;;  %v1971_v34 = vld [vmem:[#allocation11 + $0xf58] sm:$0xff] }
 0x4dc   : > { %7139 = vmatpush2.bf16.msra.mxu0 %v7827_v0  ;;  %7099 = vmatprep.subr.bf16.mxu1 %v8186_v45  ;;  %v1983_v0 = vld [vmem:[#allocation11 + $0xfb8] sm:$0xff] }
 0x4dd   : > { %7140 = vmatprep.subr.bf16.mxu0 %v7804_v46  ;;  %v8043_v46 = vcombine.low %v1995_v6, %v2007_v36  ;;  %v8019_v52 = vcombine.low %v1971_v34, %v1983_v0  ;;  %v2115_v6 = vld [vmem:[#allocation11 + $0x13d8] sm:$0xff] }
 0x4de   : > { %v2127_v36 = vld [vmem:[#allocation11 + $0x1438] sm:$0xff] }
 0x4df   : > { %7100 = vmatpush2.bf16.msra.mxu1 %v8185_v53 }
 0x4e0   : > { %7141 = vmatpush2.bf16.msra.mxu0 %v7803_v54  ;;  %7101 = vmatprep.subr.bf16.mxu1 %v8162_v57  ;;  %v1923_v54 = vld [vmem:[#allocation11 + $0xdd8] sm:$0xff] }
 0x4e1   : > { %7142 = vmatprep.subr.bf16.mxu0 %v7780_v59  ;;  %v1935_v57 = vld [vmem:[#allocation11 + $0xe38] sm:$0xff] }
 0x4e2   : > { %v7972_v60 = vcombine.high %v1923_v54, %v1935_v57  ;;  %v7971_v62 = vcombine.low %v1923_v54, %v1935_v57 }
 0x4e3   : > { %7102 = vmatpush2.bf16.msra.mxu1 %v8161_v63  ;;  %v7948_v63 = vcombine.high %v1899_v8, %v1911_v61 }
 0x4e4   : > { %7143 = vmatpush2.bf16.msra.mxu0 %v7779_v5  ;;  %7103 = vmatprep.subr.bf16.mxu1 %v8138_v7  ;;  %v1875_v5 = vld [vmem:[#allocation11 + $0xc58] sm:$0xff] }
 0x4e5   : > { %7144 = vmatprep.subr.bf16.mxu0 %v7756_v23  ;;  %v1887_v7 = vld [vmem:[#allocation11 + $0xcb8] sm:$0xff]  ;;  %v7947_v23 = vcombine.low %v1899_v8, %v1911_v61 }
 0x4e6   : > { %v7924_v9 = vcombine.high %v1875_v5, %v1887_v7  ;;  %v7923_v18 = vcombine.low %v1875_v5, %v1887_v7 }
 0x4e7   : > { %7104 = vmatpush2.bf16.msra.mxu1 %v8137_v24  ;;  %v8284_v24 = vcombine.high %v2235_v44, %v2247_v16 }
 0x4e8   : > { %7145 = vmatpush2.bf16.msra.mxu0 %v7755_v1  ;;  %7105 = vmatprep.subr.bf16.mxu1 %v8114_v19  ;;  %v2211_v1 = vld [vmem:[#allocation11 + $0x16d8] sm:$0xff] }
 0x4e9   : > { %7146 = vmatprep.subr.bf16.mxu0 %v7732_v20  ;;  %v2223_v19 = vld [vmem:[#allocation11 + $0x1738] sm:$0xff]  ;;  %v8283_v20 = vcombine.low %v2235_v44, %v2247_v16 }
 0x4ea   : > { %v8260_v10 = vcombine.high %v2211_v1, %v2223_v19 }
 0x4eb   : > { %7106 = vmatpush2.bf16.msra.mxu1 %v8113_v22  ;;  %v2199_v22 = vld [vmem:[#allocation11 + $0x1678] sm:$0xff] }
 0x4ec   : > { %7147 = vmatpush2.bf16.msra.mxu0 %v7731_v35  ;;  %7157 = vmatprep.subr.bf16.mxu1 %v8092_v27  ;;  %v8259_v35 = vcombine.low %v2211_v1, %v2223_v19  ;;  %v8236_v27 = vcombine.high %v2187_v30, %v2199_v22  ;;  %v8235_v26 = vcombine.low %v2187_v30, %v2199_v22 }
 0x4ee   : > { %v6863_v37 = vpop.f32.mrf.mxu1  ;;  %7108 = vmatmul.mubr.bf16.vlgmr.msra.gmra.mxu1 %v9167_v56 }
 0x4ef   : > { %v6864_v39 = vadd.f32 %v6863_v37, %v6823_v33  ;;  %v9325_v49 = vpop.f32.mrf.mxu0  ;;  %7149 = vmatmul.mubr.bf16.vlgmr.msra.gmra.mxu0 %v9153_v28  ;;  %7158 = vmatpush1.bf16.msra.mxu1 %v8091_v31  ;;  %v8020_v28 = vcombine.high %v1971_v34, %v1983_v0  ;;  %v2151_v31 = vld [vmem:[#allocation11 + $0x14f8] sm:$0xff] }
 0x4f0   : > { %7189 = vmatprep.mubr.bf16.mxu1 %v9165_v55  ;;  %v6865_v43 = vpop.f32.mrf.mxu1  ;;  %7159 = vmatprep.subr.bf16.mxu1 %v8068_v32  ;;  %v1959_v55 = vld [vmem:[#allocation11 + $0xef8] sm:$0xff]  ;;  %v8211_v32 = vcombine.low %v2163_v25, %v2175_v41  ;;  %v8188_v33 = vcombine.high %v2139_v40, %v2151_v31  ;;  %v8187_v37 = vcombine.low %v2139_v40, %v2151_v31 }
 0x4f1   : > { %7212 = vst [vmem:[%s9207_s8 + $0x70] sm:$0xff] %v6864_v39  ;;  %v6866_v51 = vadd.f32 %v6865_v43, %v6825_v38  ;;  %v9330_v2 = vpop.f32.mrf.mxu0  ;;  %v7996_v53 = vcombine.high %v1947_v50, %v1959_v55  ;;  %v7995_v59 = vcombine.low %v1947_v50, %v1959_v55  ;;  %v8164_v38 = vcombine.high %v2115_v6, %v2127_v36  ;;  %v2091_v39 = vld [vmem:[#allocation11 + $0x1318] sm:$0xff] }
 0x4f2   : > { %v6867_v13 = vpop.f32.mrf.mxu1  ;;  %v8163_v43 = vcombine.low %v2115_v6, %v2127_v36  ;;  %v2079_v34 = vld [vmem:[#allocation11 + $0x12b8] sm:$0xff] }
 0x4f3   : > { %7213 = vst [vmem:[%s9207_s8 + $0x78] sm:$0xff] %v6866_v51  ;;  %v6908_v45 = vpop.f32.mrf.mxu0  ;;  %7160 = vmatpush1.bf16.msra.mxu1 %v8067_v42  ;;  %v2103_v42 = vld [vmem:[#allocation11 + $0x1378] sm:$0xff] }
 0x4f4   : > { %v6868_v47 = vpop.f32.mrf.mxu1  ;;  %7161 = vmatprep.subr.bf16.mxu1 %v8044_v3  ;;  %v8140_v3 = vcombine.high %v2091_v39, %v2103_v42  ;;  %v2067_v51 = vld [vmem:[#allocation11 + $0x1258] sm:$0xff]  ;;  %v8139_v0 = vcombine.low %v2091_v39, %v2103_v42  ;;  %v2250_v45 = vld [vmem:[#allocation13 + $0x10] sm:$0xff] }
 0x4f5   : > { %v6909_v48 = vpop.f32.mrf.mxu0  ;;  %v8116_v13 = vcombine.high %v2067_v51, %v2079_v34  ;;  %v2321_v47 = vrot.slane %v2250_v45, %v9106_v11  ;;  %v2333_v61 = vrot.slane %v2250_v45, %v9115_v15  ;;  %v2341_v15 = vrot.slane %v2250_v45, %v9232_v21 }
 0x4f6   : > { %v2345_v21 = vrot.slane %v2250_v45, %v9251_v58 }
 0x4f7   : > { %7162 = vmatpush1.bf16.msra.mxu1 %v8043_v46  ;;  %v8115_v46 = vcombine.low %v2067_v51, %v2079_v34  ;;  %v6905_v48 = vadd.f32 %v9325_v49, %v2321_v47  ;;  %v2329_v49 = vrot.slane %v2250_v45, %v9109_v12  ;;  %v2337_v12 = vrot.slane %v2250_v45, %v9229_v17 }
 0x4f8   : > { %7163 = vmatprep.subr.bf16.mxu1 %v8020_v28  ;;  %v2325_v28 = vrot.slane %v2250_v45, %v9112_v14 }
 0x4fa   : > { %v6907_v55 = vadd.f32 %v9330_v2, %v2325_v28 }
 0x4fb   : > { %7164 = vmatpush1.bf16.msra.mxu1 %v8019_v52 }
 0x4fc   : > { %7165 = vmatprep.subr.bf16.mxu1 %v7996_v53 }
 0x4ff   : > { %7166 = vmatpush1.bf16.msra.mxu1 %v7995_v59 }
 0x500   : > { %7167 = vmatprep.subr.bf16.mxu1 %v7972_v60 }
 0x503   : > { %7168 = vmatpush1.bf16.msra.mxu1 %v7971_v62 }
 0x504   : > { %7169 = vmatprep.subr.bf16.mxu1 %v7948_v63 }
 0x507   : > { %7170 = vmatpush1.bf16.msra.mxu1 %v7947_v23 }
 0x508   : > { %7171 = vmatprep.subr.bf16.mxu1 %v7924_v9 }
 0x50b   : > { %7172 = vmatpush1.bf16.msra.mxu1 %v7923_v18 }
 0x50c   : > { %7173 = vmatprep.subr.bf16.mxu1 %v8284_v24 }
 0x50f   : > { %7174 = vmatpush2.bf16.msra.mxu1 %v8283_v20 }
 0x510   : > { %7175 = vmatprep.subr.bf16.mxu1 %v8260_v10 }
 0x513   : > { %7176 = vmatpush2.bf16.msra.mxu1 %v8259_v35 }
 0x514   : > { %7177 = vmatprep.subr.bf16.mxu1 %v8236_v27 }
 0x517   : > { %7178 = vmatpush2.bf16.msra.mxu1 %v8235_v26 }
 0x518   : > { %7179 = vmatprep.subr.bf16.mxu1 %v8212_v29  ;;  %v2349_v29 = vrot.slane %v2250_v45, %v9254_v4 }
 0x51b   : > { %7180 = vmatpush2.bf16.msra.mxu1 %v8211_v32 }
 0x51c   : > { %7181 = vmatprep.subr.bf16.mxu1 %v8188_v33 }
 0x51f   : > { %7182 = vmatpush2.bf16.msra.mxu1 %v8187_v37 }
 0x520   : > { %7183 = vmatprep.subr.bf16.mxu1 %v8164_v38 }
 0x523   : > { %7184 = vmatpush2.bf16.msra.mxu1 %v8163_v43 }
 0x524   : > { %7185 = vmatprep.subr.bf16.mxu1 %v8140_v3 }
 0x527   : > { %7186 = vmatpush2.bf16.msra.mxu1 %v8139_v0 }
 0x528   : > { %7187 = vmatprep.subr.bf16.mxu1 %v8116_v13 }
 0x52b   : > { %7188 = vmatpush2.bf16.msra.mxu1 %v8115_v46 }
 0x52e   : > { %v6945_v50 = vpop.f32.mrf.mxu1  ;;  %7190 = vmatmul.mubr.bf16.vlgmr.msra.gmra.mxu1 %v9167_v56 }
 0x52f   : > { %v6946_v52 = vadd.f32 %v6945_v50, %v6905_v48  ;;  %v6986_v53 = vpop.f32.mrf.mxu0 }
 0x530   : > { %v6947_v54 = vpop.f32.mrf.mxu1  ;;  %v6987_v56 = vadd.f32 %v6986_v53, %v2329_v49 }
 0x531   : > { %7214 = vst [vmem:[%s9207_s8 + $0x80] sm:$0xff] %v6946_v52  ;;  %v6948_v57 = vadd.f32 %v6947_v54, %v6907_v55  ;;  %v6988_v59 = vpop.f32.mrf.mxu0 }
 0x532   : > { %v6949_v60 = vpop.f32.mrf.mxu1  ;;  %v6989_v2 = vadd.f32 %v6988_v59, %v2333_v61 }
 0x533   : > { %7215 = vst [vmem:[%s9207_s8 + $0x88] sm:$0xff] %v6948_v57  ;;  %v6990_v11 = vpop.f32.mrf.mxu0 }
 0x534   : > { %v6950_v14 = vpop.f32.mrf.mxu1 }
 0x535   : > { %v6991_v8 = vpop.f32.mrf.mxu0 }
 0x56e   : > { %v7027_v62 = vpop.f32.mrf.mxu1 }
 0x56f   : > { %v7028_v63 = vadd.f32 %v7027_v62, %v6987_v56  ;;  %v7068_v5 = vpop.f32.mrf.mxu0 }
 0x570   : > { %v7029_v7 = vpop.f32.mrf.mxu1  ;;  %v7069_v1 = vadd.f32 %v7068_v5, %v2337_v12 }
 0x571   : > { %7216 = vst [vmem:[%s9207_s8 + $0x90] sm:$0xff] %v7028_v63  ;;  %v7030_v23 = vadd.f32 %v7029_v7, %v6989_v2  ;;  %v7070_v9 = vpop.f32.mrf.mxu0 }
 0x572   : > { %v7031_v44 = vpop.f32.mrf.mxu1  ;;  %v7071_v20 = vadd.f32 %v7070_v9, %v2341_v15 }
 0x573   : > { %7217 = vst [vmem:[%s9207_s8 + $0x98] sm:$0xff] %v7030_v23  ;;  %v7072_v16 = vpop.f32.mrf.mxu0 }
 0x574   : > { %v7032_v18 = vpop.f32.mrf.mxu1 }
 0x575   : > { %v7073_v24 = vpop.f32.mrf.mxu0 }
 0x5ae   : > { %v7109_v19 = vpop.f32.mrf.mxu1 }
 0x5af   : > { %v7110_v10 = vadd.f32 %v7109_v19, %v7069_v1  ;;  %v7150_v30 = vpop.f32.mrf.mxu0 }
 0x5b0   : > { %v7111_v22 = vpop.f32.mrf.mxu1  ;;  %v7151_v40 = vadd.f32 %v7150_v30, %v2345_v21 }
 0x5b1   : > { %7218 = vst [vmem:[%s9207_s8 + $0xa0] sm:$0xff] %v7110_v10  ;;  %v7112_v35 = vadd.f32 %v7111_v22, %v7071_v20  ;;  %v7152_v27 = vpop.f32.mrf.mxu0 }
 0x5b2   : > { %v7113_v25 = vpop.f32.mrf.mxu1  ;;  %v7153_v32 = vadd.f32 %v7152_v27, %v2349_v29 }
 0x5b3   : > { %7219 = vst [vmem:[%s9207_s8 + $0xa8] sm:$0xff] %v7112_v35  ;;  %v7154_v41 = vpop.f32.mrf.mxu0 }
 0x5b4   : > { %v7114_v26 = vpop.f32.mrf.mxu1 }
 0x5b5   : > { %v7155_v17 = vpop.f32.mrf.mxu0 }
 0x5ee   : > { %v7191_v31 = vpop.f32.mrf.mxu1 }
 0x5ef   : > { %v7192_v33 = vadd.f32 %v7191_v31, %v7151_v40 }
 0x5f0   : > { %v7193_v6 = vpop.f32.mrf.mxu1 }
 0x5f1   : > { %7220 = vst [vmem:[%s9207_s8 + $0xb0] sm:$0xff] %v7192_v33  ;;  %v7194_v36 = vadd.f32 %v7193_v6, %v7153_v32 }
 0x5f2   : > { %v7195_v58 = vpop.f32.mrf.mxu1 }
 0x5f3   : > { %7221 = vst [vmem:[%s9207_s8 + $0xb8] sm:$0xff] %v7194_v36 }
 0x5f4   : > { %v7196_v4 = vpop.f32.mrf.mxu1 }
 0x5f5   : > { %8799 = shalt.err (!%p8796_p3)
}
 0x5f6   : > { %s8800_s19 = scalar_lea.hbm %s9356_s10, 3072  ;;  %s8804_s23 = scalar_lea.hbm %s9407_s7, 6144 }
 0x5f7   : > { %p8801_p6 = scmp.ne.s32.totalorder %s9356_s10, %s8800_s19  ;;  %p8805_p9 = scmp.lt.s32.totalorder %s9356_s10, %s9407_s7 }
 0x5f8   : > { %p8806_p10 = scmp.lt.s32.totalorder %s8804_s23, %s8800_s19 }
 0x5f9   : > { %p8802_p5 = pnand %p8801_p6, %p9433_p13 }
 0x5fa   : > { %p8807_p11 = por %p8806_p10, %p8805_p9 }
 0x5fb   : > { %p8803_p8 = pneg %p8802_p5 }
 0x5fd   : > { %p8808_p12 = pnand %p8807_p11, %p8803_p8 }
 0x5ff   : > { %8811 = shalt.err (!%p8808_p12)
}
 0x600   : > { %8316 = dma.vmem_to_hbm [thread:$0]  (%p9433_p13), %s9358_s29, 3072, %s9356_s10, %s7223_s30  }
 0x601 PF: > { %s7249_s8 = sand.u32 1, %s8850_s24   ;;  %p9434_p0 = scmp.ne.s32.totalorder %s9423_s13, 0 }
 0x602   : > { %p9435_p2 = scmp.ge.s32.totalorder %s8862_s27, 2  ;;  %s7250_s18 = scalar_lea.sflag [#allocation4], %s7249_s8 }
 0x604   : > { %p8342_p1 = pnand %p9435_p2, %p9434_p0 }
 0x606   : > { %p8343_p4 = pneg %p8342_p1 }
 0x608   : > { %8845 = dma.done.wait (%p8343_p4), %s7250_s18, 3072  }
 0x609   : > { %8847 = vsyncadd (%p8343_p4), %s7250_s18, 4294964224  ;;  %p23_p7 = scmp.ge.s32.totalorder %s9020_s11, 4   ;;  %s9436_s24 = smov %s8854_s25 }
 0x60a   : > { %s9437_s25 = smov %s8858_s26  ;;  %s9438_s26 = smov %s9031_s16 }
 0x60b   : > { %s9439_s27 = smov %s9020_s11  ;;  %25 = sbr.rel (!%p23_p7) target bundleno = 11 (0xb), region = 117 }
 0x610   :  { %7255 = vsyncpa [#allocation3], 1 }
 0x611   :  { %7257 = vsyncpa [#allocation3 + $0x1], 1 }
 0x612   :  { %7258 = vsyncpa [#allocation6], 1 }
 0x613   :  { %7259 = vsyncpa [#allocation9], 1 }
 0x614   :  { %7260 = vsyncpa [#allocation12], 1 }
 0x615   :  { %7261 = vsyncpa [#allocation4], 1 }
 0x616   :  { %7263 = vsyncpa [#allocation4 + $0x1], 1 }

// kernel: tpu_custom_call.1
= control target key start
LH: loop header
LB: loop body
LE: loop exit
PB: predicated region body
PF: predicated region fallthrough
CT: control target
= control target key end

     0   :  { %s9400_s0 = inlined_call_operand.hbm [shape: f32[16,16], index: 0, kind: input, shape index: {}]   ;;  %s9401_s1 = inlined_call_operand.hbm [shape: bf16[16,512], index: 1, kind: input, shape index: {}]   ;;  %s9402_s2 = inlined_call_operand.hbm [shape: f32[1,512], index: 2, kind: input, shape index: {}]   ;;  %s9403_s3 = inlined_call_operand.hbm [shape: bf16[512,512], index: 3, kind: input, shape index: {}]   ;;  %s9404_s4 = inlined_call_operand.hbm [shape: f32[1,512], index: 4, kind: input, shape index: {}]   ;;  %s9405_s5 = inlined_call_operand.hbm [shape: bf16[512,3072], index: 5, kind: input, shape index: {}]   ;;  %s9406_s6 = inlined_call_operand.hbm [shape: f32[1,3072], index: 6, kind: input, shape index: {}]   ;;  %s9407_s7 = inlined_call_operand.hbm [shape: f32[16,3072], index: 7, kind: output, shape index: {}]  }
   0x1   :  { %9412 = sst [smem:[#allocation20_spill]] %s9401_s1 }
   0x2   :  { %9413 = sst [smem:[#allocation21_spill]] %s9402_s2 }
   0x3   :  { %12 = vsyncpa [#allocation3], 0 }
   0x4   :  { %14 = vsyncpa [#allocation3 + $0x1], 0 }
   0x5   :  { %15 = vsyncpa [#allocation6], 0 }
   0x6   :  { %16 = vsyncpa [#allocation9], 0 }
   0x7   :  { %17 = vsyncpa [#allocation12], 0 }
   0x8   :  { %18 = vsyncpa [#allocation4], 0 }
   0x9   :  { %20 = vsyncpa [#allocation4 + $0x1], 0  ;;  %s8917_s24 = smov 0   ;;  %s8919_s25 = smov 0  }
   0xa   :  { %s8921_s26 = smov 0   ;;  %s8923_s27 = smov 0  }
   0xb LB: > { %s8864_s28 = smov [#allocation5]   ;;  %s8938_s30 = sadd.s32 4294967295, %s8862_s27   ;;  %s8862_s27 = sphi %s8923_s27, %s9439_s27   ;;  %s8858_s26 = sphi %s8921_s26, %s9438_s26   ;;  %s8854_s25 = sphi %s8919_s25, %s9437_s25   ;;  %s8850_s24 = sphi %s8917_s24, %s9436_s24  }
   0xc   : > { %s221_s29 = sshll.u32 %s8864_s28, 4  ;;  %p7365_p0 = scmp.ge.s32.totalorder %s8862_s27, 1  ;;  %s222_s29 = int_to_ptr.vmem [resolvable:$true] %s221_s29 }
   0xd   : > { %p9408_p1 = scmp.eq.s32.totalorder %s8938_s30, 0  ;;  %p209_p2 = scmp.lt.s32.totalorder %s8862_s27, 3 }
   0xe   : > { %s8865_s9 = smov [#allocation8]   ;;  %s8866_s12 = smov [#allocation11]  }
   0xf   : > { %p8943_p3 = pnand %p7365_p0, %p209_p2  ;;  %s245_s10 = sshll.u32 %s8865_s9, 4  ;;  %s8956_s10 = int_to_ptr.vmem [resolvable:$true] %s245_s10 }
  0x10   : > { %s269_s13 = sshll.u32 %s8866_s12, 4  ;;  %s8613_s15 = scalar_lea.vmem %s222_s29, 512  ;;  %s8958_s13 = int_to_ptr.vmem [resolvable:$true] %s269_s13 }
  0x11   : > { %s9414_s8 = scalar_select %p8943_p3, 1, 0 }
  0x12   : > { %p8318_p5 = pneg %p8943_p3  ;;  %p8614_p8 = scmp.ne.s32.totalorder %s222_s29, %s8613_s15 }
  0x13   : > { %p8621_p11 = scmp.lt.s32.totalorder %s222_s29, %s222_s29  ;;  %p8622_p12 = scmp.lt.s32.totalorder %s8613_s15, %s8613_s15 }
  0x14   : > { %p8952_p6 = pnand %p8318_p5, %p9408_p1 }
  0x15   : > { %p8623_p13 = por %p8622_p12, %p8621_p11 }
  0x16   : > { %p8962_p7 = pneg %p8952_p6 }
  0x18   : > { %p8616_p9 = pnand %p8614_p8, %p8962_p7 }
  0x1a   : > { %p8617_p10 = pneg %p8616_p9 }
  0x1c   : > { %p8624_p0 = pnand %p8623_p13, %p8617_p10 }
  0x1e   : > { %8627 = shalt.err (!%p8624_p0)
}
  0x1f   : > { %s8867_s16 = smov 256   ;;  %s8868_s17 = smov 16  }
  0x20   : > { %s9417_s1 = sld [smem:[#allocation20_spill]]  ;;  %s8639_s20 = scalar_lea.vmem %s8956_s10, 16384 }
  0x21   : > { %p8640_p2 = scmp.ne.s32.totalorder %s8956_s10, %s8639_s20  ;;  %p8647_p9 = scmp.lt.s32.totalorder %s8956_s10, %s8956_s10 }
  0x22   : > { %p8648_p10 = scmp.lt.s32.totalorder %s8639_s20, %s8639_s20 }
  0x23   : > { %p8642_p5 = pnand %p8640_p2, %p8962_p7 }
  0x24   : > { %p8649_p11 = por %p8648_p10, %p8647_p9 }
  0x25   : > { %p8643_p8 = pneg %p8642_p5 }
  0x26   : > { %8321 = dma.hbm_to_vmem [thread:$0]  (!%p8952_p6), %s9417_s1, 512, %s222_s29, [#allocation6], %s8867_s16, %s8867_s16, %s8868_s17  }
  0x27   : > { %p8650_p12 = pnand %p8649_p11, %p8643_p8 }
  0x29   : > { %8653 = shalt.err (!%p8650_p12)
}
  0x2a   : > { %8327 = dma.hbm_to_vmem [thread:$0]  (!%p8952_p6), %s9403_s3, 16384, %s8956_s10, [#allocation9], %s8867_s16, %s8867_s16, %s8868_s17  }
  0x2b   : > { %s8665_s23 = scalar_lea.vmem %s8958_s13, 98304  ;;  %p8673_p5 = scmp.lt.s32.totalorder %s8958_s13, %s8958_s13 }
  0x2c   : > { %p8666_p13 = scmp.ne.s32.totalorder %s8958_s13, %s8665_s23  ;;  %p8674_p8 = scmp.lt.s32.totalorder %s8665_s23, %s8665_s23 }
  0x2e   : > { %p8668_p0 = pnand %p8666_p13, %p8962_p7  ;;  %p8675_p9 = por %p8674_p8, %p8673_p5 }
  0x30   : > { %p8669_p2 = pneg %p8668_p0 }
  0x32   : > { %p8676_p10 = pnand %p8675_p9, %p8669_p2 }
  0x34   : > { %8679 = shalt.err (!%p8676_p10)
}
  0x35   : > { %s8869_s28 = smov 1536   ;;  %s8870_s29 = smov 96  }
  0x36   : > { %8333 = dma.hbm_to_vmem [thread:$0]  (!%p8952_p6), %s9405_s5, 98304, %s8958_s13, [#allocation12], %s8869_s28, %s8869_s28, %s8870_s29  }
  0x37   : > { %s8871_s10 = smov [#allocation7]   ;;  %s8872_s16 = smov [#allocation10]  }
  0x38   : > { %s235_s15 = sshll.u32 %s8871_s10, 4  ;;  %s259_s17 = sshll.u32 %s8872_s16, 4  ;;  %s236_s15 = int_to_ptr.vmem [resolvable:$true] %s235_s15  ;;  %s260_s17 = int_to_ptr.vmem [resolvable:$true] %s259_s17 }
  0x39   : > { %s8691_s18 = scalar_lea.vmem %s236_s15, 64  ;;  %p8699_p0 = scmp.lt.s32.totalorder %s236_s15, %s236_s15 }
  0x3a   : > { %p8692_p11 = scmp.ne.s32.totalorder %s236_s15, %s8691_s18  ;;  %p8700_p2 = scmp.lt.s32.totalorder %s8691_s18, %s8691_s18 }
  0x3c   : > { %p8694_p12 = pnand %p8692_p11, %p8962_p7  ;;  %p8701_p5 = por %p8700_p2, %p8699_p0 }
  0x3e   : > { %p8695_p13 = pneg %p8694_p12 }
  0x40   : > { %p8702_p8 = pnand %p8701_p5, %p8695_p13 }
  0x42   : > { %8705 = shalt.err (!%p8702_p8)
}
  0x43   : > { %s9418_s2 = sld [smem:[#allocation21_spill]]  ;;  %s8717_s13 = scalar_lea.vmem %s260_s17, 64 }
  0x44   : > { %p8718_p9 = scmp.ne.s32.totalorder %s260_s17, %s8717_s13  ;;  %p8725_p11 = scmp.lt.s32.totalorder %s260_s17, %s260_s17 }
  0x45   : > { %p8726_p12 = scmp.lt.s32.totalorder %s8717_s13, %s8717_s13 }
  0x46   : > { %p8720_p10 = pnand %p8718_p9, %p8962_p7 }
  0x47   : > { %p8727_p1 = por %p8726_p12, %p8725_p11 }
  0x48   : > { %p8721_p4 = pneg %p8720_p10 }
  0x49   : > { %8324 = dma.hbm_to_vmem [thread:$0]  (!%p8952_p6), %s9418_s2, 64, %s236_s15, [#allocation6]  }
  0x4a   : > { %p8728_p3 = pnand %p8727_p1, %p8721_p4 }
  0x4c   : > { %8731 = shalt.err (!%p8728_p3)
}
  0x4d   : > { %8330 = dma.hbm_to_vmem [thread:$0]  (!%p8952_p6), %s9404_s4, 64, %s260_s17, [#allocation9]  }
  0x4e   : > { %s8873_s23 = smov [#allocation13]  }
  0x4f   : > { %s283_s28 = sshll.u32 %s8873_s23, 4  ;;  %s284_s28 = int_to_ptr.vmem [resolvable:$true] %s283_s28 }
  0x50   : > { %s8743_s29 = scalar_lea.vmem %s284_s28, 384  ;;  %p8751_p5 = scmp.lt.s32.totalorder %s284_s28, %s284_s28 }
  0x51   : > { %p8744_p13 = scmp.ne.s32.totalorder %s284_s28, %s8743_s29  ;;  %p8752_p8 = scmp.lt.s32.totalorder %s8743_s29, %s8743_s29 }
  0x53   : > { %p8746_p0 = pnand %p8744_p13, %p8962_p7  ;;  %p8753_p9 = por %p8752_p8, %p8751_p5 }
  0x55   : > { %p8747_p2 = pneg %p8746_p0 }
  0x57   : > { %p8754_p1 = pnand %p8753_p9, %p8747_p2 }
  0x59   : > { %8757 = shalt.err (!%p8754_p1)
}
  0x5a   : > { %8336 = dma.hbm_to_vmem [thread:$0]  (!%p8952_p6), %s9406_s6, 384, %s284_s28, [#allocation12]  }
  0x5b   : > { %s7364_s14 = sadd.s32 4294967294, %s8862_s27   ;;  %s9020_s11 = sadd.s32 1, %s8862_s27  }
  0x5c   : > { %s30_s10 = ssub.s32 %s8862_s27, %s9020_s11  ;;  %s33_s15 = sadd.s32 1, %s8858_s26 }
  0x5d   : > { %p31_p3 = scmp.eq.s32.totalorder %s30_s10, 0  ;;  %p40_p4 = scmp.ne.s32.totalorder %s8858_s26, %s8854_s25 }
  0x5e   : > { %p41_p7 = scmp.eq.s32.totalorder %s8862_s27, 0  ;;  %p46_p10 = scmp.ne.s32.totalorder %s8854_s25, %s8850_s24 }
  0x5f   : > { %s9031_s16 = scalar_select %p31_p3, %s8858_s26, %s33_s15  }
  0x60   : > { %p9033_p11 = por %p41_p7, %p40_p4  ;;  %p9420_p12 = scmp.eq.s32.totalorder %s8938_s30, 0 }
  0x61   : > { %p196_p13 = scmp.eq.s32.totalorder %s8938_s30, 1  ;;  %p202_p0 = scmp.eq.s32.totalorder %s7364_s14, 1 }
  0x62   : > { %p9039_p6 = por %p9420_p12, %p46_p10  ;;  %p8351_p2 = scmp.lt.s32.totalorder %s8862_s27, 2 }
  0x63   : > { %s294_s19 = sand.u32 1, %s8858_s26   ;;  %p9046_p5 = por %p196_p13, %p40_p4 }
  0x64   : > { %s9421_s18 = scalar_select %p9039_p6, 1, 0 }
  0x65   : > { %s9422_s20 = scalar_select %p9046_p5, 1, 0 }
  0x66   : > { %p9050_p8 = por %p202_p0, %p46_p10  ;;  %s7373_s21 = sshll.u32 %s294_s19, 3 }
  0x67   : > { %s7374_s22 = sshll.u32 %s8862_s27, 7  ;;  %s298_s9 = scalar_lea.vmem [#allocation2], %s7373_s21 }
  0x68   : > { %s9423_s13 = scalar_select %p9050_p8, 1, 0 }
  0x69   : > { %s9058_s29 = scalar_lea.hbm %s9400_s0, %s7374_s22  ;;  %s305_s12 = sshll.u32 %s298_s9, 4  ;;  %s306_s12 = int_to_ptr.vmem [resolvable:$true] %s305_s12 }
  0x6a   : > { %p9062_p9 = pnand %p8351_p2, %p9033_p11  ;;  %s295_s10 = scalar_lea.sflag [#allocation3], %s294_s19 }
  0x6b   : > { %s8758_s15 = scalar_lea.hbm %s9058_s29, 128  ;;  %s8763_s28 = scalar_lea.hbm %s9400_s0, 256 }
  0x6c   : > { %p8759_p1 = scmp.ne.s32.totalorder %s9058_s29, %s8758_s15  ;;  %p8760_p3 = pneg %p9062_p9 }
  0x6d   : > { %p8764_p10 = scmp.lt.s32.totalorder %s9058_s29, %s9400_s0  ;;  %p8765_p11 = scmp.lt.s32.totalorder %s8763_s28, %s8758_s15 }
  0x6e   : > { %p8761_p4 = pnand %p8760_p3, %p8759_p1 }
  0x6f   : > { %p8766_p12 = por %p8765_p11, %p8764_p10 }
  0x70   : > { %p8762_p7 = pneg %p8761_p4 }
  0x72   : > { %p8767_p13 = pnand %p8766_p12, %p8762_p7 }
  0x74   : > { %8770 = shalt.err (!%p8767_p13)
}
  0x75   : > { %s8771_s17 = scalar_lea.vmem %s306_s12, 128  ;;  %s8874_s19 = smov [#allocation2]  }
  0x76   : > { %p8772_p0 = scmp.ne.s32.totalorder %s306_s12, %s8771_s17  ;;  %s8776_s1 = sshll.u32 %s8874_s19, 4  ;;  %s8777_s1 = int_to_ptr.vmem [resolvable:$false] %s8776_s1 }
  0x77   : > { %s8778_s2 = scalar_lea.vmem %s8777_s1, 256  ;;  %p8779_p1 = scmp.lt.s32.totalorder %s306_s12, %s8777_s1 }
  0x78   : > { %p8774_p2 = pnand %p8772_p0, %p8760_p3  ;;  %p8780_p4 = scmp.lt.s32.totalorder %s8778_s2, %s8771_s17 }
  0x7a   : > { %p8775_p8 = pneg %p8774_p2  ;;  %p8781_p5 = por %p8780_p4, %p8779_p1 }
  0x7c   : > { %p8782_p6 = pnand %p8781_p5, %p8775_p8 }
  0x7e   : > { %8785 = shalt.err (!%p8782_p6)
}
  0x7f   : > { %8340 = dma.hbm_to_vmem [thread:$0]  (!%p9062_p9), %s9058_s29, 128, %s306_s12, %s295_s10  }
  0x80   : > { %p9425_p7 = scmp.ne.s32.totalorder %s9414_s8, 0 }
  0x81   : > { %s9083_s15 = sand.u32 (!%p9425_p7), 1, %s8854_s25   ;;  %p9426_p3 = scmp.ne.s32.totalorder (!%p9425_p7), %s9421_s18, 0 }
  0x82   : > { %314 = sbr.rel (%p9425_p7) target bundleno = 1537 (0x601), region = 48  ;;  %s7376_s22 = sshll.u32 (!%p9425_p7), %s9083_s15, 3 }
  0x83   : > { %s317_s23 = scalar_lea.sflag (!%p9425_p7), [#allocation3], %s9083_s15  ;;  %s320_s1 = scalar_lea.vmem (!%p9425_p7), [#allocation2], %s7376_s22 }
  0x87   : > { %8829 = dma.done.wait (%p9426_p3), %s317_s23, 128  }
  0x88   : > { %8831 = vsyncadd (%p9426_p3), %s317_s23, 4294967168  ;;  %p9427_p6 = scmp.eq.s32.totalorder %s8938_s30, 0 }
  0x8a   : > { %8833 = dma.done.wait (%p9427_p6), [#allocation6], 576   ;;  %p9428_p5 = pmov %p9427_p6 }
  0x8c   : > { %8835 = vsyncadd (%p9428_p5), [#allocation6], 4294966720  ;;  %p9429_p8 = pmov %p9428_p5 }
  0x8d   : > { %p9430_p9 = pmov %p9428_p5 }
  0x8e   : > { %8837 = dma.done.wait (%p9429_p8), [#allocation9], 16448  }
  0x8f   : > { %8839 = vsyncadd (%p9430_p9), [#allocation9], 4294950848  ;;  %p9431_p10 = pmov %p9428_p5 }
  0x90   : > { %p9432_p11 = pmov %p9428_p5 }
  0x91   : > { %8841 = dma.done.wait (%p9431_p10), [#allocation12], 98688  }
  0x92   : > { %8843 = vsyncadd (%p9432_p11), [#allocation12], 4294868608  ;;  %v8875_v0 = vmov 0   ;;  %v8402_v1 = vld [vmem:[#allocation5 + $0x4] ss:$16 sps:$4 sm:$0xff]   ;;  %vm424_vm0 = vcmask 130048  }
  0x93   : > { %460 = vmatprep.mubr.bf16.mxu0 %v8875_v0  ;;  %501 = vmatprep.mubr.bf16.mxu1 %v8875_v0  ;;  %v8404_v2 = vld [vmem:[#allocation5 + $0xc] ss:$16 sps:$4 sm:$0xff]   ;;  %v8406_v3 = vld [vmem:[#allocation5] ss:$16 sps:$4 sm:$0xff]   ;;  %v8407_v4 = vld [vmem:[#allocation5 + $0x8] ss:$16 sps:$4 sm:$0xff]  }
  0x94   : > { %442 = vmatprep.subr.bf16.mxu0 %v8402_v1  ;;  %v376_v5 = vld [vmem:[%s320_s1] sm:$0xff]  ;;  %483 = vmatprep.subr.bf16.mxu1 %v8404_v2  ;;  %s8288_s2 = smul.u32 192, %s9083_s15  ;;  %p9433_p13 = scmp.ne.s32.totalorder %s9422_s20, 0 }
  0x95   : > { %v377_v6 = vpack.c.bf16 %v376_v5, %v376_v5  ;;  %v8408_v7 = vld [vmem:[#allocation8 + $0xe0] ss:$16 sps:$4 sm:$0xff]   ;;  %443 = vmatpush1.bf16.msra.mxu0 %v8406_v3  ;;  %484 = vmatpush1.bf16.msra.mxu1 %v8407_v4  ;;  %v8410_v8 = vld [vmem:[#allocation8 + $0xe4] ss:$16 sps:$4 sm:$0xff]   ;;  %s8289_s18 = smul.u32 3072, %s8938_s30  ;;  %s7223_s30 = scalar_lea.sflag [#allocation4], %s9083_s15 }
  0x96   : > { %v8411_v9 = vld [vmem:[#allocation8 + $0x2e0] ss:$16 sps:$4 sm:$0xff]   ;;  %v8413_v10 = vld [vmem:[#allocation8 + $0x2e4] ss:$16 sps:$4 sm:$0xff]   ;;  %1308 = vmatprep.subr.bf16.mxu0 %v8410_v8  ;;  %v8509_v8 = vld [vmem:[#allocation8 + $0x2ec] ss:$16 sps:$4 sm:$0xff]  }
  0x97   : > { %v8416_v11 = vld [vmem:[#allocation8 + $0xc4] ss:$16 sps:$4 sm:$0xff]   ;;  %v8414_v12 = vld [vmem:[#allocation8 + $0xc0] ss:$16 sps:$4 sm:$0xff]   ;;  %1349 = vmatprep.subr.bf16.mxu1 %v8413_v10  ;;  %s9207_s8 = scalar_lea.vmem [#allocation14], %s8288_s2  ;;  %s9356_s10 = scalar_lea.hbm %s9407_s7, %s8289_s18 }
  0x98   : > { %7387 = vmatmul.mubr.msk.bf16.vlgmr.msra.gmra.mxu0 %vm424_vm0, %v377_v6  ;;  %7388 = vmatmul.mubr.msk.bf16.vlgmr.msra.gmra.mxu1 %vm424_vm0, %v377_v6  ;;  %v8419_v13 = vld [vmem:[#allocation8 + $0x2c4] ss:$16 sps:$4 sm:$0xff]   ;;  %v8417_v14 = vld [vmem:[#allocation8 + $0x2c0] ss:$16 sps:$4 sm:$0xff]   ;;  %s7237_s29 = sshll.u32 %s9207_s8, 4  ;;  %s8876_s21 = smov [#allocation14]   ;;  %s9358_s29 = int_to_ptr.vmem [resolvable:$true] %s7237_s29 }
  0x99   : > { %1309 = vmatpush1.bf16.msra.mxu0 %v8408_v7  ;;  %1350 = vmatpush1.bf16.msra.mxu1 %v8411_v9  ;;  %v8422_v15 = vld [vmem:[#allocation8 + $0xa4] ss:$16 sps:$4 sm:$0xff]   ;;  %v8420_v17 = vld [vmem:[#allocation8 + $0xa0] ss:$16 sps:$4 sm:$0xff]   ;;  %v8506_v7 = vld [vmem:[#allocation8 + $0xec] ss:$16 sps:$4 sm:$0xff]   ;;  %v384_v9 = vlaneseq }
  0x9a   : > { %1310 = vmatprep.subr.bf16.mxu0 %v8416_v11  ;;  %1351 = vmatprep.subr.bf16.mxu1 %v8419_v13  ;;  %v8425_v16 = vld [vmem:[#allocation8 + $0x2a4] ss:$16 sps:$4 sm:$0xff]   ;;  %v8423_v18 = vld [vmem:[#allocation8 + $0x2a0] ss:$16 sps:$4 sm:$0xff]   ;;  %v382_v13 = vld [vmem:[#allocation7] sm:$0xf] }
  0x9b   : > { %v8428_v19 = vld [vmem:[#allocation8 + $0x84] ss:$16 sps:$4 sm:$0xff]   ;;  %v8426_v21 = vld [vmem:[#allocation8 + $0x80] ss:$16 sps:$4 sm:$0xff]   ;;  %v9103_v10 = vshrl.u32 %v384_v9, 7  ;;  %s8786_s28 = scalar_lea.vmem %s9358_s29, 3072 }
  0x9c   : > { %v8431_v20 = vld [vmem:[#allocation8 + $0x284] ss:$16 sps:$4 sm:$0xff]   ;;  %v8429_v22 = vld [vmem:[#allocation8 + $0x280] ss:$16 sps:$4 sm:$0xff]   ;;  %v8555_v9 = vld [vmem:[#allocation8 + $0x3e8] ss:$16 sps:$4 sm:$0xff]   ;;  %p8787_p12 = scmp.ne.s32.totalorder %s9358_s29, %s8786_s28 }
  0x9d   : > { %1311 = vmatpush1.bf16.msra.mxu0 %v8414_v12  ;;  %1352 = vmatpush1.bf16.msra.mxu1 %v8417_v14  ;;  %v8434_v23 = vld [vmem:[#allocation8 + $0x64] ss:$16 sps:$4 sm:$0xff]   ;;  %v8432_v25 = vld [vmem:[#allocation8 + $0x60] ss:$16 sps:$4 sm:$0xff]   ;;  %v9106_v11 = vsub.s32 0, %v9103_v10  ;;  %v9109_v12 = vsub.s32 2, %v9103_v10 }
  0x9e   : > { %1312 = vmatprep.subr.bf16.mxu0 %v8422_v15  ;;  %1353 = vmatprep.subr.bf16.mxu1 %v8425_v16  ;;  %v8437_v24 = vld [vmem:[#allocation8 + $0x264] ss:$16 sps:$4 sm:$0xff]   ;;  %v8435_v26 = vld [vmem:[#allocation8 + $0x260] ss:$16 sps:$4 sm:$0xff]   ;;  %v9112_v14 = vsub.s32 1, %v9103_v10  ;;  %v9115_v15 = vsub.s32 3, %v9103_v10  ;;  %p8788_p0 = pnand %p8787_p12, %p9433_p13 }
  0x9f   : > { %v8440_v27 = vld [vmem:[#allocation8 + $0x44] ss:$16 sps:$4 sm:$0xff]   ;;  %v8438_v29 = vld [vmem:[#allocation8 + $0x40] ss:$16 sps:$4 sm:$0xff]   ;;  %v387_v16 = vrot.slane %v382_v13, %v9106_v11  ;;  %s8790_s9 = sshll.u32 %s8876_s21, 4  ;;  %s8791_s9 = int_to_ptr.vmem [resolvable:$false] %s8790_s9 }
  0xa0   : > { %v8443_v28 = vld [vmem:[#allocation8 + $0x244] ss:$16 sps:$4 sm:$0xff]   ;;  %v8441_v30 = vld [vmem:[#allocation8 + $0x240] ss:$16 sps:$4 sm:$0xff]   ;;  %p8789_p2 = pneg %p8788_p0  ;;  %s8792_s17 = scalar_lea.vmem %s8791_s9, 6144 }
  0xa1   : > { %1313 = vmatpush1.bf16.msra.mxu0 %v8420_v17  ;;  %1354 = vmatpush1.bf16.msra.mxu1 %v8423_v18  ;;  %v8446_v31 = vld [vmem:[#allocation8 + $0x24] ss:$16 sps:$4 sm:$0xff]   ;;  %v8444_v33 = vld [vmem:[#allocation8 + $0x20] ss:$16 sps:$4 sm:$0xff]   ;;  %v395_v17 = vrot.slane %v382_v13, %v9109_v12  ;;  %v391_v18 = vrot.slane %v382_v13, %v9112_v14  ;;  %p8793_p1 = scmp.lt.s32.totalorder %s9358_s29, %s8791_s9  ;;  %p8794_p4 = scmp.lt.s32.totalorder %s8792_s17, %s8786_s28 }
  0xa2   : > { %1314 = vmatprep.subr.bf16.mxu0 %v8428_v19  ;;  %1355 = vmatprep.subr.bf16.mxu1 %v8431_v20  ;;  %v8449_v32 = vld [vmem:[#allocation8 + $0x224] ss:$16 sps:$4 sm:$0xff]   ;;  %v8447_v34 = vld [vmem:[#allocation8 + $0x220] ss:$16 sps:$4 sm:$0xff]   ;;  %v399_v19 = vrot.slane %v382_v13, %v9115_v15  ;;  %v8560_v13 = vld [vmem:[#allocation8 + $0x1cc] ss:$16 sps:$4 sm:$0xff]  }
  0xa3   : > { %v8452_v35 = vld [vmem:[#allocation8 + $0x4] ss:$16 sps:$4 sm:$0xff]   ;;  %v8450_v37 = vld [vmem:[#allocation8] ss:$16 sps:$4 sm:$0xff]   ;;  %p8795_p7 = por %p8794_p4, %p8793_p1 }
  0xa4   : > { %v8455_v36 = vld [vmem:[#allocation8 + $0x204] ss:$16 sps:$4 sm:$0xff]   ;;  %v8453_v38 = vld [vmem:[#allocation8 + $0x200] ss:$16 sps:$4 sm:$0xff]  }
  0xa5   : > { %1315 = vmatpush1.bf16.msra.mxu0 %v8426_v21  ;;  %1356 = vmatpush1.bf16.msra.mxu1 %v8429_v22  ;;  %v8458_v39 = vld [vmem:[#allocation8 + $0x1e4] ss:$16 sps:$4 sm:$0xff]   ;;  %v8456_v41 = vld [vmem:[#allocation8 + $0x1e0] ss:$16 sps:$4 sm:$0xff]   ;;  %p8796_p3 = pnand %p8795_p7, %p8789_p2 }
  0xa6   : > { %1316 = vmatprep.subr.bf16.mxu0 %v8434_v23  ;;  %1357 = vmatprep.subr.bf16.mxu1 %v8437_v24  ;;  %v8461_v40 = vld [vmem:[#allocation8 + $0x3e4] ss:$16 sps:$4 sm:$0xff]   ;;  %v8459_v42 = vld [vmem:[#allocation8 + $0x3e0] ss:$16 sps:$4 sm:$0xff]  }
  0xa7   : > { %v8464_v43 = vld [vmem:[#allocation8 + $0x1c4] ss:$16 sps:$4 sm:$0xff]   ;;  %v8462_v44 = vld [vmem:[#allocation8 + $0x1c0] ss:$16 sps:$4 sm:$0xff]  }
  0xa8   : > { %v8467_v45 = vld [vmem:[#allocation8 + $0x3c4] ss:$16 sps:$4 sm:$0xff]   ;;  %v8465_v46 = vld [vmem:[#allocation8 + $0x3c0] ss:$16 sps:$4 sm:$0xff]  }
  0xa9   : > { %1317 = vmatpush1.bf16.msra.mxu0 %v8432_v25  ;;  %1358 = vmatpush1.bf16.msra.mxu1 %v8435_v26  ;;  %v8470_v47 = vld [vmem:[#allocation8 + $0x1a4] ss:$16 sps:$4 sm:$0xff]   ;;  %v8468_v49 = vld [vmem:[#allocation8 + $0x1a0] ss:$16 sps:$4 sm:$0xff]  }
  0xaa   : > { %1318 = vmatprep.subr.bf16.mxu0 %v8440_v27  ;;  %1359 = vmatprep.subr.bf16.mxu1 %v8443_v28  ;;  %v8473_v48 = vld [vmem:[#allocation8 + $0x3a4] ss:$16 sps:$4 sm:$0xff]   ;;  %v8471_v50 = vld [vmem:[#allocation8 + $0x3a0] ss:$16 sps:$4 sm:$0xff]  }
  0xab   : > { %v8476_v51 = vld [vmem:[#allocation8 + $0x184] ss:$16 sps:$4 sm:$0xff]   ;;  %v8474_v53 = vld [vmem:[#allocation8 + $0x180] ss:$16 sps:$4 sm:$0xff]  }
  0xac   : > { %v8479_v52 = vld [vmem:[#allocation8 + $0x384] ss:$16 sps:$4 sm:$0xff]   ;;  %v8477_v54 = vld [vmem:[#allocation8 + $0x380] ss:$16 sps:$4 sm:$0xff]  }
  0xad   : > { %1319 = vmatpush1.bf16.msra.mxu0 %v8438_v29  ;;  %1360 = vmatpush1.bf16.msra.mxu1 %v8441_v30  ;;  %v8482_v55 = vld [vmem:[#allocation8 + $0x164] ss:$16 sps:$4 sm:$0xff]   ;;  %v8480_v57 = vld [vmem:[#allocation8 + $0x160] ss:$16 sps:$4 sm:$0xff]  }
  0xae   : > { %1320 = vmatprep.subr.bf16.mxu0 %v8446_v31  ;;  %1361 = vmatprep.subr.bf16.mxu1 %v8449_v32  ;;  %v8485_v56 = vld [vmem:[#allocation8 + $0x364] ss:$16 sps:$4 sm:$0xff]   ;;  %v8483_v58 = vld [vmem:[#allocation8 + $0x360] ss:$16 sps:$4 sm:$0xff]  }
  0xaf   : > { %v8488_v59 = vld [vmem:[#allocation8 + $0x144] ss:$16 sps:$4 sm:$0xff]   ;;  %v8486_v61 = vld [vmem:[#allocation8 + $0x140] ss:$16 sps:$4 sm:$0xff]  }
  0xb0   : > { %v8491_v60 = vld [vmem:[#allocation8 + $0x344] ss:$16 sps:$4 sm:$0xff]   ;;  %v8489_v62 = vld [vmem:[#allocation8 + $0x340] ss:$16 sps:$4 sm:$0xff]  }
  0xb1   : > { %1321 = vmatpush1.bf16.msra.mxu0 %v8444_v33  ;;  %1362 = vmatpush1.bf16.msra.mxu1 %v8447_v34  ;;  %v8494_v63 = vld [vmem:[#allocation8 + $0x124] ss:$16 sps:$4 sm:$0xff]   ;;  %v8492_v1 = vld [vmem:[#allocation8 + $0x120] ss:$16 sps:$4 sm:$0xff]  }
  0xb2   : > { %1322 = vmatprep.subr.bf16.mxu0 %v8452_v35  ;;  %1363 = vmatprep.subr.bf16.mxu1 %v8455_v36  ;;  %v8497_v0 = vld [vmem:[#allocation8 + $0x324] ss:$16 sps:$4 sm:$0xff]   ;;  %v8495_v2 = vld [vmem:[#allocation8 + $0x320] ss:$16 sps:$4 sm:$0xff]  }
  0xb3   : > { %v8500_v3 = vld [vmem:[#allocation8 + $0x104] ss:$16 sps:$4 sm:$0xff]   ;;  %v8498_v5 = vld [vmem:[#allocation8 + $0x100] ss:$16 sps:$4 sm:$0xff]  }
  0xb4   : > { %v8503_v4 = vld [vmem:[#allocation8 + $0x304] ss:$16 sps:$4 sm:$0xff]   ;;  %v8501_v6 = vld [vmem:[#allocation8 + $0x300] ss:$16 sps:$4 sm:$0xff]  }
  0xb5   : > { %1323 = vmatpush1.bf16.msra.mxu0 %v8450_v37  ;;  %1364 = vmatpush1.bf16.msra.mxu1 %v8453_v38 }
  0xb6   : > { %1324 = vmatprep.subr.bf16.mxu0 %v8458_v39  ;;  %1365 = vmatprep.subr.bf16.mxu1 %v8461_v40  ;;  %v8504_v39 = vld [vmem:[#allocation8 + $0xe8] ss:$16 sps:$4 sm:$0xff]  }
  0xb7   : > { %v8507_v40 = vld [vmem:[#allocation8 + $0x2e8] ss:$16 sps:$4 sm:$0xff]  }
  0xb9   : > { %1325 = vmatpush2.bf16.msra.mxu0 %v8456_v41  ;;  %1366 = vmatpush2.bf16.msra.mxu1 %v8459_v42  ;;  %v8512_v42 = vld [vmem:[#allocation8 + $0xcc] ss:$16 sps:$4 sm:$0xff]  }
  0xba   : > { %1326 = vmatprep.subr.bf16.mxu0 %v8464_v43  ;;  %1367 = vmatprep.subr.bf16.mxu1 %v8467_v45  ;;  %v8515_v43 = vld [vmem:[#allocation8 + $0x2cc] ss:$16 sps:$4 sm:$0xff]   ;;  %v8513_v45 = vld [vmem:[#allocation8 + $0x2c8] ss:$16 sps:$4 sm:$0xff]  }
  0xbd   : > { %1327 = vmatpush2.bf16.msra.mxu0 %v8462_v44  ;;  %1368 = vmatpush2.bf16.msra.mxu1 %v8465_v46  ;;  %v8510_v44 = vld [vmem:[#allocation8 + $0xc8] ss:$16 sps:$4 sm:$0xff]   ;;  %v8518_v46 = vld [vmem:[#allocation8 + $0xac] ss:$16 sps:$4 sm:$0xff]  }
  0xbe   : > { %1328 = vmatprep.subr.bf16.mxu0 %v8470_v47  ;;  %1369 = vmatprep.subr.bf16.mxu1 %v8473_v48  ;;  %v8521_v47 = vld [vmem:[#allocation8 + $0x2ac] ss:$16 sps:$4 sm:$0xff]   ;;  %v8516_v48 = vld [vmem:[#allocation8 + $0xa8] ss:$16 sps:$4 sm:$0xff]  }
  0xc1   : > { %1329 = vmatpush2.bf16.msra.mxu0 %v8468_v49  ;;  %1370 = vmatpush2.bf16.msra.mxu1 %v8471_v50  ;;  %v8519_v49 = vld [vmem:[#allocation8 + $0x2a8] ss:$16 sps:$4 sm:$0xff]   ;;  %v8524_v50 = vld [vmem:[#allocation8 + $0x8c] ss:$16 sps:$4 sm:$0xff]  }
  0xc2   : > { %1330 = vmatprep.subr.bf16.mxu0 %v8476_v51  ;;  %1371 = vmatprep.subr.bf16.mxu1 %v8479_v52  ;;  %v8527_v51 = vld [vmem:[#allocation8 + $0x28c] ss:$16 sps:$4 sm:$0xff]   ;;  %v8522_v52 = vld [vmem:[#allocation8 + $0x88] ss:$16 sps:$4 sm:$0xff]  }
  0xc5   : > { %1331 = vmatpush2.bf16.msra.mxu0 %v8474_v53  ;;  %1372 = vmatpush2.bf16.msra.mxu1 %v8477_v54  ;;  %v8525_v53 = vld [vmem:[#allocation8 + $0x288] ss:$16 sps:$4 sm:$0xff]   ;;  %v8530_v54 = vld [vmem:[#allocation8 + $0x6c] ss:$16 sps:$4 sm:$0xff]  }
  0xc6   : > { %1332 = vmatprep.subr.bf16.mxu0 %v8482_v55  ;;  %1373 = vmatprep.subr.bf16.mxu1 %v8485_v56  ;;  %v8533_v55 = vld [vmem:[#allocation8 + $0x26c] ss:$16 sps:$4 sm:$0xff]   ;;  %v8528_v56 = vld [vmem:[#allocation8 + $0x68] ss:$16 sps:$4 sm:$0xff]  }
  0xc9   : > { %1333 = vmatpush2.bf16.msra.mxu0 %v8480_v57  ;;  %1374 = vmatpush2.bf16.msra.mxu1 %v8483_v58  ;;  %v8531_v57 = vld [vmem:[#allocation8 + $0x268] ss:$16 sps:$4 sm:$0xff]   ;;  %v8536_v58 = vld [vmem:[#allocation8 + $0x4c] ss:$16 sps:$4 sm:$0xff]  }
  0xca   : > { %1334 = vmatprep.subr.bf16.mxu0 %v8488_v59  ;;  %1375 = vmatprep.subr.bf16.mxu1 %v8491_v60  ;;  %v8539_v59 = vld [vmem:[#allocation8 + $0x24c] ss:$16 sps:$4 sm:$0xff]   ;;  %v8534_v60 = vld [vmem:[#allocation8 + $0x48] ss:$16 sps:$4 sm:$0xff]  }
  0xcd   : > { %1335 = vmatpush2.bf16.msra.mxu0 %v8486_v61  ;;  %1376 = vmatpush2.bf16.msra.mxu1 %v8489_v62  ;;  %v8537_v61 = vld [vmem:[#allocation8 + $0x248] ss:$16 sps:$4 sm:$0xff]   ;;  %v8542_v62 = vld [vmem:[#allocation8 + $0x2c] ss:$16 sps:$4 sm:$0xff]  }
  0xce   : > { %1336 = vmatprep.subr.bf16.mxu0 %v8494_v63  ;;  %1377 = vmatprep.subr.bf16.mxu1 %v8497_v0  ;;  %v8545_v63 = vld [vmem:[#allocation8 + $0x22c] ss:$16 sps:$4 sm:$0xff]   ;;  %v8540_v0 = vld [vmem:[#allocation8 + $0x28] ss:$16 sps:$4 sm:$0xff]  }
  0xd1   : > { %1337 = vmatpush2.bf16.msra.mxu0 %v8492_v1  ;;  %1378 = vmatpush2.bf16.msra.mxu1 %v8495_v2  ;;  %v8543_v1 = vld [vmem:[#allocation8 + $0x228] ss:$16 sps:$4 sm:$0xff]   ;;  %v8548_v2 = vld [vmem:[#allocation8 + $0xc] ss:$16 sps:$4 sm:$0xff]  }
  0xd2   : > { %1338 = vmatprep.subr.bf16.mxu0 %v8500_v3  ;;  %1379 = vmatprep.subr.bf16.mxu1 %v8503_v4  ;;  %v8551_v3 = vld [vmem:[#allocation8 + $0x20c] ss:$16 sps:$4 sm:$0xff]   ;;  %v8546_v4 = vld [vmem:[#allocation8 + $0x8] ss:$16 sps:$4 sm:$0xff]  }
  0xd5   : > { %1339 = vmatpush2.bf16.msra.mxu0 %v8498_v5  ;;  %1380 = vmatpush2.bf16.msra.mxu1 %v8501_v6  ;;  %v8549_v5 = vld [vmem:[#allocation8 + $0x208] ss:$16 sps:$4 sm:$0xff]   ;;  %v8554_v6 = vld [vmem:[#allocation8 + $0x1ec] ss:$16 sps:$4 sm:$0xff]  }
  0xd6   : > { %1390 = vmatprep.subr.bf16.mxu0 %v8506_v7  ;;  %1431 = vmatprep.subr.bf16.mxu1 %v8509_v8  ;;  %v8557_v7 = vld [vmem:[#allocation8 + $0x3ec] ss:$16 sps:$4 sm:$0xff]   ;;  %v8552_v8 = vld [vmem:[#allocation8 + $0x1e8] ss:$16 sps:$4 sm:$0xff]  }
 0x158   : > { %v462_v20 = vpop.f32.mrf.mxu0  ;;  %v503_v21 = vpop.f32.mrf.mxu1 }
 0x159   : > { %v463_v22 = vadd.f32 %v462_v20, %v387_v16  ;;  %v504_v23 = vadd.f32 %v503_v21, %v395_v17  ;;  %v8563_v16 = vld [vmem:[#allocation8 + $0x3cc] ss:$16 sps:$4 sm:$0xff]   ;;  %v8558_v17 = vld [vmem:[#allocation8 + $0x1c8] ss:$16 sps:$4 sm:$0xff]  }
 0x15a   : > { %v464_v24 = vpop.f32.mrf.mxu0  ;;  %v505_v25 = vpop.f32.mrf.mxu1  ;;  %v8569_v20 = vld [vmem:[#allocation8 + $0x3ac] ss:$16 sps:$4 sm:$0xff]   ;;  %v8564_v21 = vld [vmem:[#allocation8 + $0x1a8] ss:$16 sps:$4 sm:$0xff]  }
 0x15b   : > { %v512_v26 = vmax.f32 %v504_v23, 0.0  ;;  %v465_v27 = vadd.f32 %v464_v24, %v391_v18  ;;  %v506_v28 = vadd.f32 %v505_v25, %v399_v19  ;;  %v510_v29 = vmax.f32 %v463_v22, 0.0  ;;  %v8561_v18 = vld [vmem:[#allocation8 + $0x3c8] ss:$16 sps:$4 sm:$0xff]   ;;  %v8566_v19 = vld [vmem:[#allocation8 + $0x1ac] ss:$16 sps:$4 sm:$0xff]  }
 0x15c   : > { %v466_v30 = vpop.f32.mrf.mxu0  ;;  %v507_v31 = vpop.f32.mrf.mxu1  ;;  %v8567_v22 = vld [vmem:[#allocation8 + $0x3a8] ss:$16 sps:$4 sm:$0xff]   ;;  %v8572_v23 = vld [vmem:[#allocation8 + $0x18c] ss:$16 sps:$4 sm:$0xff]  }
 0x15d   : > { %v511_v32 = vmax.f32 %v465_v27, 0.0  ;;  %v513_v33 = vmax.f32 %v506_v28, 0.0  ;;  %v9121_v34 = vpack.c.bf16 %v512_v26, %v512_v26  ;;  %v9123_v41 = vpack.c.bf16 %v510_v29, %v510_v29  ;;  %v8575_v24 = vld [vmem:[#allocation8 + $0x38c] ss:$16 sps:$4 sm:$0xff]   ;;  %v8570_v25 = vld [vmem:[#allocation8 + $0x188] ss:$16 sps:$4 sm:$0xff]  }
 0x15e   : > { %v467_v35 = vpop.f32.mrf.mxu0  ;;  %v508_v36 = vpop.f32.mrf.mxu1  ;;  %v8573_v26 = vld [vmem:[#allocation8 + $0x388] ss:$16 sps:$4 sm:$0xff]   ;;  %v8578_v27 = vld [vmem:[#allocation8 + $0x16c] ss:$16 sps:$4 sm:$0xff]  }
 0x15f   : > { %v515_v37 = vpack.c.bf16 %v511_v32, %v511_v32  ;;  %v517_v38 = vpack.c.bf16 %v513_v33, %v513_v33  ;;  %v8581_v28 = vld [vmem:[#allocation8 + $0x36c] ss:$16 sps:$4 sm:$0xff]   ;;  %v8576_v29 = vld [vmem:[#allocation8 + $0x168] ss:$16 sps:$4 sm:$0xff]  }
 0x160   : > { %v8579_v30 = vld [vmem:[#allocation8 + $0x368] ss:$16 sps:$4 sm:$0xff]   ;;  %v8584_v31 = vld [vmem:[#allocation8 + $0x14c] ss:$16 sps:$4 sm:$0xff]  }
 0x161   : > { %1340 = vmatprep.mubr.bf16.mxu0 %v515_v37  ;;  %1381 = vmatprep.mubr.bf16.mxu1 %v517_v38  ;;  %v8587_v32 = vld [vmem:[#allocation8 + $0x34c] ss:$16 sps:$4 sm:$0xff]   ;;  %v8582_v33 = vld [vmem:[#allocation8 + $0x148] ss:$16 sps:$4 sm:$0xff]  }
 0x162   : > { %1341 = vmatmul.mubr.bf16.vlgmr.msra.gmra.mxu0 %v9123_v41  ;;  %1382 = vmatmul.mubr.bf16.vlgmr.msra.gmra.mxu1 %v9121_v34  ;;  %v8585_v35 = vld [vmem:[#allocation8 + $0x348] ss:$16 sps:$4 sm:$0xff]   ;;  %v8590_v36 = vld [vmem:[#allocation8 + $0x12c] ss:$16 sps:$4 sm:$0xff]  }
 0x163   : > { %1391 = vmatpush1.bf16.msra.mxu0 %v8504_v39  ;;  %1432 = vmatpush1.bf16.msra.mxu1 %v8507_v40  ;;  %v8591_v39 = vld [vmem:[#allocation8 + $0x328] ss:$16 sps:$4 sm:$0xff]   ;;  %v8596_v40 = vld [vmem:[#allocation8 + $0x10c] ss:$16 sps:$4 sm:$0xff]  }
 0x164   : > { %1422 = vmatprep.mubr.bf16.mxu0 %v515_v37  ;;  %1463 = vmatprep.mubr.bf16.mxu1 %v517_v38  ;;  %v8593_v37 = vld [vmem:[#allocation8 + $0x32c] ss:$16 sps:$4 sm:$0xff]   ;;  %v8588_v38 = vld [vmem:[#allocation8 + $0x128] ss:$16 sps:$4 sm:$0xff]  }
 0x165   : > { %1392 = vmatprep.subr.bf16.mxu0 %v8512_v42  ;;  %1433 = vmatprep.subr.bf16.mxu1 %v8515_v43  ;;  %v8599_v42 = vld [vmem:[#allocation8 + $0x30c] ss:$16 sps:$4 sm:$0xff]   ;;  %v1648_v43 = vld [vmem:[#allocation11 + $0x540] sm:$0xff] }
 0x167   : > { %1393 = vmatpush1.bf16.msra.mxu0 %v8510_v44  ;;  %1434 = vmatpush1.bf16.msra.mxu1 %v8513_v45  ;;  %v1660_v44 = vld [vmem:[#allocation11 + $0x5a0] sm:$0xff] }
 0x168   : > { %1394 = vmatprep.subr.bf16.mxu0 %v8518_v46  ;;  %1435 = vmatprep.subr.bf16.mxu1 %v8521_v47  ;;  %v8594_v45 = vld [vmem:[#allocation8 + $0x108] ss:$16 sps:$4 sm:$0xff]   ;;  %v7686_v47 = vcombine.high %v1648_v43, %v1660_v44 }
 0x169   : > { %v8597_v46 = vld [vmem:[#allocation8 + $0x308] ss:$16 sps:$4 sm:$0xff]  }
 0x16b   : > { %1395 = vmatpush1.bf16.msra.mxu0 %v8516_v48  ;;  %1436 = vmatpush1.bf16.msra.mxu1 %v8519_v49  ;;  %v1624_v48 = vld [vmem:[#allocation11 + $0x480] sm:$0xff] }
 0x16c   : > { %1396 = vmatprep.subr.bf16.mxu0 %v8524_v50  ;;  %1437 = vmatprep.subr.bf16.mxu1 %v8527_v51  ;;  %v1636_v49 = vld [vmem:[#allocation11 + $0x4e0] sm:$0xff]  ;;  %v7685_v50 = vcombine.low %v1648_v43, %v1660_v44 }
 0x16d   : > { %v7662_v51 = vcombine.high %v1624_v48, %v1636_v49  ;;  %v1816_v44 = vld [vmem:[#allocation11 + $0xa80] sm:$0xff] }
 0x16f   : > { %1397 = vmatpush1.bf16.msra.mxu0 %v8522_v52  ;;  %1438 = vmatpush1.bf16.msra.mxu1 %v8525_v53  ;;  %v1600_v52 = vld [vmem:[#allocation11 + $0x3c0] sm:$0xff] }
 0x170   : > { %1398 = vmatprep.subr.bf16.mxu0 %v8530_v54  ;;  %1439 = vmatprep.subr.bf16.mxu1 %v8533_v55  ;;  %v1612_v53 = vld [vmem:[#allocation11 + $0x420] sm:$0xff]  ;;  %v7661_v54 = vcombine.low %v1624_v48, %v1636_v49 }
 0x171   : > { %v7638_v55 = vcombine.high %v1600_v52, %v1612_v53 }
 0x173   : > { %1399 = vmatpush1.bf16.msra.mxu0 %v8528_v56  ;;  %1440 = vmatpush1.bf16.msra.mxu1 %v8531_v57  ;;  %v1576_v56 = vld [vmem:[#allocation11 + $0x300] sm:$0xff] }
 0x174   : > { %1400 = vmatprep.subr.bf16.mxu0 %v8536_v58  ;;  %1441 = vmatprep.subr.bf16.mxu1 %v8539_v59  ;;  %v1588_v57 = vld [vmem:[#allocation11 + $0x360] sm:$0xff]  ;;  %v7637_v58 = vcombine.low %v1600_v52, %v1612_v53 }
 0x175   : > { %v7614_v59 = vcombine.high %v1576_v56, %v1588_v57  ;;  %v1792_v52 = vld [vmem:[#allocation11 + $0x9c0] sm:$0xff] }
 0x176   : > { %v1804_v53 = vld [vmem:[#allocation11 + $0xa20] sm:$0xff] }
 0x177   : > { %1401 = vmatpush1.bf16.msra.mxu0 %v8534_v60  ;;  %1442 = vmatpush1.bf16.msra.mxu1 %v8537_v61  ;;  %v1552_v60 = vld [vmem:[#allocation11 + $0x240] sm:$0xff] }
 0x178   : > { %1402 = vmatprep.subr.bf16.mxu0 %v8542_v62  ;;  %1443 = vmatprep.subr.bf16.mxu1 %v8545_v63  ;;  %v1564_v61 = vld [vmem:[#allocation11 + $0x2a0] sm:$0xff] }
 0x179   : > { %v2032_v62 = vld [vmem:[#allocation11 + $0x1140] sm:$0xff] }
 0x17a   : > { %v2044_v63 = vld [vmem:[#allocation11 + $0x11a0] sm:$0xff] }
 0x17b   : > { %1403 = vmatpush1.bf16.msra.mxu0 %v8540_v0  ;;  %1444 = vmatpush1.bf16.msra.mxu1 %v8543_v1  ;;  %v7613_v0 = vcombine.low %v1576_v56, %v1588_v57  ;;  %v8069_v1 = vcombine.low %v2032_v62, %v2044_v63 }
 0x17c   : > { %1404 = vmatprep.subr.bf16.mxu0 %v8548_v2  ;;  %1445 = vmatprep.subr.bf16.mxu1 %v8551_v3  ;;  %v9129_v2 = vld [vmem:[#allocation11 + $0x548] sm:$0xff]  ;;  %v7590_v3 = vcombine.high %v1552_v60, %v1564_v61 }
 0x17f   : > { %1405 = vmatpush1.bf16.msra.mxu0 %v8546_v4  ;;  %1446 = vmatpush1.bf16.msra.mxu1 %v8549_v5  ;;  %v1528_v4 = vld [vmem:[#allocation11 + $0x180] sm:$0xff] }
 0x180   : > { %1406 = vmatprep.subr.bf16.mxu0 %v8554_v6  ;;  %1447 = vmatprep.subr.bf16.mxu1 %v8557_v7  ;;  %v1540_v5 = vld [vmem:[#allocation11 + $0x1e0] sm:$0xff] }
 0x181   : > { %v2008_v7 = vld [vmem:[#allocation11 + $0x1080] sm:$0xff] }
 0x183   : > { %1407 = vmatpush2.bf16.msra.mxu0 %v8552_v8  ;;  %1448 = vmatpush2.bf16.msra.mxu1 %v8555_v9  ;;  %v2020_v8 = vld [vmem:[#allocation11 + $0x10e0] sm:$0xff]  ;;  %v7589_v9 = vcombine.low %v1552_v60, %v1564_v61 }
 0x184   : > { %1408 = vmatprep.subr.bf16.mxu0 %v8560_v13  ;;  %1449 = vmatprep.subr.bf16.mxu1 %v8563_v16  ;;  %v8045_v13 = vcombine.low %v2008_v7, %v2020_v8  ;;  %v8046_v16 = vcombine.high %v2008_v7, %v2020_v8  ;;  %v1768_v60 = vld [vmem:[#allocation11 + $0x900] sm:$0xff] }
 0x185   : > { %v1780_v61 = vld [vmem:[#allocation11 + $0x960] sm:$0xff] }
 0x186   : > { %v2224_v7 = vld [vmem:[#allocation11 + $0x1740] sm:$0xff] }
 0x187   : > { %1409 = vmatpush2.bf16.msra.mxu0 %v8558_v17  ;;  %1450 = vmatpush2.bf16.msra.mxu1 %v8561_v18  ;;  %v7566_v17 = vcombine.high %v1528_v4, %v1540_v5  ;;  %v1504_v18 = vld [vmem:[#allocation11 + $0xc0] sm:$0xff] }
 0x188   : > { %1410 = vmatprep.subr.bf16.mxu0 %v8566_v19  ;;  %1451 = vmatprep.subr.bf16.mxu1 %v8569_v20  ;;  %v1516_v19 = vld [vmem:[#allocation11 + $0x120] sm:$0xff] }
 0x189   : > { %v1984_v20 = vld [vmem:[#allocation11 + $0xfc0] sm:$0xff] }
 0x18a   : > { %v2236_v8 = vld [vmem:[#allocation11 + $0x17a0] sm:$0xff] }
 0x18b   : > { %1411 = vmatpush2.bf16.msra.mxu0 %v8564_v21  ;;  %1452 = vmatpush2.bf16.msra.mxu1 %v8567_v22  ;;  %v1996_v21 = vld [vmem:[#allocation11 + $0x1020] sm:$0xff]  ;;  %v7565_v22 = vcombine.low %v1528_v4, %v1540_v5 }
 0x18c   : > { %1412 = vmatprep.subr.bf16.mxu0 %v8572_v23  ;;  %1453 = vmatprep.subr.bf16.mxu1 %v8575_v24  ;;  %v8021_v23 = vcombine.low %v1984_v20, %v1996_v21  ;;  %v8022_v24 = vcombine.high %v1984_v20, %v1996_v21  ;;  %v1744_v4 = vld [vmem:[#allocation11 + $0x840] sm:$0xff] }
 0x18d   : > { %v1756_v5 = vld [vmem:[#allocation11 + $0x8a0] sm:$0xff] }
 0x18e   : > { %v2200_v20 = vld [vmem:[#allocation11 + $0x1680] sm:$0xff] }
 0x18f   : > { %1413 = vmatpush2.bf16.msra.mxu0 %v8570_v25  ;;  %1454 = vmatpush2.bf16.msra.mxu1 %v8573_v26  ;;  %v7542_v25 = vcombine.high %v1504_v18, %v1516_v19  ;;  %v1480_v26 = vld [vmem:[#allocation11] sm:$0xff] }
 0x190   : > { %1414 = vmatprep.subr.bf16.mxu0 %v8578_v27  ;;  %1455 = vmatprep.subr.bf16.mxu1 %v8581_v28  ;;  %v1492_v27 = vld [vmem:[#allocation11 + $0x60] sm:$0xff] }
 0x191   : > { %v1960_v28 = vld [vmem:[#allocation11 + $0xf00] sm:$0xff] }
 0x192   : > { %v2212_v21 = vld [vmem:[#allocation11 + $0x16e0] sm:$0xff] }
 0x193   : > { %1415 = vmatpush2.bf16.msra.mxu0 %v8576_v29  ;;  %1456 = vmatpush2.bf16.msra.mxu1 %v8579_v30  ;;  %v1972_v29 = vld [vmem:[#allocation11 + $0xf60] sm:$0xff]  ;;  %v7541_v30 = vcombine.low %v1504_v18, %v1516_v19 }
 0x194   : > { %1416 = vmatprep.subr.bf16.mxu0 %v8584_v31  ;;  %1457 = vmatprep.subr.bf16.mxu1 %v8587_v32  ;;  %v7997_v31 = vcombine.low %v1960_v28, %v1972_v29  ;;  %v7998_v32 = vcombine.high %v1960_v28, %v1972_v29  ;;  %v1720_v18 = vld [vmem:[#allocation11 + $0x780] sm:$0xff] }
 0x195   : > { %v1732_v19 = vld [vmem:[#allocation11 + $0x7e0] sm:$0xff] }
 0x196   : > { %v2176_v28 = vld [vmem:[#allocation11 + $0x15c0] sm:$0xff] }
 0x197   : > { %1417 = vmatpush2.bf16.msra.mxu0 %v8582_v33  ;;  %1458 = vmatpush2.bf16.msra.mxu1 %v8585_v35  ;;  %v7518_v33 = vcombine.high %v1480_v26, %v1492_v27  ;;  %v1840_v35 = vld [vmem:[#allocation11 + $0xb40] sm:$0xff] }
 0x198   : > { %1418 = vmatprep.subr.bf16.mxu0 %v8590_v36  ;;  %1459 = vmatprep.subr.bf16.mxu1 %v8593_v37  ;;  %v1852_v36 = vld [vmem:[#allocation11 + $0xba0] sm:$0xff] }
 0x199   : > { %v1936_v37 = vld [vmem:[#allocation11 + $0xe40] sm:$0xff]  ;;  %v7878_v43 = vcombine.high %v1840_v35, %v1852_v36  ;;  %v7877_v48 = vcombine.low %v1840_v35, %v1852_v36 }
 0x19a   : > { %v2188_v29 = vld [vmem:[#allocation11 + $0x1620] sm:$0xff] }
 0x19b   : > { %1419 = vmatpush2.bf16.msra.mxu0 %v8588_v38  ;;  %1460 = vmatpush2.bf16.msra.mxu1 %v8591_v39  ;;  %v1948_v38 = vld [vmem:[#allocation11 + $0xea0] sm:$0xff]  ;;  %v7517_v39 = vcombine.low %v1480_v26, %v1492_v27 }
 0x19c   : > { %1420 = vmatprep.subr.bf16.mxu0 %v8596_v40  ;;  %1461 = vmatprep.subr.bf16.mxu1 %v8599_v42  ;;  %v7973_v40 = vcombine.low %v1936_v37, %v1948_v38  ;;  %v7974_v42 = vcombine.high %v1936_v37, %v1948_v38  ;;  %v1696_v26 = vld [vmem:[#allocation11 + $0x6c0] sm:$0xff] }
 0x19d   : > { %v1708_v27 = vld [vmem:[#allocation11 + $0x720] sm:$0xff] }
 0x19e   : > { %v1672_v35 = vld [vmem:[#allocation11 + $0x600] sm:$0xff] }
 0x19f   : > { %1421 = vmatpush2.bf16.msra.mxu0 %v8594_v45  ;;  %1462 = vmatpush2.bf16.msra.mxu1 %v8597_v46  ;;  %v1828_v45 = vld [vmem:[#allocation11 + $0xae0] sm:$0xff] }
 0x1a0   : > { %6214 = vmatprep.subr.bf16.mxu0 %v7686_v47  ;;  %v1912_v46 = vld [vmem:[#allocation11 + $0xd80] sm:$0xff]  ;;  %v7853_v56 = vcombine.low %v1816_v44, %v1828_v45 }
 0x1a1   : > { %v1924_v47 = vld [vmem:[#allocation11 + $0xde0] sm:$0xff] }
 0x1a2   : > { %1423 = vmatmul.mubr.bf16.vlgmr.msra.gmra.mxu0 %v9123_v41  ;;  %1464 = vmatmul.mubr.bf16.vlgmr.msra.gmra.mxu1 %v9121_v34  ;;  %v8070_v41 = vcombine.high %v2032_v62, %v2044_v63  ;;  %v9131_v34 = vld [vmem:[#allocation11 + $0x5a8] sm:$0xff]  ;;  %v7949_v49 = vcombine.low %v1912_v46, %v1924_v47  ;;  %v1864_v62 = vld [vmem:[#allocation11 + $0xc00] sm:$0xff] }
 0x1a3   : > { %6215 = vmatpush1.bf16.msra.mxu0 %v7685_v50  ;;  %v7687_v6 = vcombine.low %v9129_v2, %v9131_v34  ;;  %v7950_v50 = vcombine.high %v1912_v46, %v1924_v47  ;;  %v1876_v63 = vld [vmem:[#allocation11 + $0xc60] sm:$0xff] }
 0x1a4   : > { %6216 = vmatprep.subr.bf16.mxu0 %v7662_v51  ;;  %6255 = vmatprep.subr.bf16.mxu1 %v8070_v41  ;;  %v7854_v51 = vcombine.high %v1816_v44, %v1828_v45  ;;  %v7902_v41 = vcombine.high %v1864_v62, %v1876_v63  ;;  %v1684_v36 = vld [vmem:[#allocation11 + $0x660] sm:$0xff] }
 0x1a5   : > { %6256 = vmatpush1.bf16.msra.mxu1 %v8069_v1  ;;  %v7901_v1 = vcombine.low %v1864_v62, %v1876_v63  ;;  %v2152_v37 = vld [vmem:[#allocation11 + $0x1500] sm:$0xff]  ;;  %v7709_v46 = vcombine.low %v1672_v35, %v1684_v36  ;;  %v9137_v62 = vld [vmem:[#allocation11 + $0x1148] sm:$0xff] }
 0x1a6   : > { %6257 = vmatprep.subr.bf16.mxu1 %v8046_v16  ;;  %v8262_v16 = vcombine.high %v2224_v7, %v2236_v8  ;;  %v2164_v38 = vld [vmem:[#allocation11 + $0x1560] sm:$0xff]  ;;  %v9139_v63 = vld [vmem:[#allocation11 + $0x11a8] sm:$0xff] }
 0x1a7   : > { %6217 = vmatpush1.bf16.msra.mxu0 %v7661_v54  ;;  %v1888_v54 = vld [vmem:[#allocation11 + $0xcc0] sm:$0xff] }
 0x1a8   : > { %6218 = vmatprep.subr.bf16.mxu0 %v7638_v55  ;;  %v1900_v55 = vld [vmem:[#allocation11 + $0xd20] sm:$0xff] }
 0x1a9   : > { %6258 = vmatpush1.bf16.msra.mxu1 %v8045_v13  ;;  %v7925_v57 = vcombine.low %v1888_v54, %v1900_v55  ;;  %v8261_v13 = vcombine.low %v2224_v7, %v2236_v8  ;;  %v2128_v44 = vld [vmem:[#allocation11 + $0x1440] sm:$0xff] }
 0x1aa   : > { %6259 = vmatprep.subr.bf16.mxu1 %v8022_v24  ;;  %v8238_v24 = vcombine.high %v2200_v20, %v2212_v21  ;;  %v2140_v45 = vld [vmem:[#allocation11 + $0x14a0] sm:$0xff] }
 0x1ab   : > { %6219 = vmatpush1.bf16.msra.mxu0 %v7637_v58  ;;  %v7926_v58 = vcombine.high %v1888_v54, %v1900_v55  ;;  %v8165_v47 = vcombine.low %v2128_v44, %v2140_v45  ;;  %v2080_v54 = vld [vmem:[#allocation11 + $0x12c0] sm:$0xff] }
 0x1ac   : > { %6220 = vmatprep.subr.bf16.mxu0 %v7614_v59  ;;  %v7830_v59 = vcombine.high %v1792_v52, %v1804_v53  ;;  %v2092_v55 = vld [vmem:[#allocation11 + $0x1320] sm:$0xff] }
 0x1ad   : > { %6260 = vmatpush1.bf16.msra.mxu1 %v8021_v23  ;;  %v8237_v23 = vcombine.low %v2200_v20, %v2212_v21 }
 0x1ae   : > { %6261 = vmatprep.subr.bf16.mxu1 %v7998_v32  ;;  %v8214_v32 = vcombine.high %v2176_v28, %v2188_v29 }
 0x1af   : > { %6221 = vmatpush1.bf16.msra.mxu0 %v7613_v0  ;;  %v7829_v0 = vcombine.low %v1792_v52, %v1804_v53 }
 0x1b0   : > { %6222 = vmatprep.subr.bf16.mxu0 %v7590_v3  ;;  %v7806_v3 = vcombine.high %v1768_v60, %v1780_v61 }
 0x1b1   : > { %6262 = vmatpush1.bf16.msra.mxu1 %v7997_v31  ;;  %v8213_v31 = vcombine.low %v2176_v28, %v2188_v29 }
 0x1b2   : > { %6263 = vmatprep.subr.bf16.mxu1 %v7974_v42  ;;  %v8190_v42 = vcombine.high %v2152_v37, %v2164_v38 }
 0x1b3   : > { %6223 = vmatpush1.bf16.msra.mxu0 %v7589_v9  ;;  %v7805_v9 = vcombine.low %v1768_v60, %v1780_v61 }
 0x1b4   : > { %6224 = vmatprep.subr.bf16.mxu0 %v7566_v17  ;;  %v7782_v17 = vcombine.high %v1744_v4, %v1756_v5 }
 0x1b5   : > { %6264 = vmatpush1.bf16.msra.mxu1 %v7973_v40  ;;  %v8189_v40 = vcombine.low %v2152_v37, %v2164_v38 }
 0x1b6   : > { %6265 = vmatprep.subr.bf16.mxu1 %v7950_v50  ;;  %v2104_v50 = vld [vmem:[#allocation11 + $0x1380] sm:$0xff] }
 0x1b7   : > { %6225 = vmatpush1.bf16.msra.mxu0 %v7565_v22  ;;  %v7781_v22 = vcombine.low %v1744_v4, %v1756_v5 }
 0x1b8   : > { %6226 = vmatprep.subr.bf16.mxu0 %v7542_v25  ;;  %v7758_v25 = vcombine.high %v1720_v18, %v1732_v19 }
 0x1b9   : > { %6266 = vmatpush1.bf16.msra.mxu1 %v7949_v49  ;;  %v7688_v49 = vcombine.high %v9129_v2, %v9131_v34  ;;  %v1541_v2 = vld [vmem:[#allocation11 + $0x1e8] sm:$0xff] }
 0x1ba   : > { %6267 = vmatprep.subr.bf16.mxu1 %v7926_v58  ;;  %v2056_v58 = vld [vmem:[#allocation11 + $0x1200] sm:$0xff] }
 0x1bb   : > { %6227 = vmatpush1.bf16.msra.mxu0 %v7541_v30  ;;  %v7757_v30 = vcombine.low %v1720_v18, %v1732_v19 }
 0x1bc   : > { %6228 = vmatprep.subr.bf16.mxu0 %v7518_v33  ;;  %v7734_v33 = vcombine.high %v1696_v26, %v1708_v27 }
 0x1bd   : > { %6268 = vmatpush1.bf16.msra.mxu1 %v7925_v57  ;;  %v8117_v57 = vcombine.low %v2080_v54, %v2092_v55 }
 0x1be   : > { %6269 = vmatprep.subr.bf16.mxu1 %v7902_v41  ;;  %v9145_v41 = vld [vmem:[#allocation10] sm:$0xf] }
 0x1bf   : > { %6229 = vmatpush1.bf16.msra.mxu0 %v7517_v39  ;;  %v7733_v39 = vcombine.low %v1696_v26, %v1708_v27  ;;  %v655_v4 = vrot.slane %v9145_v41, %v9112_v14  ;;  %v1637_v26 = vld [vmem:[#allocation11 + $0x4e8] sm:$0xff] }
 0x1c0   : > { %6230 = vmatprep.subr.bf16.mxu0 %v7878_v43  ;;  %v7710_v43 = vcombine.high %v1672_v35, %v1684_v36  ;;  %v1577_v35 = vld [vmem:[#allocation11 + $0x308] sm:$0xff] }
 0x1c1   : > { %6270 = vmatpush1.bf16.msra.mxu1 %v7901_v1  ;;  %v8071_v1 = vcombine.low %v9137_v62, %v9139_v63  ;;  %v1589_v36 = vld [vmem:[#allocation11 + $0x368] sm:$0xff] }
 0x1c2   : > { %6271 = vmatprep.subr.bf16.mxu1 %v8262_v16  ;;  %v7616_v38 = vcombine.high %v1577_v35, %v1589_v36 }
 0x1c3   : > { %6231 = vmatpush2.bf16.msra.mxu0 %v7877_v48  ;;  %v8166_v48 = vcombine.high %v2128_v44, %v2140_v45  ;;  %v1529_v44 = vld [vmem:[#allocation11 + $0x188] sm:$0xff] }
 0x1c4   : > { %6232 = vmatprep.subr.bf16.mxu0 %v7854_v51  ;;  %v2116_v51 = vld [vmem:[#allocation11 + $0x13e0] sm:$0xff]  ;;  %v1505_v45 = vld [vmem:[#allocation11 + $0xc8] sm:$0xff] }
 0x1c5   : > { %6272 = vmatpush2.bf16.msra.mxu1 %v8261_v13  ;;  %v8141_v52 = vcombine.low %v2104_v50, %v2116_v51  ;;  %v8142_v53 = vcombine.high %v2104_v50, %v2116_v51  ;;  %v1493_v50 = vld [vmem:[#allocation11 + $0x68] sm:$0xff] }
 0x1c6   : > { %6273 = vmatprep.subr.bf16.mxu1 %v8238_v24 }
 0x1c7   : > { %6233 = vmatpush2.bf16.msra.mxu0 %v7853_v56  ;;  %v8118_v56 = vcombine.high %v2080_v54, %v2092_v55  ;;  %v1853_v54 = vld [vmem:[#allocation11 + $0xba8] sm:$0xff] }
 0x1c8   : > { %6234 = vmatprep.subr.bf16.mxu0 %v7830_v59  ;;  %v2068_v59 = vld [vmem:[#allocation11 + $0x1260] sm:$0xff] }
 0x1c9   : > { %6274 = vmatpush2.bf16.msra.mxu1 %v8237_v23  ;;  %v8094_v60 = vcombine.high %v2056_v58, %v2068_v59  ;;  %v8093_v61 = vcombine.low %v2056_v58, %v2068_v59  ;;  %v1829_v58 = vld [vmem:[#allocation11 + $0xae8] sm:$0xff] }
 0x1ca   : > { %6275 = vmatprep.subr.bf16.mxu1 %v8214_v32 }
 0x1cb   : > { %6235 = vmatpush2.bf16.msra.mxu0 %v7829_v0  ;;  %v8072_v0 = vcombine.high %v9137_v62, %v9139_v63 }
 0x1cc   : > { %6236 = vmatprep.subr.bf16.mxu0 %v7806_v3  ;;  %v651_v3 = vrot.slane %v9145_v41, %v9106_v11 }
 0x1cd   : > { %6276 = vmatpush2.bf16.msra.mxu1 %v8213_v31  ;;  %v1613_v31 = vld [vmem:[#allocation11 + $0x428] sm:$0xff] }
 0x1ce   : > { %6277 = vmatprep.subr.bf16.mxu1 %v8190_v42  ;;  %v7615_v42 = vcombine.low %v1577_v35, %v1589_v36 }
 0x1cf   : > { %6237 = vmatpush2.bf16.msra.mxu0 %v7805_v9 }
 0x1d0   : > { %6238 = vmatprep.subr.bf16.mxu0 %v7782_v17 }
 0x1d1   : > { %6278 = vmatpush2.bf16.msra.mxu1 %v8189_v40  ;;  %v1565_v40 = vld [vmem:[#allocation11 + $0x2a8] sm:$0xff] }
 0x1d2   : > { %6279 = vmatprep.subr.bf16.mxu1 %v8166_v48 }
 0x1d3   : > { %6239 = vmatpush2.bf16.msra.mxu0 %v7781_v22 }
 0x1d4   : > { %6240 = vmatprep.subr.bf16.mxu0 %v7758_v25  ;;  %v1625_v25 = vld [vmem:[#allocation11 + $0x488] sm:$0xff] }
 0x1d5   : > { %6280 = vmatpush2.bf16.msra.mxu1 %v8165_v47  ;;  %v7664_v29 = vcombine.high %v1625_v25, %v1637_v26  ;;  %v7663_v32 = vcombine.low %v1625_v25, %v1637_v26  ;;  %v7567_v47 = vcombine.low %v1529_v44, %v1541_v2  ;;  %v659_v25 = vrot.slane %v9145_v41, %v9109_v12 }
 0x1d6   : > { %6281 = vmatprep.subr.bf16.mxu1 %v8142_v53  ;;  %v1841_v53 = vld [vmem:[#allocation11 + $0xb48] sm:$0xff] }
 0x1d7   : > { %6241 = vmatpush2.bf16.msra.mxu0 %v7757_v30  ;;  %v1601_v30 = vld [vmem:[#allocation11 + $0x3c8] sm:$0xff]  ;;  %v7879_v59 = vcombine.low %v1841_v53, %v1853_v54 }
 0x1d8   : > { %6242 = vmatprep.subr.bf16.mxu0 %v7734_v33  ;;  %v7640_v33 = vcombine.high %v1601_v30, %v1613_v31  ;;  %v7639_v37 = vcombine.low %v1601_v30, %v1613_v31  ;;  %v663_v30 = vrot.slane %v9145_v41, %v9115_v15  ;;  %v1673_v31 = vld [vmem:[#allocation11 + $0x608] sm:$0xff] }
 0x1d9   : > { %6282 = vmatpush2.bf16.msra.mxu1 %v8141_v52 }
 0x1da   : > { %6283 = vmatprep.subr.bf16.mxu1 %v8118_v56  ;;  %v7880_v56 = vcombine.high %v1841_v53, %v1853_v54  ;;  %v1626_v53 = vld [vmem:[#allocation11 + $0x490] sm:$0xff] }
 0x1db   : > { %6243 = vmatpush2.bf16.msra.mxu0 %v7733_v39  ;;  %v1553_v39 = vld [vmem:[#allocation11 + $0x248] sm:$0xff]  ;;  %v1638_v54 = vld [vmem:[#allocation11 + $0x4f0] sm:$0xff] }
 0x1dc   : > { %6244 = vmatprep.subr.bf16.mxu0 %v7710_v43  ;;  %v7592_v43 = vcombine.high %v1553_v39, %v1565_v40  ;;  %v7591_v34 = vcombine.low %v1553_v39, %v1565_v40 }
 0x1dd   : > { %6284 = vmatpush2.bf16.msra.mxu1 %v8117_v57  ;;  %v1817_v57 = vld [vmem:[#allocation11 + $0xa88] sm:$0xff] }
 0x1de   : > { %6285 = vmatprep.subr.bf16.mxu1 %v8094_v60  ;;  %v7856_v60 = vcombine.high %v1817_v57, %v1829_v58 }
 0x1df   : > { %6245 = vmatpush2.bf16.msra.mxu0 %v7709_v46  ;;  %v1517_v46 = vld [vmem:[#allocation11 + $0x128] sm:$0xff] }
 0x1e0   : > { %6296 = vmatprep.subr.bf16.mxu0 %v7688_v49  ;;  %v7544_v48 = vcombine.high %v1505_v45, %v1517_v46  ;;  %v1481_v49 = vld [vmem:[#allocation11 + $0x8] sm:$0xff]  ;;  %v7543_v51 = vcombine.low %v1505_v45, %v1517_v46 }
 0x1e1   : > { %6286 = vmatpush2.bf16.msra.mxu1 %v8093_v61  ;;  %v7520_v52 = vcombine.high %v1481_v49, %v1493_v50  ;;  %v7519_v55 = vcombine.low %v1481_v49, %v1493_v50  ;;  %v1793_v61 = vld [vmem:[#allocation11 + $0x9c8] sm:$0xff] }
 0x1e2   : > { %6337 = vmatprep.subr.bf16.mxu1 %v8072_v0  ;;  %v1805_v0 = vld [vmem:[#allocation11 + $0xa28] sm:$0xff] }
 0x222   : > { %v1342_v5 = vpop.f32.mrf.mxu0  ;;  %v1383_v7 = vpop.f32.mrf.mxu1 }
 0x223   : > { %v1343_v8 = vadd.f32 %v1342_v5, %v651_v3  ;;  %v7855_v3 = vcombine.low %v1817_v57, %v1829_v58  ;;  %v1769_v5 = vld [vmem:[#allocation11 + $0x908] sm:$0xff] }
 0x224   : > { %v1344_v9 = vpop.f32.mrf.mxu0  ;;  %v1385_v13 = vpop.f32.mrf.mxu1 }
 0x225   : > { %v1384_v16 = vadd.f32 %v1383_v7, %v1343_v8  ;;  %v1345_v17 = vadd.f32 %v1344_v9, %v655_v4  ;;  %v7832_v4 = vcombine.high %v1793_v61, %v1805_v0  ;;  %v1781_v7 = vld [vmem:[#allocation11 + $0x968] sm:$0xff]  ;;  %v7831_v8 = vcombine.low %v1793_v61, %v1805_v0  ;;  %v1602_v0 = vld [vmem:[#allocation11 + $0x3d0] sm:$0xff] }
 0x226   : > { %v1346_v18 = vpop.f32.mrf.mxu0  ;;  %v1387_v19 = vpop.f32.mrf.mxu1  ;;  %v7808_v9 = vcombine.high %v1769_v5, %v1781_v7  ;;  %v1997_v61 = vld [vmem:[#allocation11 + $0x1028] sm:$0xff] }
 0x227   : > { %v1386_v20 = vadd.f32 %v1385_v13, %v1345_v17  ;;  %v1472_v21 = vmax.f32 %v1384_v16, 0.0  ;;  %v1745_v13 = vld [vmem:[#allocation11 + $0x848] sm:$0xff]  ;;  %v7807_v17 = vcombine.low %v1769_v5, %v1781_v7  ;;  %v7665_v5 = vcombine.low %v1626_v53, %v1638_v54 }
 0x228   : > { %v1347_v22 = vpop.f32.mrf.mxu0  ;;  %v1388_v23 = vpop.f32.mrf.mxu1  ;;  %v1757_v16 = vld [vmem:[#allocation11 + $0x8a8] sm:$0xff] }
 0x229   : > { %v1473_v24 = vmax.f32 %v1386_v20, 0.0  ;;  %v9153_v28 = vpack.c.bf16 %v1472_v21, %v1472_v21  ;;  %v7784_v18 = vcombine.high %v1745_v13, %v1757_v16  ;;  %v1721_v19 = vld [vmem:[#allocation11 + $0x788] sm:$0xff]  ;;  %v7783_v21 = vcombine.low %v1745_v13, %v1757_v16  ;;  %v1578_v16 = vld [vmem:[#allocation11 + $0x310] sm:$0xff] }
 0x22a   : > { %v1733_v20 = vld [vmem:[#allocation11 + $0x7e8] sm:$0xff] }
 0x22b   : > { %v9151_v27 = vpack.c.bf16 %v1473_v24, %v1473_v24  ;;  %v7760_v22 = vcombine.high %v1721_v19, %v1733_v20  ;;  %v1697_v23 = vld [vmem:[#allocation11 + $0x6c8] sm:$0xff]  ;;  %v7759_v26 = vcombine.low %v1721_v19, %v1733_v20 }
 0x22c   : > { %v1709_v24 = vld [vmem:[#allocation11 + $0x728] sm:$0xff] }
 0x22d   : > { %6246 = vmatprep.mubr.bf16.mxu0 %v9151_v27  ;;  %v1973_v13 = vld [vmem:[#allocation11 + $0xf68] sm:$0xff] }
 0x22e   : > { %6247 = vmatmul.mubr.bf16.vlgmr.msra.gmra.mxu0 %v9153_v28  ;;  %v1937_v19 = vld [vmem:[#allocation11 + $0xe48] sm:$0xff] }
 0x22f   : > { %6297 = vmatpush1.bf16.msra.mxu0 %v7687_v6  ;;  %6328 = vmatprep.mubr.bf16.mxu0 %v9151_v27  ;;  %v7568_v6 = vcombine.high %v1529_v44, %v1541_v2  ;;  %v1650_v44 = vld [vmem:[#allocation11 + $0x550] sm:$0xff]  ;;  %v1949_v20 = vld [vmem:[#allocation11 + $0xea8] sm:$0xff] }
 0x230   : > { %6298 = vmatprep.subr.bf16.mxu0 %v7664_v29  ;;  %v7736_v29 = vcombine.high %v1697_v23, %v1709_v24  ;;  %v1662_v2 = vld [vmem:[#allocation11 + $0x5b0] sm:$0xff] }
 0x231   : > { %v7690_v49 = vcombine.high %v1650_v44, %v1662_v2  ;;  %v7689_v57 = vcombine.low %v1650_v44, %v1662_v2 }
 0x233   : > { %6299 = vmatpush1.bf16.msra.mxu0 %v7663_v32  ;;  %v1685_v32 = vld [vmem:[#allocation11 + $0x668] sm:$0xff] }
 0x234   : > { %6300 = vmatprep.subr.bf16.mxu0 %v7640_v33  ;;  %v7712_v40 = vcombine.high %v1673_v31, %v1685_v32  ;;  %v7711_v41 = vcombine.low %v1673_v31, %v1685_v32  ;;  %v1530_v31 = vld [vmem:[#allocation11 + $0x190] sm:$0xff] }
 0x235   : > { %v1542_v32 = vld [vmem:[#allocation11 + $0x1f0] sm:$0xff] }
 0x236   : > { %v7569_v44 = vcombine.low %v1530_v31, %v1542_v32 }
 0x237   : > { %6301 = vmatpush1.bf16.msra.mxu0 %v7639_v37  ;;  %v7735_v37 = vcombine.low %v1697_v23, %v1709_v24 }
 0x238   : > { %6302 = vmatprep.subr.bf16.mxu0 %v7616_v38 }
 0x23b   : > { %6303 = vmatpush1.bf16.msra.mxu0 %v7615_v42 }
 0x23c   : > { %6304 = vmatprep.subr.bf16.mxu0 %v7592_v43 }
 0x23f   : > { %6305 = vmatpush1.bf16.msra.mxu0 %v7591_v34 }
 0x240   : > { %6306 = vmatprep.subr.bf16.mxu0 %v7568_v6 }
 0x243   : > { %6307 = vmatpush1.bf16.msra.mxu0 %v7567_v47 }
 0x244   : > { %6308 = vmatprep.subr.bf16.mxu0 %v7544_v48 }
 0x247   : > { %6309 = vmatpush1.bf16.msra.mxu0 %v7543_v51  ;;  %v2009_v51 = vld [vmem:[#allocation11 + $0x1088] sm:$0xff] }
 0x248   : > { %6310 = vmatprep.subr.bf16.mxu0 %v7520_v52  ;;  %v2021_v52 = vld [vmem:[#allocation11 + $0x10e8] sm:$0xff] }
 0x249   : > { %v8048_v58 = vcombine.high %v2009_v51, %v2021_v52 }
 0x24b   : > { %6311 = vmatpush1.bf16.msra.mxu0 %v7519_v55 }
 0x24c   : > { %6312 = vmatprep.subr.bf16.mxu0 %v7880_v56 }
 0x24f   : > { %6313 = vmatpush2.bf16.msra.mxu0 %v7879_v59  ;;  %v7666_v59 = vcombine.high %v1626_v53, %v1638_v54  ;;  %v1842_v53 = vld [vmem:[#allocation11 + $0xb50] sm:$0xff] }
 0x250   : > { %6314 = vmatprep.subr.bf16.mxu0 %v7856_v60  ;;  %v1985_v60 = vld [vmem:[#allocation11 + $0xfc8] sm:$0xff]  ;;  %v1854_v54 = vld [vmem:[#allocation11 + $0xbb0] sm:$0xff] }
 0x251   : > { %v8024_v7 = vcombine.high %v1985_v60, %v1997_v61 }
 0x253   : > { %6315 = vmatpush2.bf16.msra.mxu0 %v7855_v3  ;;  %v1614_v3 = vld [vmem:[#allocation11 + $0x430] sm:$0xff] }
 0x254   : > { %6316 = vmatprep.subr.bf16.mxu0 %v7832_v4  ;;  %v8047_v4 = vcombine.low %v2009_v51, %v2021_v52  ;;  %v7641_v62 = vcombine.low %v1602_v0, %v1614_v3  ;;  %v2225_v51 = vld [vmem:[#allocation11 + $0x1748] sm:$0xff] }
 0x255   : > { %v2237_v52 = vld [vmem:[#allocation11 + $0x17a8] sm:$0xff] }
 0x257   : > { %6317 = vmatpush2.bf16.msra.mxu0 %v7831_v8  ;;  %v7642_v8 = vcombine.high %v1602_v0, %v1614_v3  ;;  %v2213_v0 = vld [vmem:[#allocation11 + $0x16e8] sm:$0xff]  ;;  %v1818_v3 = vld [vmem:[#allocation11 + $0xa90] sm:$0xff] }
 0x258   : > { %6318 = vmatprep.subr.bf16.mxu0 %v7808_v9  ;;  %v1961_v9 = vld [vmem:[#allocation11 + $0xf08] sm:$0xff] }
 0x259   : > { %v8000_v63 = vcombine.high %v1961_v9, %v1973_v13  ;;  %v7999_v23 = vcombine.low %v1961_v9, %v1973_v13  ;;  %v2177_v13 = vld [vmem:[#allocation11 + $0x15c8] sm:$0xff] }
 0x25b   : > { %6319 = vmatpush2.bf16.msra.mxu0 %v7807_v17  ;;  %v1590_v17 = vld [vmem:[#allocation11 + $0x370] sm:$0xff] }
 0x25c   : > { %6320 = vmatprep.subr.bf16.mxu0 %v7784_v18  ;;  %v8023_v18 = vcombine.low %v1985_v60, %v1997_v61  ;;  %v7617_v24 = vcombine.low %v1578_v16, %v1590_v17  ;;  %v7882_v60 = vcombine.high %v1842_v53, %v1854_v54  ;;  %v2201_v61 = vld [vmem:[#allocation11 + $0x1688] sm:$0xff] }
 0x25f   : > { %6321 = vmatpush2.bf16.msra.mxu0 %v7783_v21  ;;  %v1554_v21 = vld [vmem:[#allocation11 + $0x250] sm:$0xff] }
 0x260   : > { %6322 = vmatprep.subr.bf16.mxu0 %v7760_v22  ;;  %v1566_v22 = vld [vmem:[#allocation11 + $0x2b0] sm:$0xff] }
 0x262   : > { %v1424_v33 = vpop.f32.mrf.mxu0  ;;  %v1465_v35 = vpop.f32.mrf.mxu1 }
 0x263   : > { %v1425_v36 = vadd.f32 %v1424_v33, %v659_v25  ;;  %6323 = vmatpush2.bf16.msra.mxu0 %v7759_v26  ;;  %v7976_v25 = vcombine.high %v1937_v19, %v1949_v20  ;;  %v7594_v26 = vcombine.high %v1554_v21, %v1566_v22  ;;  %v7975_v33 = vcombine.low %v1937_v19, %v1949_v20  ;;  %v2153_v20 = vld [vmem:[#allocation11 + $0x1508] sm:$0xff] }
 0x264   : > { %v1426_v38 = vpop.f32.mrf.mxu0  ;;  %v1467_v39 = vpop.f32.mrf.mxu1  ;;  %6324 = vmatprep.subr.bf16.mxu0 %v7736_v29  ;;  %v1913_v29 = vld [vmem:[#allocation11 + $0xd88] sm:$0xff] }
 0x265   : > { %v1466_v42 = vadd.f32 %v1465_v35, %v1425_v36  ;;  %v1427_v43 = vadd.f32 %v1426_v38, %v663_v30  ;;  %v1925_v30 = vld [vmem:[#allocation11 + $0xde8] sm:$0xff]  ;;  %v7593_v35 = vcombine.low %v1554_v21, %v1566_v22  ;;  %v1770_v22 = vld [vmem:[#allocation11 + $0x910] sm:$0xff] }
 0x266   : > { %v1428_v34 = vpop.f32.mrf.mxu0  ;;  %v1469_v6 = vpop.f32.mrf.mxu1  ;;  %v7952_v36 = vcombine.high %v1913_v29, %v1925_v30  ;;  %v1889_v38 = vld [vmem:[#allocation11 + $0xcc8] sm:$0xff] }
 0x267   : > { %v1468_v45 = vadd.f32 %v1467_v39, %v1427_v43  ;;  %6325 = vmatpush2.bf16.msra.mxu0 %v7735_v37  ;;  %v1474_v46 = vmax.f32 %v1466_v42, 0.0  ;;  %v7570_v37 = vcombine.high %v1530_v31, %v1542_v32  ;;  %v1901_v39 = vld [vmem:[#allocation11 + $0xd28] sm:$0xff]  ;;  %v1518_v42 = vld [vmem:[#allocation11 + $0x130] sm:$0xff]  ;;  %v7951_v43 = vcombine.low %v1913_v29, %v1925_v30 }
 0x268   : > { %v1429_v47 = vpop.f32.mrf.mxu0  ;;  %v1470_v48 = vpop.f32.mrf.mxu1  ;;  %6326 = vmatprep.subr.bf16.mxu0 %v7712_v40  ;;  %v1506_v40 = vld [vmem:[#allocation11 + $0xd0] sm:$0xff]  ;;  %v7928_v2 = vcombine.high %v1889_v38, %v1901_v39  ;;  %v1865_v6 = vld [vmem:[#allocation11 + $0xc08] sm:$0xff] }
 0x269   : > { %v1475_v50 = vmax.f32 %v1468_v45, 0.0  ;;  %v9167_v56 = vpack.c.bf16 %v1474_v46, %v1474_v46  ;;  %v7546_v34 = vcombine.high %v1506_v40, %v1518_v42  ;;  %v1877_v45 = vld [vmem:[#allocation11 + $0xc68] sm:$0xff]  ;;  %v1494_v46 = vld [vmem:[#allocation11 + $0x70] sm:$0xff]  ;;  %v7927_v47 = vcombine.low %v1889_v38, %v1901_v39 }
 0x26a   : > { %v7545_v48 = vcombine.low %v1506_v40, %v1518_v42  ;;  %v2165_v21 = vld [vmem:[#allocation11 + $0x1568] sm:$0xff]  ;;  %v1746_v32 = vld [vmem:[#allocation11 + $0x850] sm:$0xff] }
 0x26b   : > { %v9165_v55 = vpack.c.bf16 %v1475_v50, %v1475_v50  ;;  %6327 = vmatpush2.bf16.msra.mxu0 %v7711_v41  ;;  %v1482_v41 = vld [vmem:[#allocation11 + $0x10] sm:$0xff]  ;;  %v2129_v30 = vld [vmem:[#allocation11 + $0x1448] sm:$0xff] }
 0x26c   : > { %6378 = vmatprep.subr.bf16.mxu0 %v7690_v49  ;;  %v7904_v49 = vcombine.high %v1865_v6, %v1877_v45  ;;  %v7522_v50 = vcombine.high %v1482_v41, %v1494_v46  ;;  %v2141_v31 = vld [vmem:[#allocation11 + $0x14a8] sm:$0xff]  ;;  %v1722_v42 = vld [vmem:[#allocation11 + $0x790] sm:$0xff] }
 0x26d   : > { %6287 = vmatprep.mubr.bf16.mxu1 %v9165_v55  ;;  %v2105_v39 = vld [vmem:[#allocation11 + $0x1388] sm:$0xff] }
 0x26e   : > { %6288 = vmatmul.mubr.bf16.vlgmr.msra.gmra.mxu1 %v9167_v56  ;;  %6329 = vmatmul.mubr.bf16.vlgmr.msra.gmra.mxu0 %v9153_v28  ;;  %v2117_v40 = vld [vmem:[#allocation11 + $0x13e8] sm:$0xff] }
 0x26f   : > { %6338 = vmatpush1.bf16.msra.mxu1 %v8071_v1  ;;  %6369 = vmatprep.mubr.bf16.mxu1 %v9165_v55  ;;  %v7618_v1 = vcombine.high %v1578_v16, %v1590_v17  ;;  %v2189_v16 = vld [vmem:[#allocation11 + $0x1628] sm:$0xff]  ;;  %v1794_v17 = vld [vmem:[#allocation11 + $0x9d0] sm:$0xff] }
 0x270   : > { %6379 = vmatpush1.bf16.msra.mxu0 %v7689_v57  ;;  %6410 = vmatprep.mubr.bf16.mxu0 %v9151_v27  ;;  %v7903_v57 = vcombine.low %v1865_v6, %v1877_v45  ;;  %v2081_v45 = vld [vmem:[#allocation11 + $0x12c8] sm:$0xff] }
 0x271   : > { %6339 = vmatprep.subr.bf16.mxu1 %v8048_v58  ;;  %6380 = vmatprep.subr.bf16.mxu0 %v7666_v59  ;;  %v7521_v58 = vcombine.low %v1482_v41, %v1494_v46  ;;  %v8264_v59 = vcombine.high %v2225_v51, %v2237_v52  ;;  %v2093_v41 = vld [vmem:[#allocation11 + $0x1328] sm:$0xff]  ;;  %v1698_v46 = vld [vmem:[#allocation11 + $0x6d0] sm:$0xff] }
 0x273   : > { %6340 = vmatpush1.bf16.msra.mxu1 %v8047_v4  ;;  %v1830_v4 = vld [vmem:[#allocation11 + $0xaf0] sm:$0xff] }
 0x274   : > { %6381 = vmatpush1.bf16.msra.mxu0 %v7665_v5  ;;  %6341 = vmatprep.subr.bf16.mxu1 %v8024_v7  ;;  %v8263_v5 = vcombine.low %v2225_v51, %v2237_v52  ;;  %v7881_v7 = vcombine.low %v1842_v53, %v1854_v54  ;;  %v7858_v9 = vcombine.high %v1818_v3, %v1830_v4  ;;  %v2057_v52 = vld [vmem:[#allocation11 + $0x1208] sm:$0xff]  ;;  %v1674_v54 = vld [vmem:[#allocation11 + $0x610] sm:$0xff] }
 0x275   : > { %6382 = vmatprep.subr.bf16.mxu0 %v7642_v8  ;;  %v8240_v8 = vcombine.high %v2201_v61, %v2213_v0  ;;  %v2069_v53 = vld [vmem:[#allocation11 + $0x1268] sm:$0xff] }
 0x277   : > { %6342 = vmatpush1.bf16.msra.mxu1 %v8023_v18  ;;  %v1806_v18 = vld [vmem:[#allocation11 + $0xa30] sm:$0xff] }
 0x278   : > { %6383 = vmatpush1.bf16.msra.mxu0 %v7641_v62  ;;  %6343 = vmatprep.subr.bf16.mxu1 %v8000_v63  ;;  %v8239_v62 = vcombine.low %v2201_v61, %v2213_v0  ;;  %v7857_v63 = vcombine.low %v1818_v3, %v1830_v4  ;;  %v7834_v19 = vcombine.high %v1794_v17, %v1806_v18  ;;  %v2034_v0 = vld [vmem:[#allocation11 + $0x1150] sm:$0xff]  ;;  %v1651_v4 = vld [vmem:[#allocation11 + $0x558] sm:$0xff] }
 0x279   : > { %6384 = vmatprep.subr.bf16.mxu0 %v7618_v1  ;;  %v8216_v1 = vcombine.high %v2177_v13, %v2189_v16  ;;  %v2046_v3 = vld [vmem:[#allocation11 + $0x11b0] sm:$0xff] }
 0x27b   : > { %6344 = vmatpush1.bf16.msra.mxu1 %v7999_v23  ;;  %v1782_v23 = vld [vmem:[#allocation11 + $0x970] sm:$0xff] }
 0x27c   : > { %6385 = vmatpush1.bf16.msra.mxu0 %v7617_v24  ;;  %6345 = vmatprep.subr.bf16.mxu1 %v7976_v25  ;;  %v8215_v24 = vcombine.low %v2177_v13, %v2189_v16  ;;  %v7833_v25 = vcombine.low %v1794_v17, %v1806_v18  ;;  %v7810_v29 = vcombine.high %v1770_v22, %v1782_v23  ;;  %v2010_v16 = vld [vmem:[#allocation11 + $0x1090] sm:$0xff] }
 0x27d   : > { %6386 = vmatprep.subr.bf16.mxu0 %v7594_v26  ;;  %v8192_v26 = vcombine.high %v2153_v20, %v2165_v21  ;;  %v2022_v17 = vld [vmem:[#allocation11 + $0x10f0] sm:$0xff]  ;;  %v8073_v18 = vcombine.low %v2034_v0, %v2046_v3 }
 0x27f   : > { %6346 = vmatpush1.bf16.msra.mxu1 %v7975_v33  ;;  %v1758_v33 = vld [vmem:[#allocation11 + $0x8b0] sm:$0xff] }
 0x280   : > { %6387 = vmatpush1.bf16.msra.mxu0 %v7593_v35  ;;  %6347 = vmatprep.subr.bf16.mxu1 %v7952_v36  ;;  %v8191_v35 = vcombine.low %v2153_v20, %v2165_v21  ;;  %v7809_v36 = vcombine.low %v1770_v22, %v1782_v23  ;;  %v7786_v38 = vcombine.high %v1746_v32, %v1758_v33  ;;  %v1986_v20 = vld [vmem:[#allocation11 + $0xfd0] sm:$0xff]  ;;  %v1603_v23 = vld [vmem:[#allocation11 + $0x3d8] sm:$0xff] }
 0x281   : > { %6388 = vmatprep.subr.bf16.mxu0 %v7570_v37  ;;  %v8168_v37 = vcombine.high %v2129_v30, %v2141_v31  ;;  %v1998_v21 = vld [vmem:[#allocation11 + $0x1030] sm:$0xff] }
 0x283   : > { %6348 = vmatpush1.bf16.msra.mxu1 %v7951_v43  ;;  %v1734_v43 = vld [vmem:[#allocation11 + $0x7f0] sm:$0xff] }
 0x284   : > { %6389 = vmatpush1.bf16.msra.mxu0 %v7569_v44  ;;  %6349 = vmatprep.subr.bf16.mxu1 %v7928_v2  ;;  %v8167_v44 = vcombine.low %v2129_v30, %v2141_v31  ;;  %v7785_v2 = vcombine.low %v1746_v32, %v1758_v33  ;;  %v7762_v6 = vcombine.high %v1722_v42, %v1734_v43  ;;  %v1962_v31 = vld [vmem:[#allocation11 + $0xf10] sm:$0xff]  ;;  %v1579_v33 = vld [vmem:[#allocation11 + $0x318] sm:$0xff] }
 0x285   : > { %6390 = vmatprep.subr.bf16.mxu0 %v7546_v34  ;;  %v8144_v34 = vcombine.high %v2105_v39, %v2117_v40  ;;  %v1974_v32 = vld [vmem:[#allocation11 + $0xf70] sm:$0xff] }
 0x287   : > { %6350 = vmatpush1.bf16.msra.mxu1 %v7927_v47  ;;  %v1710_v47 = vld [vmem:[#allocation11 + $0x730] sm:$0xff] }
 0x288   : > { %6391 = vmatpush1.bf16.msra.mxu0 %v7545_v48  ;;  %6351 = vmatprep.subr.bf16.mxu1 %v7904_v49  ;;  %v8143_v48 = vcombine.low %v2105_v39, %v2117_v40  ;;  %v7761_v49 = vcombine.low %v1722_v42, %v1734_v43  ;;  %v7738_v51 = vcombine.high %v1698_v46, %v1710_v47  ;;  %v1938_v40 = vld [vmem:[#allocation11 + $0xe50] sm:$0xff]  ;;  %v1555_v43 = vld [vmem:[#allocation11 + $0x258] sm:$0xff] }
 0x289   : > { %6392 = vmatprep.subr.bf16.mxu0 %v7522_v50  ;;  %v8120_v50 = vcombine.high %v2081_v45, %v2093_v41  ;;  %v1950_v42 = vld [vmem:[#allocation11 + $0xeb0] sm:$0xff] }
 0x28b   : > { %6352 = vmatpush1.bf16.msra.mxu1 %v7903_v57  ;;  %v1686_v57 = vld [vmem:[#allocation11 + $0x670] sm:$0xff] }
 0x28c   : > { %6393 = vmatpush1.bf16.msra.mxu0 %v7521_v58  ;;  %6353 = vmatprep.subr.bf16.mxu1 %v8264_v59  ;;  %v8119_v58 = vcombine.low %v2081_v45, %v2093_v41  ;;  %v7737_v59 = vcombine.low %v1698_v46, %v1710_v47  ;;  %v7714_v61 = vcombine.high %v1674_v54, %v1686_v57  ;;  %v1914_v41 = vld [vmem:[#allocation11 + $0xd90] sm:$0xff]  ;;  %v1531_v47 = vld [vmem:[#allocation11 + $0x198] sm:$0xff] }
 0x28d   : > { %6394 = vmatprep.subr.bf16.mxu0 %v7882_v60  ;;  %v8096_v60 = vcombine.high %v2057_v52, %v2069_v53  ;;  %v1926_v46 = vld [vmem:[#allocation11 + $0xdf0] sm:$0xff] }
 0x28f   : > { %6354 = vmatpush2.bf16.msra.mxu1 %v8263_v5  ;;  %v1663_v5 = vld [vmem:[#allocation11 + $0x5b8] sm:$0xff] }
 0x290   : > { %6395 = vmatpush2.bf16.msra.mxu0 %v7881_v7  ;;  %6355 = vmatprep.subr.bf16.mxu1 %v8240_v8  ;;  %v8095_v7 = vcombine.low %v2057_v52, %v2069_v53  ;;  %v7713_v8 = vcombine.low %v1674_v54, %v1686_v57  ;;  %v7692_v13 = vcombine.high %v1651_v4, %v1663_v5  ;;  %v1890_v53 = vld [vmem:[#allocation11 + $0xcd0] sm:$0xff]  ;;  %v1507_v57 = vld [vmem:[#allocation11 + $0xd8] sm:$0xff] }
 0x291   : > { %6396 = vmatprep.subr.bf16.mxu0 %v7858_v9  ;;  %v8074_v9 = vcombine.high %v2034_v0, %v2046_v3  ;;  %v1902_v54 = vld [vmem:[#allocation11 + $0xd30] sm:$0xff] }
 0x292   : > { %v1866_v3 = vld [vmem:[#allocation11 + $0xc10] sm:$0xff] }
 0x293   : > { %6356 = vmatpush2.bf16.msra.mxu1 %v8239_v62  ;;  %v1627_v62 = vld [vmem:[#allocation11 + $0x498] sm:$0xff] }
 0x294   : > { %6397 = vmatpush2.bf16.msra.mxu0 %v7857_v63  ;;  %6357 = vmatprep.subr.bf16.mxu1 %v8216_v1  ;;  %v1639_v63 = vld [vmem:[#allocation11 + $0x4f8] sm:$0xff]  ;;  %v7691_v1 = vcombine.low %v1651_v4, %v1663_v5  ;;  %v1878_v4 = vld [vmem:[#allocation11 + $0xc70] sm:$0xff] }
 0x295   : > { %6398 = vmatprep.subr.bf16.mxu0 %v7834_v19  ;;  %v8050_v19 = vcombine.high %v2010_v16, %v2022_v17  ;;  %v7668_v22 = vcombine.high %v1627_v62, %v1639_v63  ;;  %v1483_v5 = vld [vmem:[#allocation11 + $0x18] sm:$0xff] }
 0x297   : > { %6358 = vmatpush2.bf16.msra.mxu1 %v8215_v24  ;;  %v1615_v24 = vld [vmem:[#allocation11 + $0x438] sm:$0xff] }
 0x298   : > { %6399 = vmatpush2.bf16.msra.mxu0 %v7833_v25  ;;  %6359 = vmatprep.subr.bf16.mxu1 %v8192_v26  ;;  %v8049_v25 = vcombine.low %v2010_v16, %v2022_v17  ;;  %v7667_v26 = vcombine.low %v1627_v62, %v1639_v63  ;;  %v7644_v30 = vcombine.high %v1603_v23, %v1615_v24  ;;  %v2226_v17 = vld [vmem:[#allocation11 + $0x1750] sm:$0xff]  ;;  %v1843_v62 = vld [vmem:[#allocation11 + $0xb58] sm:$0xff] }
 0x299   : > { %6400 = vmatprep.subr.bf16.mxu0 %v7810_v29  ;;  %v8026_v29 = vcombine.high %v1986_v20, %v1998_v21  ;;  %v1855_v63 = vld [vmem:[#allocation11 + $0xbb8] sm:$0xff] }
 0x29b   : > { %6360 = vmatpush2.bf16.msra.mxu1 %v8191_v35  ;;  %v1591_v35 = vld [vmem:[#allocation11 + $0x378] sm:$0xff] }
 0x29c   : > { %6401 = vmatpush2.bf16.msra.mxu0 %v7809_v36  ;;  %6361 = vmatprep.subr.bf16.mxu1 %v8168_v37  ;;  %v8025_v36 = vcombine.low %v1986_v20, %v1998_v21  ;;  %v7643_v37 = vcombine.low %v1603_v23, %v1615_v24  ;;  %v7620_v39 = vcombine.high %v1579_v33, %v1591_v35  ;;  %v2214_v23 = vld [vmem:[#allocation11 + $0x16f0] sm:$0xff]  ;;  %v1819_v24 = vld [vmem:[#allocation11 + $0xa98] sm:$0xff] }
 0x29d   : > { %6402 = vmatprep.subr.bf16.mxu0 %v7786_v38  ;;  %v8002_v38 = vcombine.high %v1962_v31, %v1974_v32  ;;  %v7884_v21 = vcombine.high %v1843_v62, %v1855_v63 }
 0x29f   : > { %6362 = vmatpush2.bf16.msra.mxu1 %v8167_v44  ;;  %v1567_v44 = vld [vmem:[#allocation11 + $0x2b8] sm:$0xff] }
 0x2a0   : > { %6403 = vmatpush2.bf16.msra.mxu0 %v7785_v2  ;;  %6363 = vmatprep.subr.bf16.mxu1 %v8144_v34  ;;  %v8001_v2 = vcombine.low %v1962_v31, %v1974_v32  ;;  %v7619_v34 = vcombine.low %v1579_v33, %v1591_v35  ;;  %v7596_v45 = vcombine.high %v1555_v43, %v1567_v44  ;;  %v2178_v32 = vld [vmem:[#allocation11 + $0x15d0] sm:$0xff]  ;;  %v1795_v35 = vld [vmem:[#allocation11 + $0x9d8] sm:$0xff] }
 0x2a1   : > { %6404 = vmatprep.subr.bf16.mxu0 %v7762_v6  ;;  %v7978_v6 = vcombine.high %v1938_v40, %v1950_v42  ;;  %v2190_v33 = vld [vmem:[#allocation11 + $0x1630] sm:$0xff] }
 0x2a3   : > { %6364 = vmatpush2.bf16.msra.mxu1 %v8143_v48  ;;  %v1543_v48 = vld [vmem:[#allocation11 + $0x1f8] sm:$0xff] }
 0x2a4   : > { %6405 = vmatpush2.bf16.msra.mxu0 %v7761_v49  ;;  %6365 = vmatprep.subr.bf16.mxu1 %v8120_v50  ;;  %v7977_v49 = vcombine.low %v1938_v40, %v1950_v42  ;;  %v7595_v50 = vcombine.low %v1555_v43, %v1567_v44  ;;  %v7572_v52 = vcombine.high %v1531_v47, %v1543_v48  ;;  %v2154_v42 = vld [vmem:[#allocation11 + $0x1510] sm:$0xff]  ;;  %v1771_v44 = vld [vmem:[#allocation11 + $0x918] sm:$0xff] }
 0x2a5   : > { %6406 = vmatprep.subr.bf16.mxu0 %v7738_v51  ;;  %v7954_v51 = vcombine.high %v1914_v41, %v1926_v46  ;;  %v2166_v43 = vld [vmem:[#allocation11 + $0x1570] sm:$0xff] }
 0x2a7   : > { %6366 = vmatpush2.bf16.msra.mxu1 %v8119_v58  ;;  %v1519_v58 = vld [vmem:[#allocation11 + $0x138] sm:$0xff] }
 0x2a8   : > { %6407 = vmatpush2.bf16.msra.mxu0 %v7737_v59  ;;  %6367 = vmatprep.subr.bf16.mxu1 %v8096_v60  ;;  %v7953_v59 = vcombine.low %v1914_v41, %v1926_v46  ;;  %v7571_v60 = vcombine.low %v1531_v47, %v1543_v48  ;;  %v7548_v0 = vcombine.high %v1507_v57, %v1519_v58  ;;  %v2130_v46 = vld [vmem:[#allocation11 + $0x1450] sm:$0xff]  ;;  %v1747_v48 = vld [vmem:[#allocation11 + $0x858] sm:$0xff] }
 0x2a9   : > { %6408 = vmatprep.subr.bf16.mxu0 %v7714_v61  ;;  %v7930_v61 = vcombine.high %v1890_v53, %v1902_v54  ;;  %v2142_v47 = vld [vmem:[#allocation11 + $0x14b0] sm:$0xff] }
 0x2ab   : > { %6368 = vmatpush2.bf16.msra.mxu1 %v8095_v7  ;;  %v1495_v7 = vld [vmem:[#allocation11 + $0x78] sm:$0xff] }
 0x2ac   : > { %6409 = vmatpush2.bf16.msra.mxu0 %v7713_v8  ;;  %6419 = vmatprep.subr.bf16.mxu1 %v8074_v9  ;;  %v7929_v8 = vcombine.low %v1890_v53, %v1902_v54  ;;  %v7547_v9 = vcombine.low %v1507_v57, %v1519_v58  ;;  %v7524_v16 = vcombine.high %v1483_v5, %v1495_v7  ;;  %v2106_v54 = vld [vmem:[#allocation11 + $0x1390] sm:$0xff]  ;;  %v1723_v58 = vld [vmem:[#allocation11 + $0x798] sm:$0xff] }
 0x2ad   : > { %6460 = vmatprep.subr.bf16.mxu0 %v7692_v13  ;;  %v7906_v13 = vcombine.high %v1866_v3, %v1878_v4  ;;  %v2118_v57 = vld [vmem:[#allocation11 + $0x13f0] sm:$0xff] }
 0x2ae   : > { %6370 = vmatmul.mubr.bf16.vlgmr.msra.gmra.mxu1 %v9167_v56 }
 0x2af   : > { %6411 = vmatmul.mubr.bf16.vlgmr.msra.gmra.mxu0 %v9153_v28  ;;  %6420 = vmatpush1.bf16.msra.mxu1 %v8073_v18  ;;  %v2238_v18 = vld [vmem:[#allocation11 + $0x17b0] sm:$0xff] }
 0x2b0   : > { %6451 = vmatprep.mubr.bf16.mxu1 %v9165_v55  ;;  %6461 = vmatpush1.bf16.msra.mxu0 %v7691_v1  ;;  %v7905_v1 = vcombine.low %v1866_v3, %v1878_v4  ;;  %v8266_v20 = vcombine.high %v2226_v17, %v2238_v18  ;;  %v2082_v4 = vld [vmem:[#allocation11 + $0x12d0] sm:$0xff] }
 0x2b1   : > { %6492 = vmatprep.mubr.bf16.mxu0 %v9151_v27  ;;  %6421 = vmatprep.subr.bf16.mxu1 %v8050_v19  ;;  %v7523_v19 = vcombine.low %v1483_v5, %v1495_v7  ;;  %v2094_v5 = vld [vmem:[#allocation11 + $0x1330] sm:$0xff]  ;;  %v1699_v7 = vld [vmem:[#allocation11 + $0x6d8] sm:$0xff] }
 0x2b2   : > { %6462 = vmatprep.subr.bf16.mxu0 %v7668_v22  ;;  %v2202_v22 = vld [vmem:[#allocation11 + $0x1690] sm:$0xff] }
 0x2b3   : > { %6422 = vmatpush1.bf16.msra.mxu1 %v8049_v25  ;;  %v1831_v25 = vld [vmem:[#allocation11 + $0xaf8] sm:$0xff] }
 0x2b4   : > { %6463 = vmatpush1.bf16.msra.mxu0 %v7667_v26  ;;  %6423 = vmatprep.subr.bf16.mxu1 %v8026_v29  ;;  %v8265_v26 = vcombine.low %v2226_v17, %v2238_v18  ;;  %v7883_v29 = vcombine.low %v1843_v62, %v1855_v63  ;;  %v7860_v31 = vcombine.high %v1819_v24, %v1831_v25  ;;  %v2058_v18 = vld [vmem:[#allocation11 + $0x1210] sm:$0xff]  ;;  %v1675_v63 = vld [vmem:[#allocation11 + $0x618] sm:$0xff] }
 0x2b5   : > { %6464 = vmatprep.subr.bf16.mxu0 %v7644_v30  ;;  %v8242_v30 = vcombine.high %v2202_v22, %v2214_v23  ;;  %v2070_v62 = vld [vmem:[#allocation11 + $0x1270] sm:$0xff] }
 0x2b7   : > { %6424 = vmatpush1.bf16.msra.mxu1 %v8025_v36  ;;  %v1807_v36 = vld [vmem:[#allocation11 + $0xa38] sm:$0xff] }
 0x2b8   : > { %6465 = vmatpush1.bf16.msra.mxu0 %v7643_v37  ;;  %6425 = vmatprep.subr.bf16.mxu1 %v8002_v38  ;;  %v8241_v37 = vcombine.low %v2202_v22, %v2214_v23  ;;  %v7859_v38 = vcombine.low %v1819_v24, %v1831_v25  ;;  %v7836_v40 = vcombine.high %v1795_v35, %v1807_v36  ;;  %v2035_v23 = vld [vmem:[#allocation11 + $0x1158] sm:$0xff]  ;;  %v1652_v25 = vld [vmem:[#allocation11 + $0x560] sm:$0xff] }
 0x2b9   : > { %6466 = vmatprep.subr.bf16.mxu0 %v7620_v39  ;;  %v8218_v39 = vcombine.high %v2178_v32, %v2190_v33  ;;  %v2047_v24 = vld [vmem:[#allocation11 + $0x11b8] sm:$0xff] }
 0x2bb   : > { %6426 = vmatpush1.bf16.msra.mxu1 %v8001_v2  ;;  %v1783_v2 = vld [vmem:[#allocation11 + $0x978] sm:$0xff] }
 0x2bc   : > { %6467 = vmatpush1.bf16.msra.mxu0 %v7619_v34  ;;  %6427 = vmatprep.subr.bf16.mxu1 %v7978_v6  ;;  %v8217_v34 = vcombine.low %v2178_v32, %v2190_v33  ;;  %v7835_v6 = vcombine.low %v1795_v35, %v1807_v36  ;;  %v7812_v41 = vcombine.high %v1771_v44, %v1783_v2  ;;  %v2011_v33 = vld [vmem:[#allocation11 + $0x1098] sm:$0xff] }
 0x2bd   : > { %6468 = vmatprep.subr.bf16.mxu0 %v7596_v45  ;;  %v8194_v45 = vcombine.high %v2154_v42, %v2166_v43  ;;  %v2023_v35 = vld [vmem:[#allocation11 + $0x10f8] sm:$0xff]  ;;  %v8075_v36 = vcombine.low %v2035_v23, %v2047_v24 }
 0x2bf   : > { %6428 = vmatpush1.bf16.msra.mxu1 %v7977_v49  ;;  %v1759_v49 = vld [vmem:[#allocation11 + $0x8b8] sm:$0xff] }
 0x2c0   : > { %6469 = vmatpush1.bf16.msra.mxu0 %v7595_v50  ;;  %6429 = vmatprep.subr.bf16.mxu1 %v7954_v51  ;;  %v8193_v50 = vcombine.low %v2154_v42, %v2166_v43  ;;  %v7811_v51 = vcombine.low %v1771_v44, %v1783_v2  ;;  %v7788_v53 = vcombine.high %v1747_v48, %v1759_v49  ;;  %v1987_v42 = vld [vmem:[#allocation11 + $0xfd8] sm:$0xff] }
 0x2c1   : > { %6470 = vmatprep.subr.bf16.mxu0 %v7572_v52  ;;  %v8170_v52 = vcombine.high %v2130_v46, %v2142_v47  ;;  %v1999_v43 = vld [vmem:[#allocation11 + $0x1038] sm:$0xff] }
 0x2c3   : > { %6430 = vmatpush1.bf16.msra.mxu1 %v7953_v59  ;;  %v1735_v59 = vld [vmem:[#allocation11 + $0x7f8] sm:$0xff] }
 0x2c4   : > { %6471 = vmatpush1.bf16.msra.mxu0 %v7571_v60  ;;  %6431 = vmatprep.subr.bf16.mxu1 %v7930_v61  ;;  %v8169_v60 = vcombine.low %v2130_v46, %v2142_v47  ;;  %v7787_v61 = vcombine.low %v1747_v48, %v1759_v49  ;;  %v7764_v3 = vcombine.high %v1723_v58, %v1735_v59  ;;  %v1963_v49 = vld [vmem:[#allocation11 + $0xf18] sm:$0xff] }
 0x2c5   : > { %6472 = vmatprep.subr.bf16.mxu0 %v7548_v0  ;;  %v8146_v0 = vcombine.high %v2106_v54, %v2118_v57  ;;  %v8028_v47 = vcombine.high %v1987_v42, %v1999_v43 }
 0x2c7   : > { %6432 = vmatpush1.bf16.msra.mxu1 %v7929_v8  ;;  %v1711_v8 = vld [vmem:[#allocation11 + $0x738] sm:$0xff] }
 0x2c8   : > { %6473 = vmatpush1.bf16.msra.mxu0 %v7547_v9  ;;  %6433 = vmatprep.subr.bf16.mxu1 %v7906_v13  ;;  %v8145_v9 = vcombine.low %v2106_v54, %v2118_v57  ;;  %v7763_v13 = vcombine.low %v1723_v58, %v1735_v59  ;;  %v7740_v17 = vcombine.high %v1699_v7, %v1711_v8 }
 0x2c9   : > { %6474 = vmatprep.subr.bf16.mxu0 %v7524_v16  ;;  %v8122_v16 = vcombine.high %v2082_v4, %v2094_v5  ;;  %v8027_v54 = vcombine.low %v1987_v42, %v1999_v43  ;;  %v1844_v42 = vld [vmem:[#allocation11 + $0xb60] sm:$0xff] }
 0x2ca   : > { %v1856_v43 = vld [vmem:[#allocation11 + $0xbc0] sm:$0xff] }
 0x2cb   : > { %6434 = vmatpush1.bf16.msra.mxu1 %v7905_v1  ;;  %v1687_v1 = vld [vmem:[#allocation11 + $0x678] sm:$0xff] }
 0x2cc   : > { %6475 = vmatpush1.bf16.msra.mxu0 %v7523_v19  ;;  %6435 = vmatprep.subr.bf16.mxu1 %v8266_v20  ;;  %v8121_v19 = vcombine.low %v2082_v4, %v2094_v5  ;;  %v7739_v20 = vcombine.low %v1699_v7, %v1711_v8  ;;  %v7716_v22 = vcombine.high %v1675_v63, %v1687_v1  ;;  %v1568_v4 = vld [vmem:[#allocation11 + $0x2c0] sm:$0xff] }
 0x2cd   : > { %6476 = vmatprep.subr.bf16.mxu0 %v7884_v21  ;;  %v8098_v21 = vcombine.high %v2058_v18, %v2070_v62 }
 0x2cf   : > { %6436 = vmatpush2.bf16.msra.mxu1 %v8265_v26  ;;  %v1664_v26 = vld [vmem:[#allocation11 + $0x5c0] sm:$0xff] }
 0x2d0   : > { %6477 = vmatpush2.bf16.msra.mxu0 %v7883_v29  ;;  %6437 = vmatprep.subr.bf16.mxu1 %v8242_v30  ;;  %v8097_v29 = vcombine.low %v2058_v18, %v2070_v62  ;;  %v7715_v30 = vcombine.low %v1675_v63, %v1687_v1  ;;  %v7694_v32 = vcombine.high %v1652_v25, %v1664_v26  ;;  %v1544_v18 = vld [vmem:[#allocation11 + $0x200] sm:$0xff] }
 0x2d1   : > { %6478 = vmatprep.subr.bf16.mxu0 %v7860_v31  ;;  %v8076_v31 = vcombine.high %v2035_v23, %v2047_v24  ;;  %v1520_v23 = vld [vmem:[#allocation11 + $0x140] sm:$0xff] }
 0x2d3   : > { %6438 = vmatpush2.bf16.msra.mxu1 %v8241_v37  ;;  %v1628_v37 = vld [vmem:[#allocation11 + $0x4a0] sm:$0xff] }
 0x2d4   : > { %6479 = vmatpush2.bf16.msra.mxu0 %v7859_v38  ;;  %6439 = vmatprep.subr.bf16.mxu1 %v8218_v39  ;;  %v1640_v38 = vld [vmem:[#allocation11 + $0x500] sm:$0xff]  ;;  %v7693_v39 = vcombine.low %v1652_v25, %v1664_v26 }
 0x2d5   : > { %6480 = vmatprep.subr.bf16.mxu0 %v7836_v40  ;;  %v8052_v40 = vcombine.high %v2011_v33, %v2023_v35  ;;  %v7670_v2 = vcombine.high %v1628_v37, %v1640_v38  ;;  %v7669_v46 = vcombine.low %v1628_v37, %v1640_v38 }
 0x2d7   : > { %6440 = vmatpush2.bf16.msra.mxu1 %v8217_v34  ;;  %v1604_v34 = vld [vmem:[#allocation11 + $0x3e0] sm:$0xff] }
 0x2d8   : > { %6481 = vmatpush2.bf16.msra.mxu0 %v7835_v6  ;;  %6441 = vmatprep.subr.bf16.mxu1 %v8194_v45  ;;  %v1616_v6 = vld [vmem:[#allocation11 + $0x440] sm:$0xff]  ;;  %v8051_v45 = vcombine.low %v2011_v33, %v2023_v35 }
 0x2d9   : > { %6482 = vmatprep.subr.bf16.mxu0 %v7812_v41  ;;  %v7646_v48 = vcombine.high %v1604_v34, %v1616_v6  ;;  %v7645_v58 = vcombine.low %v1604_v34, %v1616_v6  ;;  %v1496_v33 = vld [vmem:[#allocation11 + $0x80] sm:$0xff] }
 0x2db   : > { %6442 = vmatpush2.bf16.msra.mxu1 %v8193_v50  ;;  %v1975_v50 = vld [vmem:[#allocation11 + $0xf78] sm:$0xff] }
 0x2dc   : > { %6483 = vmatpush2.bf16.msra.mxu0 %v7811_v51  ;;  %6443 = vmatprep.subr.bf16.mxu1 %v8170_v52  ;;  %v1580_v52 = vld [vmem:[#allocation11 + $0x320] sm:$0xff]  ;;  %v8004_v59 = vcombine.high %v1963_v49, %v1975_v50  ;;  %v8003_v5 = vcombine.low %v1963_v49, %v1975_v50 }
 0x2dd   : > { %6484 = vmatprep.subr.bf16.mxu0 %v7788_v53  ;;  %v1592_v53 = vld [vmem:[#allocation11 + $0x380] sm:$0xff] }
 0x2de   : > { %v7621_v7 = vcombine.low %v1580_v52, %v1592_v53  ;;  %v1832_v49 = vld [vmem:[#allocation11 + $0xb00] sm:$0xff] }
 0x2df   : > { %6444 = vmatpush2.bf16.msra.mxu1 %v8169_v60  ;;  %v7622_v60 = vcombine.high %v1580_v52, %v1592_v53 }
 0x2e0   : > { %6485 = vmatpush2.bf16.msra.mxu0 %v7787_v61  ;;  %6445 = vmatprep.subr.bf16.mxu1 %v8146_v0  ;;  %v1939_v61 = vld [vmem:[#allocation11 + $0xe58] sm:$0xff] }
 0x2e1   : > { %6486 = vmatprep.subr.bf16.mxu0 %v7764_v3  ;;  %v1951_v0 = vld [vmem:[#allocation11 + $0xeb8] sm:$0xff]  ;;  %v1556_v3 = vld [vmem:[#allocation11 + $0x260] sm:$0xff] }
 0x2e2   : > { %v7980_v8 = vcombine.high %v1939_v61, %v1951_v0  ;;  %v7979_v62 = vcombine.low %v1939_v61, %v1951_v0  ;;  %v7597_v63 = vcombine.low %v1556_v3, %v1568_v4 }
 0x2e3   : > { %6446 = vmatpush2.bf16.msra.mxu1 %v8145_v9  ;;  %v7598_v9 = vcombine.high %v1556_v3, %v1568_v4  ;;  %v2155_v4 = vld [vmem:[#allocation11 + $0x1518] sm:$0xff] }
 0x2e4   : > { %6487 = vmatpush2.bf16.msra.mxu0 %v7763_v13  ;;  %6447 = vmatprep.subr.bf16.mxu1 %v8122_v16  ;;  %v1915_v13 = vld [vmem:[#allocation11 + $0xd98] sm:$0xff] }
 0x2e5   : > { %6488 = vmatprep.subr.bf16.mxu0 %v7740_v17  ;;  %v1927_v16 = vld [vmem:[#allocation11 + $0xdf8] sm:$0xff]  ;;  %v1532_v17 = vld [vmem:[#allocation11 + $0x1a0] sm:$0xff] }
 0x2e6   : > { %v7956_v1 = vcombine.high %v1915_v13, %v1927_v16  ;;  %v7955_v24 = vcombine.low %v1915_v13, %v1927_v16  ;;  %v7573_v25 = vcombine.low %v1532_v17, %v1544_v18 }
 0x2e7   : > { %6448 = vmatpush2.bf16.msra.mxu1 %v8121_v19  ;;  %v7574_v19 = vcombine.high %v1532_v17, %v1544_v18  ;;  %v2131_v18 = vld [vmem:[#allocation11 + $0x1458] sm:$0xff] }
 0x2e8   : > { %6489 = vmatpush2.bf16.msra.mxu0 %v7739_v20  ;;  %6449 = vmatprep.subr.bf16.mxu1 %v8098_v21  ;;  %v1891_v20 = vld [vmem:[#allocation11 + $0xcd8] sm:$0xff] }
 0x2e9   : > { %6490 = vmatprep.subr.bf16.mxu0 %v7716_v22  ;;  %v1903_v21 = vld [vmem:[#allocation11 + $0xd38] sm:$0xff]  ;;  %v1508_v22 = vld [vmem:[#allocation11 + $0xe0] sm:$0xff] }
 0x2ea   : > { %v7932_v26 = vcombine.high %v1891_v20, %v1903_v21  ;;  %v7931_v35 = vcombine.low %v1891_v20, %v1903_v21 }
 0x2eb   : > { %6450 = vmatpush2.bf16.msra.mxu1 %v8097_v29  ;;  %v7550_v29 = vcombine.high %v1508_v22, %v1520_v23 }
 0x2ec   : > { %6491 = vmatpush2.bf16.msra.mxu0 %v7715_v30  ;;  %6501 = vmatprep.subr.bf16.mxu1 %v8076_v31  ;;  %v1867_v30 = vld [vmem:[#allocation11 + $0xc18] sm:$0xff] }
 0x2ed   : > { %6542 = vmatprep.subr.bf16.mxu0 %v7694_v32  ;;  %v1879_v31 = vld [vmem:[#allocation11 + $0xc78] sm:$0xff]  ;;  %v1484_v32 = vld [vmem:[#allocation11 + $0x20] sm:$0xff] }
 0x2ee   : > { %6452 = vmatmul.mubr.bf16.vlgmr.msra.gmra.mxu1 %v9167_v56  ;;  %v9182_v44 = vpop.f32.mrf.mxu0  ;;  %v7908_v37 = vcombine.high %v1867_v30, %v1879_v31  ;;  %v7526_v38 = vcombine.high %v1484_v32, %v1496_v33  ;;  %v7525_v34 = vcombine.low %v1484_v32, %v1496_v33  ;;  %v2083_v33 = vld [vmem:[#allocation11 + $0x12d8] sm:$0xff] }
 0x2ef   : > { %6493 = vmatmul.mubr.bf16.vlgmr.msra.gmra.mxu0 %v9153_v28  ;;  %6502 = vmatpush1.bf16.msra.mxu1 %v8075_v36  ;;  %v7549_v36 = vcombine.low %v1508_v22, %v1520_v23  ;;  %v2107_v23 = vld [vmem:[#allocation11 + $0x1398] sm:$0xff] }
 0x2f0   : > { %6533 = vmatprep.mubr.bf16.mxu1 %v9165_v55  ;;  %6543 = vmatpush1.bf16.msra.mxu0 %v7693_v39  ;;  %v9186_v41 = vpop.f32.mrf.mxu0  ;;  %v2227_v39 = vld [vmem:[#allocation11 + $0x1758] sm:$0xff] }
 0x2f1   : > { %6574 = vmatprep.mubr.bf16.mxu0 %v9151_v27  ;;  %6503 = vmatprep.subr.bf16.mxu1 %v8052_v40  ;;  %v2239_v40 = vld [vmem:[#allocation11 + $0x17b8] sm:$0xff] }
 0x2f2   : > { %6544 = vmatprep.subr.bf16.mxu0 %v7670_v2  ;;  %v6252_v51 = vpop.f32.mrf.mxu0  ;;  %v7907_v2 = vcombine.low %v1867_v30, %v1879_v31  ;;  %v8268_v6 = vcombine.high %v2227_v39, %v2239_v40  ;;  %v8267_v50 = vcombine.low %v2227_v39, %v2239_v40 }
 0x2f3   : > { %6504 = vmatpush1.bf16.msra.mxu1 %v8051_v45  ;;  %v7886_v45 = vcombine.high %v1844_v42, %v1856_v43  ;;  %v7885_v51 = vcombine.low %v1844_v42, %v1856_v43  ;;  %v2059_v43 = vld [vmem:[#allocation11 + $0x1218] sm:$0xff] }
 0x2f4   : > { %6545 = vmatpush1.bf16.msra.mxu0 %v7669_v46  ;;  %v6253_v57 = vpop.f32.mrf.mxu0  ;;  %6505 = vmatprep.subr.bf16.mxu1 %v8028_v47  ;;  %v2203_v46 = vld [vmem:[#allocation11 + $0x1698] sm:$0xff] }
 0x2f5   : > { %6546 = vmatprep.subr.bf16.mxu0 %v7646_v48  ;;  %v2215_v47 = vld [vmem:[#allocation11 + $0x16f8] sm:$0xff]  ;;  %v1820_v48 = vld [vmem:[#allocation11 + $0xaa0] sm:$0xff] }
 0x2f6   : > { %v8244_v52 = vcombine.high %v2203_v46, %v2215_v47  ;;  %v7862_v53 = vcombine.high %v1820_v48, %v1832_v49  ;;  %v2191_v57 = vld [vmem:[#allocation11 + $0x1638] sm:$0xff]  ;;  %v7861_v61 = vcombine.low %v1820_v48, %v1832_v49  ;;  %v2036_v49 = vld [vmem:[#allocation11 + $0x1160] sm:$0xff] }
 0x2f7   : > { %6506 = vmatpush1.bf16.msra.mxu1 %v8027_v54  ;;  %v2179_v54 = vld [vmem:[#allocation11 + $0x15d8] sm:$0xff] }
 0x2f8   : > { %6547 = vmatpush1.bf16.msra.mxu0 %v7645_v58  ;;  %6507 = vmatprep.subr.bf16.mxu1 %v8004_v59  ;;  %v1796_v58 = vld [vmem:[#allocation11 + $0x9e0] sm:$0xff]  ;;  %v8220_v0 = vcombine.high %v2179_v54, %v2191_v57 }
 0x2f9   : > { %6548 = vmatprep.subr.bf16.mxu0 %v7622_v60  ;;  %v1808_v59 = vld [vmem:[#allocation11 + $0xa40] sm:$0xff]  ;;  %v8243_v60 = vcombine.low %v2203_v46, %v2215_v47 }
 0x2fa   : > { %v7838_v3 = vcombine.high %v1796_v58, %v1808_v59  ;;  %v7837_v13 = vcombine.low %v1796_v58, %v1808_v59 }
 0x2fb   : > { %6508 = vmatpush1.bf16.msra.mxu1 %v8003_v5  ;;  %v2167_v5 = vld [vmem:[#allocation11 + $0x1578] sm:$0xff] }
 0x2fc   : > { %6549 = vmatpush1.bf16.msra.mxu0 %v7621_v7  ;;  %6509 = vmatprep.subr.bf16.mxu1 %v7980_v8  ;;  %v1772_v7 = vld [vmem:[#allocation11 + $0x920] sm:$0xff]  ;;  %v8196_v16 = vcombine.high %v2155_v4, %v2167_v5 }
 0x2fd   : > { %6550 = vmatprep.subr.bf16.mxu0 %v7598_v9  ;;  %v1784_v8 = vld [vmem:[#allocation11 + $0x980] sm:$0xff]  ;;  %v8219_v9 = vcombine.low %v2179_v54, %v2191_v57 }
 0x2fe   : > { %v7814_v17 = vcombine.high %v1772_v7, %v1784_v8  ;;  %v7813_v20 = vcombine.low %v1772_v7, %v1784_v8  ;;  %v1641_v7 = vld [vmem:[#allocation11 + $0x508] sm:$0xff] }
 0x2ff   : > { %6510 = vmatpush1.bf16.msra.mxu1 %v7979_v62  ;;  %v2143_v62 = vld [vmem:[#allocation11 + $0x14b8] sm:$0xff] }
 0x300   : > { %6551 = vmatpush1.bf16.msra.mxu0 %v7597_v63  ;;  %6511 = vmatprep.subr.bf16.mxu1 %v7956_v1  ;;  %v1748_v63 = vld [vmem:[#allocation11 + $0x860] sm:$0xff]  ;;  %v8172_v21 = vcombine.high %v2131_v18, %v2143_v62 }
 0x301   : > { %6552 = vmatprep.subr.bf16.mxu0 %v7574_v19  ;;  %v1760_v1 = vld [vmem:[#allocation11 + $0x8c0] sm:$0xff]  ;;  %v8195_v19 = vcombine.low %v2155_v4, %v2167_v5  ;;  %v1629_v5 = vld [vmem:[#allocation11 + $0x4a8] sm:$0xff] }
 0x302   : > { %v7790_v22 = vcombine.high %v1748_v63, %v1760_v1  ;;  %v7789_v30 = vcombine.low %v1748_v63, %v1760_v1  ;;  %v7672_v63 = vcombine.high %v1629_v5, %v1641_v7  ;;  %v1605_v1 = vld [vmem:[#allocation11 + $0x3e8] sm:$0xff] }
 0x303   : > { %6512 = vmatpush1.bf16.msra.mxu1 %v7955_v24  ;;  %v2119_v24 = vld [vmem:[#allocation11 + $0x13f8] sm:$0xff] }
 0x304   : > { %6553 = vmatpush1.bf16.msra.mxu0 %v7573_v25  ;;  %6513 = vmatprep.subr.bf16.mxu1 %v7932_v26  ;;  %v1724_v25 = vld [vmem:[#allocation11 + $0x7a0] sm:$0xff]  ;;  %v8148_v31 = vcombine.high %v2107_v23, %v2119_v24 }
 0x305   : > { %6554 = vmatprep.subr.bf16.mxu0 %v7550_v29  ;;  %v1736_v26 = vld [vmem:[#allocation11 + $0x800] sm:$0xff]  ;;  %v8171_v29 = vcombine.low %v2131_v18, %v2143_v62 }
 0x306   : > { %v7766_v32 = vcombine.high %v1724_v25, %v1736_v26  ;;  %v7765_v39 = vcombine.low %v1724_v25, %v1736_v26 }
 0x307   : > { %6514 = vmatpush1.bf16.msra.mxu1 %v7931_v35  ;;  %v2095_v35 = vld [vmem:[#allocation11 + $0x1338] sm:$0xff] }
 0x308   : > { %6555 = vmatpush1.bf16.msra.mxu0 %v7549_v36  ;;  %6515 = vmatprep.subr.bf16.mxu1 %v7908_v37  ;;  %v1700_v36 = vld [vmem:[#allocation11 + $0x6e0] sm:$0xff]  ;;  %v8124_v40 = vcombine.high %v2083_v33, %v2095_v35 }
 0x309   : > { %6556 = vmatprep.subr.bf16.mxu0 %v7526_v38  ;;  %v1712_v37 = vld [vmem:[#allocation11 + $0x740] sm:$0xff]  ;;  %v8147_v38 = vcombine.low %v2107_v23, %v2119_v24  ;;  %v7671_v24 = vcombine.low %v1629_v5, %v1641_v7 }
 0x30a   : > { %v7742_v42 = vcombine.high %v1700_v36, %v1712_v37  ;;  %v7741_v46 = vcombine.low %v1700_v36, %v1712_v37 }
 0x30b   : > { %6516 = vmatpush1.bf16.msra.mxu1 %v7907_v2  ;;  %v2071_v2 = vld [vmem:[#allocation11 + $0x1278] sm:$0xff] }
 0x30c   : > { %6557 = vmatpush1.bf16.msra.mxu0 %v7525_v34  ;;  %6517 = vmatprep.subr.bf16.mxu1 %v8268_v6  ;;  %v1676_v34 = vld [vmem:[#allocation11 + $0x620] sm:$0xff]  ;;  %v8100_v47 = vcombine.high %v2059_v43, %v2071_v2  ;;  %v8099_v54 = vcombine.low %v2059_v43, %v2071_v2 }
 0x30d   : > { %6558 = vmatprep.subr.bf16.mxu0 %v7886_v45  ;;  %v1688_v6 = vld [vmem:[#allocation11 + $0x680] sm:$0xff]  ;;  %v8123_v45 = vcombine.low %v2083_v33, %v2095_v35  ;;  %v1581_v33 = vld [vmem:[#allocation11 + $0x328] sm:$0xff] }
 0x30e   : > { %v7718_v48 = vcombine.high %v1676_v34, %v1688_v6  ;;  %v7717_v57 = vcombine.low %v1676_v34, %v1688_v6  ;;  %v1593_v35 = vld [vmem:[#allocation11 + $0x388] sm:$0xff]  ;;  %v1940_v43 = vld [vmem:[#allocation11 + $0xe60] sm:$0xff] }
 0x30f   : > { %6518 = vmatpush2.bf16.msra.mxu1 %v8267_v50  ;;  %v2048_v50 = vld [vmem:[#allocation11 + $0x11c0] sm:$0xff]  ;;  %v1557_v34 = vld [vmem:[#allocation11 + $0x268] sm:$0xff] }
 0x310   : > { %6559 = vmatpush2.bf16.msra.mxu0 %v7885_v51  ;;  %6519 = vmatprep.subr.bf16.mxu1 %v8244_v52  ;;  %v9189_v51 = vld [vmem:[#allocation13] sm:$0xff]  ;;  %v1653_v52 = vld [vmem:[#allocation11 + $0x568] sm:$0xff]  ;;  %v8078_v58 = vcombine.high %v2036_v49, %v2048_v50  ;;  %v8077_v4 = vcombine.low %v2036_v49, %v2048_v50 }
 0x311   : > { %6560 = vmatprep.subr.bf16.mxu0 %v7862_v53  ;;  %v1665_v53 = vld [vmem:[#allocation11 + $0x5c8] sm:$0xff]  ;;  %v2257_v59 = vrot.slane %v9189_v51, %v9106_v11  ;;  %v1952_v2 = vld [vmem:[#allocation11 + $0xec0] sm:$0xff] }
 0x312   : > { %v7695_v8 = vcombine.low %v1653_v52, %v1665_v53  ;;  %v1569_v6 = vld [vmem:[#allocation11 + $0x2c8] sm:$0xff]  ;;  %v1916_v49 = vld [vmem:[#allocation11 + $0xda0] sm:$0xff] }
 0x313   : > { %6520 = vmatpush2.bf16.msra.mxu1 %v8243_v60  ;;  %v7696_v60 = vcombine.high %v1653_v52, %v1665_v53  ;;  %v1928_v50 = vld [vmem:[#allocation11 + $0xe00] sm:$0xff]  ;;  %v1533_v52 = vld [vmem:[#allocation11 + $0x1a8] sm:$0xff] }
 0x314   : > { %6561 = vmatpush2.bf16.msra.mxu0 %v7861_v61  ;;  %6521 = vmatprep.subr.bf16.mxu1 %v8220_v0  ;;  %v2012_v61 = vld [vmem:[#allocation11 + $0x10a0] sm:$0xff]  ;;  %v1545_v53 = vld [vmem:[#allocation11 + $0x208] sm:$0xff] }
 0x315   : > { %6562 = vmatprep.subr.bf16.mxu0 %v7838_v3  ;;  %v2024_v0 = vld [vmem:[#allocation11 + $0x1100] sm:$0xff]  ;;  %v2261_v3 = vrot.slane %v9189_v51, %v9112_v14  ;;  %v7575_v5 = vcombine.low %v1533_v52, %v1545_v53 }
 0x317   : > { %6522 = vmatpush2.bf16.msra.mxu1 %v8219_v9  ;;  %v6249_v9 = vadd.f32 %v9182_v44, %v2257_v59  ;;  %v8053_v44 = vcombine.low %v2012_v61, %v2024_v0  ;;  %v7576_v59 = vcombine.high %v1533_v52, %v1545_v53 }
 0x318   : > { %6563 = vmatpush2.bf16.msra.mxu0 %v7837_v13  ;;  %6523 = vmatprep.subr.bf16.mxu1 %v8196_v16  ;;  %v8054_v13 = vcombine.high %v2012_v61, %v2024_v0  ;;  %v1988_v16 = vld [vmem:[#allocation11 + $0xfe0] sm:$0xff]  ;;  %v1509_v0 = vld [vmem:[#allocation11 + $0xe8] sm:$0xff] }
 0x319   : > { %6564 = vmatprep.subr.bf16.mxu0 %v7814_v17  ;;  %v2000_v17 = vld [vmem:[#allocation11 + $0x1040] sm:$0xff] }
 0x31a   : > { %v8030_v25 = vcombine.high %v1988_v16, %v2000_v17  ;;  %v8029_v36 = vcombine.low %v1988_v16, %v2000_v17  ;;  %v1904_v61 = vld [vmem:[#allocation11 + $0xd40] sm:$0xff]  ;;  %v1485_v16 = vld [vmem:[#allocation11 + $0x28] sm:$0xff] }
 0x31b   : > { %6524 = vmatpush2.bf16.msra.mxu1 %v8195_v19  ;;  %v1617_v19 = vld [vmem:[#allocation11 + $0x448] sm:$0xff] }
 0x31c   : > { %6565 = vmatpush2.bf16.msra.mxu0 %v7813_v20  ;;  %6525 = vmatprep.subr.bf16.mxu1 %v8172_v21  ;;  %v6251_v20 = vadd.f32 %v9186_v41, %v2261_v3  ;;  %v7648_v26 = vcombine.high %v1605_v1, %v1617_v19  ;;  %v1521_v3 = vld [vmem:[#allocation11 + $0x148] sm:$0xff] }
 0x31d   : > { %6566 = vmatprep.subr.bf16.mxu0 %v7790_v22  ;;  %v1497_v17 = vld [vmem:[#allocation11 + $0x88] sm:$0xff] }
 0x31f   : > { %6526 = vmatpush2.bf16.msra.mxu1 %v8171_v29  ;;  %v1964_v29 = vld [vmem:[#allocation11 + $0xf20] sm:$0xff] }
 0x320   : > { %6567 = vmatpush2.bf16.msra.mxu0 %v7789_v30  ;;  %6527 = vmatprep.subr.bf16.mxu1 %v8148_v31  ;;  %v1976_v30 = vld [vmem:[#allocation11 + $0xf80] sm:$0xff] }
 0x321   : > { %6568 = vmatprep.subr.bf16.mxu0 %v7766_v32 }
 0x323   : > { %6528 = vmatpush2.bf16.msra.mxu1 %v8147_v38 }
 0x324   : > { %6569 = vmatpush2.bf16.msra.mxu0 %v7765_v39  ;;  %6529 = vmatprep.subr.bf16.mxu1 %v8124_v40  ;;  %v7647_v39 = vcombine.low %v1605_v1, %v1617_v19  ;;  %v8006_v40 = vcombine.high %v1964_v29, %v1976_v30  ;;  %v7528_v19 = vcombine.high %v1485_v16, %v1497_v17 }
 0x325   : > { %6570 = vmatprep.subr.bf16.mxu0 %v7742_v42  ;;  %v7624_v42 = vcombine.high %v1581_v33, %v1593_v35 }
 0x327   : > { %6530 = vmatpush2.bf16.msra.mxu1 %v8123_v45  ;;  %v8005_v45 = vcombine.low %v1964_v29, %v1976_v30  ;;  %v2204_v29 = vld [vmem:[#allocation11 + $0x16a0] sm:$0xff] }
 0x328   : > { %6571 = vmatpush2.bf16.msra.mxu0 %v7741_v46  ;;  %6531 = vmatprep.subr.bf16.mxu1 %v8100_v47  ;;  %v7623_v46 = vcombine.low %v1581_v33, %v1593_v35  ;;  %v7982_v47 = vcombine.high %v1940_v43, %v1952_v2  ;;  %v2216_v30 = vld [vmem:[#allocation11 + $0x1700] sm:$0xff] }
 0x329   : > { %6572 = vmatprep.subr.bf16.mxu0 %v7718_v48  ;;  %v7600_v48 = vcombine.high %v1557_v34, %v1569_v6 }
 0x32b   : > { %6532 = vmatpush2.bf16.msra.mxu1 %v8099_v54  ;;  %v7981_v54 = vcombine.low %v1940_v43, %v1952_v2  ;;  %v8245_v43 = vcombine.low %v2204_v29, %v2216_v30 }
 0x32c   : > { %6573 = vmatpush2.bf16.msra.mxu0 %v7717_v57  ;;  %6583 = vmatprep.subr.bf16.mxu1 %v8078_v58  ;;  %v7599_v57 = vcombine.low %v1557_v34, %v1569_v6  ;;  %v7958_v58 = vcombine.high %v1916_v49, %v1928_v50 }
 0x32d   : > { %6624 = vmatprep.subr.bf16.mxu0 %v7696_v60  ;;  %v1892_v60 = vld [vmem:[#allocation11 + $0xce0] sm:$0xff] }
 0x32e   : > { %6534 = vmatmul.mubr.bf16.vlgmr.msra.gmra.mxu1 %v9167_v56  ;;  %v6289_v18 = vpop.f32.mrf.mxu1  ;;  %v9198_v62 = vpop.f32.mrf.mxu0  ;;  %v7934_v7 = vcombine.high %v1892_v60, %v1904_v61 }
 0x32f   : > { %v6290_v21 = vadd.f32 %v6289_v18, %v6249_v9  ;;  %6575 = vmatmul.mubr.bf16.vlgmr.msra.gmra.mxu0 %v9153_v28  ;;  %6584 = vmatpush1.bf16.msra.mxu1 %v8077_v4  ;;  %v7957_v4 = vcombine.low %v1916_v49, %v1928_v50  ;;  %v1868_v9 = vld [vmem:[#allocation11 + $0xc20] sm:$0xff]  ;;  %v7933_v18 = vcombine.low %v1892_v60, %v1904_v61 }
 0x330   : > { %6615 = vmatprep.mubr.bf16.mxu1 %v9165_v55  ;;  %6625 = vmatpush1.bf16.msra.mxu0 %v7695_v8  ;;  %v6291_v22 = vpop.f32.mrf.mxu1  ;;  %v9203_v23 = vpop.f32.mrf.mxu0  ;;  %v7552_v8 = vcombine.high %v1509_v0, %v1521_v3 }
 0x331   : > { %7198 = vst [vmem:[%s9207_s8] sm:$0xff] %v6290_v21  ;;  %6656 = vmatprep.mubr.bf16.mxu0 %v9151_v27  ;;  %v6292_v41 = vadd.f32 %v6291_v22, %v6251_v20  ;;  %6585 = vmatprep.subr.bf16.mxu1 %v8054_v13  ;;  %v1880_v13 = vld [vmem:[#allocation11 + $0xc80] sm:$0xff]  ;;  %v1857_v22 = vld [vmem:[#allocation11 + $0xbc8] sm:$0xff] }
 0x332   : > { %v6293_v31 = vpop.f32.mrf.mxu1  ;;  %v6334_v32 = vpop.f32.mrf.mxu0  ;;  %6626 = vmatprep.subr.bf16.mxu0 %v7672_v63  ;;  %v7551_v63 = vcombine.low %v1509_v0, %v1521_v3  ;;  %v7910_v1 = vcombine.high %v1868_v9, %v1880_v13  ;;  %v2228_v20 = vld [vmem:[#allocation11 + $0x1760] sm:$0xff] }
 0x333   : > { %7199 = vst [vmem:[%s9207_s8 + $0x8] sm:$0xff] %v6292_v41  ;;  %6586 = vmatpush1.bf16.msra.mxu1 %v8053_v44  ;;  %v2240_v21 = vld [vmem:[#allocation11 + $0x17c0] sm:$0xff]  ;;  %v1845_v44 = vld [vmem:[#allocation11 + $0xb68] sm:$0xff] }
 0x334   : > { %6627 = vmatpush1.bf16.msra.mxu0 %v7671_v24  ;;  %v6294_v37 = vpop.f32.mrf.mxu1  ;;  %v6335_v38 = vpop.f32.mrf.mxu0  ;;  %6587 = vmatprep.subr.bf16.mxu1 %v8030_v25  ;;  %v7909_v24 = vcombine.low %v1868_v9, %v1880_v13  ;;  %v7527_v25 = vcombine.low %v1485_v16, %v1497_v17  ;;  %v8270_v41 = vcombine.high %v2228_v20, %v2240_v21  ;;  %v1821_v31 = vld [vmem:[#allocation11 + $0xaa8] sm:$0xff] }
 0x335   : > { %6628 = vmatprep.subr.bf16.mxu0 %v7648_v26  ;;  %v7888_v26 = vcombine.high %v1845_v44, %v1857_v22  ;;  %v1833_v32 = vld [vmem:[#allocation11 + $0xb08] sm:$0xff]  ;;  %v8269_v33 = vcombine.low %v2228_v20, %v2240_v21  ;;  %v7887_v35 = vcombine.low %v1845_v44, %v1857_v22  ;;  %v2180_v38 = vld [vmem:[#allocation11 + $0x15e0] sm:$0xff] }
 0x336   : > { %v7864_v37 = vcombine.high %v1821_v31, %v1833_v32  ;;  %v7863_v2 = vcombine.low %v1821_v31, %v1833_v32 }
 0x337   : > { %6588 = vmatpush1.bf16.msra.mxu1 %v8029_v36  ;;  %v8246_v36 = vcombine.high %v2204_v29, %v2216_v30 }
 0x338   : > { %6629 = vmatpush1.bf16.msra.mxu0 %v7647_v39  ;;  %6589 = vmatprep.subr.bf16.mxu1 %v8006_v40  ;;  %v2192_v39 = vld [vmem:[#allocation11 + $0x1640] sm:$0xff]  ;;  %v1797_v40 = vld [vmem:[#allocation11 + $0x9e8] sm:$0xff] }
 0x339   : > { %6630 = vmatprep.subr.bf16.mxu0 %v7624_v42  ;;  %v1809_v42 = vld [vmem:[#allocation11 + $0xa48] sm:$0xff]  ;;  %v8222_v34 = vcombine.high %v2180_v38, %v2192_v39  ;;  %v8221_v49 = vcombine.low %v2180_v38, %v2192_v39 }
 0x33a   : > { %v7840_v6 = vcombine.high %v1797_v40, %v1809_v42  ;;  %v7839_v50 = vcombine.low %v1797_v40, %v1809_v42  ;;  %v2265_v42 = vrot.slane %v9189_v51, %v9109_v12 }
 0x33b   : > { %6590 = vmatpush1.bf16.msra.mxu1 %v8005_v45  ;;  %v2156_v45 = vld [vmem:[#allocation11 + $0x1520] sm:$0xff] }
 0x33c   : > { %6631 = vmatpush1.bf16.msra.mxu0 %v7623_v46  ;;  %6591 = vmatprep.subr.bf16.mxu1 %v7982_v47  ;;  %v2168_v46 = vld [vmem:[#allocation11 + $0x1580] sm:$0xff]  ;;  %v1773_v47 = vld [vmem:[#allocation11 + $0x928] sm:$0xff] }
 0x33d   : > { %6632 = vmatprep.subr.bf16.mxu0 %v7600_v48  ;;  %v1785_v48 = vld [vmem:[#allocation11 + $0x988] sm:$0xff]  ;;  %v8198_v52 = vcombine.high %v2156_v45, %v2168_v46  ;;  %v8197_v60 = vcombine.low %v2156_v45, %v2168_v46  ;;  %v1630_v46 = vld [vmem:[#allocation11 + $0x4b0] sm:$0xff] }
 0x33e   : > { %v7816_v53 = vcombine.high %v1773_v47, %v1785_v48  ;;  %v7815_v61 = vcombine.low %v1773_v47, %v1785_v48  ;;  %v1642_v47 = vld [vmem:[#allocation11 + $0x510] sm:$0xff] }
 0x33f   : > { %6592 = vmatpush1.bf16.msra.mxu1 %v7981_v54  ;;  %v2132_v54 = vld [vmem:[#allocation11 + $0x1460] sm:$0xff] }
 0x340   : > { %6633 = vmatpush1.bf16.msra.mxu0 %v7599_v57  ;;  %6593 = vmatprep.subr.bf16.mxu1 %v7958_v58  ;;  %v2144_v57 = vld [vmem:[#allocation11 + $0x14c0] sm:$0xff]  ;;  %v1749_v58 = vld [vmem:[#allocation11 + $0x868] sm:$0xff] }
 0x341   : > { %6634 = vmatprep.subr.bf16.mxu0 %v7576_v59  ;;  %v1761_v59 = vld [vmem:[#allocation11 + $0x8c8] sm:$0xff]  ;;  %v8174_v0 = vcombine.high %v2132_v54, %v2144_v57  ;;  %v8173_v9 = vcombine.low %v2132_v54, %v2144_v57  ;;  %v7674_v57 = vcombine.high %v1630_v46, %v1642_v47 }
 0x342   : > { %v7792_v3 = vcombine.high %v1749_v58, %v1761_v59  ;;  %v7791_v13 = vcombine.low %v1749_v58, %v1761_v59  ;;  %v1606_v58 = vld [vmem:[#allocation11 + $0x3f0] sm:$0xff] }
 0x343   : > { %6594 = vmatpush1.bf16.msra.mxu1 %v7957_v4  ;;  %v2108_v4 = vld [vmem:[#allocation11 + $0x13a0] sm:$0xff]  ;;  %v1618_v59 = vld [vmem:[#allocation11 + $0x450] sm:$0xff] }
 0x344   : > { %6635 = vmatpush1.bf16.msra.mxu0 %v7575_v5  ;;  %6595 = vmatprep.subr.bf16.mxu1 %v7934_v7  ;;  %v2120_v5 = vld [vmem:[#allocation11 + $0x1400] sm:$0xff]  ;;  %v1725_v7 = vld [vmem:[#allocation11 + $0x7a8] sm:$0xff] }
 0x345   : > { %6636 = vmatprep.subr.bf16.mxu0 %v7552_v8  ;;  %v1737_v8 = vld [vmem:[#allocation11 + $0x808] sm:$0xff]  ;;  %v8150_v16 = vcombine.high %v2108_v4, %v2120_v5  ;;  %v8149_v20 = vcombine.low %v2108_v4, %v2120_v5  ;;  %v7673_v4 = vcombine.low %v1630_v46, %v1642_v47 }
 0x346   : > { %v7768_v17 = vcombine.high %v1725_v7, %v1737_v8  ;;  %v7767_v21 = vcombine.low %v1725_v7, %v1737_v8 }
 0x347   : > { %6596 = vmatpush1.bf16.msra.mxu1 %v7933_v18  ;;  %v2084_v18 = vld [vmem:[#allocation11 + $0x12e0] sm:$0xff] }
 0x348   : > { %6637 = vmatpush1.bf16.msra.mxu0 %v7551_v63  ;;  %6597 = vmatprep.subr.bf16.mxu1 %v7910_v1  ;;  %v2096_v63 = vld [vmem:[#allocation11 + $0x1340] sm:$0xff]  ;;  %v1701_v1 = vld [vmem:[#allocation11 + $0x6e8] sm:$0xff] }
 0x349   : > { %6638 = vmatprep.subr.bf16.mxu0 %v7528_v19  ;;  %v1713_v19 = vld [vmem:[#allocation11 + $0x748] sm:$0xff]  ;;  %v8126_v44 = vcombine.high %v2084_v18, %v2096_v63  ;;  %v8125_v29 = vcombine.low %v2084_v18, %v2096_v63  ;;  %v1594_v18 = vld [vmem:[#allocation11 + $0x390] sm:$0xff] }
 0x34a   : > { %v7744_v22 = vcombine.high %v1701_v1, %v1713_v19  ;;  %v7743_v30 = vcombine.low %v1701_v1, %v1713_v19 }
 0x34b   : > { %6598 = vmatpush1.bf16.msra.mxu1 %v7909_v24  ;;  %v2060_v24 = vld [vmem:[#allocation11 + $0x1220] sm:$0xff] }
 0x34c   : > { %6639 = vmatpush1.bf16.msra.mxu0 %v7527_v25  ;;  %6599 = vmatprep.subr.bf16.mxu1 %v8270_v41  ;;  %v2072_v25 = vld [vmem:[#allocation11 + $0x1280] sm:$0xff]  ;;  %v1677_v41 = vld [vmem:[#allocation11 + $0x628] sm:$0xff] }
 0x34d   : > { %6640 = vmatprep.subr.bf16.mxu0 %v7888_v26  ;;  %v1689_v26 = vld [vmem:[#allocation11 + $0x688] sm:$0xff]  ;;  %v8102_v31 = vcombine.high %v2060_v24, %v2072_v25  ;;  %v8101_v38 = vcombine.low %v2060_v24, %v2072_v25 }
 0x34e   : > { %v7720_v32 = vcombine.high %v1677_v41, %v1689_v26  ;;  %v7719_v39 = vcombine.low %v1677_v41, %v1689_v26  ;;  %v1941_v24 = vld [vmem:[#allocation11 + $0xe68] sm:$0xff]  ;;  %v1558_v41 = vld [vmem:[#allocation11 + $0x270] sm:$0xff] }
 0x34f   : > { %6600 = vmatpush2.bf16.msra.mxu1 %v8269_v33  ;;  %v2037_v33 = vld [vmem:[#allocation11 + $0x1168] sm:$0xff]  ;;  %v1570_v26 = vld [vmem:[#allocation11 + $0x2d0] sm:$0xff] }
 0x350   : > { %6641 = vmatpush2.bf16.msra.mxu0 %v7887_v35  ;;  %6601 = vmatprep.subr.bf16.mxu1 %v8246_v36  ;;  %v2049_v35 = vld [vmem:[#allocation11 + $0x11c8] sm:$0xff]  ;;  %v1654_v36 = vld [vmem:[#allocation11 + $0x570] sm:$0xff] }
 0x351   : > { %6642 = vmatprep.subr.bf16.mxu0 %v7864_v37  ;;  %v1666_v37 = vld [vmem:[#allocation11 + $0x5d0] sm:$0xff]  ;;  %v8080_v40 = vcombine.high %v2037_v33, %v2049_v35  ;;  %v8079_v45 = vcombine.low %v2037_v33, %v2049_v35  ;;  %v1953_v25 = vld [vmem:[#allocation11 + $0xec8] sm:$0xff] }
 0x352   : > { %v7697_v48 = vcombine.low %v1654_v36, %v1666_v37  ;;  %v1917_v33 = vld [vmem:[#allocation11 + $0xda8] sm:$0xff] }
 0x353   : > { %6602 = vmatpush2.bf16.msra.mxu1 %v8245_v43  ;;  %v7698_v43 = vcombine.high %v1654_v36, %v1666_v37  ;;  %v1929_v35 = vld [vmem:[#allocation11 + $0xe08] sm:$0xff]  ;;  %v1534_v36 = vld [vmem:[#allocation11 + $0x1b0] sm:$0xff] }
 0x354   : > { %6643 = vmatpush2.bf16.msra.mxu0 %v7863_v2  ;;  %6603 = vmatprep.subr.bf16.mxu1 %v8222_v34  ;;  %v2013_v2 = vld [vmem:[#allocation11 + $0x10a8] sm:$0xff]  ;;  %v1546_v37 = vld [vmem:[#allocation11 + $0x210] sm:$0xff] }
 0x355   : > { %6644 = vmatprep.subr.bf16.mxu0 %v7840_v6  ;;  %v2025_v34 = vld [vmem:[#allocation11 + $0x1108] sm:$0xff]  ;;  %v2269_v6 = vrot.slane %v9189_v51, %v9115_v15  ;;  %v7577_v46 = vcombine.low %v1534_v36, %v1546_v37 }
 0x357   : > { %6604 = vmatpush2.bf16.msra.mxu1 %v8221_v49  ;;  %v6331_v49 = vadd.f32 %v9198_v62, %v2265_v42  ;;  %v8055_v62 = vcombine.low %v2013_v2, %v2025_v34  ;;  %v7578_v42 = vcombine.high %v1534_v36, %v1546_v37 }
 0x358   : > { %6645 = vmatpush2.bf16.msra.mxu0 %v7839_v50  ;;  %6605 = vmatprep.subr.bf16.mxu1 %v8198_v52  ;;  %v8056_v50 = vcombine.high %v2013_v2, %v2025_v34  ;;  %v1989_v52 = vld [vmem:[#allocation11 + $0xfe8] sm:$0xff]  ;;  %v1510_v34 = vld [vmem:[#allocation11 + $0xf0] sm:$0xff] }
 0x359   : > { %6646 = vmatprep.subr.bf16.mxu0 %v7816_v53  ;;  %v2001_v53 = vld [vmem:[#allocation11 + $0x1048] sm:$0xff] }
 0x35a   : > { %v8032_v5 = vcombine.high %v1989_v52, %v2001_v53  ;;  %v8031_v1 = vcombine.low %v1989_v52, %v2001_v53  ;;  %v1905_v2 = vld [vmem:[#allocation11 + $0xd48] sm:$0xff]  ;;  %v1486_v52 = vld [vmem:[#allocation11 + $0x30] sm:$0xff] }
 0x35b   : > { %6606 = vmatpush2.bf16.msra.mxu1 %v8197_v60  ;;  %v6333_v60 = vadd.f32 %v9203_v23, %v2269_v6  ;;  %v7650_v23 = vcombine.high %v1606_v58, %v1618_v59  ;;  %v1522_v6 = vld [vmem:[#allocation11 + $0x150] sm:$0xff] }
 0x35c   : > { %6647 = vmatpush2.bf16.msra.mxu0 %v7815_v61  ;;  %6607 = vmatprep.subr.bf16.mxu1 %v8174_v0  ;;  %v1498_v53 = vld [vmem:[#allocation11 + $0x90] sm:$0xff] }
 0x35d   : > { %6648 = vmatprep.subr.bf16.mxu0 %v7792_v3 }
 0x35f   : > { %6608 = vmatpush2.bf16.msra.mxu1 %v8173_v9  ;;  %v1965_v9 = vld [vmem:[#allocation11 + $0xf28] sm:$0xff] }
 0x360   : > { %6649 = vmatpush2.bf16.msra.mxu0 %v7791_v13  ;;  %6609 = vmatprep.subr.bf16.mxu1 %v8150_v16  ;;  %v1977_v13 = vld [vmem:[#allocation11 + $0xf88] sm:$0xff] }
 0x361   : > { %6650 = vmatprep.subr.bf16.mxu0 %v7768_v17  ;;  %v1582_v17 = vld [vmem:[#allocation11 + $0x330] sm:$0xff] }
 0x363   : > { %6610 = vmatpush2.bf16.msra.mxu1 %v8149_v20  ;;  %v7649_v20 = vcombine.low %v1606_v58, %v1618_v59  ;;  %v7530_v59 = vcombine.high %v1486_v52, %v1498_v53 }
 0x364   : > { %6651 = vmatpush2.bf16.msra.mxu0 %v7767_v21  ;;  %6611 = vmatprep.subr.bf16.mxu1 %v8126_v44  ;;  %v8008_v21 = vcombine.high %v1965_v9, %v1977_v13 }
 0x365   : > { %6652 = vmatprep.subr.bf16.mxu0 %v7744_v22  ;;  %v7626_v22 = vcombine.high %v1582_v17, %v1594_v18 }
 0x367   : > { %6612 = vmatpush2.bf16.msra.mxu1 %v8125_v29  ;;  %v8007_v29 = vcombine.low %v1965_v9, %v1977_v13  ;;  %v2205_v9 = vld [vmem:[#allocation11 + $0x16a8] sm:$0xff] }
 0x368   : > { %6653 = vmatpush2.bf16.msra.mxu0 %v7743_v30  ;;  %6613 = vmatprep.subr.bf16.mxu1 %v8102_v31  ;;  %v7625_v30 = vcombine.low %v1582_v17, %v1594_v18  ;;  %v7984_v31 = vcombine.high %v1941_v24, %v1953_v25  ;;  %v2217_v13 = vld [vmem:[#allocation11 + $0x1708] sm:$0xff]  ;;  %v1834_v17 = vld [vmem:[#allocation11 + $0xb10] sm:$0xff] }
 0x369   : > { %6654 = vmatprep.subr.bf16.mxu0 %v7720_v32  ;;  %v7602_v32 = vcombine.high %v1558_v41, %v1570_v26 }
 0x36b   : > { %6614 = vmatpush2.bf16.msra.mxu1 %v8101_v38  ;;  %v7983_v38 = vcombine.low %v1941_v24, %v1953_v25  ;;  %v8247_v24 = vcombine.low %v2205_v9, %v2217_v13 }
 0x36c   : > { %6655 = vmatpush2.bf16.msra.mxu0 %v7719_v39  ;;  %6665 = vmatprep.subr.bf16.mxu1 %v8080_v40  ;;  %v7601_v39 = vcombine.low %v1558_v41, %v1570_v26  ;;  %v7960_v40 = vcombine.high %v1917_v33, %v1929_v35 }
 0x36d   : > { %6706 = vmatprep.subr.bf16.mxu0 %v7698_v43  ;;  %v1893_v43 = vld [vmem:[#allocation11 + $0xce8] sm:$0xff] }
 0x36e   : > { %v6371_v54 = vpop.f32.mrf.mxu1  ;;  %6616 = vmatmul.mubr.bf16.vlgmr.msra.gmra.mxu1 %v9167_v56  ;;  %v7936_v47 = vcombine.high %v1893_v43, %v1905_v2 }
 0x36f   : > { %v6372_v61 = vadd.f32 %v6371_v54, %v6331_v49  ;;  %v9219_v0 = vpop.f32.mrf.mxu0  ;;  %6657 = vmatmul.mubr.bf16.vlgmr.msra.gmra.mxu0 %v9153_v28  ;;  %6666 = vmatpush1.bf16.msra.mxu1 %v8079_v45  ;;  %v7959_v45 = vcombine.low %v1917_v33, %v1929_v35  ;;  %v1869_v49 = vld [vmem:[#allocation11 + $0xc28] sm:$0xff]  ;;  %v7935_v54 = vcombine.low %v1893_v43, %v1905_v2 }
 0x370   : > { %6697 = vmatprep.mubr.bf16.mxu1 %v9165_v55  ;;  %v6373_v3 = vpop.f32.mrf.mxu1  ;;  %6707 = vmatpush1.bf16.msra.mxu0 %v7697_v48  ;;  %v7554_v48 = vcombine.high %v1510_v34, %v1522_v6 }
 0x371   : > { %7200 = vst [vmem:[%s9207_s8 + $0x10] sm:$0xff] %v6372_v61  ;;  %v6374_v7 = vadd.f32 %v6373_v3, %v6333_v60  ;;  %6738 = vmatprep.mubr.bf16.mxu0 %v9151_v27  ;;  %v9225_v8 = vpop.f32.mrf.mxu0  ;;  %6667 = vmatprep.subr.bf16.mxu1 %v8056_v50  ;;  %v1881_v50 = vld [vmem:[#allocation11 + $0xc88] sm:$0xff]  ;;  %v1858_v3 = vld [vmem:[#allocation11 + $0xbd0] sm:$0xff] }
 0x372   : > { %v6375_v16 = vpop.f32.mrf.mxu1  ;;  %6708 = vmatprep.subr.bf16.mxu0 %v7674_v57  ;;  %v7553_v57 = vcombine.low %v1510_v34, %v1522_v6  ;;  %v7912_v58 = vcombine.high %v1869_v49, %v1881_v50  ;;  %v2229_v60 = vld [vmem:[#allocation11 + $0x1768] sm:$0xff] }
 0x373   : > { %7201 = vst [vmem:[%s9207_s8 + $0x18] sm:$0xff] %v6374_v7  ;;  %v6416_v63 = vpop.f32.mrf.mxu0  ;;  %6668 = vmatpush1.bf16.msra.mxu1 %v8055_v62  ;;  %v2241_v61 = vld [vmem:[#allocation11 + $0x17c8] sm:$0xff]  ;;  %v1846_v62 = vld [vmem:[#allocation11 + $0xb70] sm:$0xff] }
 0x374   : > { %v6376_v19 = vpop.f32.mrf.mxu1  ;;  %6709 = vmatpush1.bf16.msra.mxu0 %v7673_v4  ;;  %6669 = vmatprep.subr.bf16.mxu1 %v8032_v5  ;;  %v7911_v4 = vcombine.low %v1869_v49, %v1881_v50  ;;  %v7529_v5 = vcombine.low %v1486_v52, %v1498_v53  ;;  %v8272_v7 = vcombine.high %v2229_v60, %v2241_v61  ;;  %v1822_v16 = vld [vmem:[#allocation11 + $0xab0] sm:$0xff] }
 0x375   : > { %v6417_v44 = vpop.f32.mrf.mxu0  ;;  %6710 = vmatprep.subr.bf16.mxu0 %v7650_v23  ;;  %v7890_v23 = vcombine.high %v1846_v62, %v1858_v3  ;;  %v8271_v18 = vcombine.low %v2229_v60, %v2241_v61  ;;  %v7889_v63 = vcombine.low %v1846_v62, %v1858_v3  ;;  %v7866_v19 = vcombine.high %v1822_v16, %v1834_v17 }
 0x376   : > { %v1798_v44 = vld [vmem:[#allocation11 + $0x9f0] sm:$0xff]  ;;  %v7865_v25 = vcombine.low %v1822_v16, %v1834_v17  ;;  %v9229_v17 = vsub.s32 4, %v9103_v10 }
 0x377   : > { %6670 = vmatpush1.bf16.msra.mxu1 %v8031_v1  ;;  %v8248_v1 = vcombine.high %v2205_v9, %v2217_v13 }
 0x378   : > { %6711 = vmatpush1.bf16.msra.mxu0 %v7649_v20  ;;  %6671 = vmatprep.subr.bf16.mxu1 %v8008_v21  ;;  %v2181_v20 = vld [vmem:[#allocation11 + $0x15e8] sm:$0xff] }
 0x379   : > { %6712 = vmatprep.subr.bf16.mxu0 %v7626_v22  ;;  %v2193_v21 = vld [vmem:[#allocation11 + $0x1648] sm:$0xff]  ;;  %v1810_v22 = vld [vmem:[#allocation11 + $0xa50] sm:$0xff] }
 0x37a   : > { %v8224_v41 = vcombine.high %v2181_v20, %v2193_v21  ;;  %v7842_v26 = vcombine.high %v1798_v44, %v1810_v22  ;;  %v8223_v33 = vcombine.low %v2181_v20, %v2193_v21  ;;  %v7841_v35 = vcombine.low %v1798_v44, %v1810_v22  ;;  %v1667_v20 = vld [vmem:[#allocation11 + $0x5d8] sm:$0xff] }
 0x37b   : > { %6672 = vmatpush1.bf16.msra.mxu1 %v8007_v29  ;;  %v2157_v29 = vld [vmem:[#allocation11 + $0x1528] sm:$0xff]  ;;  %v9232_v21 = vsub.s32 5, %v9103_v10 }
 0x37c   : > { %6713 = vmatpush1.bf16.msra.mxu0 %v7625_v30  ;;  %6673 = vmatprep.subr.bf16.mxu1 %v7984_v31  ;;  %v2169_v30 = vld [vmem:[#allocation11 + $0x1588] sm:$0xff]  ;;  %v1774_v31 = vld [vmem:[#allocation11 + $0x930] sm:$0xff] }
 0x37d   : > { %6714 = vmatprep.subr.bf16.mxu0 %v7602_v32  ;;  %v1786_v32 = vld [vmem:[#allocation11 + $0x990] sm:$0xff]  ;;  %v8200_v36 = vcombine.high %v2157_v29, %v2169_v30  ;;  %v8199_v43 = vcombine.low %v2157_v29, %v2169_v30  ;;  %v2277_v30 = vrot.slane %v9189_v51, %v9232_v21 }
 0x37e   : > { %v7818_v37 = vcombine.high %v1774_v31, %v1786_v32  ;;  %v7817_v2 = vcombine.low %v1774_v31, %v1786_v32  ;;  %v2026_v29 = vld [vmem:[#allocation11 + $0x1110] sm:$0xff]  ;;  %v1631_v32 = vld [vmem:[#allocation11 + $0x4b8] sm:$0xff] }
 0x37f   : > { %6674 = vmatpush1.bf16.msra.mxu1 %v7983_v38  ;;  %v2133_v38 = vld [vmem:[#allocation11 + $0x1468] sm:$0xff] }
 0x380   : > { %6715 = vmatpush1.bf16.msra.mxu0 %v7601_v39  ;;  %6675 = vmatprep.subr.bf16.mxu1 %v7960_v40  ;;  %v2145_v39 = vld [vmem:[#allocation11 + $0x14c8] sm:$0xff]  ;;  %v1750_v40 = vld [vmem:[#allocation11 + $0x870] sm:$0xff] }
 0x381   : > { %6716 = vmatprep.subr.bf16.mxu0 %v7578_v42  ;;  %v1762_v42 = vld [vmem:[#allocation11 + $0x8d0] sm:$0xff]  ;;  %v8176_v34 = vcombine.high %v2133_v38, %v2145_v39  ;;  %v8175_v49 = vcombine.low %v2133_v38, %v2145_v39 }
 0x382   : > { %v7794_v6 = vcombine.high %v1750_v40, %v1762_v42  ;;  %v7793_v50 = vcombine.low %v1750_v40, %v1762_v42  ;;  %v1990_v38 = vld [vmem:[#allocation11 + $0xff0] sm:$0xff] }
 0x383   : > { %6676 = vmatpush1.bf16.msra.mxu1 %v7959_v45  ;;  %v2109_v45 = vld [vmem:[#allocation11 + $0x13a8] sm:$0xff]  ;;  %v2002_v39 = vld [vmem:[#allocation11 + $0x1050] sm:$0xff] }
 0x384   : > { %6717 = vmatpush1.bf16.msra.mxu0 %v7577_v46  ;;  %6677 = vmatprep.subr.bf16.mxu1 %v7936_v47  ;;  %v2121_v46 = vld [vmem:[#allocation11 + $0x1408] sm:$0xff]  ;;  %v1726_v47 = vld [vmem:[#allocation11 + $0x7b0] sm:$0xff] }
 0x385   : > { %6718 = vmatprep.subr.bf16.mxu0 %v7554_v48  ;;  %v1738_v48 = vld [vmem:[#allocation11 + $0x810] sm:$0xff]  ;;  %v8152_v52 = vcombine.high %v2109_v45, %v2121_v46  ;;  %v8151_v60 = vcombine.low %v2109_v45, %v2121_v46 }
 0x386   : > { %v7770_v53 = vcombine.high %v1726_v47, %v1738_v48  ;;  %v7769_v61 = vcombine.low %v1726_v47, %v1738_v48  ;;  %v8034_v47 = vcombine.high %v1990_v38, %v2002_v39 }
 0x387   : > { %6678 = vmatpush1.bf16.msra.mxu1 %v7935_v54  ;;  %v2085_v54 = vld [vmem:[#allocation11 + $0x12e8] sm:$0xff] }
 0x388   : > { %6719 = vmatpush1.bf16.msra.mxu0 %v7553_v57  ;;  %6679 = vmatprep.subr.bf16.mxu1 %v7912_v58  ;;  %v2097_v57 = vld [vmem:[#allocation11 + $0x1348] sm:$0xff]  ;;  %v1702_v58 = vld [vmem:[#allocation11 + $0x6f0] sm:$0xff] }
 0x389   : > { %6720 = vmatprep.subr.bf16.mxu0 %v7530_v59  ;;  %v1714_v59 = vld [vmem:[#allocation11 + $0x750] sm:$0xff]  ;;  %v8128_v62 = vcombine.high %v2085_v54, %v2097_v57  ;;  %v8127_v9 = vcombine.low %v2085_v54, %v2097_v57  ;;  %v1583_v54 = vld [vmem:[#allocation11 + $0x338] sm:$0xff] }
 0x38a   : > { %v7746_v3 = vcombine.high %v1702_v58, %v1714_v59  ;;  %v7745_v13 = vcombine.low %v1702_v58, %v1714_v59  ;;  %v1595_v57 = vld [vmem:[#allocation11 + $0x398] sm:$0xff]  ;;  %v8033_v59 = vcombine.low %v1990_v38, %v2002_v39  ;;  %v1882_v38 = vld [vmem:[#allocation11 + $0xc90] sm:$0xff] }
 0x38b   : > { %6680 = vmatpush1.bf16.msra.mxu1 %v7911_v4  ;;  %v2061_v4 = vld [vmem:[#allocation11 + $0x1228] sm:$0xff]  ;;  %v1487_v39 = vld [vmem:[#allocation11 + $0x38] sm:$0xff] }
 0x38c   : > { %6721 = vmatpush1.bf16.msra.mxu0 %v7529_v5  ;;  %6681 = vmatprep.subr.bf16.mxu1 %v8272_v7  ;;  %v2073_v5 = vld [vmem:[#allocation11 + $0x1288] sm:$0xff]  ;;  %v1678_v7 = vld [vmem:[#allocation11 + $0x630] sm:$0xff] }
 0x38d   : > { %6722 = vmatprep.subr.bf16.mxu0 %v7890_v23  ;;  %v1690_v23 = vld [vmem:[#allocation11 + $0x690] sm:$0xff]  ;;  %v8104_v16 = vcombine.high %v2061_v4, %v2073_v5  ;;  %v8103_v44 = vcombine.low %v2061_v4, %v2073_v5  ;;  %v7628_v4 = vcombine.high %v1583_v54, %v1595_v57 }
 0x38e   : > { %v7721_v22 = vcombine.low %v1678_v7, %v1690_v23  ;;  %v1942_v5 = vld [vmem:[#allocation11 + $0xe70] sm:$0xff] }
 0x38f   : > { %6682 = vmatpush2.bf16.msra.mxu1 %v8271_v18  ;;  %v7722_v18 = vcombine.high %v1678_v7, %v1690_v23  ;;  %v1954_v7 = vld [vmem:[#allocation11 + $0xed0] sm:$0xff]  ;;  %v1559_v23 = vld [vmem:[#allocation11 + $0x278] sm:$0xff] }
 0x390   : > { %6723 = vmatpush2.bf16.msra.mxu0 %v7889_v63  ;;  %6683 = vmatprep.subr.bf16.mxu1 %v8248_v1  ;;  %v2038_v63 = vld [vmem:[#allocation11 + $0x1170] sm:$0xff] }
 0x391   : > { %6724 = vmatprep.subr.bf16.mxu0 %v7866_v19  ;;  %v2050_v1 = vld [vmem:[#allocation11 + $0x11d0] sm:$0xff]  ;;  %v1655_v19 = vld [vmem:[#allocation11 + $0x578] sm:$0xff] }
 0x392   : > { %v8081_v31 = vcombine.low %v2038_v63, %v2050_v1 }
 0x393   : > { %6684 = vmatpush2.bf16.msra.mxu1 %v8247_v24  ;;  %v8082_v24 = vcombine.high %v2038_v63, %v2050_v1  ;;  %v1918_v1 = vld [vmem:[#allocation11 + $0xdb0] sm:$0xff] }
 0x394   : > { %6725 = vmatpush2.bf16.msra.mxu0 %v7865_v25  ;;  %6685 = vmatprep.subr.bf16.mxu1 %v8224_v41  ;;  %v2273_v25 = vrot.slane %v9189_v51, %v9229_v17  ;;  %v7700_v41 = vcombine.high %v1655_v19, %v1667_v20  ;;  %v1619_v51 = vld [vmem:[#allocation11 + $0x458] sm:$0xff] }
 0x395   : > { %6726 = vmatprep.subr.bf16.mxu0 %v7842_v26  ;;  %v2014_v26 = vld [vmem:[#allocation11 + $0x10b0] sm:$0xff] }
 0x397   : > { %6686 = vmatpush2.bf16.msra.mxu1 %v8223_v33  ;;  %v1643_v33 = vld [vmem:[#allocation11 + $0x518] sm:$0xff] }
 0x398   : > { %6727 = vmatpush2.bf16.msra.mxu0 %v7841_v35  ;;  %6687 = vmatprep.subr.bf16.mxu1 %v8200_v36  ;;  %v7699_v35 = vcombine.low %v1655_v19, %v1667_v20  ;;  %v6413_v36 = vadd.f32 %v9219_v0, %v2273_v25  ;;  %v7676_v42 = vcombine.high %v1631_v32, %v1643_v33  ;;  %v1930_v19 = vld [vmem:[#allocation11 + $0xe10] sm:$0xff]  ;;  %v1535_v20 = vld [vmem:[#allocation11 + $0x1b8] sm:$0xff] }
 0x399   : > { %6728 = vmatprep.subr.bf16.mxu0 %v7818_v37  ;;  %v8058_v37 = vcombine.high %v2014_v26, %v2026_v29  ;;  %v8057_v0 = vcombine.low %v2014_v26, %v2026_v29  ;;  %v7675_v46 = vcombine.low %v1631_v32, %v1643_v33  ;;  %v7962_v25 = vcombine.high %v1918_v1, %v1930_v19  ;;  %v1894_v26 = vld [vmem:[#allocation11 + $0xcf0] sm:$0xff] }
 0x39a   : > { %v1906_v29 = vld [vmem:[#allocation11 + $0xd50] sm:$0xff]  ;;  %v7961_v32 = vcombine.low %v1918_v1, %v1930_v19  ;;  %v1787_v1 = vld [vmem:[#allocation11 + $0x998] sm:$0xff] }
 0x39b   : > { %6688 = vmatpush2.bf16.msra.mxu1 %v8199_v43  ;;  %v1607_v43 = vld [vmem:[#allocation11 + $0x3f8] sm:$0xff] }
 0x39c   : > { %6729 = vmatpush2.bf16.msra.mxu0 %v7817_v2  ;;  %6689 = vmatprep.subr.bf16.mxu1 %v8176_v34  ;;  %v6415_v2 = vadd.f32 %v9225_v8, %v2277_v30  ;;  %v7652_v8 = vcombine.high %v1607_v43, %v1619_v51  ;;  %v1511_v30 = vld [vmem:[#allocation11 + $0xf8] sm:$0xff] }
 0x39d   : > { %6730 = vmatprep.subr.bf16.mxu0 %v7794_v6 }
 0x39f   : > { %6690 = vmatpush2.bf16.msra.mxu1 %v8175_v49 }
 0x3a0   : > { %6731 = vmatpush2.bf16.msra.mxu0 %v7793_v50  ;;  %6691 = vmatprep.subr.bf16.mxu1 %v8152_v52  ;;  %v1966_v50 = vld [vmem:[#allocation11 + $0xf30] sm:$0xff] }
 0x3a1   : > { %6732 = vmatprep.subr.bf16.mxu0 %v7770_v53  ;;  %v1978_v52 = vld [vmem:[#allocation11 + $0xf90] sm:$0xff] }
 0x3a3   : > { %6692 = vmatpush2.bf16.msra.mxu1 %v8151_v60 }
 0x3a4   : > { %6733 = vmatpush2.bf16.msra.mxu0 %v7769_v61  ;;  %6693 = vmatprep.subr.bf16.mxu1 %v8128_v62  ;;  %v7651_v61 = vcombine.low %v1607_v43, %v1619_v51  ;;  %v8010_v62 = vcombine.high %v1966_v50, %v1978_v52 }
 0x3a5   : > { %6734 = vmatprep.subr.bf16.mxu0 %v7746_v3 }
 0x3a7   : > { %6694 = vmatpush2.bf16.msra.mxu1 %v8127_v9  ;;  %v1571_v9 = vld [vmem:[#allocation11 + $0x2d8] sm:$0xff] }
 0x3a8   : > { %6735 = vmatpush2.bf16.msra.mxu0 %v7745_v13  ;;  %6695 = vmatprep.subr.bf16.mxu1 %v8104_v16  ;;  %v8009_v13 = vcombine.low %v1966_v50, %v1978_v52  ;;  %v7627_v16 = vcombine.low %v1583_v54, %v1595_v57  ;;  %v7604_v63 = vcombine.high %v1559_v23, %v1571_v9  ;;  %v2206_v52 = vld [vmem:[#allocation11 + $0x16b0] sm:$0xff]  ;;  %v1823_v54 = vld [vmem:[#allocation11 + $0xab8] sm:$0xff] }
 0x3a9   : > { %6736 = vmatprep.subr.bf16.mxu0 %v7722_v18  ;;  %v7986_v18 = vcombine.high %v1942_v5, %v1954_v7  ;;  %v1835_v57 = vld [vmem:[#allocation11 + $0xb18] sm:$0xff] }
 0x3ab   : > { %6696 = vmatpush2.bf16.msra.mxu1 %v8103_v44  ;;  %v1547_v44 = vld [vmem:[#allocation11 + $0x218] sm:$0xff] }
 0x3ac   : > { %6737 = vmatpush2.bf16.msra.mxu0 %v7721_v22  ;;  %6747 = vmatprep.subr.bf16.mxu1 %v8082_v24  ;;  %v7985_v22 = vcombine.low %v1942_v5, %v1954_v7  ;;  %v7603_v24 = vcombine.low %v1559_v23, %v1571_v9  ;;  %v7579_v33 = vcombine.low %v1535_v20, %v1547_v44  ;;  %v1811_v5 = vld [vmem:[#allocation11 + $0xa58] sm:$0xff] }
 0x3ad   : > { %6788 = vmatprep.subr.bf16.mxu0 %v7700_v41  ;;  %v7580_v41 = vcombine.high %v1535_v20, %v1547_v44  ;;  %v7867_v23 = vcombine.low %v1823_v54, %v1835_v57 }
 0x3ae   : > { %v6453_v40 = vpop.f32.mrf.mxu1  ;;  %6698 = vmatmul.mubr.bf16.vlgmr.msra.gmra.mxu1 %v9167_v56 }
 0x3af   : > { %v6454_v34 = vadd.f32 %v6453_v40, %v6413_v36  ;;  %v9241_v6 = vpop.f32.mrf.mxu0  ;;  %6739 = vmatmul.mubr.bf16.vlgmr.msra.gmra.mxu0 %v9153_v28  ;;  %6748 = vmatpush1.bf16.msra.mxu1 %v8081_v31  ;;  %v1523_v31 = vld [vmem:[#allocation11 + $0x158] sm:$0xff] }
 0x3b0   : > { %6779 = vmatprep.mubr.bf16.mxu1 %v9165_v55  ;;  %v6455_v45 = vpop.f32.mrf.mxu1  ;;  %6789 = vmatpush1.bf16.msra.mxu0 %v7699_v35  ;;  %v7938_v35 = vcombine.high %v1894_v26, %v1906_v29  ;;  %v7556_v36 = vcombine.high %v1511_v30, %v1523_v31  ;;  %v1499_v40 = vld [vmem:[#allocation11 + $0x98] sm:$0xff]  ;;  %v7555_v43 = vcombine.low %v1511_v30, %v1523_v31 }
 0x3b1   : > { %7202 = vst [vmem:[%s9207_s8 + $0x20] sm:$0xff] %v6454_v34  ;;  %v6456_v48 = vadd.f32 %v6455_v45, %v6415_v2  ;;  %6820 = vmatprep.mubr.bf16.mxu0 %v9151_v27  ;;  %v9247_v49 = vpop.f32.mrf.mxu0  ;;  %6749 = vmatprep.subr.bf16.mxu1 %v8058_v37  ;;  %v1870_v37 = vld [vmem:[#allocation11 + $0xc30] sm:$0xff]  ;;  %v7532_v2 = vcombine.high %v1487_v39, %v1499_v40  ;;  %v1847_v45 = vld [vmem:[#allocation11 + $0xb78] sm:$0xff] }
 0x3b2   : > { %v6457_v53 = vpop.f32.mrf.mxu1  ;;  %6790 = vmatprep.subr.bf16.mxu0 %v7676_v42  ;;  %v7937_v42 = vcombine.low %v1894_v26, %v1906_v29  ;;  %v7914_v51 = vcombine.high %v1870_v37, %v1882_v38  ;;  %v2230_v34 = vld [vmem:[#allocation11 + $0x1770] sm:$0xff]  ;;  %v1763_v26 = vld [vmem:[#allocation11 + $0x8d8] sm:$0xff] }
 0x3b3   : > { %7203 = vst [vmem:[%s9207_s8 + $0x28] sm:$0xff] %v6456_v48  ;;  %v6498_v58 = vpop.f32.mrf.mxu0  ;;  %6750 = vmatpush1.bf16.msra.mxu1 %v8057_v0  ;;  %v2242_v0 = vld [vmem:[#allocation11 + $0x17d0] sm:$0xff]  ;;  %v7531_v48 = vcombine.low %v1487_v39, %v1499_v40 }
 0x3b4   : > { %v6458_v60 = vpop.f32.mrf.mxu1  ;;  %6791 = vmatpush1.bf16.msra.mxu0 %v7675_v46  ;;  %6751 = vmatprep.subr.bf16.mxu1 %v8034_v47  ;;  %v1859_v46 = vld [vmem:[#allocation11 + $0xbd8] sm:$0xff]  ;;  %v7913_v47 = vcombine.low %v1870_v37, %v1882_v38  ;;  %v2218_v53 = vld [vmem:[#allocation11 + $0x1710] sm:$0xff]  ;;  %v8273_v58 = vcombine.low %v2230_v34, %v2242_v0 }
 0x3b5   : > { %v6499_v3 = vpop.f32.mrf.mxu0  ;;  %6792 = vmatprep.subr.bf16.mxu0 %v7652_v8  ;;  %v8274_v8 = vcombine.high %v2230_v34, %v2242_v0  ;;  %v7892_v50 = vcombine.high %v1847_v45, %v1859_v46  ;;  %v8250_v60 = vcombine.high %v2206_v52, %v2218_v53  ;;  %v8249_v7 = vcombine.low %v2206_v52, %v2218_v53  ;;  %v1739_v37 = vld [vmem:[#allocation11 + $0x818] sm:$0xff] }
 0x3b6   : > { %v2194_v3 = vld [vmem:[#allocation11 + $0x1650] sm:$0xff]  ;;  %v1715_v34 = vld [vmem:[#allocation11 + $0x758] sm:$0xff] }
 0x3b7   : > { %6752 = vmatpush1.bf16.msra.mxu1 %v8033_v59  ;;  %v7891_v59 = vcombine.low %v1847_v45, %v1859_v46  ;;  %v1691_v52 = vld [vmem:[#allocation11 + $0x698] sm:$0xff] }
 0x3b8   : > { %6793 = vmatpush1.bf16.msra.mxu0 %v7651_v61  ;;  %6753 = vmatprep.subr.bf16.mxu1 %v8010_v62  ;;  %v7868_v61 = vcombine.high %v1823_v54, %v1835_v57  ;;  %v2182_v62 = vld [vmem:[#allocation11 + $0x15f0] sm:$0xff] }
 0x3b9   : > { %6794 = vmatprep.subr.bf16.mxu0 %v7628_v4  ;;  %v1799_v4 = vld [vmem:[#allocation11 + $0x9f8] sm:$0xff]  ;;  %v8226_v9 = vcombine.high %v2182_v62, %v2194_v3  ;;  %v8225_v19 = vcombine.low %v2182_v62, %v2194_v3  ;;  %v1656_v62 = vld [vmem:[#allocation11 + $0x580] sm:$0xff] }
 0x3ba   : > { %v7843_v20 = vcombine.low %v1799_v4, %v1811_v5  ;;  %v1668_v3 = vld [vmem:[#allocation11 + $0x5e0] sm:$0xff] }
 0x3bb   : > { %6754 = vmatpush1.bf16.msra.mxu1 %v8009_v13  ;;  %v7844_v13 = vcombine.high %v1799_v4, %v1811_v5  ;;  %v9254_v4 = vsub.s32 7, %v9103_v10 }
 0x3bc   : > { %6795 = vmatpush1.bf16.msra.mxu0 %v7627_v16  ;;  %6755 = vmatprep.subr.bf16.mxu1 %v7986_v18  ;;  %v2158_v16 = vld [vmem:[#allocation11 + $0x1530] sm:$0xff] }
 0x3bd   : > { %6796 = vmatprep.subr.bf16.mxu0 %v7604_v63  ;;  %v2170_v18 = vld [vmem:[#allocation11 + $0x1590] sm:$0xff]  ;;  %v1775_v63 = vld [vmem:[#allocation11 + $0x938] sm:$0xff] }
 0x3be   : > { %v8202_v44 = vcombine.high %v2158_v16, %v2170_v18  ;;  %v8201_v29 = vcombine.low %v2158_v16, %v2170_v18  ;;  %v7819_v30 = vcombine.low %v1775_v63, %v1787_v1  ;;  %v7702_v16 = vcombine.high %v1656_v62, %v1668_v3  ;;  %v2015_v18 = vld [vmem:[#allocation11 + $0x10b8] sm:$0xff] }
 0x3bf   : > { %6756 = vmatpush1.bf16.msra.mxu1 %v7985_v22  ;;  %v7820_v22 = vcombine.high %v1775_v63, %v1787_v1  ;;  %v2027_v63 = vld [vmem:[#allocation11 + $0x1118] sm:$0xff] }
 0x3c0   : > { %6797 = vmatpush1.bf16.msra.mxu0 %v7603_v24  ;;  %6757 = vmatprep.subr.bf16.mxu1 %v7962_v25  ;;  %v2134_v24 = vld [vmem:[#allocation11 + $0x1470] sm:$0xff] }
 0x3c1   : > { %6798 = vmatprep.subr.bf16.mxu0 %v7580_v41  ;;  %v2146_v25 = vld [vmem:[#allocation11 + $0x14d0] sm:$0xff]  ;;  %v1751_v41 = vld [vmem:[#allocation11 + $0x878] sm:$0xff] }
 0x3c2   : > { %v8178_v31 = vcombine.high %v2134_v24, %v2146_v25  ;;  %v8177_v38 = vcombine.low %v2134_v24, %v2146_v25  ;;  %v7795_v39 = vcombine.low %v1751_v41, %v1763_v26  ;;  %v8060_v24 = vcombine.high %v2015_v18, %v2027_v63  ;;  %v1991_v25 = vld [vmem:[#allocation11 + $0xff8] sm:$0xff] }
 0x3c3   : > { %6758 = vmatpush1.bf16.msra.mxu1 %v7961_v32  ;;  %v7796_v32 = vcombine.high %v1751_v41, %v1763_v26  ;;  %v2003_v41 = vld [vmem:[#allocation11 + $0x1058] sm:$0xff] }
 0x3c4   : > { %6799 = vmatpush1.bf16.msra.mxu0 %v7579_v33  ;;  %6759 = vmatprep.subr.bf16.mxu1 %v7938_v35  ;;  %v2110_v33 = vld [vmem:[#allocation11 + $0x13b0] sm:$0xff] }
 0x3c5   : > { %6800 = vmatprep.subr.bf16.mxu0 %v7556_v36  ;;  %v2122_v35 = vld [vmem:[#allocation11 + $0x1410] sm:$0xff]  ;;  %v1727_v36 = vld [vmem:[#allocation11 + $0x7b8] sm:$0xff] }
 0x3c6   : > { %v8154_v40 = vcombine.high %v2110_v33, %v2122_v35  ;;  %v8153_v0 = vcombine.low %v2110_v33, %v2122_v35  ;;  %v7771_v45 = vcombine.low %v1727_v36, %v1739_v37 }
 0x3c7   : > { %6760 = vmatpush1.bf16.msra.mxu1 %v7937_v42  ;;  %v7772_v42 = vcombine.high %v1727_v36, %v1739_v37 }
 0x3c8   : > { %6801 = vmatpush1.bf16.msra.mxu0 %v7555_v43  ;;  %6761 = vmatprep.subr.bf16.mxu1 %v7914_v51  ;;  %v2086_v43 = vld [vmem:[#allocation11 + $0x12f0] sm:$0xff] }
 0x3c9   : > { %6802 = vmatprep.subr.bf16.mxu0 %v7532_v2  ;;  %v2098_v51 = vld [vmem:[#allocation11 + $0x1350] sm:$0xff]  ;;  %v1703_v2 = vld [vmem:[#allocation11 + $0x6f8] sm:$0xff] }
 0x3ca   : > { %v8130_v46 = vcombine.high %v2086_v43, %v2098_v51  ;;  %v8129_v53 = vcombine.low %v2086_v43, %v2098_v51  ;;  %v7747_v54 = vcombine.low %v1703_v2, %v1715_v34  ;;  %v1979_v43 = vld [vmem:[#allocation11 + $0xf98] sm:$0xff] }
 0x3cb   : > { %6762 = vmatpush1.bf16.msra.mxu1 %v7913_v47  ;;  %v7748_v47 = vcombine.high %v1703_v2, %v1715_v34  ;;  %v1584_v2 = vld [vmem:[#allocation11 + $0x340] sm:$0xff] }
 0x3cc   : > { %6803 = vmatpush1.bf16.msra.mxu0 %v7531_v48  ;;  %6763 = vmatprep.subr.bf16.mxu1 %v8274_v8  ;;  %v2062_v48 = vld [vmem:[#allocation11 + $0x1230] sm:$0xff]  ;;  %v1596_v34 = vld [vmem:[#allocation11 + $0x3a0] sm:$0xff] }
 0x3cd   : > { %6804 = vmatprep.subr.bf16.mxu0 %v7892_v50  ;;  %v2074_v8 = vld [vmem:[#allocation11 + $0x1290] sm:$0xff]  ;;  %v1679_v50 = vld [vmem:[#allocation11 + $0x638] sm:$0xff] }
 0x3ce   : > { %v8106_v57 = vcombine.high %v2062_v48, %v2074_v8  ;;  %v8105_v5 = vcombine.low %v2062_v48, %v2074_v8 }
 0x3cf   : > { %6764 = vmatpush2.bf16.msra.mxu1 %v8273_v58  ;;  %v9251_v58 = vsub.s32 6, %v9103_v10  ;;  %v1644_v10 = vld [vmem:[#allocation11 + $0x520] sm:$0xff] }
 0x3d0   : > { %6805 = vmatpush2.bf16.msra.mxu0 %v7891_v59  ;;  %6765 = vmatprep.subr.bf16.mxu1 %v8250_v60  ;;  %v7724_v59 = vcombine.high %v1679_v50, %v1691_v52  ;;  %v2039_v60 = vld [vmem:[#allocation11 + $0x1178] sm:$0xff] }
 0x3d1   : > { %6806 = vmatprep.subr.bf16.mxu0 %v7868_v61  ;;  %v2051_v61 = vld [vmem:[#allocation11 + $0x11d8] sm:$0xff] }
 0x3d3   : > { %6766 = vmatpush2.bf16.msra.mxu1 %v8249_v7  ;;  %v7723_v7 = vcombine.low %v1679_v50, %v1691_v52  ;;  %v7630_v50 = vcombine.high %v1584_v2, %v1596_v34  ;;  %v1943_v52 = vld [vmem:[#allocation11 + $0xe78] sm:$0xff] }
 0x3d4   : > { %6807 = vmatpush2.bf16.msra.mxu0 %v7867_v23  ;;  %6767 = vmatprep.subr.bf16.mxu1 %v8226_v9  ;;  %v8084_v23 = vcombine.high %v2039_v60, %v2051_v61  ;;  %v8600_v9 = vld [vmem:[#allocation13] sm:$0xff] }
 0x3d5   : > { %6808 = vmatprep.subr.bf16.mxu0 %v7844_v13  ;;  %v2281_v13 = vrot.slane %v8600_v9, %v9251_v58  ;;  %v2285_v1 = vrot.slane %v8600_v9, %v9254_v4 }
 0x3d7   : > { %6768 = vmatpush2.bf16.msra.mxu1 %v8225_v19  ;;  %v8083_v19 = vcombine.low %v2039_v60, %v2051_v61  ;;  %v7629_v60 = vcombine.low %v1584_v2, %v1596_v34  ;;  %v2219_v2 = vld [vmem:[#allocation11 + $0x1718] sm:$0xff]  ;;  %v1824_v34 = vld [vmem:[#allocation11 + $0xac0] sm:$0xff] }
 0x3d8   : > { %6809 = vmatpush2.bf16.msra.mxu0 %v7843_v20  ;;  %6769 = vmatprep.subr.bf16.mxu1 %v8202_v44  ;;  %v1632_v20 = vld [vmem:[#allocation11 + $0x4c0] sm:$0xff]  ;;  %v7701_v44 = vcombine.low %v1656_v62, %v1668_v3  ;;  %v1919_v3 = vld [vmem:[#allocation11 + $0xdb8] sm:$0xff] }
 0x3d9   : > { %6810 = vmatprep.subr.bf16.mxu0 %v7820_v22  ;;  %v6495_v22 = vadd.f32 %v9241_v6, %v2281_v13  ;;  %v8059_v6 = vcombine.low %v2015_v18, %v2027_v63  ;;  %v7677_v37 = vcombine.low %v1632_v20, %v1644_v10  ;;  %v1895_v63 = vld [vmem:[#allocation11 + $0xcf8] sm:$0xff] }
 0x3db   : > { %6770 = vmatpush2.bf16.msra.mxu1 %v8201_v29  ;;  %v7678_v29 = vcombine.high %v1632_v20, %v1644_v10  ;;  %v1524_v20 = vld [vmem:[#allocation11 + $0x160] sm:$0xff] }
 0x3dc   : > { %6811 = vmatpush2.bf16.msra.mxu0 %v7819_v30  ;;  %6771 = vmatprep.subr.bf16.mxu1 %v8178_v31  ;;  %v1608_v30 = vld [vmem:[#allocation11 + $0x400] sm:$0xff] }
 0x3dd   : > { %6812 = vmatprep.subr.bf16.mxu0 %v7796_v32  ;;  %v1620_v31 = vld [vmem:[#allocation11 + $0x460] sm:$0xff]  ;;  %v6497_v32 = vadd.f32 %v9247_v49, %v2285_v1  ;;  %v1907_v1 = vld [vmem:[#allocation11 + $0xd58] sm:$0xff] }
 0x3de   : > { %v7654_v49 = vcombine.high %v1608_v30, %v1620_v31 }
 0x3df   : > { %6772 = vmatpush2.bf16.msra.mxu1 %v8177_v38  ;;  %v8036_v38 = vcombine.high %v1991_v25, %v2003_v41 }
 0x3e0   : > { %6813 = vmatpush2.bf16.msra.mxu0 %v7795_v39  ;;  %6773 = vmatprep.subr.bf16.mxu1 %v8154_v40 }
 0x3e1   : > { %6814 = vmatprep.subr.bf16.mxu0 %v7772_v42  ;;  %v1967_v42 = vld [vmem:[#allocation11 + $0xf38] sm:$0xff] }
 0x3e2   : > { %v8012_v48 = vcombine.high %v1967_v42, %v1979_v43 }
 0x3e3   : > { %6774 = vmatpush2.bf16.msra.mxu1 %v8153_v0 }
 0x3e4   : > { %6815 = vmatpush2.bf16.msra.mxu0 %v7771_v45  ;;  %6775 = vmatprep.subr.bf16.mxu1 %v8130_v46  ;;  %v8035_v45 = vcombine.low %v1991_v25, %v2003_v41  ;;  %v1871_v25 = vld [vmem:[#allocation11 + $0xc38] sm:$0xff] }
 0x3e5   : > { %6816 = vmatprep.subr.bf16.mxu0 %v7748_v47  ;;  %v7653_v47 = vcombine.low %v1608_v30, %v1620_v31  ;;  %v1883_v41 = vld [vmem:[#allocation11 + $0xc98] sm:$0xff]  ;;  %v7939_v30 = vcombine.low %v1895_v63, %v1907_v1 }
 0x3e7   : > { %6776 = vmatpush2.bf16.msra.mxu1 %v8129_v53  ;;  %v1955_v53 = vld [vmem:[#allocation11 + $0xed8] sm:$0xff] }
 0x3e8   : > { %6817 = vmatpush2.bf16.msra.mxu0 %v7747_v54  ;;  %6777 = vmatprep.subr.bf16.mxu1 %v8106_v57  ;;  %v1560_v54 = vld [vmem:[#allocation11 + $0x280] sm:$0xff]  ;;  %v7988_v61 = vcombine.high %v1943_v52, %v1955_v53  ;;  %v7987_v9 = vcombine.low %v1943_v52, %v1955_v53 }
 0x3e9   : > { %6818 = vmatprep.subr.bf16.mxu0 %v7724_v59  ;;  %v1572_v57 = vld [vmem:[#allocation11 + $0x2e0] sm:$0xff]  ;;  %v8011_v59 = vcombine.low %v1967_v42, %v1979_v43 }
 0x3ea   : > { %v7606_v62 = vcombine.high %v1560_v54, %v1572_v57  ;;  %v7605_v13 = vcombine.low %v1560_v54, %v1572_v57  ;;  %v1800_v52 = vld [vmem:[#allocation11 + $0xa00] sm:$0xff] }
 0x3eb   : > { %6778 = vmatpush2.bf16.msra.mxu1 %v8105_v5  ;;  %v1931_v5 = vld [vmem:[#allocation11 + $0xe18] sm:$0xff]  ;;  %v1812_v53 = vld [vmem:[#allocation11 + $0xa60] sm:$0xff] }
 0x3ec   : > { %6819 = vmatpush2.bf16.msra.mxu0 %v7723_v7  ;;  %6829 = vmatprep.subr.bf16.mxu1 %v8084_v23  ;;  %v1536_v7 = vld [vmem:[#allocation11 + $0x1c0] sm:$0xff]  ;;  %v7963_v10 = vcombine.low %v1919_v3, %v1931_v5 }
 0x3ed   : > { %6870 = vmatprep.subr.bf16.mxu0 %v7702_v16  ;;  %v1548_v23 = vld [vmem:[#allocation11 + $0x220] sm:$0xff]  ;;  %v7964_v16 = vcombine.high %v1919_v3, %v1931_v5 }
 0x3ee   : > { %v6535_v26 = vpop.f32.mrf.mxu1  ;;  %6780 = vmatmul.mubr.bf16.vlgmr.msra.gmra.mxu1 %v9167_v56  ;;  %v7582_v18 = vcombine.high %v1536_v7, %v1548_v23  ;;  %v1776_v3 = vld [vmem:[#allocation11 + $0x940] sm:$0xff] }
 0x3ef   : > { %v6536_v33 = vadd.f32 %v6535_v26, %v6495_v22  ;;  %v9261_v35 = vpop.f32.mrf.mxu0  ;;  %6821 = vmatmul.mubr.bf16.vlgmr.msra.gmra.mxu0 %v9153_v28  ;;  %6830 = vmatpush1.bf16.msra.mxu1 %v8083_v19  ;;  %v1512_v19 = vld [vmem:[#allocation11 + $0x100] sm:$0xff]  ;;  %v7940_v22 = vcombine.high %v1895_v63, %v1907_v1 }
 0x3f0   : > { %6861 = vmatprep.mubr.bf16.mxu1 %v9165_v55  ;;  %v6537_v36 = vpop.f32.mrf.mxu1  ;;  %6871 = vmatpush1.bf16.msra.mxu0 %v7701_v44  ;;  %v7581_v44 = vcombine.low %v1536_v7, %v1548_v23  ;;  %v1488_v26 = vld [vmem:[#allocation11 + $0x40] sm:$0xff]  ;;  %v7557_v31 = vcombine.low %v1512_v19, %v1524_v20  ;;  %v7845_v23 = vcombine.low %v1800_v52, %v1812_v53 }
 0x3f1   : > { %7204 = vst [vmem:[%s9207_s8 + $0x30] sm:$0xff] %v6536_v33  ;;  %v6538_v39 = vadd.f32 %v6537_v36, %v6497_v32  ;;  %6902 = vmatprep.mubr.bf16.mxu0 %v9151_v27  ;;  %v9267_v40 = vpop.f32.mrf.mxu0  ;;  %6831 = vmatprep.subr.bf16.mxu1 %v8060_v24  ;;  %v7558_v24 = vcombine.high %v1512_v19, %v1524_v20  ;;  %v2243_v36 = vld [vmem:[#allocation11 + $0x17d8] sm:$0xff]  ;;  %v1788_v5 = vld [vmem:[#allocation11 + $0x9a0] sm:$0xff] }
 0x3f2   : > { %v6539_v51 = vpop.f32.mrf.mxu1  ;;  %6872 = vmatprep.subr.bf16.mxu0 %v7678_v29  ;;  %v1500_v29 = vld [vmem:[#allocation11 + $0xa0] sm:$0xff]  ;;  %v7916_v32 = vcombine.high %v1871_v25, %v1883_v41  ;;  %v7821_v20 = vcombine.low %v1776_v3, %v1788_v5 }
 0x3f3   : > { %7205 = vst [vmem:[%s9207_s8 + $0x38] sm:$0xff] %v6538_v39  ;;  %v6580_v0 = vpop.f32.mrf.mxu0  ;;  %6832 = vmatpush1.bf16.msra.mxu1 %v8059_v6  ;;  %v7534_v33 = vcombine.high %v1488_v26, %v1500_v29  ;;  %v2231_v6 = vld [vmem:[#allocation11 + $0x1778] sm:$0xff]  ;;  %v7915_v39 = vcombine.low %v1871_v25, %v1883_v41  ;;  %v1752_v63 = vld [vmem:[#allocation11 + $0x880] sm:$0xff] }
 0x3f4   : > { %v6540_v46 = vpop.f32.mrf.mxu1  ;;  %6873 = vmatpush1.bf16.msra.mxu0 %v7677_v37  ;;  %6833 = vmatprep.subr.bf16.mxu1 %v8036_v38  ;;  %v1848_v37 = vld [vmem:[#allocation11 + $0xb80] sm:$0xff]  ;;  %v8276_v42 = vcombine.high %v2231_v6, %v2243_v36  ;;  %v2207_v51 = vld [vmem:[#allocation11 + $0x16b8] sm:$0xff] }
 0x3f5   : > { %v6581_v8 = vpop.f32.mrf.mxu0  ;;  %6874 = vmatprep.subr.bf16.mxu0 %v7654_v49  ;;  %v1860_v38 = vld [vmem:[#allocation11 + $0xbe0] sm:$0xff]  ;;  %v7533_v49 = vcombine.low %v1488_v26, %v1500_v29  ;;  %v8251_v54 = vcombine.low %v2207_v51, %v2219_v2 }
 0x3f6   : > { %v7894_v43 = vcombine.high %v1848_v37, %v1860_v38  ;;  %v1836_v0 = vld [vmem:[#allocation11 + $0xb20] sm:$0xff]  ;;  %v7893_v46 = vcombine.low %v1848_v37, %v1860_v38  ;;  %v2183_v8 = vld [vmem:[#allocation11 + $0x15f8] sm:$0xff] }
 0x3f7   : > { %6834 = vmatpush1.bf16.msra.mxu1 %v8035_v45  ;;  %v8275_v45 = vcombine.low %v2231_v6, %v2243_v36  ;;  %v7869_v57 = vcombine.low %v1824_v34, %v1836_v0  ;;  %v1764_v1 = vld [vmem:[#allocation11 + $0x8e0] sm:$0xff] }
 0x3f8   : > { %6875 = vmatpush1.bf16.msra.mxu0 %v7653_v47  ;;  %6835 = vmatprep.subr.bf16.mxu1 %v8012_v48  ;;  %v8252_v47 = vcombine.high %v2207_v51, %v2219_v2  ;;  %v7870_v48 = vcombine.high %v1824_v34, %v1836_v0  ;;  %v1728_v25 = vld [vmem:[#allocation11 + $0x7c0] sm:$0xff]  ;;  %v7797_v29 = vcombine.low %v1752_v63, %v1764_v1 }
 0x3f9   : > { %6876 = vmatprep.subr.bf16.mxu0 %v7630_v50  ;;  %v2195_v50 = vld [vmem:[#allocation11 + $0x1658] sm:$0xff]  ;;  %v1740_v41 = vld [vmem:[#allocation11 + $0x820] sm:$0xff] }
 0x3fa   : > { %v8227_v7 = vcombine.low %v2183_v8, %v2195_v50  ;;  %v1704_v6 = vld [vmem:[#allocation11 + $0x700] sm:$0xff]  ;;  %v7773_v38 = vcombine.low %v1728_v25, %v1740_v41 }
 0x3fb   : > { %6836 = vmatpush1.bf16.msra.mxu1 %v8011_v59  ;;  %v8228_v59 = vcombine.high %v2183_v8, %v2195_v50  ;;  %v1716_v36 = vld [vmem:[#allocation11 + $0x760] sm:$0xff]  ;;  %v9270_v8 = vld [vmem:[#allocation13 + $0x8] sm:$0xff] }
 0x3fc   : > { %6877 = vmatpush1.bf16.msra.mxu0 %v7629_v60  ;;  %6837 = vmatprep.subr.bf16.mxu1 %v7988_v61  ;;  %v7846_v60 = vcombine.high %v1800_v52, %v1812_v53  ;;  %v2159_v61 = vld [vmem:[#allocation11 + $0x1538] sm:$0xff]  ;;  %v1680_v51 = vld [vmem:[#allocation11 + $0x640] sm:$0xff]  ;;  %v7749_v0 = vcombine.low %v1704_v6, %v1716_v36  ;;  %v1657_v50 = vld [vmem:[#allocation11 + $0x588] sm:$0xff] }
 0x3fd   : > { %6878 = vmatprep.subr.bf16.mxu0 %v7606_v62  ;;  %v2171_v62 = vld [vmem:[#allocation11 + $0x1598] sm:$0xff]  ;;  %v1692_v2 = vld [vmem:[#allocation11 + $0x6a0] sm:$0xff]  ;;  %v1669_v52 = vld [vmem:[#allocation11 + $0x5e8] sm:$0xff] }
 0x3fe   : > { %v8203_v19 = vcombine.low %v2159_v61, %v2171_v62 }
 0x3ff   : > { %6838 = vmatpush1.bf16.msra.mxu1 %v7987_v9  ;;  %v8204_v9 = vcombine.high %v2159_v61, %v2171_v62  ;;  %v2016_v61 = vld [vmem:[#allocation11 + $0x10c0] sm:$0xff] }
 0x400   : > { %6879 = vmatpush1.bf16.msra.mxu0 %v7605_v13  ;;  %6839 = vmatprep.subr.bf16.mxu1 %v7964_v16  ;;  %v7822_v13 = vcombine.high %v1776_v3, %v1788_v5  ;;  %v2135_v16 = vld [vmem:[#allocation11 + $0x1478] sm:$0xff]  ;;  %v2028_v62 = vld [vmem:[#allocation11 + $0x1120] sm:$0xff]  ;;  %v2293_v3 = vrot.slane %v9270_v8, %v9112_v14 }
 0x401   : > { %6880 = vmatprep.subr.bf16.mxu0 %v7582_v18  ;;  %v2147_v18 = vld [vmem:[#allocation11 + $0x14d8] sm:$0xff] }
 0x402   : > { %v8179_v26 = vcombine.low %v2135_v16, %v2147_v18 }
 0x403   : > { %6840 = vmatpush1.bf16.msra.mxu1 %v7963_v10  ;;  %v8180_v10 = vcombine.high %v2135_v16, %v2147_v18  ;;  %v8062_v16 = vcombine.high %v2016_v61, %v2028_v62  ;;  %v1992_v18 = vld [vmem:[#allocation11 + $0x1000] sm:$0xff] }
 0x404   : > { %6881 = vmatpush1.bf16.msra.mxu0 %v7581_v44  ;;  %6841 = vmatprep.subr.bf16.mxu1 %v7940_v22  ;;  %v7798_v44 = vcombine.high %v1752_v63, %v1764_v1  ;;  %v2111_v22 = vld [vmem:[#allocation11 + $0x13b8] sm:$0xff]  ;;  %v2004_v63 = vld [vmem:[#allocation11 + $0x1060] sm:$0xff] }
 0x405   : > { %6882 = vmatprep.subr.bf16.mxu0 %v7558_v24  ;;  %v2123_v24 = vld [vmem:[#allocation11 + $0x1418] sm:$0xff] }
 0x406   : > { %v8155_v37 = vcombine.low %v2111_v22, %v2123_v24 }
 0x407   : > { %6842 = vmatpush1.bf16.msra.mxu1 %v7939_v30  ;;  %v8156_v30 = vcombine.high %v2111_v22, %v2123_v24 }
 0x408   : > { %6883 = vmatpush1.bf16.msra.mxu0 %v7557_v31  ;;  %6843 = vmatprep.subr.bf16.mxu1 %v7916_v32  ;;  %v7774_v31 = vcombine.high %v1728_v25, %v1740_v41  ;;  %v2087_v32 = vld [vmem:[#allocation11 + $0x12f8] sm:$0xff] }
 0x409   : > { %6884 = vmatprep.subr.bf16.mxu0 %v7534_v33  ;;  %v2099_v33 = vld [vmem:[#allocation11 + $0x1358] sm:$0xff] }
 0x40a   : > { %v8131_v34 = vcombine.low %v2087_v32, %v2099_v33 }
 0x40b   : > { %6844 = vmatpush1.bf16.msra.mxu1 %v7915_v39  ;;  %v8132_v39 = vcombine.high %v2087_v32, %v2099_v33  ;;  %v1980_v32 = vld [vmem:[#allocation11 + $0xfa0] sm:$0xff] }
 0x40c   : > { %6885 = vmatpush1.bf16.msra.mxu0 %v7533_v49  ;;  %6845 = vmatprep.subr.bf16.mxu1 %v8276_v42  ;;  %v7750_v49 = vcombine.high %v1704_v6, %v1716_v36  ;;  %v2063_v42 = vld [vmem:[#allocation11 + $0x1238] sm:$0xff]  ;;  %v1585_v6 = vld [vmem:[#allocation11 + $0x348] sm:$0xff] }
 0x40d   : > { %6886 = vmatprep.subr.bf16.mxu0 %v7894_v43  ;;  %v2075_v43 = vld [vmem:[#allocation11 + $0x1298] sm:$0xff]  ;;  %v1597_v36 = vld [vmem:[#allocation11 + $0x3a8] sm:$0xff] }
 0x40e   : > { %v8107_v53 = vcombine.low %v2063_v42, %v2075_v43 }
 0x40f   : > { %6846 = vmatpush2.bf16.msra.mxu1 %v8275_v45  ;;  %v8108_v45 = vcombine.high %v2063_v42, %v2075_v43 }
 0x410   : > { %6887 = vmatpush2.bf16.msra.mxu0 %v7893_v46  ;;  %6847 = vmatprep.subr.bf16.mxu1 %v8252_v47  ;;  %v7726_v46 = vcombine.high %v1680_v51, %v1692_v2  ;;  %v2040_v47 = vld [vmem:[#allocation11 + $0x1180] sm:$0xff] }
 0x411   : > { %6888 = vmatprep.subr.bf16.mxu0 %v7870_v48  ;;  %v2052_v48 = vld [vmem:[#allocation11 + $0x11e0] sm:$0xff] }
 0x412   : > { %v8085_v5 = vcombine.low %v2040_v47, %v2052_v48 }
 0x413   : > { %6848 = vmatpush2.bf16.msra.mxu1 %v8251_v54  ;;  %v7725_v54 = vcombine.low %v1680_v51, %v1692_v2  ;;  %v7632_v51 = vcombine.high %v1585_v6, %v1597_v36  ;;  %v1944_v2 = vld [vmem:[#allocation11 + $0xe80] sm:$0xff] }
 0x414   : > { %6889 = vmatpush2.bf16.msra.mxu0 %v7869_v57  ;;  %6849 = vmatprep.subr.bf16.mxu1 %v8228_v59  ;;  %v8086_v57 = vcombine.high %v2040_v47, %v2052_v48  ;;  %v2289_v59 = vrot.slane %v9270_v8, %v9106_v11  ;;  %v7631_v47 = vcombine.low %v1585_v6, %v1597_v36  ;;  %v2208_v6 = vld [vmem:[#allocation11 + $0x16c0] sm:$0xff] }
 0x415   : > { %6890 = vmatprep.subr.bf16.mxu0 %v7846_v60  ;;  %v7704_v60 = vcombine.high %v1657_v50, %v1669_v52  ;;  %v2220_v36 = vld [vmem:[#allocation11 + $0x1720] sm:$0xff] }
 0x417   : > { %6850 = vmatpush2.bf16.msra.mxu1 %v8227_v7  ;;  %v1633_v7 = vld [vmem:[#allocation11 + $0x4c8] sm:$0xff] }
 0x418   : > { %6891 = vmatpush2.bf16.msra.mxu0 %v7845_v23  ;;  %6851 = vmatprep.subr.bf16.mxu1 %v8204_v9  ;;  %v1645_v23 = vld [vmem:[#allocation11 + $0x528] sm:$0xff]  ;;  %v7703_v9 = vcombine.low %v1657_v50, %v1669_v52  ;;  %v1920_v52 = vld [vmem:[#allocation11 + $0xdc0] sm:$0xff] }
 0x419   : > { %6892 = vmatprep.subr.bf16.mxu0 %v7822_v13  ;;  %v6577_v13 = vadd.f32 %v9261_v35, %v2289_v59  ;;  %v8061_v35 = vcombine.low %v2016_v61, %v2028_v62  ;;  %v7679_v41 = vcombine.low %v1633_v7, %v1645_v23 }
 0x41b   : > { %6852 = vmatpush2.bf16.msra.mxu1 %v8203_v19  ;;  %v7680_v19 = vcombine.high %v1633_v7, %v1645_v23  ;;  %v1513_v7 = vld [vmem:[#allocation11 + $0x108] sm:$0xff] }
 0x41c   : > { %6893 = vmatpush2.bf16.msra.mxu0 %v7821_v20  ;;  %6853 = vmatprep.subr.bf16.mxu1 %v8180_v10  ;;  %v1609_v20 = vld [vmem:[#allocation11 + $0x408] sm:$0xff] }
 0x41d   : > { %6894 = vmatprep.subr.bf16.mxu0 %v7798_v44  ;;  %v1621_v10 = vld [vmem:[#allocation11 + $0x468] sm:$0xff]  ;;  %v6579_v44 = vadd.f32 %v9267_v40, %v2293_v3  ;;  %v1896_v3 = vld [vmem:[#allocation11 + $0xd00] sm:$0xff] }
 0x41e   : > { %v7656_v40 = vcombine.high %v1609_v20, %v1621_v10  ;;  %v1525_v23 = vld [vmem:[#allocation11 + $0x168] sm:$0xff] }
 0x41f   : > { %6854 = vmatpush2.bf16.msra.mxu1 %v8179_v26  ;;  %v8038_v26 = vcombine.high %v1992_v18, %v2004_v63 }
 0x420   : > { %6895 = vmatpush2.bf16.msra.mxu0 %v7797_v29  ;;  %6855 = vmatprep.subr.bf16.mxu1 %v8156_v30 }
 0x421   : > { %6896 = vmatprep.subr.bf16.mxu0 %v7774_v31  ;;  %v1968_v31 = vld [vmem:[#allocation11 + $0xf40] sm:$0xff] }
 0x422   : > { %v8014_v42 = vcombine.high %v1968_v31, %v1980_v32 }
 0x423   : > { %6856 = vmatpush2.bf16.msra.mxu1 %v8155_v37 }
 0x424   : > { %6897 = vmatpush2.bf16.msra.mxu0 %v7773_v38  ;;  %6857 = vmatprep.subr.bf16.mxu1 %v8132_v39  ;;  %v8037_v38 = vcombine.low %v1992_v18, %v2004_v63  ;;  %v7560_v18 = vcombine.high %v1513_v7, %v1525_v23  ;;  %v1872_v63 = vld [vmem:[#allocation11 + $0xc40] sm:$0xff] }
 0x425   : > { %6898 = vmatprep.subr.bf16.mxu0 %v7750_v49  ;;  %v7655_v49 = vcombine.low %v1609_v20, %v1621_v10  ;;  %v1501_v20 = vld [vmem:[#allocation11 + $0xa8] sm:$0xff] }
 0x427   : > { %6858 = vmatpush2.bf16.msra.mxu1 %v8131_v34  ;;  %v1956_v34 = vld [vmem:[#allocation11 + $0xee0] sm:$0xff] }
 0x428   : > { %6899 = vmatpush2.bf16.msra.mxu0 %v7749_v0  ;;  %6859 = vmatprep.subr.bf16.mxu1 %v8108_v45  ;;  %v1561_v0 = vld [vmem:[#allocation11 + $0x288] sm:$0xff]  ;;  %v7990_v48 = vcombine.high %v1944_v2, %v1956_v34  ;;  %v7989_v59 = vcombine.low %v1944_v2, %v1956_v34  ;;  %v2196_v2 = vld [vmem:[#allocation11 + $0x1660] sm:$0xff] }
 0x429   : > { %6900 = vmatprep.subr.bf16.mxu0 %v7726_v46  ;;  %v1573_v45 = vld [vmem:[#allocation11 + $0x2e8] sm:$0xff]  ;;  %v8013_v46 = vcombine.low %v1968_v31, %v1980_v32 }
 0x42a   : > { %v7608_v50 = vcombine.high %v1561_v0, %v1573_v45  ;;  %v1801_v34 = vld [vmem:[#allocation11 + $0xa08] sm:$0xff] }
 0x42b   : > { %6860 = vmatpush2.bf16.msra.mxu1 %v8107_v53  ;;  %v1932_v53 = vld [vmem:[#allocation11 + $0xe20] sm:$0xff] }
 0x42c   : > { %6901 = vmatpush2.bf16.msra.mxu0 %v7725_v54  ;;  %6911 = vmatprep.subr.bf16.mxu1 %v8086_v57  ;;  %v1537_v54 = vld [vmem:[#allocation11 + $0x1c8] sm:$0xff]  ;;  %v7966_v61 = vcombine.high %v1920_v52, %v1932_v53 }
 0x42d   : > { %6952 = vmatprep.subr.bf16.mxu0 %v7704_v60  ;;  %v1549_v57 = vld [vmem:[#allocation11 + $0x228] sm:$0xff]  ;;  %v7607_v60 = vcombine.low %v1561_v0, %v1573_v45  ;;  %v8253_v45 = vcombine.low %v2208_v6, %v2220_v36 }
 0x42e   : > { %v6617_v1 = vpop.f32.mrf.mxu1  ;;  %6862 = vmatmul.mubr.bf16.vlgmr.msra.gmra.mxu1 %v9167_v56  ;;  %v7584_v62 = vcombine.high %v1537_v54, %v1549_v57  ;;  %v1813_v0 = vld [vmem:[#allocation11 + $0xa68] sm:$0xff] }
 0x42f   : > { %v6618_v22 = vadd.f32 %v6617_v1, %v6577_v13  ;;  %v9279_v24 = vpop.f32.mrf.mxu0  ;;  %6903 = vmatmul.mubr.bf16.vlgmr.msra.gmra.mxu0 %v9153_v28  ;;  %6912 = vmatpush1.bf16.msra.mxu1 %v8085_v5  ;;  %v1908_v5 = vld [vmem:[#allocation11 + $0xd60] sm:$0xff]  ;;  %v7583_v13 = vcombine.low %v1537_v54, %v1549_v57  ;;  %v1789_v54 = vld [vmem:[#allocation11 + $0x9a8] sm:$0xff] }
 0x430   : > { %6943 = vmatprep.mubr.bf16.mxu1 %v9165_v55  ;;  %v6619_v25 = vpop.f32.mrf.mxu1  ;;  %6953 = vmatpush1.bf16.msra.mxu0 %v7703_v9  ;;  %v7965_v9 = vcombine.low %v1920_v52, %v1932_v53  ;;  %v1884_v1 = vld [vmem:[#allocation11 + $0xca0] sm:$0xff]  ;;  %v7941_v10 = vcombine.low %v1896_v3, %v1908_v5  ;;  %v1777_v53 = vld [vmem:[#allocation11 + $0x948] sm:$0xff] }
 0x431   : > { %7206 = vst [vmem:[%s9207_s8 + $0x40] sm:$0xff] %v6618_v22  ;;  %v6620_v29 = vadd.f32 %v6619_v25, %v6579_v44  ;;  %6984 = vmatprep.mubr.bf16.mxu0 %v9151_v27  ;;  %v9285_v30 = vpop.f32.mrf.mxu0  ;;  %6913 = vmatprep.subr.bf16.mxu1 %v8062_v16  ;;  %v7942_v16 = vcombine.high %v1896_v3, %v1908_v5  ;;  %v2232_v25 = vld [vmem:[#allocation11 + $0x1780] sm:$0xff]  ;;  %v1753_v5 = vld [vmem:[#allocation11 + $0x888] sm:$0xff] }
 0x432   : > { %v6621_v33 = vpop.f32.mrf.mxu1  ;;  %6954 = vmatprep.subr.bf16.mxu0 %v7680_v19  ;;  %v1489_v19 = vld [vmem:[#allocation11 + $0x48] sm:$0xff]  ;;  %v7559_v44 = vcombine.low %v1513_v7, %v1525_v23  ;;  %v7918_v22 = vcombine.high %v1872_v63, %v1884_v1  ;;  %v2172_v52 = vld [vmem:[#allocation11 + $0x15a0] sm:$0xff] }
 0x433   : > { %7207 = vst [vmem:[%s9207_s8 + $0x48] sm:$0xff] %v6620_v29  ;;  %v6662_v37 = vpop.f32.mrf.mxu0  ;;  %6914 = vmatpush1.bf16.msra.mxu1 %v8061_v35  ;;  %v7536_v35 = vcombine.high %v1489_v19, %v1501_v20  ;;  %v1861_v29 = vld [vmem:[#allocation11 + $0xbe8] sm:$0xff]  ;;  %v7535_v31 = vcombine.low %v1489_v19, %v1501_v20  ;;  %v2148_v3 = vld [vmem:[#allocation11 + $0x14e0] sm:$0xff] }
 0x434   : > { %v6622_v39 = vpop.f32.mrf.mxu1  ;;  %6955 = vmatpush1.bf16.msra.mxu0 %v7679_v41  ;;  %6915 = vmatprep.subr.bf16.mxu1 %v8038_v26  ;;  %v2244_v41 = vld [vmem:[#allocation11 + $0x17e0] sm:$0xff]  ;;  %v1849_v26 = vld [vmem:[#allocation11 + $0xb88] sm:$0xff] }
 0x435   : > { %v6663_v43 = vpop.f32.mrf.mxu0  ;;  %6956 = vmatprep.subr.bf16.mxu0 %v7656_v40  ;;  %v7917_v40 = vcombine.low %v1872_v63, %v1884_v1  ;;  %v8278_v32 = vcombine.high %v2232_v25, %v2244_v41  ;;  %v7896_v33 = vcombine.high %v1849_v26, %v1861_v29  ;;  %v1825_v37 = vld [vmem:[#allocation11 + $0xac8] sm:$0xff]  ;;  %v8277_v39 = vcombine.low %v2232_v25, %v2244_v41  ;;  %v2124_v63 = vld [vmem:[#allocation11 + $0x1420] sm:$0xff] }
 0x436   : > { %v1765_v7 = vld [vmem:[#allocation11 + $0x8e8] sm:$0xff]  ;;  %v2100_v25 = vld [vmem:[#allocation11 + $0x1360] sm:$0xff] }
 0x437   : > { %6916 = vmatpush1.bf16.msra.mxu1 %v8037_v38  ;;  %v1837_v38 = vld [vmem:[#allocation11 + $0xb28] sm:$0xff] }
 0x438   : > { %6957 = vmatpush1.bf16.msra.mxu0 %v7655_v49  ;;  %6917 = vmatprep.subr.bf16.mxu1 %v8014_v42  ;;  %v7895_v49 = vcombine.low %v1849_v26, %v1861_v29  ;;  %v8254_v42 = vcombine.high %v2208_v6, %v2220_v36  ;;  %v7872_v43 = vcombine.high %v1825_v37, %v1837_v38  ;;  %v1729_v1 = vld [vmem:[#allocation11 + $0x7c8] sm:$0xff]  ;;  %v2076_v6 = vld [vmem:[#allocation11 + $0x12a0] sm:$0xff] }
 0x439   : > { %6958 = vmatprep.subr.bf16.mxu0 %v7632_v51  ;;  %v2184_v51 = vld [vmem:[#allocation11 + $0x1600] sm:$0xff]  ;;  %v1741_v19 = vld [vmem:[#allocation11 + $0x828] sm:$0xff] }
 0x43a   : > { %v8229_v57 = vcombine.low %v2184_v51, %v2196_v2  ;;  %v1705_v41 = vld [vmem:[#allocation11 + $0x708] sm:$0xff] }
 0x43b   : > { %6918 = vmatpush1.bf16.msra.mxu1 %v8013_v46  ;;  %v7871_v46 = vcombine.low %v1825_v37, %v1837_v38  ;;  %v1717_v26 = vld [vmem:[#allocation11 + $0x768] sm:$0xff] }
 0x43c   : > { %6959 = vmatpush1.bf16.msra.mxu0 %v7631_v47  ;;  %6919 = vmatprep.subr.bf16.mxu1 %v7990_v48  ;;  %v8230_v47 = vcombine.high %v2184_v51, %v2196_v2  ;;  %v7848_v48 = vcombine.high %v1801_v34, %v1813_v0  ;;  %v1681_v36 = vld [vmem:[#allocation11 + $0x648] sm:$0xff]  ;;  %v1658_v2 = vld [vmem:[#allocation11 + $0x590] sm:$0xff] }
 0x43d   : > { %6960 = vmatprep.subr.bf16.mxu0 %v7608_v50  ;;  %v2160_v50 = vld [vmem:[#allocation11 + $0x1540] sm:$0xff]  ;;  %v1693_v37 = vld [vmem:[#allocation11 + $0x6a8] sm:$0xff] }
 0x43e   : > { %v8205_v23 = vcombine.low %v2160_v50, %v2172_v52  ;;  %v2053_v51 = vld [vmem:[#allocation11 + $0x11e8] sm:$0xff] }
 0x43f   : > { %6920 = vmatpush1.bf16.msra.mxu1 %v7989_v59  ;;  %v7847_v59 = vcombine.low %v1801_v34, %v1813_v0  ;;  %v1670_v34 = vld [vmem:[#allocation11 + $0x5f0] sm:$0xff] }
 0x440   : > { %6961 = vmatpush1.bf16.msra.mxu0 %v7607_v60  ;;  %6921 = vmatprep.subr.bf16.mxu1 %v7966_v61  ;;  %v8206_v60 = vcombine.high %v2160_v50, %v2172_v52  ;;  %v7824_v61 = vcombine.high %v1777_v53, %v1789_v54  ;;  %v2017_v50 = vld [vmem:[#allocation11 + $0x10c8] sm:$0xff] }
 0x441   : > { %6962 = vmatprep.subr.bf16.mxu0 %v7584_v62  ;;  %v2136_v62 = vld [vmem:[#allocation11 + $0x1480] sm:$0xff]  ;;  %v2029_v52 = vld [vmem:[#allocation11 + $0x1128] sm:$0xff] }
 0x442   : > { %v8181_v20 = vcombine.low %v2136_v62, %v2148_v3 }
 0x443   : > { %6922 = vmatpush1.bf16.msra.mxu1 %v7965_v9  ;;  %v7823_v9 = vcombine.low %v1777_v53, %v1789_v54  ;;  %v2301_v53 = vrot.slane %v9270_v8, %v9115_v15 }
 0x444   : > { %6963 = vmatpush1.bf16.msra.mxu0 %v7583_v13  ;;  %6923 = vmatprep.subr.bf16.mxu1 %v7942_v16  ;;  %v8182_v13 = vcombine.high %v2136_v62, %v2148_v3  ;;  %v7800_v16 = vcombine.high %v1753_v5, %v1765_v7  ;;  %v8064_v62 = vcombine.high %v2017_v50, %v2029_v52  ;;  %v1993_v3 = vld [vmem:[#allocation11 + $0x1008] sm:$0xff] }
 0x445   : > { %6964 = vmatprep.subr.bf16.mxu0 %v7560_v18  ;;  %v2112_v18 = vld [vmem:[#allocation11 + $0x13c0] sm:$0xff] }
 0x446   : > { %v8157_v29 = vcombine.low %v2112_v18, %v2124_v63 }
 0x447   : > { %6924 = vmatpush1.bf16.msra.mxu1 %v7941_v10  ;;  %v7799_v10 = vcombine.low %v1753_v5, %v1765_v7  ;;  %v2005_v5 = vld [vmem:[#allocation11 + $0x1068] sm:$0xff] }
 0x448   : > { %6965 = vmatpush1.bf16.msra.mxu0 %v7559_v44  ;;  %6925 = vmatprep.subr.bf16.mxu1 %v7918_v22  ;;  %v8158_v44 = vcombine.high %v2112_v18, %v2124_v63  ;;  %v7776_v22 = vcombine.high %v1729_v1, %v1741_v19 }
 0x449   : > { %6966 = vmatprep.subr.bf16.mxu0 %v7536_v35  ;;  %v2088_v35 = vld [vmem:[#allocation11 + $0x1300] sm:$0xff] }
 0x44a   : > { %v8133_v38 = vcombine.low %v2088_v35, %v2100_v25 }
 0x44b   : > { %6926 = vmatpush1.bf16.msra.mxu1 %v7917_v40  ;;  %v7775_v40 = vcombine.low %v1729_v1, %v1741_v19 }
 0x44c   : > { %6967 = vmatpush1.bf16.msra.mxu0 %v7535_v31  ;;  %6927 = vmatprep.subr.bf16.mxu1 %v8278_v32  ;;  %v8134_v31 = vcombine.high %v2088_v35, %v2100_v25  ;;  %v7752_v32 = vcombine.high %v1705_v41, %v1717_v26  ;;  %v1981_v35 = vld [vmem:[#allocation11 + $0xfa8] sm:$0xff] }
 0x44d   : > { %6968 = vmatprep.subr.bf16.mxu0 %v7896_v33  ;;  %v2064_v33 = vld [vmem:[#allocation11 + $0x1240] sm:$0xff] }
 0x44e   : > { %v8109_v0 = vcombine.low %v2064_v33, %v2076_v6 }
 0x44f   : > { %6928 = vmatpush2.bf16.msra.mxu1 %v8277_v39  ;;  %v7751_v39 = vcombine.low %v1705_v41, %v1717_v26  ;;  %v1586_v41 = vld [vmem:[#allocation11 + $0x350] sm:$0xff] }
 0x450   : > { %6969 = vmatpush2.bf16.msra.mxu0 %v7895_v49  ;;  %6929 = vmatprep.subr.bf16.mxu1 %v8254_v42  ;;  %v8110_v49 = vcombine.high %v2064_v33, %v2076_v6  ;;  %v7728_v42 = vcombine.high %v1681_v36, %v1693_v37  ;;  %v1598_v26 = vld [vmem:[#allocation11 + $0x3b0] sm:$0xff] }
 0x451   : > { %6970 = vmatprep.subr.bf16.mxu0 %v7872_v43  ;;  %v2041_v43 = vld [vmem:[#allocation11 + $0x1188] sm:$0xff] }
 0x452   : > { %v8087_v54 = vcombine.low %v2041_v43, %v2053_v51 }
 0x453   : > { %6930 = vmatpush2.bf16.msra.mxu1 %v8253_v45  ;;  %v7727_v45 = vcombine.low %v1681_v36, %v1693_v37  ;;  %v7634_v36 = vcombine.high %v1586_v41, %v1598_v26  ;;  %v1945_v37 = vld [vmem:[#allocation11 + $0xe88] sm:$0xff] }
 0x454   : > { %6971 = vmatpush2.bf16.msra.mxu0 %v7871_v46  ;;  %6931 = vmatprep.subr.bf16.mxu1 %v8230_v47  ;;  %v8088_v46 = vcombine.high %v2041_v43, %v2053_v51  ;;  %v2297_v47 = vrot.slane %v9270_v8, %v9109_v12  ;;  %v7633_v43 = vcombine.low %v1586_v41, %v1598_v26  ;;  %v2209_v41 = vld [vmem:[#allocation11 + $0x16c8] sm:$0xff] }
 0x455   : > { %6972 = vmatprep.subr.bf16.mxu0 %v7848_v48  ;;  %v7706_v48 = vcombine.high %v1658_v2, %v1670_v34  ;;  %v2221_v26 = vld [vmem:[#allocation11 + $0x1728] sm:$0xff] }
 0x457   : > { %6932 = vmatpush2.bf16.msra.mxu1 %v8229_v57  ;;  %v1634_v57 = vld [vmem:[#allocation11 + $0x4d0] sm:$0xff] }
 0x458   : > { %6973 = vmatpush2.bf16.msra.mxu0 %v7847_v59  ;;  %6933 = vmatprep.subr.bf16.mxu1 %v8206_v60  ;;  %v1646_v59 = vld [vmem:[#allocation11 + $0x530] sm:$0xff]  ;;  %v7705_v60 = vcombine.low %v1658_v2, %v1670_v34  ;;  %v1921_v34 = vld [vmem:[#allocation11 + $0xdc8] sm:$0xff] }
 0x459   : > { %6974 = vmatprep.subr.bf16.mxu0 %v7824_v61  ;;  %v6659_v61 = vadd.f32 %v9279_v24, %v2297_v47  ;;  %v8063_v24 = vcombine.low %v2017_v50, %v2029_v52  ;;  %v7681_v19 = vcombine.low %v1634_v57, %v1646_v59 }
 0x45b   : > { %6934 = vmatpush2.bf16.msra.mxu1 %v8205_v23  ;;  %v7682_v23 = vcombine.high %v1634_v57, %v1646_v59  ;;  %v1514_v57 = vld [vmem:[#allocation11 + $0x110] sm:$0xff] }
 0x45c   : > { %6975 = vmatpush2.bf16.msra.mxu0 %v7823_v9  ;;  %6935 = vmatprep.subr.bf16.mxu1 %v8182_v13  ;;  %v1610_v9 = vld [vmem:[#allocation11 + $0x410] sm:$0xff] }
 0x45d   : > { %6976 = vmatprep.subr.bf16.mxu0 %v7800_v16  ;;  %v1622_v13 = vld [vmem:[#allocation11 + $0x470] sm:$0xff]  ;;  %v6661_v16 = vadd.f32 %v9285_v30, %v2301_v53  ;;  %v1897_v53 = vld [vmem:[#allocation11 + $0xd08] sm:$0xff] }
 0x45e   : > { %v7658_v30 = vcombine.high %v1610_v9, %v1622_v13  ;;  %v1526_v59 = vld [vmem:[#allocation11 + $0x170] sm:$0xff] }
 0x45f   : > { %6936 = vmatpush2.bf16.msra.mxu1 %v8181_v20  ;;  %v8040_v20 = vcombine.high %v1993_v3, %v2005_v5 }
 0x460   : > { %6977 = vmatpush2.bf16.msra.mxu0 %v7799_v10  ;;  %6937 = vmatprep.subr.bf16.mxu1 %v8158_v44 }
 0x461   : > { %6978 = vmatprep.subr.bf16.mxu0 %v7776_v22  ;;  %v1969_v22 = vld [vmem:[#allocation11 + $0xf48] sm:$0xff] }
 0x462   : > { %v8016_v33 = vcombine.high %v1969_v22, %v1981_v35 }
 0x463   : > { %6938 = vmatpush2.bf16.msra.mxu1 %v8157_v29 }
 0x464   : > { %6979 = vmatpush2.bf16.msra.mxu0 %v7775_v40  ;;  %6939 = vmatprep.subr.bf16.mxu1 %v8134_v31  ;;  %v8039_v40 = vcombine.low %v1993_v3, %v2005_v5  ;;  %v7562_v3 = vcombine.high %v1514_v57, %v1526_v59  ;;  %v1873_v5 = vld [vmem:[#allocation11 + $0xc48] sm:$0xff] }
 0x465   : > { %6980 = vmatprep.subr.bf16.mxu0 %v7752_v32  ;;  %v7657_v32 = vcombine.low %v1610_v9, %v1622_v13  ;;  %v1502_v9 = vld [vmem:[#allocation11 + $0xb0] sm:$0xff] }
 0x467   : > { %6940 = vmatpush2.bf16.msra.mxu1 %v8133_v38  ;;  %v1957_v38 = vld [vmem:[#allocation11 + $0xee8] sm:$0xff] }
 0x468   : > { %6981 = vmatpush2.bf16.msra.mxu0 %v7751_v39  ;;  %6941 = vmatprep.subr.bf16.mxu1 %v8110_v49  ;;  %v1562_v39 = vld [vmem:[#allocation11 + $0x290] sm:$0xff]  ;;  %v7992_v51 = vcombine.high %v1945_v37, %v1957_v38  ;;  %v7991_v47 = vcombine.low %v1945_v37, %v1957_v38  ;;  %v2197_v37 = vld [vmem:[#allocation11 + $0x1668] sm:$0xff] }
 0x469   : > { %6982 = vmatprep.subr.bf16.mxu0 %v7728_v42  ;;  %v1574_v49 = vld [vmem:[#allocation11 + $0x2f0] sm:$0xff]  ;;  %v8015_v42 = vcombine.low %v1969_v22, %v1981_v35 }
 0x46a   : > { %v7610_v2 = vcombine.high %v1562_v39, %v1574_v49  ;;  %v1802_v38 = vld [vmem:[#allocation11 + $0xa10] sm:$0xff] }
 0x46b   : > { %6942 = vmatpush2.bf16.msra.mxu1 %v8109_v0  ;;  %v1933_v0 = vld [vmem:[#allocation11 + $0xe28] sm:$0xff] }
 0x46c   : > { %6983 = vmatpush2.bf16.msra.mxu0 %v7727_v45  ;;  %6993 = vmatprep.subr.bf16.mxu1 %v8088_v46  ;;  %v1538_v45 = vld [vmem:[#allocation11 + $0x1d0] sm:$0xff]  ;;  %v7968_v50 = vcombine.high %v1921_v34, %v1933_v0 }
 0x46d   : > { %7034 = vmatprep.subr.bf16.mxu0 %v7706_v48  ;;  %v1550_v46 = vld [vmem:[#allocation11 + $0x230] sm:$0xff]  ;;  %v7609_v48 = vcombine.low %v1562_v39, %v1574_v49  ;;  %v8255_v49 = vcombine.low %v2209_v41, %v2221_v26 }
 0x46e   : > { %v6699_v7 = vpop.f32.mrf.mxu1  ;;  %6944 = vmatmul.mubr.bf16.vlgmr.msra.gmra.mxu1 %v9167_v56  ;;  %v7586_v52 = vcombine.high %v1538_v45, %v1550_v46  ;;  %v1814_v39 = vld [vmem:[#allocation11 + $0xa70] sm:$0xff] }
 0x46f   : > { %v6700_v18 = vadd.f32 %v6699_v7, %v6659_v61  ;;  %v9295_v63 = vpop.f32.mrf.mxu0  ;;  %6985 = vmatmul.mubr.bf16.vlgmr.msra.gmra.mxu0 %v9153_v28  ;;  %6994 = vmatpush1.bf16.msra.mxu1 %v8087_v54  ;;  %v1909_v54 = vld [vmem:[#allocation11 + $0xd68] sm:$0xff]  ;;  %v7585_v61 = vcombine.low %v1538_v45, %v1550_v46  ;;  %v1790_v45 = vld [vmem:[#allocation11 + $0x9b0] sm:$0xff] }
 0x470   : > { %7025 = vmatprep.mubr.bf16.mxu1 %v9165_v55  ;;  %v6701_v1 = vpop.f32.mrf.mxu1  ;;  %7035 = vmatpush1.bf16.msra.mxu0 %v7705_v60  ;;  %v7967_v60 = vcombine.low %v1921_v34, %v1933_v0  ;;  %v1885_v7 = vld [vmem:[#allocation11 + $0xca8] sm:$0xff]  ;;  %v7943_v13 = vcombine.low %v1897_v53, %v1909_v54  ;;  %v1778_v0 = vld [vmem:[#allocation11 + $0x950] sm:$0xff] }
 0x471   : > { %7208 = vst [vmem:[%s9207_s8 + $0x50] sm:$0xff] %v6700_v18  ;;  %v6702_v10 = vadd.f32 %v6701_v1, %v6661_v16  ;;  %7066 = vmatprep.mubr.bf16.mxu0 %v9151_v27  ;;  %v9301_v44 = vpop.f32.mrf.mxu0  ;;  %6995 = vmatprep.subr.bf16.mxu1 %v8064_v62  ;;  %v7944_v62 = vcombine.high %v1897_v53, %v1909_v54  ;;  %v2233_v1 = vld [vmem:[#allocation11 + $0x1788] sm:$0xff]  ;;  %v1754_v54 = vld [vmem:[#allocation11 + $0x890] sm:$0xff] }
 0x472   : > { %v6703_v25 = vpop.f32.mrf.mxu1  ;;  %7036 = vmatprep.subr.bf16.mxu0 %v7682_v23  ;;  %v1490_v23 = vld [vmem:[#allocation11 + $0x50] sm:$0xff]  ;;  %v7561_v16 = vcombine.low %v1514_v57, %v1526_v59  ;;  %v7920_v18 = vcombine.high %v1873_v5, %v1885_v7  ;;  %v2173_v34 = vld [vmem:[#allocation11 + $0x15a8] sm:$0xff] }
 0x473   : > { %7209 = vst [vmem:[%s9207_s8 + $0x58] sm:$0xff] %v6702_v10  ;;  %v6744_v29 = vpop.f32.mrf.mxu0  ;;  %6996 = vmatpush1.bf16.msra.mxu1 %v8063_v24  ;;  %v7538_v24 = vcombine.high %v1490_v23, %v1502_v9  ;;  %v1862_v10 = vld [vmem:[#allocation11 + $0xbf0] sm:$0xff]  ;;  %v7537_v22 = vcombine.low %v1490_v23, %v1502_v9  ;;  %v2149_v53 = vld [vmem:[#allocation11 + $0x14e8] sm:$0xff] }
 0x474   : > { %v6704_v31 = vpop.f32.mrf.mxu1  ;;  %7037 = vmatpush1.bf16.msra.mxu0 %v7681_v19  ;;  %6997 = vmatprep.subr.bf16.mxu1 %v8040_v20  ;;  %v2245_v19 = vld [vmem:[#allocation11 + $0x17e8] sm:$0xff]  ;;  %v1850_v20 = vld [vmem:[#allocation11 + $0xb90] sm:$0xff] }
 0x475   : > { %v6745_v6 = vpop.f32.mrf.mxu0  ;;  %7038 = vmatprep.subr.bf16.mxu0 %v7658_v30  ;;  %v7919_v30 = vcombine.low %v1873_v5, %v1885_v7  ;;  %v8280_v35 = vcombine.high %v2233_v1, %v2245_v19  ;;  %v7898_v25 = vcombine.high %v1850_v20, %v1862_v10  ;;  %v1826_v29 = vld [vmem:[#allocation11 + $0xad0] sm:$0xff]  ;;  %v8279_v31 = vcombine.low %v2233_v1, %v2245_v19  ;;  %v2125_v5 = vld [vmem:[#allocation11 + $0x1428] sm:$0xff] }
 0x476   : > { %v1766_v57 = vld [vmem:[#allocation11 + $0x8f0] sm:$0xff]  ;;  %v2101_v1 = vld [vmem:[#allocation11 + $0x1368] sm:$0xff] }
 0x477   : > { %6998 = vmatpush1.bf16.msra.mxu1 %v8039_v40  ;;  %v1838_v40 = vld [vmem:[#allocation11 + $0xb30] sm:$0xff] }
 0x478   : > { %7039 = vmatpush1.bf16.msra.mxu0 %v7657_v32  ;;  %6999 = vmatprep.subr.bf16.mxu1 %v8016_v33  ;;  %v7897_v32 = vcombine.low %v1850_v20, %v1862_v10  ;;  %v8256_v33 = vcombine.high %v2209_v41, %v2221_v26  ;;  %v7874_v6 = vcombine.high %v1826_v29, %v1838_v40  ;;  %v1730_v7 = vld [vmem:[#allocation11 + $0x7d0] sm:$0xff]  ;;  %v2077_v41 = vld [vmem:[#allocation11 + $0x12a8] sm:$0xff] }
 0x479   : > { %7040 = vmatprep.subr.bf16.mxu0 %v7634_v36  ;;  %v2185_v36 = vld [vmem:[#allocation11 + $0x1608] sm:$0xff]  ;;  %v1742_v23 = vld [vmem:[#allocation11 + $0x830] sm:$0xff] }
 0x47a   : > { %v8231_v46 = vcombine.low %v2185_v36, %v2197_v37  ;;  %v1706_v19 = vld [vmem:[#allocation11 + $0x710] sm:$0xff] }
 0x47b   : > { %7000 = vmatpush1.bf16.msra.mxu1 %v8015_v42  ;;  %v7873_v42 = vcombine.low %v1826_v29, %v1838_v40  ;;  %v1718_v20 = vld [vmem:[#allocation11 + $0x770] sm:$0xff] }
 0x47c   : > { %7041 = vmatpush1.bf16.msra.mxu0 %v7633_v43  ;;  %7001 = vmatprep.subr.bf16.mxu1 %v7992_v51  ;;  %v8232_v43 = vcombine.high %v2185_v36, %v2197_v37  ;;  %v7850_v51 = vcombine.high %v1802_v38, %v1814_v39  ;;  %v1682_v26 = vld [vmem:[#allocation11 + $0x650] sm:$0xff]  ;;  %v1659_v37 = vld [vmem:[#allocation11 + $0x598] sm:$0xff] }
 0x47d   : > { %7042 = vmatprep.subr.bf16.mxu0 %v7610_v2  ;;  %v2161_v2 = vld [vmem:[#allocation11 + $0x1548] sm:$0xff]  ;;  %v1694_v29 = vld [vmem:[#allocation11 + $0x6b0] sm:$0xff] }
 0x47e   : > { %v8207_v59 = vcombine.low %v2161_v2, %v2173_v34  ;;  %v2054_v36 = vld [vmem:[#allocation11 + $0x11f0] sm:$0xff] }
 0x47f   : > { %7002 = vmatpush1.bf16.msra.mxu1 %v7991_v47  ;;  %v7849_v47 = vcombine.low %v1802_v38, %v1814_v39  ;;  %v1671_v38 = vld [vmem:[#allocation11 + $0x5f8] sm:$0xff] }
 0x480   : > { %7043 = vmatpush1.bf16.msra.mxu0 %v7609_v48  ;;  %7003 = vmatprep.subr.bf16.mxu1 %v7968_v50  ;;  %v8208_v48 = vcombine.high %v2161_v2, %v2173_v34  ;;  %v7826_v50 = vcombine.high %v1778_v0, %v1790_v45  ;;  %v2018_v2 = vld [vmem:[#allocation11 + $0x10d0] sm:$0xff] }
 0x481   : > { %7044 = vmatprep.subr.bf16.mxu0 %v7586_v52  ;;  %v2137_v52 = vld [vmem:[#allocation11 + $0x1488] sm:$0xff]  ;;  %v2030_v34 = vld [vmem:[#allocation11 + $0x1130] sm:$0xff] }
 0x482   : > { %v8183_v9 = vcombine.low %v2137_v52, %v2149_v53 }
 0x483   : > { %7004 = vmatpush1.bf16.msra.mxu1 %v7967_v60  ;;  %v7825_v60 = vcombine.low %v1778_v0, %v1790_v45  ;;  %v2309_v0 = vrot.slane %v9270_v8, %v9232_v21 }
 0x484   : > { %7045 = vmatpush1.bf16.msra.mxu0 %v7585_v61  ;;  %7005 = vmatprep.subr.bf16.mxu1 %v7944_v62  ;;  %v8184_v61 = vcombine.high %v2137_v52, %v2149_v53  ;;  %v7802_v62 = vcombine.high %v1754_v54, %v1766_v57  ;;  %v8066_v52 = vcombine.high %v2018_v2, %v2030_v34  ;;  %v1994_v53 = vld [vmem:[#allocation11 + $0x1010] sm:$0xff] }
 0x485   : > { %7046 = vmatprep.subr.bf16.mxu0 %v7562_v3  ;;  %v2113_v3 = vld [vmem:[#allocation11 + $0x13c8] sm:$0xff] }
 0x486   : > { %v8159_v10 = vcombine.low %v2113_v3, %v2125_v5 }
 0x487   : > { %7006 = vmatpush1.bf16.msra.mxu1 %v7943_v13  ;;  %v7801_v13 = vcombine.low %v1754_v54, %v1766_v57  ;;  %v2006_v54 = vld [vmem:[#allocation11 + $0x1070] sm:$0xff] }
 0x488   : > { %7047 = vmatpush1.bf16.msra.mxu0 %v7561_v16  ;;  %7007 = vmatprep.subr.bf16.mxu1 %v7920_v18  ;;  %v8160_v16 = vcombine.high %v2113_v3, %v2125_v5  ;;  %v7778_v18 = vcombine.high %v1730_v7, %v1742_v23 }
 0x489   : > { %7048 = vmatprep.subr.bf16.mxu0 %v7538_v24  ;;  %v2089_v24 = vld [vmem:[#allocation11 + $0x1308] sm:$0xff] }
 0x48a   : > { %v8135_v40 = vcombine.low %v2089_v24, %v2101_v1 }
 0x48b   : > { %7008 = vmatpush1.bf16.msra.mxu1 %v7919_v30  ;;  %v7777_v30 = vcombine.low %v1730_v7, %v1742_v23  ;;  %v8042_v23 = vcombine.high %v1994_v53, %v2006_v54 }
 0x48c   : > { %7049 = vmatpush1.bf16.msra.mxu0 %v7537_v22  ;;  %7009 = vmatprep.subr.bf16.mxu1 %v8280_v35  ;;  %v8136_v22 = vcombine.high %v2089_v24, %v2101_v1  ;;  %v7754_v35 = vcombine.high %v1706_v19, %v1718_v20  ;;  %v1587_v1 = vld [vmem:[#allocation11 + $0x358] sm:$0xff] }
 0x48d   : > { %7050 = vmatprep.subr.bf16.mxu0 %v7898_v25  ;;  %v2065_v25 = vld [vmem:[#allocation11 + $0x1248] sm:$0xff] }
 0x48e   : > { %v8111_v39 = vcombine.low %v2065_v25, %v2077_v41 }
 0x48f   : > { %7010 = vmatpush2.bf16.msra.mxu1 %v8279_v31  ;;  %v7753_v31 = vcombine.low %v1706_v19, %v1718_v20  ;;  %v1599_v19 = vld [vmem:[#allocation11 + $0x3b8] sm:$0xff] }
 0x490   : > { %7051 = vmatpush2.bf16.msra.mxu0 %v7897_v32  ;;  %7011 = vmatprep.subr.bf16.mxu1 %v8256_v33  ;;  %v8112_v32 = vcombine.high %v2065_v25, %v2077_v41  ;;  %v7730_v33 = vcombine.high %v1682_v26, %v1694_v29  ;;  %v7636_v25 = vcombine.high %v1587_v1, %v1599_v19  ;;  %v1946_v41 = vld [vmem:[#allocation11 + $0xe90] sm:$0xff] }
 0x491   : > { %7052 = vmatprep.subr.bf16.mxu0 %v7874_v6  ;;  %v2042_v6 = vld [vmem:[#allocation11 + $0x1190] sm:$0xff] }
 0x492   : > { %v8089_v45 = vcombine.low %v2042_v6, %v2054_v36 }
 0x493   : > { %7012 = vmatpush2.bf16.msra.mxu1 %v8255_v49  ;;  %v7729_v49 = vcombine.low %v1682_v26, %v1694_v29  ;;  %v1958_v26 = vld [vmem:[#allocation11 + $0xef0] sm:$0xff]  ;;  %v1563_v29 = vld [vmem:[#allocation11 + $0x298] sm:$0xff] }
 0x494   : > { %7053 = vmatpush2.bf16.msra.mxu0 %v7873_v42  ;;  %7013 = vmatprep.subr.bf16.mxu1 %v8232_v43  ;;  %v8090_v42 = vcombine.high %v2042_v6, %v2054_v36  ;;  %v2305_v43 = vrot.slane %v9270_v8, %v9229_v17  ;;  %v1623_v8 = vld [vmem:[#allocation11 + $0x478] sm:$0xff]  ;;  %v1922_v36 = vld [vmem:[#allocation11 + $0xdd0] sm:$0xff] }
 0x495   : > { %7054 = vmatprep.subr.bf16.mxu0 %v7850_v51  ;;  %v7708_v51 = vcombine.high %v1659_v37, %v1671_v38 }
 0x497   : > { %7014 = vmatpush2.bf16.msra.mxu1 %v8231_v46  ;;  %v1635_v46 = vld [vmem:[#allocation11 + $0x4d8] sm:$0xff] }
 0x498   : > { %7055 = vmatpush2.bf16.msra.mxu0 %v7849_v47  ;;  %7015 = vmatprep.subr.bf16.mxu1 %v8208_v48  ;;  %v1647_v47 = vld [vmem:[#allocation11 + $0x538] sm:$0xff]  ;;  %v7707_v48 = vcombine.low %v1659_v37, %v1671_v38  ;;  %v1934_v37 = vld [vmem:[#allocation11 + $0xe30] sm:$0xff] }
 0x499   : > { %7056 = vmatprep.subr.bf16.mxu0 %v7826_v50  ;;  %v6741_v50 = vadd.f32 %v9295_v63, %v2305_v43  ;;  %v8065_v63 = vcombine.low %v2018_v2, %v2030_v34  ;;  %v7683_v7 = vcombine.low %v1635_v46, %v1647_v47  ;;  %v1539_v38 = vld [vmem:[#allocation11 + $0x1d8] sm:$0xff]  ;;  %v7970_v43 = vcombine.high %v1922_v36, %v1934_v37  ;;  %v1898_v2 = vld [vmem:[#allocation11 + $0xd10] sm:$0xff] }
 0x49a   : > { %v1910_v34 = vld [vmem:[#allocation11 + $0xd70] sm:$0xff] }
 0x49b   : > { %7016 = vmatpush2.bf16.msra.mxu1 %v8207_v59  ;;  %v7684_v59 = vcombine.high %v1635_v46, %v1647_v47  ;;  %v7969_v46 = vcombine.low %v1922_v36, %v1934_v37  ;;  %v1791_v36 = vld [vmem:[#allocation11 + $0x9b8] sm:$0xff] }
 0x49c   : > { %7057 = vmatpush2.bf16.msra.mxu0 %v7825_v60  ;;  %7017 = vmatprep.subr.bf16.mxu1 %v8184_v61  ;;  %v1611_v60 = vld [vmem:[#allocation11 + $0x418] sm:$0xff]  ;;  %v6743_v61 = vadd.f32 %v9301_v44, %v2309_v0 }
 0x49d   : > { %7058 = vmatprep.subr.bf16.mxu0 %v7802_v62  ;;  %v7660_v44 = vcombine.high %v1611_v60, %v1623_v8  ;;  %v1515_v0 = vld [vmem:[#allocation11 + $0x118] sm:$0xff] }
 0x49f   : > { %7018 = vmatpush2.bf16.msra.mxu1 %v8183_v9 }
 0x4a0   : > { %7059 = vmatpush2.bf16.msra.mxu0 %v7801_v13  ;;  %7019 = vmatprep.subr.bf16.mxu1 %v8160_v16  ;;  %v1970_v16 = vld [vmem:[#allocation11 + $0xf50] sm:$0xff] }
 0x4a1   : > { %7060 = vmatprep.subr.bf16.mxu0 %v7778_v18  ;;  %v1982_v18 = vld [vmem:[#allocation11 + $0xfb0] sm:$0xff] }
 0x4a3   : > { %7020 = vmatpush2.bf16.msra.mxu1 %v8159_v10  ;;  %v8041_v10 = vcombine.low %v1994_v53, %v2006_v54  ;;  %v1886_v53 = vld [vmem:[#allocation11 + $0xcb0] sm:$0xff]  ;;  %v1491_v54 = vld [vmem:[#allocation11 + $0x58] sm:$0xff] }
 0x4a4   : > { %7061 = vmatpush2.bf16.msra.mxu0 %v7777_v30  ;;  %7021 = vmatprep.subr.bf16.mxu1 %v8136_v22  ;;  %v7659_v22 = vcombine.low %v1611_v60, %v1623_v8 }
 0x4a5   : > { %7062 = vmatprep.subr.bf16.mxu0 %v7754_v35  ;;  %v8018_v35 = vcombine.high %v1970_v16, %v1982_v18 }
 0x4a7   : > { %7022 = vmatpush2.bf16.msra.mxu1 %v8135_v40  ;;  %v1575_v40 = vld [vmem:[#allocation11 + $0x2f8] sm:$0xff] }
 0x4a8   : > { %7063 = vmatpush2.bf16.msra.mxu0 %v7753_v31  ;;  %7023 = vmatprep.subr.bf16.mxu1 %v8112_v32  ;;  %v8017_v31 = vcombine.low %v1970_v16, %v1982_v18  ;;  %v7635_v32 = vcombine.low %v1587_v1, %v1599_v19  ;;  %v7612_v6 = vcombine.high %v1563_v29, %v1575_v40  ;;  %v2210_v18 = vld [vmem:[#allocation11 + $0x16d0] sm:$0xff]  ;;  %v1827_v1 = vld [vmem:[#allocation11 + $0xad8] sm:$0xff] }
 0x4a9   : > { %7064 = vmatprep.subr.bf16.mxu0 %v7730_v33  ;;  %v7994_v33 = vcombine.high %v1946_v41, %v1958_v26  ;;  %v1839_v19 = vld [vmem:[#allocation11 + $0xb38] sm:$0xff] }
 0x4ab   : > { %7024 = vmatpush2.bf16.msra.mxu1 %v8111_v39  ;;  %v1551_v39 = vld [vmem:[#allocation11 + $0x238] sm:$0xff] }
 0x4ac   : > { %7065 = vmatpush2.bf16.msra.mxu0 %v7729_v49  ;;  %7075 = vmatprep.subr.bf16.mxu1 %v8090_v42  ;;  %v7993_v49 = vcombine.low %v1946_v41, %v1958_v26  ;;  %v7611_v42 = vcombine.low %v1563_v29, %v1575_v40  ;;  %v7587_v47 = vcombine.low %v1539_v38, %v1551_v39  ;;  %v1815_v41 = vld [vmem:[#allocation11 + $0xa78] sm:$0xff] }
 0x4ad   : > { %7116 = vmatprep.subr.bf16.mxu0 %v7708_v51  ;;  %v7588_v51 = vcombine.high %v1539_v38, %v1551_v39  ;;  %v7875_v29 = vcombine.low %v1827_v1, %v1839_v19 }
 0x4ae   : > { %v6781_v57 = vpop.f32.mrf.mxu1  ;;  %7026 = vmatmul.mubr.bf16.vlgmr.msra.gmra.mxu1 %v9167_v56 }
 0x4af   : > { %v6782_v62 = vadd.f32 %v6781_v57, %v6741_v50  ;;  %v9311_v3 = vpop.f32.mrf.mxu0  ;;  %7067 = vmatmul.mubr.bf16.vlgmr.msra.gmra.mxu0 %v9153_v28  ;;  %7076 = vmatpush1.bf16.msra.mxu1 %v8089_v45  ;;  %v1527_v45 = vld [vmem:[#allocation11 + $0x178] sm:$0xff] }
 0x4b0   : > { %7107 = vmatprep.mubr.bf16.mxu1 %v9165_v55  ;;  %v6783_v5 = vpop.f32.mrf.mxu1  ;;  %7117 = vmatpush1.bf16.msra.mxu0 %v7707_v48  ;;  %v7946_v48 = vcombine.high %v1898_v2, %v1910_v34  ;;  %v7564_v50 = vcombine.high %v1515_v0, %v1527_v45  ;;  %v1503_v57 = vld [vmem:[#allocation11 + $0xb8] sm:$0xff]  ;;  %v7563_v60 = vcombine.low %v1515_v0, %v1527_v45 }
 0x4b1   : > { %7210 = vst [vmem:[%s9207_s8 + $0x60] sm:$0xff] %v6782_v62  ;;  %v6784_v9 = vadd.f32 %v6783_v5, %v6743_v61  ;;  %7148 = vmatprep.mubr.bf16.mxu0 %v9151_v27  ;;  %v9317_v13 = vpop.f32.mrf.mxu0  ;;  %7077 = vmatprep.subr.bf16.mxu1 %v8066_v52  ;;  %v1874_v52 = vld [vmem:[#allocation11 + $0xc50] sm:$0xff]  ;;  %v7540_v61 = vcombine.high %v1491_v54, %v1503_v57  ;;  %v1851_v5 = vld [vmem:[#allocation11 + $0xb98] sm:$0xff] }
 0x4b2   : > { %v6785_v24 = vpop.f32.mrf.mxu1  ;;  %7118 = vmatprep.subr.bf16.mxu0 %v7684_v59  ;;  %v7945_v59 = vcombine.low %v1898_v2, %v1910_v34  ;;  %v7922_v8 = vcombine.high %v1874_v52, %v1886_v53  ;;  %v2234_v62 = vld [vmem:[#allocation11 + $0x1790] sm:$0xff]  ;;  %v1767_v2 = vld [vmem:[#allocation11 + $0x8f8] sm:$0xff] }
 0x4b3   : > { %7211 = vst [vmem:[%s9207_s8 + $0x68] sm:$0xff] %v6784_v9  ;;  %v6826_v20 = vpop.f32.mrf.mxu0  ;;  %7078 = vmatpush1.bf16.msra.mxu1 %v8065_v63  ;;  %v2246_v63 = vld [vmem:[#allocation11 + $0x17f0] sm:$0xff]  ;;  %v7539_v9 = vcombine.low %v1491_v54, %v1503_v57 }
 0x4b4   : > { %v6786_v30 = vpop.f32.mrf.mxu1  ;;  %7119 = vmatpush1.bf16.msra.mxu0 %v7683_v7  ;;  %7079 = vmatprep.subr.bf16.mxu1 %v8042_v23  ;;  %v1863_v7 = vld [vmem:[#allocation11 + $0xbf8] sm:$0xff]  ;;  %v7921_v23 = vcombine.low %v1874_v52, %v1886_v53  ;;  %v2222_v24 = vld [vmem:[#allocation11 + $0x1730] sm:$0xff]  ;;  %v8281_v20 = vcombine.low %v2234_v62, %v2246_v63 }
 0x4b5   : > { %v6827_v27 = vpop.f32.mrf.mxu0  ;;  %7120 = vmatprep.subr.bf16.mxu0 %v7660_v44  ;;  %v8282_v44 = vcombine.high %v2234_v62, %v2246_v63  ;;  %v7900_v16 = vcombine.high %v1851_v5, %v1863_v7  ;;  %v8258_v30 = vcombine.high %v2210_v18, %v2222_v24  ;;  %v8257_v26 = vcombine.low %v2210_v18, %v2222_v24  ;;  %v1743_v52 = vld [vmem:[#allocation11 + $0x838] sm:$0xff] }
 0x4b6   : > { %v2198_v27 = vld [vmem:[#allocation11 + $0x1670] sm:$0xff]  ;;  %v1719_v62 = vld [vmem:[#allocation11 + $0x778] sm:$0xff] }
 0x4b7   : > { %7080 = vmatpush1.bf16.msra.mxu1 %v8041_v10  ;;  %v7899_v10 = vcombine.low %v1851_v5, %v1863_v7  ;;  %v1695_v18 = vld [vmem:[#allocation11 + $0x6b8] sm:$0xff] }
 0x4b8   : > { %7121 = vmatpush1.bf16.msra.mxu0 %v7659_v22  ;;  %7081 = vmatprep.subr.bf16.mxu1 %v8018_v35  ;;  %v7876_v22 = vcombine.high %v1827_v1, %v1839_v19  ;;  %v2186_v35 = vld [vmem:[#allocation11 + $0x1610] sm:$0xff] }
 0x4b9   : > { %7122 = vmatprep.subr.bf16.mxu0 %v7636_v25  ;;  %v1803_v25 = vld [vmem:[#allocation11 + $0xa18] sm:$0xff]  ;;  %v8234_v40 = vcombine.high %v2186_v35, %v2198_v27  ;;  %v8233_v37 = vcombine.low %v2186_v35, %v2198_v27 }
 0x4ba   : > { %v7851_v38 = vcombine.low %v1803_v25, %v1815_v41 }
 0x4bb   : > { %7082 = vmatpush1.bf16.msra.mxu1 %v8017_v31  ;;  %v7852_v31 = vcombine.high %v1803_v25, %v1815_v41  ;;  %v8601_v25 = vld [vmem:[#allocation13 + $0x8] sm:$0xff] }
 0x4bc   : > { %7123 = vmatpush1.bf16.msra.mxu0 %v7635_v32  ;;  %7083 = vmatprep.subr.bf16.mxu1 %v7994_v33  ;;  %v2162_v32 = vld [vmem:[#allocation11 + $0x1550] sm:$0xff]  ;;  %v2313_v41 = vrot.slane %v8601_v25, %v9251_v58 }
 0x4bd   : > { %7124 = vmatprep.subr.bf16.mxu0 %v7612_v6  ;;  %v2174_v33 = vld [vmem:[#allocation11 + $0x15b0] sm:$0xff]  ;;  %v1779_v6 = vld [vmem:[#allocation11 + $0x958] sm:$0xff] }
 0x4be   : > { %v8210_v39 = vcombine.high %v2162_v32, %v2174_v33  ;;  %v8209_v34 = vcombine.low %v2162_v32, %v2174_v33  ;;  %v7827_v0 = vcombine.low %v1779_v6, %v1791_v36  ;;  %v6823_v33 = vadd.f32 %v9311_v3, %v2313_v41  ;;  %v2175_v41 = vld [vmem:[#allocation11 + $0x15b8] sm:$0xff] }
 0x4bf   : > { %7084 = vmatpush1.bf16.msra.mxu1 %v7993_v49  ;;  %v7828_v49 = vcombine.high %v1779_v6, %v1791_v36  ;;  %v1995_v6 = vld [vmem:[#allocation11 + $0x1018] sm:$0xff] }
 0x4c0   : > { %7125 = vmatpush1.bf16.msra.mxu0 %v7611_v42  ;;  %7085 = vmatprep.subr.bf16.mxu1 %v7970_v43  ;;  %v2138_v42 = vld [vmem:[#allocation11 + $0x1490] sm:$0xff]  ;;  %v2007_v36 = vld [vmem:[#allocation11 + $0x1078] sm:$0xff] }
 0x4c1   : > { %7126 = vmatprep.subr.bf16.mxu0 %v7588_v51  ;;  %v2150_v43 = vld [vmem:[#allocation11 + $0x14f0] sm:$0xff]  ;;  %v1755_v51 = vld [vmem:[#allocation11 + $0x898] sm:$0xff]  ;;  %v8044_v3 = vcombine.high %v1995_v6, %v2007_v36 }
 0x4c2   : > { %v8186_v45 = vcombine.high %v2138_v42, %v2150_v43  ;;  %v8185_v53 = vcombine.low %v2138_v42, %v2150_v43  ;;  %v7803_v54 = vcombine.low %v1755_v51, %v1767_v2 }
 0x4c3   : > { %7086 = vmatpush1.bf16.msra.mxu1 %v7969_v46  ;;  %v7804_v46 = vcombine.high %v1755_v51, %v1767_v2 }
 0x4c4   : > { %7127 = vmatpush1.bf16.msra.mxu0 %v7587_v47  ;;  %7087 = vmatprep.subr.bf16.mxu1 %v7946_v48  ;;  %v2114_v47 = vld [vmem:[#allocation11 + $0x13d0] sm:$0xff] }
 0x4c5   : > { %7128 = vmatprep.subr.bf16.mxu0 %v7564_v50  ;;  %v2126_v48 = vld [vmem:[#allocation11 + $0x1430] sm:$0xff]  ;;  %v1731_v50 = vld [vmem:[#allocation11 + $0x7d8] sm:$0xff] }
 0x4c6   : > { %v8162_v57 = vcombine.high %v2114_v47, %v2126_v48  ;;  %v8161_v63 = vcombine.low %v2114_v47, %v2126_v48  ;;  %v7779_v5 = vcombine.low %v1731_v50, %v1743_v52 }
 0x4c7   : > { %7088 = vmatpush1.bf16.msra.mxu1 %v7945_v59  ;;  %v7780_v59 = vcombine.high %v1731_v50, %v1743_v52  ;;  %v1947_v50 = vld [vmem:[#allocation11 + $0xe98] sm:$0xff] }
 0x4c8   : > { %7129 = vmatpush1.bf16.msra.mxu0 %v7563_v60  ;;  %7089 = vmatprep.subr.bf16.mxu1 %v7922_v8  ;;  %v2090_v60 = vld [vmem:[#allocation11 + $0x1310] sm:$0xff] }
 0x4c9   : > { %7130 = vmatprep.subr.bf16.mxu0 %v7540_v61  ;;  %v2102_v8 = vld [vmem:[#allocation11 + $0x1370] sm:$0xff]  ;;  %v1707_v61 = vld [vmem:[#allocation11 + $0x718] sm:$0xff] }
 0x4ca   : > { %v8138_v7 = vcombine.high %v2090_v60, %v2102_v8  ;;  %v8137_v24 = vcombine.low %v2090_v60, %v2102_v8  ;;  %v7755_v1 = vcombine.low %v1707_v61, %v1719_v62  ;;  %v1899_v8 = vld [vmem:[#allocation11 + $0xd18] sm:$0xff] }
 0x4cb   : > { %7090 = vmatpush1.bf16.msra.mxu1 %v7921_v23  ;;  %v7756_v23 = vcombine.high %v1707_v61, %v1719_v62  ;;  %v1911_v61 = vld [vmem:[#allocation11 + $0xd78] sm:$0xff] }
 0x4cc   : > { %7131 = vmatpush1.bf16.msra.mxu0 %v7539_v9  ;;  %7091 = vmatprep.subr.bf16.mxu1 %v8282_v44  ;;  %v2066_v9 = vld [vmem:[#allocation11 + $0x1250] sm:$0xff] }
 0x4cd   : > { %7132 = vmatprep.subr.bf16.mxu0 %v7900_v16  ;;  %v2078_v44 = vld [vmem:[#allocation11 + $0x12b0] sm:$0xff]  ;;  %v1683_v16 = vld [vmem:[#allocation11 + $0x658] sm:$0xff] }
 0x4ce   : > { %v8114_v19 = vcombine.high %v2066_v9, %v2078_v44  ;;  %v7731_v35 = vcombine.low %v1683_v16, %v1695_v18 }
 0x4cf   : > { %7092 = vmatpush2.bf16.msra.mxu1 %v8281_v20  ;;  %v7732_v20 = vcombine.high %v1683_v16, %v1695_v18  ;;  %v2247_v16 = vld [vmem:[#allocation11 + $0x17f8] sm:$0xff] }
 0x4d0   : > { %7133 = vmatpush2.bf16.msra.mxu0 %v7899_v10  ;;  %7093 = vmatprep.subr.bf16.mxu1 %v8258_v30  ;;  %v2043_v10 = vld [vmem:[#allocation11 + $0x1198] sm:$0xff] }
 0x4d1   : > { %7134 = vmatprep.subr.bf16.mxu0 %v7876_v22  ;;  %v2055_v30 = vld [vmem:[#allocation11 + $0x11f8] sm:$0xff]  ;;  %v8113_v22 = vcombine.low %v2066_v9, %v2078_v44 }
 0x4d2   : > { %v8092_v27 = vcombine.high %v2043_v10, %v2055_v30  ;;  %v2235_v44 = vld [vmem:[#allocation11 + $0x1798] sm:$0xff] }
 0x4d3   : > { %7094 = vmatpush2.bf16.msra.mxu1 %v8257_v26  ;;  %v2019_v26 = vld [vmem:[#allocation11 + $0x10d8] sm:$0xff] }
 0x4d4   : > { %7135 = vmatpush2.bf16.msra.mxu0 %v7875_v29  ;;  %7095 = vmatprep.subr.bf16.mxu1 %v8234_v40  ;;  %v2031_v29 = vld [vmem:[#allocation11 + $0x1138] sm:$0xff]  ;;  %v2317_v40 = vrot.slane %v8601_v25, %v9254_v4 }
 0x4d5   : > { %7136 = vmatprep.subr.bf16.mxu0 %v7852_v31  ;;  %v8091_v31 = vcombine.low %v2043_v10, %v2055_v30  ;;  %v8068_v32 = vcombine.high %v2019_v26, %v2031_v29  ;;  %v8067_v42 = vcombine.low %v2019_v26, %v2031_v29  ;;  %v2187_v30 = vld [vmem:[#allocation11 + $0x1618] sm:$0xff] }
 0x4d6   : > { %v2163_v25 = vld [vmem:[#allocation11 + $0x1558] sm:$0xff] }
 0x4d7   : > { %7096 = vmatpush2.bf16.msra.mxu1 %v8233_v37  ;;  %v8212_v29 = vcombine.high %v2163_v25, %v2175_v41 }
 0x4d8   : > { %7137 = vmatpush2.bf16.msra.mxu0 %v7851_v38  ;;  %7097 = vmatprep.subr.bf16.mxu1 %v8210_v39  ;;  %v6825_v38 = vadd.f32 %v9317_v13, %v2317_v40  ;;  %v2139_v40 = vld [vmem:[#allocation11 + $0x1498] sm:$0xff] }
 0x4d9   : > { %7138 = vmatprep.subr.bf16.mxu0 %v7828_v49 }
 0x4db   : > { %7098 = vmatpush2.bf16.msra.mxu1 %v8209_v34  ;;  %v1971_v34 = vld [vmem:[#allocation11 + $0xf58] sm:$0xff] }
 0x4dc   : > { %7139 = vmatpush2.bf16.msra.mxu0 %v7827_v0  ;;  %7099 = vmatprep.subr.bf16.mxu1 %v8186_v45  ;;  %v1983_v0 = vld [vmem:[#allocation11 + $0xfb8] sm:$0xff] }
 0x4dd   : > { %7140 = vmatprep.subr.bf16.mxu0 %v7804_v46  ;;  %v8043_v46 = vcombine.low %v1995_v6, %v2007_v36  ;;  %v8019_v52 = vcombine.low %v1971_v34, %v1983_v0  ;;  %v2115_v6 = vld [vmem:[#allocation11 + $0x13d8] sm:$0xff] }
 0x4de   : > { %v2127_v36 = vld [vmem:[#allocation11 + $0x1438] sm:$0xff] }
 0x4df   : > { %7100 = vmatpush2.bf16.msra.mxu1 %v8185_v53 }
 0x4e0   : > { %7141 = vmatpush2.bf16.msra.mxu0 %v7803_v54  ;;  %7101 = vmatprep.subr.bf16.mxu1 %v8162_v57  ;;  %v1923_v54 = vld [vmem:[#allocation11 + $0xdd8] sm:$0xff] }
 0x4e1   : > { %7142 = vmatprep.subr.bf16.mxu0 %v7780_v59  ;;  %v1935_v57 = vld [vmem:[#allocation11 + $0xe38] sm:$0xff] }
 0x4e2   : > { %v7972_v60 = vcombine.high %v1923_v54, %v1935_v57  ;;  %v7971_v62 = vcombine.low %v1923_v54, %v1935_v57 }
 0x4e3   : > { %7102 = vmatpush2.bf16.msra.mxu1 %v8161_v63  ;;  %v7948_v63 = vcombine.high %v1899_v8, %v1911_v61 }
 0x4e4   : > { %7143 = vmatpush2.bf16.msra.mxu0 %v7779_v5  ;;  %7103 = vmatprep.subr.bf16.mxu1 %v8138_v7  ;;  %v1875_v5 = vld [vmem:[#allocation11 + $0xc58] sm:$0xff] }
 0x4e5   : > { %7144 = vmatprep.subr.bf16.mxu0 %v7756_v23  ;;  %v1887_v7 = vld [vmem:[#allocation11 + $0xcb8] sm:$0xff]  ;;  %v7947_v23 = vcombine.low %v1899_v8, %v1911_v61 }
 0x4e6   : > { %v7924_v9 = vcombine.high %v1875_v5, %v1887_v7  ;;  %v7923_v18 = vcombine.low %v1875_v5, %v1887_v7 }
 0x4e7   : > { %7104 = vmatpush2.bf16.msra.mxu1 %v8137_v24  ;;  %v8284_v24 = vcombine.high %v2235_v44, %v2247_v16 }
 0x4e8   : > { %7145 = vmatpush2.bf16.msra.mxu0 %v7755_v1  ;;  %7105 = vmatprep.subr.bf16.mxu1 %v8114_v19  ;;  %v2211_v1 = vld [vmem:[#allocation11 + $0x16d8] sm:$0xff] }
 0x4e9   : > { %7146 = vmatprep.subr.bf16.mxu0 %v7732_v20  ;;  %v2223_v19 = vld [vmem:[#allocation11 + $0x1738] sm:$0xff]  ;;  %v8283_v20 = vcombine.low %v2235_v44, %v2247_v16 }
 0x4ea   : > { %v8260_v10 = vcombine.high %v2211_v1, %v2223_v19 }
 0x4eb   : > { %7106 = vmatpush2.bf16.msra.mxu1 %v8113_v22  ;;  %v2199_v22 = vld [vmem:[#allocation11 + $0x1678] sm:$0xff] }
 0x4ec   : > { %7147 = vmatpush2.bf16.msra.mxu0 %v7731_v35  ;;  %7157 = vmatprep.subr.bf16.mxu1 %v8092_v27  ;;  %v8259_v35 = vcombine.low %v2211_v1, %v2223_v19  ;;  %v8236_v27 = vcombine.high %v2187_v30, %v2199_v22  ;;  %v8235_v26 = vcombine.low %v2187_v30, %v2199_v22 }
 0x4ee   : > { %v6863_v37 = vpop.f32.mrf.mxu1  ;;  %7108 = vmatmul.mubr.bf16.vlgmr.msra.gmra.mxu1 %v9167_v56 }
 0x4ef   : > { %v6864_v39 = vadd.f32 %v6863_v37, %v6823_v33  ;;  %v9325_v49 = vpop.f32.mrf.mxu0  ;;  %7149 = vmatmul.mubr.bf16.vlgmr.msra.gmra.mxu0 %v9153_v28  ;;  %7158 = vmatpush1.bf16.msra.mxu1 %v8091_v31  ;;  %v8020_v28 = vcombine.high %v1971_v34, %v1983_v0  ;;  %v2151_v31 = vld [vmem:[#allocation11 + $0x14f8] sm:$0xff] }
 0x4f0   : > { %7189 = vmatprep.mubr.bf16.mxu1 %v9165_v55  ;;  %v6865_v43 = vpop.f32.mrf.mxu1  ;;  %7159 = vmatprep.subr.bf16.mxu1 %v8068_v32  ;;  %v1959_v55 = vld [vmem:[#allocation11 + $0xef8] sm:$0xff]  ;;  %v8211_v32 = vcombine.low %v2163_v25, %v2175_v41  ;;  %v8188_v33 = vcombine.high %v2139_v40, %v2151_v31  ;;  %v8187_v37 = vcombine.low %v2139_v40, %v2151_v31 }
 0x4f1   : > { %7212 = vst [vmem:[%s9207_s8 + $0x70] sm:$0xff] %v6864_v39  ;;  %v6866_v51 = vadd.f32 %v6865_v43, %v6825_v38  ;;  %v9330_v2 = vpop.f32.mrf.mxu0  ;;  %v7996_v53 = vcombine.high %v1947_v50, %v1959_v55  ;;  %v7995_v59 = vcombine.low %v1947_v50, %v1959_v55  ;;  %v8164_v38 = vcombine.high %v2115_v6, %v2127_v36  ;;  %v2091_v39 = vld [vmem:[#allocation11 + $0x1318] sm:$0xff] }
 0x4f2   : > { %v6867_v13 = vpop.f32.mrf.mxu1  ;;  %v8163_v43 = vcombine.low %v2115_v6, %v2127_v36  ;;  %v2079_v34 = vld [vmem:[#allocation11 + $0x12b8] sm:$0xff] }
 0x4f3   : > { %7213 = vst [vmem:[%s9207_s8 + $0x78] sm:$0xff] %v6866_v51  ;;  %v6908_v45 = vpop.f32.mrf.mxu0  ;;  %7160 = vmatpush1.bf16.msra.mxu1 %v8067_v42  ;;  %v2103_v42 = vld [vmem:[#allocation11 + $0x1378] sm:$0xff] }
 0x4f4   : > { %v6868_v47 = vpop.f32.mrf.mxu1  ;;  %7161 = vmatprep.subr.bf16.mxu1 %v8044_v3  ;;  %v8140_v3 = vcombine.high %v2091_v39, %v2103_v42  ;;  %v2067_v51 = vld [vmem:[#allocation11 + $0x1258] sm:$0xff]  ;;  %v8139_v0 = vcombine.low %v2091_v39, %v2103_v42  ;;  %v2250_v45 = vld [vmem:[#allocation13 + $0x10] sm:$0xff] }
 0x4f5   : > { %v6909_v48 = vpop.f32.mrf.mxu0  ;;  %v8116_v13 = vcombine.high %v2067_v51, %v2079_v34  ;;  %v2321_v47 = vrot.slane %v2250_v45, %v9106_v11  ;;  %v2333_v61 = vrot.slane %v2250_v45, %v9115_v15  ;;  %v2341_v15 = vrot.slane %v2250_v45, %v9232_v21 }
 0x4f6   : > { %v2345_v21 = vrot.slane %v2250_v45, %v9251_v58 }
 0x4f7   : > { %7162 = vmatpush1.bf16.msra.mxu1 %v8043_v46  ;;  %v8115_v46 = vcombine.low %v2067_v51, %v2079_v34  ;;  %v6905_v48 = vadd.f32 %v9325_v49, %v2321_v47  ;;  %v2329_v49 = vrot.slane %v2250_v45, %v9109_v12  ;;  %v2337_v12 = vrot.slane %v2250_v45, %v9229_v17 }
 0x4f8   : > { %7163 = vmatprep.subr.bf16.mxu1 %v8020_v28  ;;  %v2325_v28 = vrot.slane %v2250_v45, %v9112_v14 }
 0x4fa   : > { %v6907_v55 = vadd.f32 %v9330_v2, %v2325_v28 }
 0x4fb   : > { %7164 = vmatpush1.bf16.msra.mxu1 %v8019_v52 }
 0x4fc   : > { %7165 = vmatprep.subr.bf16.mxu1 %v7996_v53 }
 0x4ff   : > { %7166 = vmatpush1.bf16.msra.mxu1 %v7995_v59 }
 0x500   : > { %7167 = vmatprep.subr.bf16.mxu1 %v7972_v60 }
 0x503   : > { %7168 = vmatpush1.bf16.msra.mxu1 %v7971_v62 }
 0x504   : > { %7169 = vmatprep.subr.bf16.mxu1 %v7948_v63 }
 0x507   : > { %7170 = vmatpush1.bf16.msra.mxu1 %v7947_v23 }
 0x508   : > { %7171 = vmatprep.subr.bf16.mxu1 %v7924_v9 }
 0x50b   : > { %7172 = vmatpush1.bf16.msra.mxu1 %v7923_v18 }
 0x50c   : > { %7173 = vmatprep.subr.bf16.mxu1 %v8284_v24 }
 0x50f   : > { %7174 = vmatpush2.bf16.msra.mxu1 %v8283_v20 }
 0x510   : > { %7175 = vmatprep.subr.bf16.mxu1 %v8260_v10 }
 0x513   : > { %7176 = vmatpush2.bf16.msra.mxu1 %v8259_v35 }
 0x514   : > { %7177 = vmatprep.subr.bf16.mxu1 %v8236_v27 }
 0x517   : > { %7178 = vmatpush2.bf16.msra.mxu1 %v8235_v26 }
 0x518   : > { %7179 = vmatprep.subr.bf16.mxu1 %v8212_v29  ;;  %v2349_v29 = vrot.slane %v2250_v45, %v9254_v4 }
 0x51b   : > { %7180 = vmatpush2.bf16.msra.mxu1 %v8211_v32 }
 0x51c   : > { %7181 = vmatprep.subr.bf16.mxu1 %v8188_v33 }
 0x51f   : > { %7182 = vmatpush2.bf16.msra.mxu1 %v8187_v37 }
 0x520   : > { %7183 = vmatprep.subr.bf16.mxu1 %v8164_v38 }
 0x523   : > { %7184 = vmatpush2.bf16.msra.mxu1 %v8163_v43 }
 0x524   : > { %7185 = vmatprep.subr.bf16.mxu1 %v8140_v3 }
 0x527   : > { %7186 = vmatpush2.bf16.msra.mxu1 %v8139_v0 }
 0x528   : > { %7187 = vmatprep.subr.bf16.mxu1 %v8116_v13 }
 0x52b   : > { %7188 = vmatpush2.bf16.msra.mxu1 %v8115_v46 }
 0x52e   : > { %v6945_v50 = vpop.f32.mrf.mxu1  ;;  %7190 = vmatmul.mubr.bf16.vlgmr.msra.gmra.mxu1 %v9167_v56 }
 0x52f   : > { %v6946_v52 = vadd.f32 %v6945_v50, %v6905_v48  ;;  %v6986_v53 = vpop.f32.mrf.mxu0 }
 0x530   : > { %v6947_v54 = vpop.f32.mrf.mxu1  ;;  %v6987_v56 = vadd.f32 %v6986_v53, %v2329_v49 }
 0x531   : > { %7214 = vst [vmem:[%s9207_s8 + $0x80] sm:$0xff] %v6946_v52  ;;  %v6948_v57 = vadd.f32 %v6947_v54, %v6907_v55  ;;  %v6988_v59 = vpop.f32.mrf.mxu0 }
 0x532   : > { %v6949_v60 = vpop.f32.mrf.mxu1  ;;  %v6989_v2 = vadd.f32 %v6988_v59, %v2333_v61 }
 0x533   : > { %7215 = vst [vmem:[%s9207_s8 + $0x88] sm:$0xff] %v6948_v57  ;;  %v6990_v11 = vpop.f32.mrf.mxu0 }
 0x534   : > { %v6950_v14 = vpop.f32.mrf.mxu1 }
 0x535   : > { %v6991_v8 = vpop.f32.mrf.mxu0 }
 0x56e   : > { %v7027_v62 = vpop.f32.mrf.mxu1 }
 0x56f   : > { %v7028_v63 = vadd.f32 %v7027_v62, %v6987_v56  ;;  %v7068_v5 = vpop.f32.mrf.mxu0 }
 0x570   : > { %v7029_v7 = vpop.f32.mrf.mxu1  ;;  %v7069_v1 = vadd.f32 %v7068_v5, %v2337_v12 }
 0x571   : > { %7216 = vst [vmem:[%s9207_s8 + $0x90] sm:$0xff] %v7028_v63  ;;  %v7030_v23 = vadd.f32 %v7029_v7, %v6989_v2  ;;  %v7070_v9 = vpop.f32.mrf.mxu0 }
 0x572   : > { %v7031_v44 = vpop.f32.mrf.mxu1  ;;  %v7071_v20 = vadd.f32 %v7070_v9, %v2341_v15 }
 0x573   : > { %7217 = vst [vmem:[%s9207_s8 + $0x98] sm:$0xff] %v7030_v23  ;;  %v7072_v16 = vpop.f32.mrf.mxu0 }
 0x574   : > { %v7032_v18 = vpop.f32.mrf.mxu1 }
 0x575   : > { %v7073_v24 = vpop.f32.mrf.mxu0 }
 0x5ae   : > { %v7109_v19 = vpop.f32.mrf.mxu1 }
 0x5af   : > { %v7110_v10 = vadd.f32 %v7109_v19, %v7069_v1  ;;  %v7150_v30 = vpop.f32.mrf.mxu0 }
 0x5b0   : > { %v7111_v22 = vpop.f32.mrf.mxu1  ;;  %v7151_v40 = vadd.f32 %v7150_v30, %v2345_v21 }
 0x5b1   : > { %7218 = vst [vmem:[%s9207_s8 + $0xa0] sm:$0xff] %v7110_v10  ;;  %v7112_v35 = vadd.f32 %v7111_v22, %v7071_v20  ;;  %v7152_v27 = vpop.f32.mrf.mxu0 }
 0x5b2   : > { %v7113_v25 = vpop.f32.mrf.mxu1  ;;  %v7153_v32 = vadd.f32 %v7152_v27, %v2349_v29 }
 0x5b3   : > { %7219 = vst [vmem:[%s9207_s8 + $0xa8] sm:$0xff] %v7112_v35  ;;  %v7154_v41 = vpop.f32.mrf.mxu0 }
 0x5b4   : > { %v7114_v26 = vpop.f32.mrf.mxu1 }
 0x5b5   : > { %v7155_v17 = vpop.f32.mrf.mxu0 }
 0x5ee   : > { %v7191_v31 = vpop.f32.mrf.mxu1 }
 0x5ef   : > { %v7192_v33 = vadd.f32 %v7191_v31, %v7151_v40 }
 0x5f0   : > { %v7193_v6 = vpop.f32.mrf.mxu1 }
 0x5f1   : > { %7220 = vst [vmem:[%s9207_s8 + $0xb0] sm:$0xff] %v7192_v33  ;;  %v7194_v36 = vadd.f32 %v7193_v6, %v7153_v32 }
 0x5f2   : > { %v7195_v58 = vpop.f32.mrf.mxu1 }
 0x5f3   : > { %7221 = vst [vmem:[%s9207_s8 + $0xb8] sm:$0xff] %v7194_v36 }
 0x5f4   : > { %v7196_v4 = vpop.f32.mrf.mxu1 }
 0x5f5   : > { %8799 = shalt.err (!%p8796_p3)
}
 0x5f6   : > { %s8800_s19 = scalar_lea.hbm %s9356_s10, 3072  ;;  %s8804_s23 = scalar_lea.hbm %s9407_s7, 6144 }
 0x5f7   : > { %p8801_p6 = scmp.ne.s32.totalorder %s9356_s10, %s8800_s19  ;;  %p8805_p9 = scmp.lt.s32.totalorder %s9356_s10, %s9407_s7 }
 0x5f8   : > { %p8806_p10 = scmp.lt.s32.totalorder %s8804_s23, %s8800_s19 }
 0x5f9   : > { %p8802_p5 = pnand %p8801_p6, %p9433_p13 }
 0x5fa   : > { %p8807_p11 = por %p8806_p10, %p8805_p9 }
 0x5fb   : > { %p8803_p8 = pneg %p8802_p5 }
 0x5fd   : > { %p8808_p12 = pnand %p8807_p11, %p8803_p8 }
 0x5ff   : > { %8811 = shalt.err (!%p8808_p12)
}
 0x600   : > { %8316 = dma.vmem_to_hbm [thread:$0]  (%p9433_p13), %s9358_s29, 3072, %s9356_s10, %s7223_s30  }
 0x601 PF: > { %s7249_s8 = sand.u32 1, %s8850_s24   ;;  %p9434_p0 = scmp.ne.s32.totalorder %s9423_s13, 0 }
 0x602   : > { %p9435_p2 = scmp.ge.s32.totalorder %s8862_s27, 2  ;;  %s7250_s18 = scalar_lea.sflag [#allocation4], %s7249_s8 }
 0x604   : > { %p8342_p1 = pnand %p9435_p2, %p9434_p0 }
 0x606   : > { %p8343_p4 = pneg %p8342_p1 }
 0x608   : > { %8845 = dma.done.wait (%p8343_p4), %s7250_s18, 3072  }
 0x609   : > { %8847 = vsyncadd (%p8343_p4), %s7250_s18, 4294964224  ;;  %p23_p7 = scmp.ge.s32.totalorder %s9020_s11, 4   ;;  %s9436_s24 = smov %s8854_s25 }
 0x60a   : > { %s9437_s25 = smov %s8858_s26  ;;  %s9438_s26 = smov %s9031_s16 }
 0x60b   : > { %s9439_s27 = smov %s9020_s11  ;;  %25 = sbr.rel (!%p23_p7) target bundleno = 11 (0xb), region = 117 }
 0x610   :  { %7255 = vsyncpa [#allocation3], 1 }
 0x611   :  { %7257 = vsyncpa [#allocation3 + $0x1], 1 }
 0x612   :  { %7258 = vsyncpa [#allocation6], 1 }
 0x613   :  { %7259 = vsyncpa [#allocation9], 1 }
 0x614   :  { %7260 = vsyncpa [#allocation12], 1 }
 0x615   :  { %7261 = vsyncpa [#allocation4], 1 }
 0x616   :  { %7263 = vsyncpa [#allocation4 + $0x1], 1 }

</bundles_post_ra>
